<compile_context>
chip_gen: v7x
topology: tpu7x:2x2x1
jax: 0.10.0
libtpu: 0.0.40
codegen_flags: <defaults>
</compile_context>

<pallas_src>
import functools

import jax
import jax.numpy as jnp
from jax.experimental import pallas as pl
from jax.experimental.pallas import tpu as pltpu

_CMID = 128   # bottleneck width
_COUT = 512   # block output channels


# ----------------------------------------------------------------------------
# Fused stage kernel: one grid step = one image through the whole res3 stage.
# ----------------------------------------------------------------------------
def _stage_kernel(*refs, HO, WO, PW):
    x_ref = refs[0]                            # (1, HO*WO, 256) bf16
    w = refs[1:14]                             # 13 folded conv weights (bf16)
    b_ref = refs[14]                           # (13, 512) packed biases (f32)
    out_ref, dbg_ref, pad_ref = refs[15], refs[16], refs[17]

    cmid = _CMID

    # Zero-padded 3x3 scratch.  INVARIANT (load-bearing): PW >= WO + 3 and the
    # only region ever written below is rows 1..HO, cols 2..2+WO, so the zero
    # border provides the conv padding for all four 3x3 convs of this image.
    # Re-zeroed per grid step (see header: per-core scratch under "parallel").
    pad_ref[...] = jnp.zeros_like(pad_ref)

    def bias(i, cout):
        return b_ref[i:i + 1, :cout]           # (1, cout) f32

    def mm(u_bf16, w_ref, bi, cout):
        y = jnp.dot(u_bf16, w_ref[...], preferred_element_type=jnp.float32)
        return y + bias(bi, cout)

    def conv3x3_bn_relu(a_f32, w_ref, bi):
        # a_f32: (HO*WO, cmid).  One bulk slice store into the scratch
        # interior (rows 1..HO, cols 2..2+WO); the border stays zero.
        a3 = a_f32.astype(jnp.bfloat16).reshape(HO, WO, cmid)
        pad_ref[1:1 + HO, 2:2 + WO, :] = a3
        # im2col along K: column block k = dy*3+dx of the LHS is the flattened
        # padded scratch shifted by dy*PW + dx + 1.
        pf = pad_ref[...].reshape((HO + 3) * PW, cmid)
        L = HO * PW
        lhs = jnp.concatenate(
            [pf[dy * PW + dx + 1: dy * PW + dx + 1 + L, :]
             for dy in range(3) for dx in range(3)],
            axis=-1)                            # (L, 9*cmid) bf16
        acc = jnp.dot(lhs, w_ref[...], preferred_element_type=jnp.float32)
        acc = jnp.maximum(acc + bias(bi, cmid), 0.0)
        # Trim padded-row layout -> dense (HO*WO, cmid) with one reshape+slice.
        return acc.reshape(HO, PW, cmid)[:, :WO, :].reshape(HO * WO, cmid)

    x = x_ref[0]                               # (HO*WO, 256) bf16

    # ----- res3a (projection shortcut) -----
    shortcut = mm(x, w[0], 0, _COUT)           # (HO*WO, 512) f32, no ReLU
    a = jnp.maximum(mm(x, w[1], 1, cmid), 0.0)
    y = conv3x3_bn_relu(a, w[2], 2)
    z = mm(y.astype(jnp.bfloat16), w[3], 3, _COUT)
    act = jnp.maximum(z + shortcut, 0.0)
    dbg = z

    # ----- res3b1 / res3b2 / res3b3 (identity shortcut) -----
    for i in range(3):
        wa, wb3, wc = w[4 + 3 * i: 7 + 3 * i]
        bi0 = 4 + 3 * i
        a = jnp.maximum(mm(act.astype(jnp.bfloat16), wa, bi0, cmid), 0.0)
        y = conv3x3_bn_relu(a, wb3, bi0 + 1)
        z = mm(y.astype(jnp.bfloat16), wc, bi0 + 2, _COUT)
        dbg = z                                # only the last one is stored
        act = jnp.maximum(z + act, 0.0)

    out_ref[0] = act.astype(out_ref.dtype)
    dbg_ref[0] = dbg.astype(dbg_ref.dtype)


# ----------------------------------------------------------------------------
# Wrapper
# ----------------------------------------------------------------------------
def _flatten_params(params):
    ws, bs = [], []
    pa = params["res3a"]
    for k in ("branch1", "branch2a", "branch2b", "branch2c"):
        ws.append(pa[k][0]); bs.append(pa[k][1])
    for name in ("res3b1", "res3b2", "res3b3"):
        pb = params[name]
        for k in ("branch2a", "branch2b", "branch2c"):
            ws.append(pb[k][0]); bs.append(pb[k][1])
    return ws, bs


@jax.jit
def residual_block3(x_nchw, params):
    """Forward of ResidualBlock3.  Input/output are NCHW like PyTorch."""
    N, C, H, W = x_nchw.shape
    HO, WO = H // 2, W // 2
    PW = ((WO + 3 + 15) // 16) * 16       # padded row stride (bf16 tile width)
    assert PW >= WO + 3                   # required by the shifted-read trick

    # Stride-2 of res3a's 1x1 convs applied at the boundary (k=1, pad=0).
    xs = jnp.transpose(x_nchw, (0, 2, 3, 1))[:, ::2, ::2, :]
    xs = xs.reshape(N, HO * WO, C).astype(jnp.bfloat16)

    ws, bs = _flatten_params(params)
    bias_pack = jnp.stack(
        [jnp.pad(b, (0, _COUT - b.shape[0])) for b in bs], axis=0)  # (13,512)

    in_specs = [pl.BlockSpec((1, HO * WO, C), lambda n: (n, 0, 0))]
    for p in ws:
        in_specs.append(pl.BlockSpec(p.shape, lambda n: (0, 0)))
    in_specs.append(pl.BlockSpec(bias_pack.shape, lambda n: (0, 0)))
    out_spec = pl.BlockSpec((1, HO * WO, _COUT), lambda n: (n, 0, 0))

    out2, dbg2 = pl.pallas_call(
        functools.partial(_stage_kernel, HO=HO, WO=WO, PW=PW),
        out_shape=(jax.ShapeDtypeStruct((N, HO * WO, _COUT), jnp.bfloat16),
                   jax.ShapeDtypeStruct((N, HO * WO, _COUT), jnp.bfloat16)),
        grid_spec=pltpu.PrefetchScalarGridSpec(
            num_scalar_prefetch=0,
            grid=(N,),
            in_specs=in_specs,
            out_specs=(out_spec, out_spec),
            scratch_shapes=[
                # Zero-padded 3x3 activation scratch (extra tail row so the 9
                # shifted reads of length HO*PW stay in bounds).
                pltpu.VMEM((HO + 3, PW, _CMID), jnp.bfloat16),
            ],
        ),
        compiler_params=pltpu.CompilerParams(
            dimension_semantics=("parallel",),
            vmem_limit_bytes=32 * 1024 * 1024,
        ),
    )(xs, *ws, bias_pack)

    out = jnp.transpose(out2.reshape(N, HO, WO, _COUT),
                        (0, 3, 1, 2)).astype(jnp.float32)
    dbg = jnp.transpose(dbg2.reshape(N, HO, WO, _COUT),
                        (0, 3, 1, 2)).astype(jnp.float32)
    return out, dbg


# ----------------------------------------------------------------------------
# Parameters (deterministic, synthetic); BN folded into bf16 conv weights.
# ----------------------------------------------------------------------------
def _bn_affine(key, c):
    k1, k2, k3, k4 = jax.random.split(key, 4)
    gamma = 1.0 + 0.1 * jax.random.normal(k1, (c,), jnp.float32)
    beta = 0.1 * jax.random.normal(k2, (c,), jnp.float32)
    mean = 0.1 * jax.random.normal(k3, (c,), jnp.float32)
    var = jnp.abs(jax.random.normal(k4, (c,), jnp.float32)) + 0.5
    scale = gamma / jnp.sqrt(var + 1e-5)
    bias = beta - mean * scale
    return scale, bias


def _conv1x1_params(key, cin, cout):
    kw, kb = jax.random.split(key)
    w = 0.05 * jax.random.normal(kw, (cin, cout), jnp.float32)   # bias=False
    s, b = _bn_affine(kb, cout)
    return (w * s[None, :]).astype(jnp.bfloat16), b


def _conv3x3_params(key, cin, cout):
    kw, kb = jax.random.split(key)
    w = 0.05 * jax.random.normal(kw, (3, 3, cin, cout), jnp.float32)
    s, b = _bn_affine(kb, cout)
    w = w * s[None, None, None, :]
    # Stack the 9 taps along the CONTRACTION dim: row block k = dy*3 + dx.
    w_stacked = w.reshape(9 * cin, cout)
    return w_stacked.astype(jnp.bfloat16), b


def init_residual_block3_params(key):
    keys = iter(jax.random.split(key, 16))
    p3a = {
        "branch1": _conv1x1_params(next(keys), 256, 512),   # (256,512,1,2,0)
        "branch2a": _conv1x1_params(next(keys), 256, 128),  # (256,128,1,2,0)
        "branch2b": _conv3x3_params(next(keys), 128, 128),  # (128,128,3,1,1)
        "branch2c": _conv1x1_params(next(keys), 128, 512),  # (128,512,1,1,0)
    }

    def pb():
        return {
            "branch2a": _conv1x1_params(next(keys), 512, 128),
            "branch2b": _conv3x3_params(next(keys), 128, 128),
            "branch2c": _conv1x1_params(next(keys), 128, 512),
        }

    return {"res3a": p3a, "res3b1": pb(), "res3b2": pb(), "res3b3": pb()}


# ----------------------------------------------------------------------------
# Pure-JAX reference (same bf16 intermediate rounding as the kernel).
# ----------------------------------------------------------------------------
def _reference_forward(x_nchw, params):
    xs = jnp.transpose(x_nchw, (0, 2, 3, 1))[:, ::2, ::2, :].astype(jnp.bfloat16)
    N, HO, WO, _ = xs.shape

    def mm(u_bf16, wb):
        w, b = wb
        u2 = u_bf16.reshape(-1, u_bf16.shape[-1])
        y = jnp.dot(u2, w, preferred_element_type=jnp.float32) + b
        return y.reshape(u_bf16.shape[:-1] + (w.shape[1],))

    def conv3(a_f32, wb):
        w, b = wb
        cout = w.shape[1]
        cin = w.shape[0] // 9
        ap = jnp.pad(a_f32.astype(jnp.bfloat16),
                     ((0, 0), (1, 1), (1, 1), (0, 0)))
        acc = jnp.zeros((N, HO, WO, cout), jnp.float32)
        for dy in range(3):
            for dx in range(3):
                k = dy * 3 + dx
                patch = ap[:, dy:dy + HO, dx:dx + WO, :].reshape(-1, cin)
                acc = acc + jnp.dot(
                    patch, w[k * cin:(k + 1) * cin, :],
                    preferred_element_type=jnp.float32).reshape(N, HO, WO, cout)
        return jnp.maximum(acc + b.reshape(1, 1, 1, cout), 0.0)

    def block(xin_bf16, p, shortcut_f32):
        a = jnp.maximum(mm(xin_bf16, p["branch2a"]), 0.0)
        y = conv3(a, p["branch2b"])
        z = mm(y.astype(jnp.bfloat16), p["branch2c"])
        return jnp.maximum(z + shortcut_f32, 0.0), z

    pa = params["res3a"]
    shortcut = mm(xs, pa["branch1"])
    act, dbg = block(xs, pa, shortcut)
    for name in ("res3b1", "res3b2", "res3b3"):
        act, dbg = block(act.astype(jnp.bfloat16), params[name], act)

    return jnp.transpose(act, (0, 3, 1, 2)), jnp.transpose(dbg, (0, 3, 1, 2))


# ----------------------------------------------------------------------------
if __name__ == "__main__":
    root = jax.random.PRNGKey(0)
    k_x, k_p = jax.random.split(root)

    # Channel count (256 in) is fixed by the module; keep spatial small.
    N, C, H, W = 2, 256, 16, 16
    x = jax.random.normal(k_x, (N, C, H, W), jnp.float32)
    params = init_residual_block3_params(k_p)

    out, dbg = residual_block3(x, params)
    jax.block_until_ready((out, dbg))

    assert out.shape == (N, 512, H // 2, W // 2), out.shape
    assert dbg.shape == (N, 512, H // 2, W // 2), dbg.shape

    # Cross-check against a pure-JAX reference built from identical bf16
    # inputs.  The kernel additionally rounds its final outputs to bf16, so
    # per-element diffs are bounded by ~one bf16 ulp at the output magnitude;
    # real bugs produce O(1) errors across most elements.
    ref_out, ref_dbg = _reference_forward(x, params)
    max_o = float(jnp.max(jnp.abs(out - ref_out)))
    max_d = float(jnp.max(jnp.abs(dbg - ref_dbg)))
    mean_o = float(jnp.mean(jnp.abs(out - ref_out)))
    mean_d = float(jnp.mean(jnp.abs(dbg - ref_dbg)))
    assert max_o < 1.5e-1 and mean_o < 1e-2, (max_o, mean_o)
    assert max_d < 1.5e-1 and mean_d < 1e-2, (max_d, mean_d)

    print("KERNEL_OK")
</pallas_src>

<mosaic_0001>
module attributes {stable_mosaic.version = 11 : i64} {
  func.func @_stage_kernel(%arg0: i32, %arg1: memref<1x64x256xbf16, #tpu.memory_space<vmem>>, %arg2: memref<256x512xbf16, #tpu.memory_space<vmem>>, %arg3: memref<256x128xbf16, #tpu.memory_space<vmem>>, %arg4: memref<1152x128xbf16, #tpu.memory_space<vmem>>, %arg5: memref<128x512xbf16, #tpu.memory_space<vmem>>, %arg6: memref<512x128xbf16, #tpu.memory_space<vmem>>, %arg7: memref<1152x128xbf16, #tpu.memory_space<vmem>>, %arg8: memref<128x512xbf16, #tpu.memory_space<vmem>>, %arg9: memref<512x128xbf16, #tpu.memory_space<vmem>>, %arg10: memref<1152x128xbf16, #tpu.memory_space<vmem>>, %arg11: memref<128x512xbf16, #tpu.memory_space<vmem>>, %arg12: memref<512x128xbf16, #tpu.memory_space<vmem>>, %arg13: memref<1152x128xbf16, #tpu.memory_space<vmem>>, %arg14: memref<128x512xbf16, #tpu.memory_space<vmem>>, %arg15: memref<13x512xf32, #tpu.memory_space<vmem>>, %arg16: memref<1x64x512xbf16, #tpu.memory_space<vmem>>, %arg17: memref<1x64x512xbf16, #tpu.memory_space<vmem>>, %arg18: memref<11x16x128xbf16, #tpu.memory_space<vmem>>) attributes {dimension_semantics = [#tpu.dimension_semantics<parallel>], iteration_bounds = array<i64: 2>, scalar_prefetch = 0 : i64, scratch_operands = 1 : i64, tpu.core_type = #tpu.core_type<tc>, window_params = [{transform_indices = @transform_0, window_bounds = array<i64: 1, 64, 256>}, {pipeline_mode = #tpu.pipeline_mode<synchronous>, transform_indices = @transform_1, window_bounds = array<i64: 256, 512>}, {pipeline_mode = #tpu.pipeline_mode<synchronous>, transform_indices = @transform_2, window_bounds = array<i64: 256, 128>}, {pipeline_mode = #tpu.pipeline_mode<synchronous>, transform_indices = @transform_3, window_bounds = array<i64: 1152, 128>}, {pipeline_mode = #tpu.pipeline_mode<synchronous>, transform_indices = @transform_4, window_bounds = array<i64: 128, 512>}, {pipeline_mode = #tpu.pipeline_mode<synchronous>, transform_indices = @transform_5, window_bounds = array<i64: 512, 128>}, {pipeline_mode = #tpu.pipeline_mode<synchronous>, transform_indices = @transform_6, window_bounds = array<i64: 1152, 128>}, {pipeline_mode = #tpu.pipeline_mode<synchronous>, transform_indices = @transform_7, window_bounds = array<i64: 128, 512>}, {pipeline_mode = #tpu.pipeline_mode<synchronous>, transform_indices = @transform_8, window_bounds = array<i64: 512, 128>}, {pipeline_mode = #tpu.pipeline_mode<synchronous>, transform_indices = @transform_9, window_bounds = array<i64: 1152, 128>}, {pipeline_mode = #tpu.pipeline_mode<synchronous>, transform_indices = @transform_10, window_bounds = array<i64: 128, 512>}, {pipeline_mode = #tpu.pipeline_mode<synchronous>, transform_indices = @transform_11, window_bounds = array<i64: 512, 128>}, {pipeline_mode = #tpu.pipeline_mode<synchronous>, transform_indices = @transform_12, window_bounds = array<i64: 1152, 128>}, {pipeline_mode = #tpu.pipeline_mode<synchronous>, transform_indices = @transform_13, window_bounds = array<i64: 128, 512>}, {pipeline_mode = #tpu.pipeline_mode<synchronous>, transform_indices = @transform_14, window_bounds = array<i64: 13, 512>}, {transform_indices = @transform_15, window_bounds = array<i64: 1, 64, 512>}, {transform_indices = @transform_16, window_bounds = array<i64: 1, 64, 512>}]} {
    %cst = arith.constant 0.000000e+00 : bf16
    %0 = vector.broadcast %cst : bf16 to vector<11x16x128xbf16>
    %c0 = arith.constant 0 : index
    %c0_0 = arith.constant 0 : index
    %c0_1 = arith.constant 0 : index
    %1 = vector.load %arg18[%c0, %c0_0, %c0_1] : memref<11x16x128xbf16, #tpu.memory_space<vmem>>, vector<11x16x128xbf16>
    tpu.vector_store %arg18[%c0, %c0_0, %c0_1], %0 {strides = array<i32>} : memref<11x16x128xbf16, #tpu.memory_space<vmem>>, vector<11x16x128xbf16>,
    %c0_2 = arith.constant 0 : index
    %c0_3 = arith.constant 0 : index
    %c0_4 = arith.constant 0 : index
    %2 = vector.load %arg1[%c0_2, %c0_3, %c0_4] : memref<1x64x256xbf16, #tpu.memory_space<vmem>>, vector<1x64x256xbf16>
    %3 = vector.shape_cast %2 : vector<1x64x256xbf16> to vector<64x256xbf16>
    %c0_5 = arith.constant 0 : index
    %c0_6 = arith.constant 0 : index
    %4 = vector.load %arg2[%c0_5, %c0_6] : memref<256x512xbf16, #tpu.memory_space<vmem>>, vector<256x512xbf16>
    %cst_7 = arith.constant dense<0.000000e+00> : vector<64x512xf32>
    %5 = tpu.matmul %3, %4, %cst_7 {dimension_numbers = #tpu.dot_dimension_numbers<[1], [0], [0], [1], [0, 0, 1, 1], [], []>} : vector<64x256xbf16>, vector<256x512xbf16>, vector<64x512xf32> -> vector<64x512xf32>
    %c0_8 = arith.constant 0 : index
    %c0_9 = arith.constant 0 : index
    %6 = vector.load %arg15[%c0_8, %c0_9] : memref<13x512xf32, #tpu.memory_space<vmem>>, vector<1x512xf32>
    %7 = vector.broadcast %6 : vector<1x512xf32> to vector<64x512xf32>
    %8 = arith.addf %5, %7 : vector<64x512xf32>
    %c0_10 = arith.constant 0 : index
    %c0_11 = arith.constant 0 : index
    %9 = vector.load %arg3[%c0_10, %c0_11] : memref<256x128xbf16, #tpu.memory_space<vmem>>, vector<256x128xbf16>
    %cst_12 = arith.constant dense<0.000000e+00> : vector<64x128xf32>
    %10 = tpu.matmul %3, %9, %cst_12 {dimension_numbers = #tpu.dot_dimension_numbers<[1], [0], [0], [1], [0, 0, 1, 1], [], []>} : vector<64x256xbf16>, vector<256x128xbf16>, vector<64x128xf32> -> vector<64x128xf32>
    %c1 = arith.constant 1 : index
    %c0_13 = arith.constant 0 : index
    %11 = vector.load %arg15[%c1, %c0_13] : memref<13x512xf32, #tpu.memory_space<vmem>>, vector<1x128xf32>
    %12 = vector.broadcast %11 : vector<1x128xf32> to vector<64x128xf32>
    %13 = arith.addf %10, %12 : vector<64x128xf32>
    %cst_14 = arith.constant 0.000000e+00 : f32
    %14 = vector.broadcast %cst_14 : f32 to vector<64x128xf32>
    %15 = arith.maximumf %13, %14 : vector<64x128xf32>
    %16 = arith.truncf %15 : vector<64x128xf32> to vector<64x128xbf16>
    %17 = vector.shape_cast %16 : vector<64x128xbf16> to vector<8x8x128xbf16>
    %c1_15 = arith.constant 1 : index
    %c2 = arith.constant 2 : index
    %c0_16 = arith.constant 0 : index
    %18 = vector.load %arg18[%c1_15, %c2, %c0_16] : memref<11x16x128xbf16, #tpu.memory_space<vmem>>, vector<8x8x128xbf16>
    tpu.vector_store %arg18[%c1_15, %c2, %c0_16], %17 {strides = array<i32>} : memref<11x16x128xbf16, #tpu.memory_space<vmem>>, vector<8x8x128xbf16>,
    %c0_17 = arith.constant 0 : index
    %c0_18 = arith.constant 0 : index
    %c0_19 = arith.constant 0 : index
    %19 = vector.load %arg18[%c0_17, %c0_18, %c0_19] : memref<11x16x128xbf16, #tpu.memory_space<vmem>>, vector<11x16x128xbf16>
    %20 = vector.shape_cast %19 : vector<11x16x128xbf16> to vector<176x128xbf16>
    %21 = vector.extract_strided_slice %20 {offsets = [1, 0], sizes = [128, 128], strides = [1, 1]} : vector<176x128xbf16> to vector<128x128xbf16>
    %22 = vector.extract_strided_slice %20 {offsets = [2, 0], sizes = [128, 128], strides = [1, 1]} : vector<176x128xbf16> to vector<128x128xbf16>
    %23 = vector.extract_strided_slice %20 {offsets = [3, 0], sizes = [128, 128], strides = [1, 1]} : vector<176x128xbf16> to vector<128x128xbf16>
    %24 = vector.extract_strided_slice %20 {offsets = [17, 0], sizes = [128, 128], strides = [1, 1]} : vector<176x128xbf16> to vector<128x128xbf16>
    %25 = vector.extract_strided_slice %20 {offsets = [18, 0], sizes = [128, 128], strides = [1, 1]} : vector<176x128xbf16> to vector<128x128xbf16>
    %26 = vector.extract_strided_slice %20 {offsets = [19, 0], sizes = [128, 128], strides = [1, 1]} : vector<176x128xbf16> to vector<128x128xbf16>
    %27 = vector.extract_strided_slice %20 {offsets = [33, 0], sizes = [128, 128], strides = [1, 1]} : vector<176x128xbf16> to vector<128x128xbf16>
    %28 = vector.extract_strided_slice %20 {offsets = [34, 0], sizes = [128, 128], strides = [1, 1]} : vector<176x128xbf16> to vector<128x128xbf16>
    %29 = vector.extract_strided_slice %20 {offsets = [35, 0], sizes = [128, 128], strides = [1, 1]} : vector<176x128xbf16> to vector<128x128xbf16>
    %30 = tpu.concatenate %21, %22, %23, %24, %25, %26, %27, %28, %29 in 1 : vector<128x128xbf16>, vector<128x128xbf16>, vector<128x128xbf16>, vector<128x128xbf16>, vector<128x128xbf16>, vector<128x128xbf16>, vector<128x128xbf16>, vector<128x128xbf16>, vector<128x128xbf16> -> vector<128x1152xbf16>
    %c0_20 = arith.constant 0 : index
    %c0_21 = arith.constant 0 : index
    %31 = vector.load %arg4[%c0_20, %c0_21] : memref<1152x128xbf16, #tpu.memory_space<vmem>>, vector<1152x128xbf16>
    %cst_22 = arith.constant dense<0.000000e+00> : vector<128x128xf32>
    %32 = tpu.matmul %30, %31, %cst_22 {dimension_numbers = #tpu.dot_dimension_numbers<[1], [0], [0], [1], [0, 0, 1, 1], [], []>} : vector<128x1152xbf16>, vector<1152x128xbf16>, vector<128x128xf32> -> vector<128x128xf32>
    %c2_23 = arith.constant 2 : index
    %c0_24 = arith.constant 0 : index
    %33 = vector.load %arg15[%c2_23, %c0_24] : memref<13x512xf32, #tpu.memory_space<vmem>>, vector<1x128xf32>
    %34 = vector.broadcast %33 : vector<1x128xf32> to vector<128x128xf32>
    %35 = arith.addf %32, %34 : vector<128x128xf32>
    %cst_25 = arith.constant 0.000000e+00 : f32
    %36 = vector.broadcast %cst_25 : f32 to vector<128x128xf32>
    %37 = arith.maximumf %35, %36 : vector<128x128xf32>
    %38 = vector.shape_cast %37 : vector<128x128xf32> to vector<8x16x128xf32>
    %39 = vector.extract_strided_slice %38 {offsets = [0, 0, 0], sizes = [8, 8, 128], strides = [1, 1, 1]} : vector<8x16x128xf32> to vector<8x8x128xf32>
    %40 = vector.shape_cast %39 : vector<8x8x128xf32> to vector<64x128xf32>
    %41 = arith.truncf %40 : vector<64x128xf32> to vector<64x128xbf16>
    %c0_26 = arith.constant 0 : index
    %c0_27 = arith.constant 0 : index
    %42 = vector.load %arg5[%c0_26, %c0_27] : memref<128x512xbf16, #tpu.memory_space<vmem>>, vector<128x512xbf16>
    %cst_28 = arith.constant dense<0.000000e+00> : vector<64x512xf32>
    %43 = tpu.matmul %41, %42, %cst_28 {dimension_numbers = #tpu.dot_dimension_numbers<[1], [0], [0], [1], [0, 0, 1, 1], [], []>} : vector<64x128xbf16>, vector<128x512xbf16>, vector<64x512xf32> -> vector<64x512xf32>
    %c3 = arith.constant 3 : index
    %c0_29 = arith.constant 0 : index
    %44 = vector.load %arg15[%c3, %c0_29] : memref<13x512xf32, #tpu.memory_space<vmem>>, vector<1x512xf32>
    %45 = vector.broadcast %44 : vector<1x512xf32> to vector<64x512xf32>
    %46 = arith.addf %43, %45 : vector<64x512xf32>
    %47 = arith.addf %46, %8 : vector<64x512xf32>
    %cst_30 = arith.constant 0.000000e+00 : f32
    %48 = vector.broadcast %cst_30 : f32 to vector<64x512xf32>
    %49 = arith.maximumf %47, %48 : vector<64x512xf32>
    %50 = arith.truncf %49 : vector<64x512xf32> to vector<64x512xbf16>
    %c0_31 = arith.constant 0 : index
    %c0_32 = arith.constant 0 : index
    %51 = vector.load %arg6[%c0_31, %c0_32] : memref<512x128xbf16, #tpu.memory_space<vmem>>, vector<512x128xbf16>
    %cst_33 = arith.constant dense<0.000000e+00> : vector<64x128xf32>
    %52 = tpu.matmul %50, %51, %cst_33 {dimension_numbers = #tpu.dot_dimension_numbers<[1], [0], [0], [1], [0, 0, 1, 1], [], []>} : vector<64x512xbf16>, vector<512x128xbf16>, vector<64x128xf32> -> vector<64x128xf32>
    %c4 = arith.constant 4 : index
    %c0_34 = arith.constant 0 : index
    %53 = vector.load %arg15[%c4, %c0_34] : memref<13x512xf32, #tpu.memory_space<vmem>>, vector<1x128xf32>
    %54 = vector.broadcast %53 : vector<1x128xf32> to vector<64x128xf32>
    %55 = arith.addf %52, %54 : vector<64x128xf32>
    %cst_35 = arith.constant 0.000000e+00 : f32
    %56 = vector.broadcast %cst_35 : f32 to vector<64x128xf32>
    %57 = arith.maximumf %55, %56 : vector<64x128xf32>
    %58 = arith.truncf %57 : vector<64x128xf32> to vector<64x128xbf16>
    %59 = vector.shape_cast %58 : vector<64x128xbf16> to vector<8x8x128xbf16>
    %c1_36 = arith.constant 1 : index
    %c2_37 = arith.constant 2 : index
    %c0_38 = arith.constant 0 : index
    %60 = vector.load %arg18[%c1_36, %c2_37, %c0_38] : memref<11x16x128xbf16, #tpu.memory_space<vmem>>, vector<8x8x128xbf16>
    tpu.vector_store %arg18[%c1_36, %c2_37, %c0_38], %59 {strides = array<i32>} : memref<11x16x128xbf16, #tpu.memory_space<vmem>>, vector<8x8x128xbf16>,
    %c0_39 = arith.constant 0 : index
    %c0_40 = arith.constant 0 : index
    %c0_41 = arith.constant 0 : index
    %61 = vector.load %arg18[%c0_39, %c0_40, %c0_41] : memref<11x16x128xbf16, #tpu.memory_space<vmem>>, vector<11x16x128xbf16>
    %62 = vector.shape_cast %61 : vector<11x16x128xbf16> to vector<176x128xbf16>
    %63 = vector.extract_strided_slice %62 {offsets = [1, 0], sizes = [128, 128], strides = [1, 1]} : vector<176x128xbf16> to vector<128x128xbf16>
    %64 = vector.extract_strided_slice %62 {offsets = [2, 0], sizes = [128, 128], strides = [1, 1]} : vector<176x128xbf16> to vector<128x128xbf16>
    %65 = vector.extract_strided_slice %62 {offsets = [3, 0], sizes = [128, 128], strides = [1, 1]} : vector<176x128xbf16> to vector<128x128xbf16>
    %66 = vector.extract_strided_slice %62 {offsets = [17, 0], sizes = [128, 128], strides = [1, 1]} : vector<176x128xbf16> to vector<128x128xbf16>
    %67 = vector.extract_strided_slice %62 {offsets = [18, 0], sizes = [128, 128], strides = [1, 1]} : vector<176x128xbf16> to vector<128x128xbf16>
    %68 = vector.extract_strided_slice %62 {offsets = [19, 0], sizes = [128, 128], strides = [1, 1]} : vector<176x128xbf16> to vector<128x128xbf16>
    %69 = vector.extract_strided_slice %62 {offsets = [33, 0], sizes = [128, 128], strides = [1, 1]} : vector<176x128xbf16> to vector<128x128xbf16>
    %70 = vector.extract_strided_slice %62 {offsets = [34, 0], sizes = [128, 128], strides = [1, 1]} : vector<176x128xbf16> to vector<128x128xbf16>
    %71 = vector.extract_strided_slice %62 {offsets = [35, 0], sizes = [128, 128], strides = [1, 1]} : vector<176x128xbf16> to vector<128x128xbf16>
    %72 = tpu.concatenate %63, %64, %65, %66, %67, %68, %69, %70, %71 in 1 : vector<128x128xbf16>, vector<128x128xbf16>, vector<128x128xbf16>, vector<128x128xbf16>, vector<128x128xbf16>, vector<128x128xbf16>, vector<128x128xbf16>, vector<128x128xbf16>, vector<128x128xbf16> -> vector<128x1152xbf16>
    %c0_42 = arith.constant 0 : index
    %c0_43 = arith.constant 0 : index
    %73 = vector.load %arg7[%c0_42, %c0_43] : memref<1152x128xbf16, #tpu.memory_space<vmem>>, vector<1152x128xbf16>
    %cst_44 = arith.constant dense<0.000000e+00> : vector<128x128xf32>
    %74 = tpu.matmul %72, %73, %cst_44 {dimension_numbers = #tpu.dot_dimension_numbers<[1], [0], [0], [1], [0, 0, 1, 1], [], []>} : vector<128x1152xbf16>, vector<1152x128xbf16>, vector<128x128xf32> -> vector<128x128xf32>
    %c5 = arith.constant 5 : index
    %c0_45 = arith.constant 0 : index
    %75 = vector.load %arg15[%c5, %c0_45] : memref<13x512xf32, #tpu.memory_space<vmem>>, vector<1x128xf32>
    %76 = vector.broadcast %75 : vector<1x128xf32> to vector<128x128xf32>
    %77 = arith.addf %74, %76 : vector<128x128xf32>
    %cst_46 = arith.constant 0.000000e+00 : f32
    %78 = vector.broadcast %cst_46 : f32 to vector<128x128xf32>
    %79 = arith.maximumf %77, %78 : vector<128x128xf32>
    %80 = vector.shape_cast %79 : vector<128x128xf32> to vector<8x16x128xf32>
    %81 = vector.extract_strided_slice %80 {offsets = [0, 0, 0], sizes = [8, 8, 128], strides = [1, 1, 1]} : vector<8x16x128xf32> to vector<8x8x128xf32>
    %82 = vector.shape_cast %81 : vector<8x8x128xf32> to vector<64x128xf32>
    %83 = arith.truncf %82 : vector<64x128xf32> to vector<64x128xbf16>
    %c0_47 = arith.constant 0 : index
    %c0_48 = arith.constant 0 : index
    %84 = vector.load %arg8[%c0_47, %c0_48] : memref<128x512xbf16, #tpu.memory_space<vmem>>, vector<128x512xbf16>
    %cst_49 = arith.constant dense<0.000000e+00> : vector<64x512xf32>
    %85 = tpu.matmul %83, %84, %cst_49 {dimension_numbers = #tpu.dot_dimension_numbers<[1], [0], [0], [1], [0, 0, 1, 1], [], []>} : vector<64x128xbf16>, vector<128x512xbf16>, vector<64x512xf32> -> vector<64x512xf32>
    %c6 = arith.constant 6 : index
    %c0_50 = arith.constant 0 : index
    %86 = vector.load %arg15[%c6, %c0_50] : memref<13x512xf32, #tpu.memory_space<vmem>>, vector<1x512xf32>
    %87 = vector.broadcast %86 : vector<1x512xf32> to vector<64x512xf32>
    %88 = arith.addf %85, %87 : vector<64x512xf32>
    %89 = arith.addf %88, %49 : vector<64x512xf32>
    %cst_51 = arith.constant 0.000000e+00 : f32
    %90 = vector.broadcast %cst_51 : f32 to vector<64x512xf32>
    %91 = arith.maximumf %89, %90 : vector<64x512xf32>
    %92 = arith.truncf %91 : vector<64x512xf32> to vector<64x512xbf16>
    %c0_52 = arith.constant 0 : index
    %c0_53 = arith.constant 0 : index
    %93 = vector.load %arg9[%c0_52, %c0_53] : memref<512x128xbf16, #tpu.memory_space<vmem>>, vector<512x128xbf16>
    %cst_54 = arith.constant dense<0.000000e+00> : vector<64x128xf32>
    %94 = tpu.matmul %92, %93, %cst_54 {dimension_numbers = #tpu.dot_dimension_numbers<[1], [0], [0], [1], [0, 0, 1, 1], [], []>} : vector<64x512xbf16>, vector<512x128xbf16>, vector<64x128xf32> -> vector<64x128xf32>
    %c7 = arith.constant 7 : index
    %c0_55 = arith.constant 0 : index
    %95 = vector.load %arg15[%c7, %c0_55] : memref<13x512xf32, #tpu.memory_space<vmem>>, vector<1x128xf32>
    %96 = vector.broadcast %95 : vector<1x128xf32> to vector<64x128xf32>
    %97 = arith.addf %94, %96 : vector<64x128xf32>
    %cst_56 = arith.constant 0.000000e+00 : f32
    %98 = vector.broadcast %cst_56 : f32 to vector<64x128xf32>
    %99 = arith.maximumf %97, %98 : vector<64x128xf32>
    %100 = arith.truncf %99 : vector<64x128xf32> to vector<64x128xbf16>
    %101 = vector.shape_cast %100 : vector<64x128xbf16> to vector<8x8x128xbf16>
    %c1_57 = arith.constant 1 : index
    %c2_58 = arith.constant 2 : index
    %c0_59 = arith.constant 0 : index
    %102 = vector.load %arg18[%c1_57, %c2_58, %c0_59] : memref<11x16x128xbf16, #tpu.memory_space<vmem>>, vector<8x8x128xbf16>
    tpu.vector_store %arg18[%c1_57, %c2_58, %c0_59], %101 {strides = array<i32>} : memref<11x16x128xbf16, #tpu.memory_space<vmem>>, vector<8x8x128xbf16>,
    %c0_60 = arith.constant 0 : index
    %c0_61 = arith.constant 0 : index
    %c0_62 = arith.constant 0 : index
    %103 = vector.load %arg18[%c0_60, %c0_61, %c0_62] : memref<11x16x128xbf16, #tpu.memory_space<vmem>>, vector<11x16x128xbf16>
    %104 = vector.shape_cast %103 : vector<11x16x128xbf16> to vector<176x128xbf16>
    %105 = vector.extract_strided_slice %104 {offsets = [1, 0], sizes = [128, 128], strides = [1, 1]} : vector<176x128xbf16> to vector<128x128xbf16>
    %106 = vector.extract_strided_slice %104 {offsets = [2, 0], sizes = [128, 128], strides = [1, 1]} : vector<176x128xbf16> to vector<128x128xbf16>
    %107 = vector.extract_strided_slice %104 {offsets = [3, 0], sizes = [128, 128], strides = [1, 1]} : vector<176x128xbf16> to vector<128x128xbf16>
    %108 = vector.extract_strided_slice %104 {offsets = [17, 0], sizes = [128, 128], strides = [1, 1]} : vector<176x128xbf16> to vector<128x128xbf16>
    %109 = vector.extract_strided_slice %104 {offsets = [18, 0], sizes = [128, 128], strides = [1, 1]} : vector<176x128xbf16> to vector<128x128xbf16>
    %110 = vector.extract_strided_slice %104 {offsets = [19, 0], sizes = [128, 128], strides = [1, 1]} : vector<176x128xbf16> to vector<128x128xbf16>
    %111 = vector.extract_strided_slice %104 {offsets = [33, 0], sizes = [128, 128], strides = [1, 1]} : vector<176x128xbf16> to vector<128x128xbf16>
    %112 = vector.extract_strided_slice %104 {offsets = [34, 0], sizes = [128, 128], strides = [1, 1]} : vector<176x128xbf16> to vector<128x128xbf16>
    %113 = vector.extract_strided_slice %104 {offsets = [35, 0], sizes = [128, 128], strides = [1, 1]} : vector<176x128xbf16> to vector<128x128xbf16>
    %114 = tpu.concatenate %105, %106, %107, %108, %109, %110, %111, %112, %113 in 1 : vector<128x128xbf16>, vector<128x128xbf16>, vector<128x128xbf16>, vector<128x128xbf16>, vector<128x128xbf16>, vector<128x128xbf16>, vector<128x128xbf16>, vector<128x128xbf16>, vector<128x128xbf16> -> vector<128x1152xbf16>
    %c0_63 = arith.constant 0 : index
    %c0_64 = arith.constant 0 : index
    %115 = vector.load %arg10[%c0_63, %c0_64] : memref<1152x128xbf16, #tpu.memory_space<vmem>>, vector<1152x128xbf16>
    %cst_65 = arith.constant dense<0.000000e+00> : vector<128x128xf32>
    %116 = tpu.matmul %114, %115, %cst_65 {dimension_numbers = #tpu.dot_dimension_numbers<[1], [0], [0], [1], [0, 0, 1, 1], [], []>} : vector<128x1152xbf16>, vector<1152x128xbf16>, vector<128x128xf32> -> vector<128x128xf32>
    %c8 = arith.constant 8 : index
    %c0_66 = arith.constant 0 : index
    %117 = vector.load %arg15[%c8, %c0_66] : memref<13x512xf32, #tpu.memory_space<vmem>>, vector<1x128xf32>
    %118 = vector.broadcast %117 : vector<1x128xf32> to vector<128x128xf32>
    %119 = arith.addf %116, %118 : vector<128x128xf32>
    %cst_67 = arith.constant 0.000000e+00 : f32
    %120 = vector.broadcast %cst_67 : f32 to vector<128x128xf32>
    %121 = arith.maximumf %119, %120 : vector<128x128xf32>
    %122 = vector.shape_cast %121 : vector<128x128xf32> to vector<8x16x128xf32>
    %123 = vector.extract_strided_slice %122 {offsets = [0, 0, 0], sizes = [8, 8, 128], strides = [1, 1, 1]} : vector<8x16x128xf32> to vector<8x8x128xf32>
    %124 = vector.shape_cast %123 : vector<8x8x128xf32> to vector<64x128xf32>
    %125 = arith.truncf %124 : vector<64x128xf32> to vector<64x128xbf16>
    %c0_68 = arith.constant 0 : index
    %c0_69 = arith.constant 0 : index
    %126 = vector.load %arg11[%c0_68, %c0_69] : memref<128x512xbf16, #tpu.memory_space<vmem>>, vector<128x512xbf16>
    %cst_70 = arith.constant dense<0.000000e+00> : vector<64x512xf32>
    %127 = tpu.matmul %125, %126, %cst_70 {dimension_numbers = #tpu.dot_dimension_numbers<[1], [0], [0], [1], [0, 0, 1, 1], [], []>} : vector<64x128xbf16>, vector<128x512xbf16>, vector<64x512xf32> -> vector<64x512xf32>
    %c9 = arith.constant 9 : index
    %c0_71 = arith.constant 0 : index
    %128 = vector.load %arg15[%c9, %c0_71] : memref<13x512xf32, #tpu.memory_space<vmem>>, vector<1x512xf32>
    %129 = vector.broadcast %128 : vector<1x512xf32> to vector<64x512xf32>
    %130 = arith.addf %127, %129 : vector<64x512xf32>
    %131 = arith.addf %130, %91 : vector<64x512xf32>
    %cst_72 = arith.constant 0.000000e+00 : f32
    %132 = vector.broadcast %cst_72 : f32 to vector<64x512xf32>
    %133 = arith.maximumf %131, %132 : vector<64x512xf32>
    %134 = arith.truncf %133 : vector<64x512xf32> to vector<64x512xbf16>
    %c0_73 = arith.constant 0 : index
    %c0_74 = arith.constant 0 : index
    %135 = vector.load %arg12[%c0_73, %c0_74] : memref<512x128xbf16, #tpu.memory_space<vmem>>, vector<512x128xbf16>
    %cst_75 = arith.constant dense<0.000000e+00> : vector<64x128xf32>
    %136 = tpu.matmul %134, %135, %cst_75 {dimension_numbers = #tpu.dot_dimension_numbers<[1], [0], [0], [1], [0, 0, 1, 1], [], []>} : vector<64x512xbf16>, vector<512x128xbf16>, vector<64x128xf32> -> vector<64x128xf32>
    %c10 = arith.constant 10 : index
    %c0_76 = arith.constant 0 : index
    %137 = vector.load %arg15[%c10, %c0_76] : memref<13x512xf32, #tpu.memory_space<vmem>>, vector<1x128xf32>
    %138 = vector.broadcast %137 : vector<1x128xf32> to vector<64x128xf32>
    %139 = arith.addf %136, %138 : vector<64x128xf32>
    %cst_77 = arith.constant 0.000000e+00 : f32
    %140 = vector.broadcast %cst_77 : f32 to vector<64x128xf32>
    %141 = arith.maximumf %139, %140 : vector<64x128xf32>
    %142 = arith.truncf %141 : vector<64x128xf32> to vector<64x128xbf16>
    %143 = vector.shape_cast %142 : vector<64x128xbf16> to vector<8x8x128xbf16>
    %c1_78 = arith.constant 1 : index
    %c2_79 = arith.constant 2 : index
    %c0_80 = arith.constant 0 : index
    %144 = vector.load %arg18[%c1_78, %c2_79, %c0_80] : memref<11x16x128xbf16, #tpu.memory_space<vmem>>, vector<8x8x128xbf16>
    tpu.vector_store %arg18[%c1_78, %c2_79, %c0_80], %143 {strides = array<i32>} : memref<11x16x128xbf16, #tpu.memory_space<vmem>>, vector<8x8x128xbf16>,
    %c0_81 = arith.constant 0 : index
    %c0_82 = arith.constant 0 : index
    %c0_83 = arith.constant 0 : index
    %145 = vector.load %arg18[%c0_81, %c0_82, %c0_83] : memref<11x16x128xbf16, #tpu.memory_space<vmem>>, vector<11x16x128xbf16>
    %146 = vector.shape_cast %145 : vector<11x16x128xbf16> to vector<176x128xbf16>
    %147 = vector.extract_strided_slice %146 {offsets = [1, 0], sizes = [128, 128], strides = [1, 1]} : vector<176x128xbf16> to vector<128x128xbf16>
    %148 = vector.extract_strided_slice %146 {offsets = [2, 0], sizes = [128, 128], strides = [1, 1]} : vector<176x128xbf16> to vector<128x128xbf16>
    %149 = vector.extract_strided_slice %146 {offsets = [3, 0], sizes = [128, 128], strides = [1, 1]} : vector<176x128xbf16> to vector<128x128xbf16>
    %150 = vector.extract_strided_slice %146 {offsets = [17, 0], sizes = [128, 128], strides = [1, 1]} : vector<176x128xbf16> to vector<128x128xbf16>
    %151 = vector.extract_strided_slice %146 {offsets = [18, 0], sizes = [128, 128], strides = [1, 1]} : vector<176x128xbf16> to vector<128x128xbf16>
    %152 = vector.extract_strided_slice %146 {offsets = [19, 0], sizes = [128, 128], strides = [1, 1]} : vector<176x128xbf16> to vector<128x128xbf16>
    %153 = vector.extract_strided_slice %146 {offsets = [33, 0], sizes = [128, 128], strides = [1, 1]} : vector<176x128xbf16> to vector<128x128xbf16>
    %154 = vector.extract_strided_slice %146 {offsets = [34, 0], sizes = [128, 128], strides = [1, 1]} : vector<176x128xbf16> to vector<128x128xbf16>
    %155 = vector.extract_strided_slice %146 {offsets = [35, 0], sizes = [128, 128], strides = [1, 1]} : vector<176x128xbf16> to vector<128x128xbf16>
    %156 = tpu.concatenate %147, %148, %149, %150, %151, %152, %153, %154, %155 in 1 : vector<128x128xbf16>, vector<128x128xbf16>, vector<128x128xbf16>, vector<128x128xbf16>, vector<128x128xbf16>, vector<128x128xbf16>, vector<128x128xbf16>, vector<128x128xbf16>, vector<128x128xbf16> -> vector<128x1152xbf16>
    %c0_84 = arith.constant 0 : index
    %c0_85 = arith.constant 0 : index
    %157 = vector.load %arg13[%c0_84, %c0_85] : memref<1152x128xbf16, #tpu.memory_space<vmem>>, vector<1152x128xbf16>
    %cst_86 = arith.constant dense<0.000000e+00> : vector<128x128xf32>
    %158 = tpu.matmul %156, %157, %cst_86 {dimension_numbers = #tpu.dot_dimension_numbers<[1], [0], [0], [1], [0, 0, 1, 1], [], []>} : vector<128x1152xbf16>, vector<1152x128xbf16>, vector<128x128xf32> -> vector<128x128xf32>
    %c11 = arith.constant 11 : index
    %c0_87 = arith.constant 0 : index
    %159 = vector.load %arg15[%c11, %c0_87] : memref<13x512xf32, #tpu.memory_space<vmem>>, vector<1x128xf32>
    %160 = vector.broadcast %159 : vector<1x128xf32> to vector<128x128xf32>
    %161 = arith.addf %158, %160 : vector<128x128xf32>
    %cst_88 = arith.constant 0.000000e+00 : f32
    %162 = vector.broadcast %cst_88 : f32 to vector<128x128xf32>
    %163 = arith.maximumf %161, %162 : vector<128x128xf32>
    %164 = vector.shape_cast %163 : vector<128x128xf32> to vector<8x16x128xf32>
    %165 = vector.extract_strided_slice %164 {offsets = [0, 0, 0], sizes = [8, 8, 128], strides = [1, 1, 1]} : vector<8x16x128xf32> to vector<8x8x128xf32>
    %166 = vector.shape_cast %165 : vector<8x8x128xf32> to vector<64x128xf32>
    %167 = arith.truncf %166 : vector<64x128xf32> to vector<64x128xbf16>
    %c0_89 = arith.constant 0 : index
    %c0_90 = arith.constant 0 : index
    %168 = vector.load %arg14[%c0_89, %c0_90] : memref<128x512xbf16, #tpu.memory_space<vmem>>, vector<128x512xbf16>
    %cst_91 = arith.constant dense<0.000000e+00> : vector<64x512xf32>
    %169 = tpu.matmul %167, %168, %cst_91 {dimension_numbers = #tpu.dot_dimension_numbers<[1], [0], [0], [1], [0, 0, 1, 1], [], []>} : vector<64x128xbf16>, vector<128x512xbf16>, vector<64x512xf32> -> vector<64x512xf32>
    %c12 = arith.constant 12 : index
    %c0_92 = arith.constant 0 : index
    %170 = vector.load %arg15[%c12, %c0_92] : memref<13x512xf32, #tpu.memory_space<vmem>>, vector<1x512xf32>
    %171 = vector.broadcast %170 : vector<1x512xf32> to vector<64x512xf32>
    %172 = arith.addf %169, %171 : vector<64x512xf32>
    %173 = arith.addf %172, %133 : vector<64x512xf32>
    %cst_93 = arith.constant 0.000000e+00 : f32
    %174 = vector.broadcast %cst_93 : f32 to vector<64x512xf32>
    %175 = arith.maximumf %173, %174 : vector<64x512xf32>
    %176 = arith.truncf %175 : vector<64x512xf32> to vector<64x512xbf16>
    %c0_94 = arith.constant 0 : index
    %c0_95 = arith.constant 0 : index
    %c0_96 = arith.constant 0 : index
    %177 = vector.load %arg16[%c0_94, %c0_95, %c0_96] : memref<1x64x512xbf16, #tpu.memory_space<vmem>>, vector<1x64x512xbf16>
    %178 = vector.shape_cast %177 : vector<1x64x512xbf16> to vector<64x512xbf16>
    %179 = vector.shape_cast %176 : vector<64x512xbf16> to vector<1x64x512xbf16>
    tpu.vector_store %arg16[%c0_94, %c0_95, %c0_96], %179 {strides = array<i32>} : memref<1x64x512xbf16, #tpu.memory_space<vmem>>, vector<1x64x512xbf16>,
    %180 = arith.truncf %172 : vector<64x512xf32> to vector<64x512xbf16>
    %c0_97 = arith.constant 0 : index
    %c0_98 = arith.constant 0 : index
    %c0_99 = arith.constant 0 : index
    %181 = vector.load %arg17[%c0_97, %c0_98, %c0_99] : memref<1x64x512xbf16, #tpu.memory_space<vmem>>, vector<1x64x512xbf16>
    %182 = vector.shape_cast %181 : vector<1x64x512xbf16> to vector<64x512xbf16>
    %183 = vector.shape_cast %180 : vector<64x512xbf16> to vector<1x64x512xbf16>
    tpu.vector_store %arg17[%c0_97, %c0_98, %c0_99], %183 {strides = array<i32>} : memref<1x64x512xbf16, #tpu.memory_space<vmem>>, vector<1x64x512xbf16>,
    return
  }
  func.func @transform_0(%arg0: i32) -> (i32, i32, i32) {
    %c0_i32 = arith.constant 0 : i32
    %c0_i32_0 = arith.constant 0 : i32
    %c0_i32_1 = arith.constant 0 : i32
    return %arg0, %c0_i32, %c0_i32_0 : i32, i32, i32
  }
  func.func @transform_1(%arg0: i32) -> (i32, i32) {
    %c0_i32 = arith.constant 0 : i32
    %c0_i32_0 = arith.constant 0 : i32
    %c0_i32_1 = arith.constant 0 : i32
    return %c0_i32, %c0_i32_0 : i32, i32
  }
  func.func @transform_2(%arg0: i32) -> (i32, i32) {
    %c0_i32 = arith.constant 0 : i32
    %c0_i32_0 = arith.constant 0 : i32
    %c0_i32_1 = arith.constant 0 : i32
    return %c0_i32, %c0_i32_0 : i32, i32
  }
  func.func @transform_3(%arg0: i32) -> (i32, i32) {
    %c0_i32 = arith.constant 0 : i32
    %c0_i32_0 = arith.constant 0 : i32
    %c0_i32_1 = arith.constant 0 : i32
    return %c0_i32, %c0_i32_0 : i32, i32
  }
  func.func @transform_4(%arg0: i32) -> (i32, i32) {
    %c0_i32 = arith.constant 0 : i32
    %c0_i32_0 = arith.constant 0 : i32
    %c0_i32_1 = arith.constant 0 : i32
    return %c0_i32, %c0_i32_0 : i32, i32
  }
  func.func @transform_5(%arg0: i32) -> (i32, i32) {
    %c0_i32 = arith.constant 0 : i32
    %c0_i32_0 = arith.constant 0 : i32
    %c0_i32_1 = arith.constant 0 : i32
    return %c0_i32, %c0_i32_0 : i32, i32
  }
  func.func @transform_6(%arg0: i32) -> (i32, i32) {
    %c0_i32 = arith.constant 0 : i32
    %c0_i32_0 = arith.constant 0 : i32
    %c0_i32_1 = arith.constant 0 : i32
    return %c0_i32, %c0_i32_0 : i32, i32
  }
  func.func @transform_7(%arg0: i32) -> (i32, i32) {
    %c0_i32 = arith.constant 0 : i32
    %c0_i32_0 = arith.constant 0 : i32
    %c0_i32_1 = arith.constant 0 : i32
    return %c0_i32, %c0_i32_0 : i32, i32
  }
  func.func @transform_8(%arg0: i32) -> (i32, i32) {
    %c0_i32 = arith.constant 0 : i32
    %c0_i32_0 = arith.constant 0 : i32
    %c0_i32_1 = arith.constant 0 : i32
    return %c0_i32, %c0_i32_0 : i32, i32
  }
  func.func @transform_9(%arg0: i32) -> (i32, i32) {
    %c0_i32 = arith.constant 0 : i32
    %c0_i32_0 = arith.constant 0 : i32
    %c0_i32_1 = arith.constant 0 : i32
    return %c0_i32, %c0_i32_0 : i32, i32
  }
  func.func @transform_10(%arg0: i32) -> (i32, i32) {
    %c0_i32 = arith.constant 0 : i32
    %c0_i32_0 = arith.constant 0 : i32
    %c0_i32_1 = arith.constant 0 : i32
    return %c0_i32, %c0_i32_0 : i32, i32
  }
  func.func @transform_11(%arg0: i32) -> (i32, i32) {
    %c0_i32 = arith.constant 0 : i32
    %c0_i32_0 = arith.constant 0 : i32
    %c0_i32_1 = arith.constant 0 : i32
    return %c0_i32, %c0_i32_0 : i32, i32
  }
  func.func @transform_12(%arg0: i32) -> (i32, i32) {
    %c0_i32 = arith.constant 0 : i32
    %c0_i32_0 = arith.constant 0 : i32
    %c0_i32_1 = arith.constant 0 : i32
    return %c0_i32, %c0_i32_0 : i32, i32
  }
  func.func @transform_13(%arg0: i32) -> (i32, i32) {
    %c0_i32 = arith.constant 0 : i32
    %c0_i32_0 = arith.constant 0 : i32
    %c0_i32_1 = arith.constant 0 : i32
    return %c0_i32, %c0_i32_0 : i32, i32
  }
  func.func @transform_14(%arg0: i32) -> (i32, i32) {
    %c0_i32 = arith.constant 0 : i32
    %c0_i32_0 = arith.constant 0 : i32
    %c0_i32_1 = arith.constant 0 : i32
    return %c0_i32, %c0_i32_0 : i32, i32
  }
  func.func @transform_15(%arg0: i32) -> (i32, i32, i32) {
    %c0_i32 = arith.constant 0 : i32
    %c0_i32_0 = arith.constant 0 : i32
    %c0_i32_1 = arith.constant 0 : i32
    return %arg0, %c0_i32, %c0_i32_0 : i32, i32, i32
  }
  func.func @transform_16(%arg0: i32) -> (i32, i32, i32) {
    %c0_i32 = arith.constant 0 : i32
    %c0_i32_0 = arith.constant 0 : i32
    %c0_i32_1 = arith.constant 0 : i32
    return %arg0, %c0_i32, %c0_i32_0 : i32, i32, i32
  }
}

</mosaic_0001>

<bundles_post_ra>
// kernel: residual_block3.1
= control target key start
LH: loop header
LB: loop body
LE: loop exit
PB: predicated region body
PF: predicated region fallthrough
CT: control target
= control target key end

     0   :  { %s17445_s0 = inlined_call_operand.vmem [shape: bf16[2,64,256], index: 0, kind: input, shape index: {}]   ;;  %s17446_s1 = inlined_call_operand.hbm [shape: bf16[256,512], index: 1, kind: input, shape index: {}]   ;;  %s17447_s2 = inlined_call_operand.hbm [shape: bf16[256,128], index: 2, kind: input, shape index: {}]   ;;  %s17448_s3 = inlined_call_operand.vmem [shape: bf16[1152,128], index: 3, kind: input, shape index: {}]   ;;  %s17449_s4 = inlined_call_operand.vmem [shape: bf16[128,512], index: 4, kind: input, shape index: {}]   ;;  %s17450_s5 = inlined_call_operand.hbm [shape: bf16[512,128], index: 5, kind: input, shape index: {}]   ;;  %s17451_s6 = inlined_call_operand.vmem [shape: bf16[1152,128], index: 6, kind: input, shape index: {}]   ;;  %s17452_s7 = inlined_call_operand.hbm [shape: bf16[128,512], index: 7, kind: input, shape index: {}]   ;;  %s17453_s8 = inlined_call_operand.hbm [shape: bf16[512,128], index: 8, kind: input, shape index: {}]   ;;  %s17454_s9 = inlined_call_operand.vmem [shape: bf16[1152,128], index: 9, kind: input, shape index: {}]   ;;  %s17455_s10 = inlined_call_operand.hbm [shape: bf16[128,512], index: 10, kind: input, shape index: {}]   ;;  %s17456_s11 = inlined_call_operand.hbm [shape: bf16[512,128], index: 11, kind: input, shape index: {}]   ;;  %s17457_s12 = inlined_call_operand.hbm [shape: bf16[1152,128], index: 12, kind: input, shape index: {}]   ;;  %s17458_s13 = inlined_call_operand.hbm [shape: bf16[128,512], index: 13, kind: input, shape index: {}]   ;;  %s17459_s14 = inlined_call_operand.vmem [shape: f32[13,512], index: 14, kind: input, shape index: {}]   ;;  %s17460_s15 = inlined_call_operand.vmem [shape: bf16[2,64,512], index: 15, kind: output, shape index: {0}]   ;;  %s17461_s16 = inlined_call_operand.vmem [shape: bf16[2,64,512], index: 16, kind: output, shape index: {1}]  }
   0x1   :  { %17613 = sst [smem:[#allocation40_spill]] %s17445_s0 }
   0x2   :  { %17614 = sst [smem:[#allocation41_spill]] %s17447_s2 }
   0x3   :  { %17615 = sst [smem:[#allocation42_spill]] %s17452_s7 }
   0x4   :  { %17616 = sst [smem:[#allocation43_spill]] %s17454_s9 }
   0x5   :  { %17617 = sst [smem:[#allocation44_spill]] %s17460_s15 }
   0x6   :  { %17618 = sst [smem:[#allocation45_spill]] %s17461_s16 }
   0x7   :  { %22 = vsyncpa [#allocation4], 0 }
   0x8   :  { %23 = vsyncpa [#allocation6], 0 }
   0x9   :  { %24 = vsyncpa [#allocation9], 0 }
   0xa   :  { %25 = vsyncpa [#allocation12], 0 }
   0xb   :  { %26 = vsyncpa [#allocation15], 0  ;;  %s14111_s21 = smov 0  }
   0xc LB: > { %17619 = sst [smem:[#allocation22_spill]] %s14010_s21  ;;  %s14012_s22 = smov [#allocation5]   ;;  %s14010_s21 = sphi %s14111_s21, %s32_s21  }
   0xd   : > { %s434_s23 = sshll.u32 %s14012_s22, 4  ;;  %s14117_s24 = sadd.s32 4294967295, %s14010_s21   ;;  %s14122_s23 = int_to_ptr.vmem [resolvable:$true] %s434_s23 }
   0xe   : > { %p10550_p0 = scmp.ge.s32.totalorder %s14010_s21, 1  ;;  %p409_p1 = scmp.lt.s32.totalorder %s14010_s21, 3 }
   0xf   : > { %p17468_p2 = scmp.eq.s32.totalorder %s14117_s24, 0  ;;  %s14013_s27 = smov [#allocation8]  }
  0x10   : > { %p14124_p3 = pnand %p10550_p0, %p409_p1  ;;  %s469_s28 = sshll.u32 %s14013_s27, 4  ;;  %s14136_s28 = int_to_ptr.vmem [resolvable:$true] %s469_s28 }
  0x11   : > { %s14014_s29 = smov [#allocation11]   ;;  %s17622_s2 = sld [smem:[#allocation41_spill]] }
  0x12   : > { %s17620_s25 = scalar_select %p14124_p3, 1, 0 }
  0x13   : > { %p12958_p4 = pneg %p14124_p3  ;;  %s498_s30 = sshll.u32 %s14014_s29, 4  ;;  %s14138_s30 = int_to_ptr.vmem [resolvable:$true] %s498_s30 }
  0x15   : > { %p14132_p5 = pnand %p17468_p2, %p12958_p4 }
  0x17   : > { %s13732_s18 = scalar_lea.hbm %s17622_s2, 2048  ;;  %p14148_p7 = pneg %p14132_p5 }
  0x18   : > { %p13733_p6 = scmp.ne.s32.totalorder %s17622_s2, %s13732_s18  ;;  %p13739_p10 = scmp.lt.u32.totalorder %s13732_s18, %s17622_s2 }
  0x1a   : > { %p13735_p8 = pnand %p14148_p7, %p13733_p6 }
  0x1c   : > { %p13736_p9 = pneg %p13735_p8 }
  0x1e   : > { %p13741_p11 = pnand %p13739_p10, %p13736_p9 }
  0x20   : > { %13744 = shalt.err (!%p13741_p11)
}
  0x21   : > { %s13745_s0 = scalar_lea.vmem %s14122_s23, 2048  ;;  %p13753_p1 = scmp.lt.s32.totalorder %s14122_s23, %s14122_s23 }
  0x22   : > { %p13746_p12 = scmp.ne.s32.totalorder %s14122_s23, %s13745_s0  ;;  %p13754_p4 = scmp.lt.s32.totalorder %s13745_s0, %s13745_s0 }
  0x24   : > { %p13748_p13 = pnand %p13746_p12, %p14148_p7  ;;  %p13755_p6 = por %p13754_p4, %p13753_p1 }
  0x26   : > { %p13749_p0 = pneg %p13748_p13 }
  0x28   : > { %p13756_p8 = pnand %p13755_p6, %p13749_p0 }
  0x2a   : > { %13759 = shalt.err (!%p13756_p8)
}
  0x2b   : > { %s17464_s17 = smov 64   ;;  %s17466_s18 = smov 4  }
  0x2c   : > { %12964 = dma.hbm_to_vmem [thread:$0]  (!%p14132_p5), %s17622_s2, 2048, %s14122_s23, [#allocation6], %s17464_s17, %s17464_s17, %s17466_s18  }
  0x2d   : > { %s17624_s7 = sld [smem:[#allocation42_spill]] }
  0x33   : > { %s13760_s0 = scalar_lea.hbm %s17624_s7, 4096 }
  0x34   : > { %p13761_p9 = scmp.ne.s32.totalorder %s17624_s7, %s13760_s0  ;;  %p13767_p12 = scmp.lt.u32.totalorder %s13760_s0, %s17624_s7 }
  0x36   : > { %p13763_p10 = pnand %p13761_p9, %p14148_p7 }
  0x38   : > { %p13764_p11 = pneg %p13763_p10 }
  0x3a   : > { %p13769_p13 = pnand %p13767_p12, %p13764_p11 }
  0x3c   : > { %13772 = shalt.err (!%p13769_p13)
}
  0x3d   : > { %s13773_s23 = scalar_lea.vmem %s14136_s28, 4096  ;;  %p13781_p6 = scmp.lt.s32.totalorder %s14136_s28, %s14136_s28 }
  0x3e   : > { %p13774_p0 = scmp.ne.s32.totalorder %s14136_s28, %s13773_s23  ;;  %p13782_p8 = scmp.lt.s32.totalorder %s13773_s23, %s13773_s23 }
  0x40   : > { %p13776_p1 = pnand %p13774_p0, %p14148_p7  ;;  %p13783_p9 = por %p13782_p8, %p13781_p6 }
  0x42   : > { %p13777_p4 = pneg %p13776_p1 }
  0x44   : > { %p13784_p10 = pnand %p13783_p9, %p13777_p4 }
  0x46   : > { %13787 = shalt.err (!%p13784_p10)
}
  0x47   : > { %s17470_s15 = smov 256   ;;  %s14018_s9 = smov 16  }
  0x48   : > { %12970 = dma.hbm_to_vmem [thread:$0]  (!%p14132_p5), %s17624_s7, 4096, %s14136_s28, [#allocation9], %s17470_s15, %s17470_s15, %s14018_s9  }
  0x49   : > { %s13788_s27 = scalar_lea.hbm %s17455_s10, 4096 }
  0x4a   : > { %p13789_p11 = scmp.ne.s32.totalorder %s17455_s10, %s13788_s27  ;;  %p13795_p0 = scmp.lt.u32.totalorder %s13788_s27, %s17455_s10 }
  0x4c   : > { %p13791_p12 = pnand %p13789_p11, %p14148_p7 }
  0x4e   : > { %p13792_p13 = pneg %p13791_p12 }
  0x50   : > { %p13797_p1 = pnand %p13795_p0, %p13792_p13 }
  0x52   : > { %13800 = shalt.err (!%p13797_p1)
}
  0x53   : > { %s13801_s28 = scalar_lea.vmem %s14138_s30, 4096  ;;  %p13809_p9 = scmp.lt.s32.totalorder %s14138_s30, %s14138_s30 }
  0x54   : > { %p13802_p4 = scmp.ne.s32.totalorder %s14138_s30, %s13801_s28  ;;  %p13810_p10 = scmp.lt.s32.totalorder %s13801_s28, %s13801_s28 }
  0x56   : > { %p13804_p6 = pnand %p13802_p4, %p14148_p7  ;;  %p13811_p11 = por %p13810_p10, %p13809_p9 }
  0x58   : > { %p13805_p8 = pneg %p13804_p6 }
  0x5a   : > { %p13812_p12 = pnand %p13811_p11, %p13805_p8 }
  0x5c   : > { %13815 = shalt.err (!%p13812_p12)
}
  0x5d   : > { %12976 = dma.hbm_to_vmem [thread:$0]  (!%p14132_p5), %s17455_s10, 4096, %s14138_s30, [#allocation12], %s17470_s15, %s17470_s15, %s14018_s9  }
  0x5e   : > { %s14019_s21 = smov [#allocation14]   ;;  %s14020_s20 = smov [#allocation3]  }
  0x5f   : > { %s524_s19 = sshll.u32 %s14019_s21, 4  ;;  %s421_s27 = sshll.u32 %s14020_s20, 4  ;;  %s525_s19 = int_to_ptr.vmem [resolvable:$true] %s524_s19  ;;  %s14224_s27 = int_to_ptr.vmem [resolvable:$true] %s421_s27 }
  0x60   : > { %s13816_s23 = scalar_lea.hbm %s17457_s12, 9216 }
  0x61   : > { %p13817_p13 = scmp.ne.s32.totalorder %s17457_s12, %s13816_s23  ;;  %p13823_p4 = scmp.lt.u32.totalorder %s13816_s23, %s17457_s12 }
  0x63   : > { %p13819_p0 = pnand %p13817_p13, %p14148_p7 }
  0x65   : > { %p13820_p1 = pneg %p13819_p0 }
  0x67   : > { %p13825_p6 = pnand %p13823_p4, %p13820_p1 }
  0x69   : > { %13828 = shalt.err (!%p13825_p6)
}
  0x6a   : > { %s13829_s16 = scalar_lea.vmem %s525_s19, 9216  ;;  %p13837_p11 = scmp.lt.s32.totalorder %s525_s19, %s525_s19 }
  0x6b   : > { %p13830_p8 = scmp.ne.s32.totalorder %s525_s19, %s13829_s16  ;;  %p13838_p12 = scmp.lt.s32.totalorder %s13829_s16, %s13829_s16 }
  0x6d   : > { %p13832_p9 = pnand %p13830_p8, %p14148_p7  ;;  %p13839_p2 = por %p13838_p12, %p13837_p11 }
  0x6f   : > { %p13833_p10 = pneg %p13832_p9 }
  0x71   : > { %p13840_p3 = pnand %p13839_p2, %p13833_p10 }
  0x73   : > { %13843 = shalt.err (!%p13840_p3)
}
  0x74   : > { %s17625_s18 = smov 4   ;;  %s17626_s21 = smov 64  }
  0x75   : > { %12982 = dma.hbm_to_vmem [thread:$0]  (!%p14132_p5), %s17457_s12, 9216, %s525_s19, [#allocation15], %s17626_s21, %s17626_s21, %s17625_s18  }
  0x76   : > { %s13844_s28 = scalar_lea.hbm %s17446_s1, 8192 }
  0x77   : > { %p13845_p13 = scmp.ne.s32.totalorder %s17446_s1, %s13844_s28  ;;  %p13851_p0 = scmp.lt.u32.totalorder %s13844_s28, %s17446_s1 }
  0x79   : > { %p13847_p2 = pnand %p13845_p13, %p14148_p7 }
  0x7b   : > { %p13848_p3 = pneg %p13847_p2 }
  0x7d   : > { %p13853_p1 = pnand %p13851_p0, %p13848_p3 }
  0x7f   : > { %13856 = shalt.err (!%p13853_p1)
}
  0x80   : > { %s13857_s19 = scalar_lea.vmem %s14224_s27, 8192  ;;  %p13865_p9 = scmp.lt.s32.totalorder %s14224_s27, %s14224_s27 }
  0x81   : > { %p13858_p4 = scmp.ne.s32.totalorder %s14224_s27, %s13857_s19  ;;  %p13866_p10 = scmp.lt.s32.totalorder %s13857_s19, %s13857_s19 }
  0x83   : > { %p13860_p6 = pnand %p13858_p4, %p14148_p7  ;;  %p13867_p11 = por %p13866_p10, %p13865_p9 }
  0x85   : > { %p13861_p8 = pneg %p13860_p6 }
  0x87   : > { %p13868_p12 = pnand %p13867_p11, %p13861_p8 }
  0x89   : > { %13871 = shalt.err (!%p13868_p12)
}
  0x8a   : > { %s17627_s15 = smov 256   ;;  %s14021_s0 = smov [#allocation7]  }
  0x8b   : > { %12961 = dma.hbm_to_vmem [thread:$0]  (!%p14132_p5), %s17446_s1, 8192, %s14224_s27, [#allocation4], %s17627_s15, %s17627_s15, %s14018_s9  }
  0x8c   : > { %s453_s23 = sshll.u32 %s14021_s0, 4  ;;  %s14022_s28 = smov [#allocation10]   ;;  %s454_s23 = int_to_ptr.vmem [resolvable:$true] %s453_s23 }
  0x8d   : > { %s482_s17 = sshll.u32 %s14022_s28, 4  ;;  %s13872_s19 = scalar_lea.hbm %s17450_s5, 4096  ;;  %s14273_s17 = int_to_ptr.vmem [resolvable:$true] %s482_s17 }
  0x8e   : > { %p13873_p13 = scmp.ne.s32.totalorder %s17450_s5, %s13872_s19  ;;  %p13879_p0 = scmp.lt.u32.totalorder %s13872_s19, %s17450_s5 }
  0x90   : > { %p13875_p2 = pnand %p13873_p13, %p14148_p7 }
  0x92   : > { %p13876_p3 = pneg %p13875_p2 }
  0x94   : > { %p13881_p1 = pnand %p13879_p0, %p13876_p3 }
  0x96   : > { %13884 = shalt.err (!%p13881_p1)
}
  0x97   : > { %s13885_s29 = scalar_lea.vmem %s454_s23, 4096  ;;  %p13893_p9 = scmp.lt.s32.totalorder %s454_s23, %s454_s23 }
  0x98   : > { %p13886_p4 = scmp.ne.s32.totalorder %s454_s23, %s13885_s29  ;;  %p13894_p10 = scmp.lt.s32.totalorder %s13885_s29, %s13885_s29 }
  0x9a   : > { %p13888_p6 = pnand %p13886_p4, %p14148_p7  ;;  %p13895_p11 = por %p13894_p10, %p13893_p9 }
  0x9c   : > { %p13889_p8 = pneg %p13888_p6 }
  0x9e   : > { %p13896_p12 = pnand %p13895_p11, %p13889_p8 }
  0xa0   : > { %13899 = shalt.err (!%p13896_p12)
}
  0xa1   : > { %12967 = dma.hbm_to_vmem [thread:$0]  (!%p14132_p5), %s17450_s5, 4096, %s454_s23, [#allocation6], %s17626_s21, %s17626_s21, %s17625_s18  }
  0xa2   : > { %s13900_s30 = scalar_lea.hbm %s17453_s8, 4096 }
  0xa3   : > { %p13901_p13 = scmp.ne.s32.totalorder %s17453_s8, %s13900_s30  ;;  %p13907_p0 = scmp.lt.u32.totalorder %s13900_s30, %s17453_s8 }
  0xa5   : > { %p13903_p2 = pnand %p13901_p13, %p14148_p7 }
  0xa7   : > { %p13904_p3 = pneg %p13903_p2 }
  0xa9   : > { %p13909_p1 = pnand %p13907_p0, %p13904_p3 }
  0xab   : > { %13912 = shalt.err (!%p13909_p1)
}
  0xac   : > { %s13913_s23 = scalar_lea.vmem %s14273_s17, 4096  ;;  %p13921_p9 = scmp.lt.s32.totalorder %s14273_s17, %s14273_s17 }
  0xad   : > { %p13914_p4 = scmp.ne.s32.totalorder %s14273_s17, %s13913_s23  ;;  %p13922_p10 = scmp.lt.s32.totalorder %s13913_s23, %s13913_s23 }
  0xaf   : > { %p13916_p6 = pnand %p13914_p4, %p14148_p7  ;;  %p13923_p11 = por %p13922_p10, %p13921_p9 }
  0xb1   : > { %p13917_p8 = pneg %p13916_p6 }
  0xb3   : > { %p13924_p12 = pnand %p13923_p11, %p13917_p8 }
  0xb5   : > { %13927 = shalt.err (!%p13924_p12)
}
  0xb6   : > { %12973 = dma.hbm_to_vmem [thread:$0]  (!%p14132_p5), %s17453_s8, 4096, %s14273_s17, [#allocation9], %s17626_s21, %s17626_s21, %s17625_s18  }
  0xb7   : > { %s14023_s7 = smov [#allocation13]   ;;  %s14024_s28 = smov [#allocation16]  }
  0xb8   : > { %s511_s0 = sshll.u32 %s14023_s7, 4  ;;  %s537_s30 = sshll.u32 %s14024_s28, 4  ;;  %s512_s0 = int_to_ptr.vmem [resolvable:$true] %s511_s0  ;;  %s14322_s30 = int_to_ptr.vmem [resolvable:$true] %s537_s30 }
  0xb9   : > { %s13928_s20 = scalar_lea.hbm %s17456_s11, 4096 }
  0xba   : > { %p13929_p13 = scmp.ne.s32.totalorder %s17456_s11, %s13928_s20  ;;  %p13935_p0 = scmp.lt.u32.totalorder %s13928_s20, %s17456_s11 }
  0xbc   : > { %p13931_p2 = pnand %p13929_p13, %p14148_p7 }
  0xbe   : > { %p13932_p3 = pneg %p13931_p2 }
  0xc0   : > { %p13937_p1 = pnand %p13935_p0, %p13932_p3 }
  0xc2   : > { %13940 = shalt.err (!%p13937_p1)
}
  0xc3   : > { %s13941_s2 = scalar_lea.vmem %s512_s0, 4096  ;;  %p13949_p9 = scmp.lt.s32.totalorder %s512_s0, %s512_s0 }
  0xc4   : > { %p13942_p4 = scmp.ne.s32.totalorder %s512_s0, %s13941_s2  ;;  %p13950_p10 = scmp.lt.s32.totalorder %s13941_s2, %s13941_s2 }
  0xc6   : > { %p13944_p6 = pnand %p13942_p4, %p14148_p7  ;;  %p13951_p11 = por %p13950_p10, %p13949_p9 }
  0xc8   : > { %p13945_p8 = pneg %p13944_p6 }
  0xca   : > { %p13952_p12 = pnand %p13951_p11, %p13945_p8 }
  0xcc   : > { %13955 = shalt.err (!%p13952_p12)
}
  0xcd   : > { %12979 = dma.hbm_to_vmem [thread:$0]  (!%p14132_p5), %s17456_s11, 4096, %s512_s0, [#allocation12], %s17626_s21, %s17626_s21, %s17625_s18  }
  0xce   : > { %s13956_s20 = scalar_lea.hbm %s17458_s13, 4096 }
  0xcf   : > { %p13957_p13 = scmp.ne.s32.totalorder %s17458_s13, %s13956_s20  ;;  %p13963_p0 = scmp.lt.u32.totalorder %s13956_s20, %s17458_s13 }
  0xd1   : > { %p13959_p2 = pnand %p13957_p13, %p14148_p7 }
  0xd3   : > { %p13960_p3 = pneg %p13959_p2 }
  0xd5   : > { %p13965_p1 = pnand %p13963_p0, %p13960_p3 }
  0xd7   : > { %13968 = shalt.err (!%p13965_p1)
}
  0xd8   : > { %s13969_s18 = scalar_lea.vmem %s14322_s30, 4096  ;;  %p13977_p9 = scmp.lt.s32.totalorder %s14322_s30, %s14322_s30 }
  0xd9   : > { %p13970_p4 = scmp.ne.s32.totalorder %s14322_s30, %s13969_s18  ;;  %p13978_p10 = scmp.lt.s32.totalorder %s13969_s18, %s13969_s18 }
  0xdb   : > { %p13972_p6 = pnand %p13970_p4, %p14148_p7  ;;  %p13979_p11 = por %p13978_p10, %p13977_p9 }
  0xdd   : > { %p13973_p8 = pneg %p13972_p6 }
  0xdf   : > { %p13980_p12 = pnand %p13979_p11, %p13973_p8 }
  0xe1   : > { %13983 = shalt.err (!%p13980_p12)
}
  0xe2   : > { %12985 = dma.hbm_to_vmem [thread:$0]  (!%p14132_p5), %s17458_s13, 4096, %s14322_s30, [#allocation15], %s17627_s15, %s17627_s15, %s14018_s9  }
  0xe3   : > { %p17628_p13 = scmp.ne.s32.totalorder %s17620_s25, 0 }
  0xe5   : > { %564 = sbr.rel (%p17628_p13) target bundleno = 3676 (0xe5c), region = 80 }
  0xec   : > { %p17629_p7 = scmp.eq.s32.totalorder %s14117_s24, 0 }
  0xee   : > { %13989 = dma.done.wait (%p17629_p7), [#allocation4], 8192   ;;  %p17630_p2 = pmov %p17629_p7 }
  0xf0   : > { %13991 = vsyncadd (%p17630_p2), [#allocation4], 4294959104  ;;  %p17631_p3 = pmov %p17630_p2 }
  0xf1   : > { %p17632_p0 = pmov %p17630_p2 }
  0xf2   : > { %13993 = dma.done.wait (%p17631_p3), [#allocation6], 6144  }
  0xf3   : > { %13995 = vsyncadd (%p17632_p0), [#allocation6], 4294961152  ;;  %p17633_p1 = pmov %p17632_p0 }
  0xf4   : > { %p17634_p5 = pmov %p17632_p0 }
  0xf5   : > { %13997 = dma.done.wait (%p17633_p1), [#allocation9], 8192  }
  0xf6   : > { %13999 = vsyncadd (%p17634_p5), [#allocation9], 4294959104  ;;  %p17635_p4 = pmov %p17632_p0 }
  0xf7   : > { %p17636_p6 = pmov %p17632_p0 }
  0xf8   : > { %14001 = dma.done.wait (%p17635_p4), [#allocation12], 8192  }
  0xf9   : > { %14003 = vsyncadd (%p17636_p6), [#allocation12], 4294959104  ;;  %p17637_p8 = pmov %p17632_p0 }
  0xfa   : > { %p17638_p9 = pmov %p17632_p0 }
  0xfb   : > { %14005 = dma.done.wait (%p17637_p8), [#allocation15], 13312  }
  0xfc   : > { %14007 = vsyncadd (%p17638_p9), [#allocation15], 4294953984  ;;  %v13026_v0 = vld [vmem:[#allocation3 + $0x4] ss:$16 sps:$4 sm:$0xff]   ;;  %v13028_v1 = vld [vmem:[#allocation3] ss:$16 sps:$4 sm:$0xff]  }
  0xfd   : > { %1132 = vmatprep.subr.bf16.mxu0 %v13026_v0  ;;  %v13029_v2 = vld [vmem:[#allocation3 + $0x24] ss:$16 sps:$4 sm:$0xff]   ;;  %v13031_v3 = vld [vmem:[#allocation3 + $0x20] ss:$16 sps:$4 sm:$0xff]   ;;  %p651_p10 = scmp.lt.s32.totalorder %s14117_s24, 1  ;;  %s17639_s9 = sld [smem:[#allocation40_spill]] }
  0xfe   : > { %1133 = vmatpush1.bf16.msra.mxu0 %v13028_v1  ;;  %v13032_v4 = vld [vmem:[#allocation3 + $0x44] ss:$16 sps:$4 sm:$0xff]   ;;  %v13034_v5 = vld [vmem:[#allocation3 + $0x40] ss:$16 sps:$4 sm:$0xff]   ;;  %v13102_v26 = vld [vmem:[#allocation3 + $0xc] ss:$16 sps:$4 sm:$0xff]  }
  0xff   : > { %1134 = vmatprep.subr.bf16.mxu0 %v13029_v2  ;;  %v13035_v6 = vld [vmem:[#allocation3 + $0x64] ss:$16 sps:$4 sm:$0xff]   ;;  %v13037_v7 = vld [vmem:[#allocation3 + $0x60] ss:$16 sps:$4 sm:$0xff]   ;;  %s17831_s24 = smov (!%p651_p10, %s14117_s24), 1  ;;  %1205 = vmatprep.subr.bf16.mxu1 %v13102_v26  ;;  %v13079_v47 = vld [vmem:[#allocation5 + $0x48] sm:$0xff]  }
 0x100   : > { %v13038_v8 = vld [vmem:[#allocation3 + $0x84] ss:$16 sps:$4 sm:$0xff]   ;;  %v13040_v9 = vld [vmem:[#allocation3 + $0x80] ss:$16 sps:$4 sm:$0xff]   ;;  %s11247_s25 = sshll.u32 %s17831_s24, 6  ;;  %v13080_v52 = vld [vmem:[#allocation5 + $0x8] sm:$0xff]  }
 0x101   : > { %v13041_v10 = vld [vmem:[#allocation3 + $0xa4] ss:$16 sps:$4 sm:$0xff]   ;;  %v13043_v11 = vld [vmem:[#allocation3 + $0xa0] ss:$16 sps:$4 sm:$0xff]   ;;  %v13104_v27 = vld [vmem:[#allocation3 + $0x8] ss:$16 sps:$4 sm:$0xff]  }
 0x102   : > { %1135 = vmatpush1.bf16.msra.mxu0 %v13031_v3  ;;  %v13044_v12 = vld [vmem:[#allocation3 + $0xc4] ss:$16 sps:$4 sm:$0xff]   ;;  %v13046_v14 = vld [vmem:[#allocation3 + $0xc0] ss:$16 sps:$4 sm:$0xff]   ;;  %v13105_v28 = vld [vmem:[#allocation3 + $0x2c] ss:$16 sps:$4 sm:$0xff]   ;;  %1206 = vmatpush1.bf16.msra.mxu1 %v13104_v27 }
 0x103   : > { %1136 = vmatprep.subr.bf16.mxu0 %v13032_v4  ;;  %s14401_s15 = scalar_lea.vmem %s17639_s9, %s11247_s25  ;;  %v13047_v15 = vld [vmem:[#allocation3 + $0xe4] ss:$16 sps:$4 sm:$0xff]   ;;  %v13049_v16 = vld [vmem:[#allocation3 + $0xe0] ss:$16 sps:$4 sm:$0xff]   ;;  %v13107_v29 = vld [vmem:[#allocation3 + $0x28] ss:$16 sps:$4 sm:$0xff]   ;;  %1207 = vmatprep.subr.bf16.mxu1 %v13105_v28 }
 0x104   : > { %v14404_v13 = vld [vmem:[%s14401_s15 + $0x4] ss:$8 sps:$4 sm:$0xff]   ;;  %v13052_v18 = vld [vmem:[#allocation3 + $0x100] ss:$16 sps:$4 sm:$0xff]   ;;  %v13110_v33 = vld [vmem:[#allocation3 + $0x48] ss:$16 sps:$4 sm:$0xff]  }
 0x105   : > { %1164 = vmatprep.mubr.bf16.mxu0 %v14404_v13  ;;  %1237 = vmatprep.mubr.bf16.mxu1 %v14404_v13  ;;  %v13050_v17 = vld [vmem:[#allocation3 + $0x104] ss:$16 sps:$4 sm:$0xff]   ;;  %v13055_v20 = vld [vmem:[#allocation3 + $0x120] ss:$16 sps:$4 sm:$0xff]   ;;  %v13108_v31 = vld [vmem:[#allocation3 + $0x4c] ss:$16 sps:$4 sm:$0xff]  }
 0x106   : > { %1137 = vmatpush1.bf16.msra.mxu0 %v13034_v5  ;;  %v13053_v19 = vld [vmem:[#allocation3 + $0x124] ss:$16 sps:$4 sm:$0xff]   ;;  %v13058_v22 = vld [vmem:[#allocation3 + $0x140] ss:$16 sps:$4 sm:$0xff]   ;;  %1208 = vmatpush1.bf16.msra.mxu1 %v13107_v29  ;;  %v13111_v35 = vld [vmem:[#allocation3 + $0x6c] ss:$16 sps:$4 sm:$0xff]  }
 0x107   : > { %1138 = vmatprep.subr.bf16.mxu0 %v13035_v6  ;;  %v13056_v21 = vld [vmem:[#allocation3 + $0x144] ss:$16 sps:$4 sm:$0xff]   ;;  %v13061_v24 = vld [vmem:[#allocation3 + $0x160] ss:$16 sps:$4 sm:$0xff]   ;;  %1209 = vmatprep.subr.bf16.mxu1 %v13108_v31  ;;  %v13113_v37 = vld [vmem:[#allocation3 + $0x68] ss:$16 sps:$4 sm:$0xff]  }
 0x108   : > { %v13059_v23 = vld [vmem:[#allocation3 + $0x164] ss:$16 sps:$4 sm:$0xff]   ;;  %v13064_v30 = vld [vmem:[#allocation3 + $0x180] ss:$16 sps:$4 sm:$0xff]   ;;  %v13114_v39 = vld [vmem:[#allocation3 + $0x8c] ss:$16 sps:$4 sm:$0xff]  }
 0x109   : > { %v13062_v25 = vld [vmem:[#allocation3 + $0x184] ss:$16 sps:$4 sm:$0xff]   ;;  %v13067_v34 = vld [vmem:[#allocation3 + $0x1a0] ss:$16 sps:$4 sm:$0xff]   ;;  %v13116_v41 = vld [vmem:[#allocation3 + $0x88] ss:$16 sps:$4 sm:$0xff]  }
 0x10a   : > { %1139 = vmatpush1.bf16.msra.mxu0 %v13037_v7  ;;  %v13065_v32 = vld [vmem:[#allocation3 + $0x1a4] ss:$16 sps:$4 sm:$0xff]   ;;  %1210 = vmatpush1.bf16.msra.mxu1 %v13110_v33  ;;  %v13070_v38 = vld [vmem:[#allocation3 + $0x1c0] ss:$16 sps:$4 sm:$0xff]   ;;  %v13117_v43 = vld [vmem:[#allocation3 + $0xac] ss:$16 sps:$4 sm:$0xff]  }
 0x10b   : > { %1140 = vmatprep.subr.bf16.mxu0 %v13038_v8  ;;  %v13068_v36 = vld [vmem:[#allocation3 + $0x1c4] ss:$16 sps:$4 sm:$0xff]   ;;  %1211 = vmatprep.subr.bf16.mxu1 %v13111_v35  ;;  %v13073_v42 = vld [vmem:[#allocation3 + $0x1e0] ss:$16 sps:$4 sm:$0xff]   ;;  %v13119_v48 = vld [vmem:[#allocation3 + $0xa8] ss:$16 sps:$4 sm:$0xff]  }
 0x10c   : > { %v13071_v40 = vld [vmem:[#allocation3 + $0x1e4] ss:$16 sps:$4 sm:$0xff]   ;;  %v14409_v44 = vld [vmem:[%s14401_s15] ss:$8 sps:$4 sm:$0xff]   ;;  %v13120_v50 = vld [vmem:[#allocation3 + $0xcc] ss:$16 sps:$4 sm:$0xff]  }
 0x10d   : > { %v13077_v45 = vld [vmem:[#allocation5 + $0x40] sm:$0xff]   ;;  %v13122_v51 = vld [vmem:[#allocation3 + $0xc8] ss:$16 sps:$4 sm:$0xff]   ;;  %v13123_v53 = vld [vmem:[#allocation3 + $0xec] ss:$16 sps:$4 sm:$0xff]   ;;  %v14025_v29 = vmov 0  }
 0x10e   : > { %1141 = vmatpush1.bf16.msra.mxu0 %v13040_v9  ;;  %1212 = vmatpush1.bf16.msra.mxu1 %v13113_v37  ;;  %v13078_v46 = vld [vmem:[#allocation5] sm:$0xff]   ;;  %v13084_v54 = vld [vmem:[#allocation5 + $0x50] sm:$0xff]   ;;  %v13125_v56 = vld [vmem:[#allocation3 + $0xe8] ss:$16 sps:$4 sm:$0xff]   ;;  %668 = vst [vmem:[#allocation2 + $0x8] sm:$0xff] %v14025_v29  ;;  %vm1620_vm0 = vcmask 1046528  }
 0x10f   : > { %1142 = vmatprep.subr.bf16.mxu0 %v13041_v10  ;;  %1213 = vmatprep.subr.bf16.mxu1 %v13114_v39  ;;  %v14412_v49 = vld [vmem:[%s14401_s15 + $0x14] ss:$8 sps:$4 sm:$0xff]   ;;  %v14417_v55 = vld [vmem:[%s14401_s15 + $0x10] ss:$8 sps:$4 sm:$0xff]   ;;  %v13085_v57 = vld [vmem:[#allocation5 + $0x10] sm:$0xff]   ;;  %667 = vst [vmem:[#allocation2] sm:$0xff] %v14025_v29 }
 0x110   : > { %v14420_v58 = vld [vmem:[%s14401_s15 + $0x24] ss:$8 sps:$4 sm:$0xff]   ;;  %v13086_v59 = vld [vmem:[#allocation5 + $0x58] sm:$0xff]   ;;  %v13091_v0 = vld [vmem:[#allocation5 + $0x60] sm:$0xff]   ;;  %669 = vst [vmem:[#allocation2 + $0x10] sm:$0xff] %v14025_v29  ;;  %s17713_s27 = sld [smem:[#allocation43_spill]] }
 0x111   : > { %v13126_v60 = vld [vmem:[#allocation3 + $0x10c] ss:$16 sps:$4 sm:$0xff]   ;;  %v13128_v61 = vld [vmem:[#allocation3 + $0x108] ss:$16 sps:$4 sm:$0xff]   ;;  %v13092_v3 = vld [vmem:[#allocation5 + $0x20] sm:$0xff]   ;;  %670 = vst [vmem:[#allocation2 + $0x18] sm:$0xff] %v14025_v29 }
 0x112   : > { %1143 = vmatpush1.bf16.msra.mxu0 %v13043_v11  ;;  %1214 = vmatpush1.bf16.msra.mxu1 %v13116_v41  ;;  %v13087_v62 = vld [vmem:[#allocation5 + $0x18] sm:$0xff]   ;;  %v14425_v1 = vld [vmem:[%s14401_s15 + $0x20] ss:$8 sps:$4 sm:$0xff]   ;;  %671 = vst [vmem:[#allocation2 + $0x20] sm:$0xff] %v14025_v29  ;;  %672 = vst [vmem:[#allocation2 + $0x28] sm:$0xff] %v14025_v29  ;;  %s17778_s7 = sld [smem:[#allocation45_spill]] }
 0x113   : > { %1144 = vmatprep.subr.bf16.mxu0 %v13044_v12  ;;  %1215 = vmatprep.subr.bf16.mxu1 %v13117_v43  ;;  %v13129_v63 = vld [vmem:[#allocation3 + $0x12c] ss:$16 sps:$4 sm:$0xff]   ;;  %v13131_v2 = vld [vmem:[#allocation3 + $0x128] ss:$16 sps:$4 sm:$0xff]   ;;  %v13098_v10 = vld [vmem:[#allocation5 + $0x70] sm:$0xff]   ;;  %673 = vst [vmem:[#allocation2 + $0x30] sm:$0xff] %v14025_v29 }
 0x114   : > { %v14428_v4 = vld [vmem:[%s14401_s15 + $0x34] ss:$8 sps:$4 sm:$0xff]   ;;  %v13093_v5 = vld [vmem:[#allocation5 + $0x68] sm:$0xff]   ;;  %v13097_v11 = vld [vmem:[%s14401_s15 + $0x30] ss:$8 sps:$4 sm:$0xff]   ;;  %674 = vst [vmem:[#allocation2 + $0x38] sm:$0xff] %v14025_v29 }
 0x115   : > { %v13132_v6 = vld [vmem:[#allocation3 + $0x14c] ss:$16 sps:$4 sm:$0xff]   ;;  %v13134_v7 = vld [vmem:[#allocation3 + $0x148] ss:$16 sps:$4 sm:$0xff]   ;;  %v13154_v28 = vld [vmem:[%s17448_s3 + $0xc8] sm:$0xff]   ;;  %675 = vst [vmem:[#allocation2 + $0x40] sm:$0xff] %v14025_v29 }
 0x116   : > { %1145 = vmatpush1.bf16.msra.mxu0 %v13046_v14  ;;  %1216 = vmatpush1.bf16.msra.mxu1 %v13119_v48  ;;  %v13094_v8 = vld [vmem:[#allocation5 + $0x28] sm:$0xff]   ;;  %v13099_v14 = vld [vmem:[#allocation5 + $0x30] sm:$0xff]   ;;  %v13158_v33 = vld [vmem:[%s17448_s3 + $0xd0] sm:$0xff]   ;;  %vm1540_vm1 = vsmask.f32 7424  ;;  %s11248_s15 = sshll.u32 %s17831_s24, 7 }
 0x117   : > { %1146 = vmatprep.subr.bf16.mxu0 %v13047_v15  ;;  %1217 = vmatprep.subr.bf16.mxu1 %v13120_v50  ;;  %v13135_v9 = vld [vmem:[#allocation3 + $0x16c] ss:$16 sps:$4 sm:$0xff]   ;;  %v13137_v12 = vld [vmem:[#allocation3 + $0x168] ss:$16 sps:$4 sm:$0xff]   ;;  %v13156_v31 = vld [vmem:[%s17448_s3 + $0x48] sm:$0xff]   ;;  %s17785_s20 = sld [smem:[#allocation44_spill]] }
 0x118   : > { %v13100_v15 = vld [vmem:[#allocation5 + $0x78] sm:$0xff]   ;;  %v13152_v26 = vld [vmem:[%s17448_s3 + $0x40] sm:$0xff]   ;;  %v13162_v37 = vld [vmem:[%s17448_s3 + $0xd8] sm:$0xff]   ;;  %s17309_s28 = scalar_lea.vmem %s17778_s7, %s11248_s15 }
 0x119   : > { %v13153_v27 = vld [vmem:[%s17448_s3] sm:$0xff]   ;;  %v13160_v35 = vld [vmem:[%s17448_s3 + $0x50] sm:$0xff]   ;;  %v13164_v39 = vld [vmem:[%s17448_s3 + $0x58] sm:$0xff]  }
 0x11a   : > { %1147 = vmatpush1.bf16.msra.mxu0 %v13049_v16  ;;  %1218 = vmatpush1.bf16.msra.mxu1 %v13122_v51  ;;  %v13138_v16 = vld [vmem:[#allocation3 + $0x18c] ss:$16 sps:$4 sm:$0xff]   ;;  %v13173_v48 = vld [vmem:[%s17448_s3 + $0x28] sm:$0xff]  }
 0x11b   : > { %1148 = vmatprep.subr.bf16.mxu0 %v13050_v17  ;;  %1219 = vmatprep.subr.bf16.mxu1 %v13123_v53  ;;  %v13140_v17 = vld [vmem:[#allocation3 + $0x188] ss:$16 sps:$4 sm:$0xff]   ;;  %v13178_v53 = vld [vmem:[%s17448_s3 + $0xf8] sm:$0xff]  }
 0x11c   : > { %v13166_v41 = vld [vmem:[%s17448_s3 + $0xe0] sm:$0xff]   ;;  %v13175_v50 = vld [vmem:[%s17448_s3 + $0xb0] sm:$0xff]  }
 0x11d   : > { %v13168_v43 = vld [vmem:[%s17448_s3 + $0x60] sm:$0xff]   ;;  %v13176_v51 = vld [vmem:[%s17448_s3 + $0x70] sm:$0xff]   ;;  %s17334_s23 = scalar_lea.vmem %s17785_s20, %s11248_s15 }
 0x11e   : > { %1149 = vmatpush1.bf16.msra.mxu0 %v13052_v18  ;;  %1220 = vmatpush1.bf16.msra.mxu1 %v13125_v56  ;;  %v13101_v18 = vld [vmem:[#allocation5 + $0x38] sm:$0xff]   ;;  %v13181_v56 = vld [vmem:[%s17448_s3 + $0x38] sm:$0xff]  }
 0x11f   : > { %1150 = vmatprep.subr.bf16.mxu0 %v13053_v19  ;;  %1221 = vmatprep.subr.bf16.mxu1 %v13126_v60  ;;  %v13141_v19 = vld [vmem:[#allocation3 + $0x1ac] ss:$16 sps:$4 sm:$0xff]  }
 0x122   : > { %1151 = vmatpush1.bf16.msra.mxu0 %v13055_v20  ;;  %1222 = vmatpush1.bf16.msra.mxu1 %v13128_v61  ;;  %v13150_v20 = vld [vmem:[%s17448_s3 + $0xc0] sm:$0xff]  }
 0x123   : > { %1152 = vmatprep.subr.bf16.mxu0 %v13056_v21  ;;  %1223 = vmatprep.subr.bf16.mxu1 %v13129_v63  ;;  %v13143_v21 = vld [vmem:[#allocation3 + $0x1a8] ss:$16 sps:$4 sm:$0xff]  }
 0x126   : > { %1153 = vmatpush1.bf16.msra.mxu0 %v13058_v22  ;;  %1224 = vmatpush1.bf16.msra.mxu1 %v13131_v2  ;;  %v13144_v22 = vld [vmem:[#allocation3 + $0x1cc] ss:$16 sps:$4 sm:$0xff]  }
 0x127   : > { %1154 = vmatprep.subr.bf16.mxu0 %v13059_v23  ;;  %1225 = vmatprep.subr.bf16.mxu1 %v13132_v6  ;;  %v13151_v23 = vld [vmem:[%s17448_s3 + $0x80] sm:$0xff]  }
 0x12a   : > { %1155 = vmatpush1.bf16.msra.mxu0 %v13061_v24  ;;  %1226 = vmatpush1.bf16.msra.mxu1 %v13134_v7  ;;  %v13146_v24 = vld [vmem:[#allocation3 + $0x1c8] ss:$16 sps:$4 sm:$0xff]  }
 0x12b   : > { %1156 = vmatprep.subr.bf16.mxu0 %v13062_v25  ;;  %1227 = vmatprep.subr.bf16.mxu1 %v13135_v9  ;;  %v13147_v25 = vld [vmem:[#allocation3 + $0x1ec] ss:$16 sps:$4 sm:$0xff]  }
 0x12e   : > { %1157 = vmatpush1.bf16.msra.mxu0 %v13064_v30  ;;  %1228 = vmatpush1.bf16.msra.mxu1 %v13137_v12  ;;  %v13155_v30 = vld [vmem:[%s17448_s3 + $0x88] sm:$0xff]  }
 0x12f   : > { %1158 = vmatprep.subr.bf16.mxu0 %v13065_v32  ;;  %1229 = vmatprep.subr.bf16.mxu1 %v13138_v16  ;;  %v13157_v32 = vld [vmem:[%s17448_s3 + $0x8] sm:$0xff]  }
 0x132   : > { %1159 = vmatpush1.bf16.msra.mxu0 %v13067_v34  ;;  %1230 = vmatpush1.bf16.msra.mxu1 %v13140_v17  ;;  %v13159_v34 = vld [vmem:[%s17448_s3 + $0x90] sm:$0xff]  }
 0x133   : > { %1160 = vmatprep.subr.bf16.mxu0 %v13068_v36  ;;  %1231 = vmatprep.subr.bf16.mxu1 %v13141_v19  ;;  %v13161_v36 = vld [vmem:[%s17448_s3 + $0x10] sm:$0xff]  }
 0x136   : > { %1161 = vmatpush1.bf16.msra.mxu0 %v13070_v38  ;;  %1232 = vmatpush1.bf16.msra.mxu1 %v13143_v21  ;;  %v13163_v38 = vld [vmem:[%s17448_s3 + $0x98] sm:$0xff]  }
 0x137   : > { %1162 = vmatprep.subr.bf16.mxu0 %v13071_v40  ;;  %1233 = vmatprep.subr.bf16.mxu1 %v13144_v22  ;;  %v13165_v40 = vld [vmem:[%s17448_s3 + $0x18] sm:$0xff]  }
 0x13a   : > { %1163 = vmatpush1.bf16.msra.mxu0 %v13073_v42  ;;  %1234 = vmatpush1.bf16.msra.mxu1 %v13146_v24  ;;  %v13167_v42 = vld [vmem:[%s17448_s3 + $0xa0] sm:$0xff]  }
 0x13b   : > { %11314 = vmatprep.subr.bf16.mxu0 %v13077_v45  ;;  %1235 = vmatprep.subr.bf16.mxu1 %v13147_v25  ;;  %v13170_v45 = vld [vmem:[%s17448_s3 + $0xe8] sm:$0xff]  }
 0x13d   : > { %1165 = vmatmul.mubr.bf16.vlgmr.msra.gmra.mrb[0].mxu0 %v14409_v44 }
 0x13e   : > { %11315 = vmatpush3.bf16.msra.mxu0 %v13078_v46  ;;  %1174 = vmatprep.mubr.bf16.mxu0 %v14412_v49  ;;  %v13171_v46 = vld [vmem:[%s17448_s3 + $0xa8] sm:$0xff]  }
 0x13f   : > { %11316 = vmatprep.subr.bf16.mxu0 %v13079_v47  ;;  %v13172_v47 = vld [vmem:[%s17448_s3 + $0x68] sm:$0xff]  }
 0x142   : > { %11317 = vmatpush3.bf16.msra.mxu0 %v13080_v52  ;;  %v13177_v52 = vld [vmem:[%s17448_s3 + $0x30] sm:$0xff]  }
 0x143   : > { %11318 = vmatprep.subr.bf16.mxu0 %v13084_v54  ;;  %v13179_v54 = vld [vmem:[%s17448_s3 + $0xb8] sm:$0xff]  }
 0x145   : > { %1175 = vmatmul.mubr.bf16.gmra.mrb[4].mxu0 %v14417_v55 }
 0x146   : > { %11319 = vmatpush3.bf16.msra.mxu0 %v13085_v57  ;;  %1184 = vmatprep.mubr.bf16.mxu0 %v14420_v58  ;;  %v13182_v57 = vld [vmem:[%s17448_s3 + $0x140] sm:$0xff]  }
 0x147   : > { %11320 = vmatprep.subr.bf16.mxu0 %v13086_v59  ;;  %v14560_v59 = vld [vmem:[%s17459_s14 + $0x1] ss:$0 sm:$0xff] }
 0x14a   : > { %11321 = vmatpush3.bf16.msra.mxu0 %v13087_v62 }
 0x14b   : > { %11322 = vmatprep.subr.bf16.mxu0 %v13091_v0 }
 0x14d   : > { %1185 = vmatmul.mubr.bf16.gmra.mrb[8].mxu0 %v14425_v1 }
 0x14e   : > { %11323 = vmatpush3.bf16.msra.mxu0 %v13092_v3  ;;  %1194 = vmatprep.mubr.bf16.mxu0 %v14428_v4  ;;  %v14564_v3 = vrot.slane %v14025_v29, 1 }
 0x14f   : > { %11324 = vmatprep.subr.bf16.mxu0 %v13093_v5 }
 0x152   : > { %11325 = vmatpush3.bf16.msra.mxu0 %v13094_v8 }
 0x153   : > { %11326 = vmatprep.subr.bf16.mxu0 %v13098_v10 }
 0x155   : > { %1195 = vmatmul.mubr.bf16.gmra.mrb[12].mxu0 %v13097_v11 }
 0x156   : > { %11327 = vmatpush3.bf16.msra.mxu0 %v13099_v14  ;;  %1439 = vmatprep.mubr.bf16.mxu0 %v14404_v13  ;;  %v13149_v13 = vld [vmem:[#allocation3 + $0x1e8] ss:$16 sps:$4 sm:$0xff]  }
 0x157   : > { %11328 = vmatprep.subr.bf16.mxu0 %v13100_v15  ;;  %1236 = vmatpush1.bf16.msra.mxu1 %v13149_v13 }
 0x158   : > { %11354 = vmatprep.subr.bf16.mxu1 %v13152_v26 }
 0x15a   : > { %11329 = vmatpush3.bf16.msra.mxu0 %v13101_v18  ;;  %1238 = vmatmul.mubr.bf16.vlgmr.msra.gmra.mrb[0].mxu1 %v14409_v44 }
 0x15b   : > { %11418 = vmatprep.subr.bf16.mxu0 %v13150_v20  ;;  %1247 = vmatprep.mubr.bf16.mxu1 %v14412_v49 }
 0x15c   : > { %11355 = vmatpush3.bf16.msra.mxu1 %v13153_v27 }
 0x15d   : > { %1440 = vmatmul.mubr.bf16.vlgmr.msra.gmra.mrb[16].mxu0 %v14409_v44  ;;  %11356 = vmatprep.subr.bf16.mxu1 %v13156_v31  ;;  %v13169_v44 = vld [vmem:[%s17448_s3 + $0x20] sm:$0xff]  }
 0x15e   : > { %1447 = vmatprep.mubr.bf16.mxu0 %v14412_v49  ;;  %11419 = vmatpush3.bf16.msra.mxu0 %v13151_v23  ;;  %v13174_v49 = vld [vmem:[%s17448_s3 + $0xf0] sm:$0xff]  }
 0x15f   : > { %11420 = vmatprep.subr.bf16.mxu0 %v13154_v28 }
 0x160   : > { %11357 = vmatpush3.bf16.msra.mxu1 %v13157_v32 }
 0x161   : > { %11358 = vmatprep.subr.bf16.mxu1 %v13160_v35 }
 0x162   : > { %1248 = vmatmul.mubr.bf16.gmra.mrb[4].mxu1 %v14417_v55  ;;  %11421 = vmatpush3.bf16.msra.mxu0 %v13155_v30 }
 0x163   : > { %1257 = vmatprep.mubr.bf16.mxu1 %v14420_v58  ;;  %11422 = vmatprep.subr.bf16.mxu0 %v13158_v33 }
 0x164   : > { %11359 = vmatpush3.bf16.msra.mxu1 %v13161_v36 }
 0x165   : > { %1448 = vmatmul.mubr.bf16.gmra.mrb[20].mxu0 %v14417_v55  ;;  %11360 = vmatprep.subr.bf16.mxu1 %v13164_v39  ;;  %v13180_v55 = vld [vmem:[%s17448_s3 + $0x78] sm:$0xff]  }
 0x166   : > { %1455 = vmatprep.mubr.bf16.mxu0 %v14420_v58  ;;  %11423 = vmatpush3.bf16.msra.mxu0 %v13159_v34  ;;  %v13190_v58 = vld [vmem:[%s17448_s3 + $0x1c0] sm:$0xff]  }
 0x167   : > { %11424 = vmatprep.subr.bf16.mxu0 %v13162_v37 }
 0x168   : > { %11361 = vmatpush3.bf16.msra.mxu1 %v13165_v40 }
 0x169   : > { %11362 = vmatprep.subr.bf16.mxu1 %v13168_v43 }
 0x16a   : > { %1258 = vmatmul.mubr.bf16.gmra.mrb[8].mxu1 %v14425_v1  ;;  %11425 = vmatpush3.bf16.msra.mxu0 %v13163_v38 }
 0x16b   : > { %1267 = vmatprep.mubr.bf16.mxu1 %v14428_v4  ;;  %11426 = vmatprep.subr.bf16.mxu0 %v13166_v41 }
 0x16c   : > { %11363 = vmatpush3.bf16.msra.mxu1 %v13169_v44 }
 0x16d   : > { %1456 = vmatmul.mubr.bf16.gmra.mrb[24].mxu0 %v14425_v1  ;;  %11364 = vmatprep.subr.bf16.mxu1 %v13172_v47 }
 0x16e   : > { %1463 = vmatprep.mubr.bf16.mxu0 %v14428_v4  ;;  %11427 = vmatpush3.bf16.msra.mxu0 %v13167_v42 }
 0x16f   : > { %11428 = vmatprep.subr.bf16.mxu0 %v13170_v45 }
 0x170   : > { %11365 = vmatpush3.bf16.msra.mxu1 %v13173_v48 }
 0x171   : > { %11366 = vmatprep.subr.bf16.mxu1 %v13176_v51 }
 0x172   : > { %1268 = vmatmul.mubr.bf16.gmra.mrb[12].mxu1 %v13097_v11  ;;  %11429 = vmatpush3.bf16.msra.mxu0 %v13171_v46 }
 0x173   : > { %11430 = vmatprep.subr.bf16.mxu0 %v13174_v49 }
 0x174   : > { %11367 = vmatpush3.bf16.msra.mxu1 %v13177_v52 }
 0x175   : > { %1464 = vmatmul.mubr.bf16.gmra.mrb[28].mxu0 %v13097_v11  ;;  %11368 = vmatprep.subr.bf16.mxu1 %v13180_v55 }
 0x176   : > { %11431 = vmatpush3.bf16.msra.mxu0 %v13175_v50 }
 0x177   : > { %11432 = vmatprep.subr.bf16.mxu0 %v13178_v53 }
 0x178   : > { %11369 = vmatpush3.bf16.msra.mxu1 %v13181_v56 }
 0x179   : > { %11482 = vmatprep.subr.bf16.mxu1 %v13182_v57 }
 0x17a   : > { %11433 = vmatpush3.bf16.msra.mxu0 %v13179_v54 }
 0x17b   : > { %11546 = vmatprep.subr.bf16.mxu0 %v13190_v58 }
 0x230   : > { %v11330_v60 = vpop.f32.mrb[16].mxu0 }
 0x231   : > { %v11331_v61 = vpop.f32.mrb[17].mxu0 }
 0x232   : > { %v11332_v62 = vadd.f32 %v11331_v61, %v11330_v60  ;;  %v11333_v63 = vpop.f32.mrb[18].mxu0 }
 0x233   : > { %v11334_v0 = vpop.f32.mrb[19].mxu0 }
 0x234   : > { %v1442_v1 = vadd.f32 %v11332_v62, %v14560_v59  ;;  %v11335_v2 = vadd.f32 %v11334_v0, %v11333_v63 }
 0x236   : > { %v1472_v4 = vmax.f32 %v1442_v1, 0.0  ;;  %v1445_v5 = vadd.f32 %v11335_v2, %v14560_v59 }
 0x238   : > { %v11250_v6 = vpack.c.bf16 %v1472_v4, %v1472_v4  ;;  %v1473_v7 = vmax.f32 %v1445_v5, 0.0  ;;  %v11336_v8 = vpop.f32.mrb[20].mxu0 }
 0x239   : > { %v11337_v9 = vpop.f32.mrb[21].mxu0 }
 0x23a   : > { %v1504_v10 = vrot.slane %v11250_v6, 7  ;;  %v11251_v11 = vpack.c.bf16 %v1473_v7, %v1473_v7  ;;  %v11338_v12 = vadd.f32 %v11337_v9, %v11336_v8  ;;  %v11339_v14 = vpop.f32.mrb[22].mxu0 }
 0x23b   : > { %v11340_v15 = vpop.f32.mrb[23].mxu0 }
 0x23c   : > { %1521 = vst [vmem:[#allocation2 + $0x8] sm:$0x1e] %v1504_v10  ;;  %v1505_v16 = vrot.slane %v11251_v11, 7  ;;  %v1450_v17 = vadd.f32 %v11338_v12, %v14560_v59  ;;  %v11341_v18 = vadd.f32 %v11340_v15, %v11339_v14  ;;  %v13191_v11 = vld [vmem:[%s17448_s3 + $0x180] sm:$0xff]   ;;  %v13194_v12 = vld [vmem:[%s17448_s3 + $0x1c8] sm:$0xff]  }
 0x23e   : > { %1522 = vst [vmem:[#allocation2 + $0x10] sm:$0x1e] %v1505_v16  ;;  %v1474_v19 = vmax.f32 %v1450_v17, 0.0  ;;  %v1453_v20 = vadd.f32 %v11341_v18, %v14560_v59 }
 0x240   : > { %v11252_v21 = vpack.c.bf16 %v1474_v19, %v1474_v19  ;;  %v1475_v22 = vmax.f32 %v1453_v20, 0.0  ;;  %v11342_v23 = vpop.f32.mrb[24].mxu0 }
 0x241   : > { %v11343_v24 = vpop.f32.mrb[25].mxu0 }
 0x242   : > { %v1506_v25 = vrot.slane %v11252_v21, 7  ;;  %v11253_v13 = vpack.c.bf16 %v1475_v22, %v1475_v22  ;;  %v11344_v26 = vadd.f32 %v11343_v24, %v11342_v23  ;;  %v11345_v27 = vpop.f32.mrb[26].mxu0  ;;  %v13195_v23 = vld [vmem:[%s17448_s3 + $0x188] sm:$0xff]  }
 0x243   : > { %v11346_v28 = vpop.f32.mrb[27].mxu0  ;;  %v1530_v29 = vld [vmem:[#allocation2 + $0x8] sm:$0xff] }
 0x244   : > { %1523 = vst [vmem:[#allocation2 + $0x18] sm:$0x1e] %v1506_v25  ;;  %v1507_v30 = vrot.slane %v11253_v13, 7  ;;  %v1458_v31 = vadd.f32 %v11344_v26, %v14560_v59  ;;  %v11347_v32 = vadd.f32 %v11346_v28, %v11345_v27  ;;  %v1549_v33 = vshll.u32 %v1530_v29, 16  ;;  %v13183_v13 = vld [vmem:[%s17448_s3 + $0x100] sm:$0xff]   ;;  %v13196_v27 = vld [vmem:[%s17448_s3 + $0x1d0] sm:$0xff]  }
 0x245   : > { %v1531_v34 = vld [vmem:[#allocation2 + $0x10] sm:$0xff]  ;;  %v1553_v35 = vshrl.u32 %v1530_v29, 16  ;;  %v1622_v36 = vrot.slane %v1530_v29, 1 }
 0x246   : > { %1524 = vst [vmem:[#allocation2 + $0x20] sm:$0x1e] %v1507_v30  ;;  %v1476_v37 = vmax.f32 %v1458_v31, 0.0  ;;  %v1461_v38 = vadd.f32 %v11347_v32, %v14560_v59  ;;  %v1551_v39 = vrot.slane %v1549_v33, 1  ;;  %v1557_v40 = vshll.u32 %v1531_v34, 16  ;;  %v13184_v30 = vld [vmem:[%s17448_s3 + $0x148] sm:$0xff]  }
 0x247   : > { %v1561_v41 = vshrl.u32 %v1531_v34, 16  ;;  %v1623_v42 = vsel %vm1620_vm0, %v14564_v3, %v1622_v36  ;;  %v1624_v43 = vrot.slane %v1531_v34, 1 }
 0x248   : > { %v11254_v44 = vpack.c.bf16 %v1476_v37, %v1476_v37  ;;  %v1477_v45 = vmax.f32 %v1461_v38, 0.0  ;;  %v11348_v46 = vpop.f32.mrb[28].mxu0  ;;  %v1555_v47 = vor.u32 %v1553_v35, %v1551_v39  ;;  %v1559_v48 = vrot.slane %v1557_v40, 1 }
 0x249   : > { %v11349_v49 = vpop.f32.mrb[29].mxu0  ;;  %v14574_v50 = vsel %vm1620_vm0, %v1622_v36, %v1624_v43  ;;  %v1818_v51 = vshrl.u32 %v1623_v42, 16  ;;  %v1820_v52 = vshll.u32 %v1623_v42, 16  ;;  %v14578_v53 = vsel %vm1540_vm1, %v14564_v3, %v1551_v39 }
 0x24a   : > { %v1508_v54 = vrot.slane %v11254_v44, 7  ;;  %v11255_v55 = vpack.c.bf16 %v1477_v45, %v1477_v45  ;;  %v11350_v56 = vadd.f32 %v11349_v49, %v11348_v46  ;;  %v11351_v57 = vpop.f32.mrb[30].mxu0  ;;  %v14581_v58 = vsel %vm1540_vm1, %v1555_v47, %v1559_v48  ;;  %v13197_v45 = vld [vmem:[%s17448_s3 + $0x190] sm:$0xff]  }
 0x24b   : > { %v11352_v60 = vpop.f32.mrb[31].mxu0  ;;  %v1563_v61 = vor.u32 %v1561_v41, %v1559_v48  ;;  %v1829_v62 = vshrl.u32 %v14581_v58, 16  ;;  %2580 = vmatprep.mubr.bf16.mxu0 %v14581_v58  ;;  %v1822_v63 = vrot.slane %v1820_v52, 1  ;;  %v1825_v0 = vshll.u32 %v14574_v50, 16  ;;  %v14586_v1 = vld [vmem:[#allocation2 + $0x18] sm:$0xff] }
 0x24c   : > { %1525 = vst [vmem:[#allocation2 + $0x28] sm:$0x1e] %v1508_v54  ;;  %v1509_v2 = vrot.slane %v11255_v55, 7  ;;  %v1466_v4 = vadd.f32 %v11350_v56, %v14560_v59  ;;  %v11353_v5 = vadd.f32 %v11352_v60, %v11351_v57  ;;  %v1806_v6 = vshrl.u32 %v14578_v53, 16 }
 0x24d   : > { %v1823_v7 = vor.u32 %v1822_v63, %v1818_v51  ;;  %v1827_v8 = vrot.slane %v1825_v0, 1  ;;  %v1808_v9 = vshll.u32 %v14578_v53, 16  ;;  %v1813_v10 = vshll.u32 %v14581_v58, 16  ;;  %v14601_v18 = vld [vmem:[#allocation2 + $0x20] sm:$0xff]  ;;  %v13200_v51 = vld [vmem:[%s17448_s3 + $0x1d8] sm:$0xff]  }
 0x24e   : > { %1526 = vst [vmem:[#allocation2 + $0x30] sm:$0x1e] %v1509_v2  ;;  %v1478_v14 = vmax.f32 %v1466_v4, 0.0  ;;  %v1469_v15 = vadd.f32 %v11353_v5, %v14560_v59  ;;  %v1565_v16 = vshll.u32 %v14586_v1, 16  ;;  %v1626_v17 = vrot.slane %v14586_v1, 1  ;;  %v13187_v2 = vld [vmem:[%s17448_s3 + $0x110] sm:$0xff]  }
 0x24f   : > { %v1828_v19 = vsel %vm1540_vm1, %v1823_v7, %v1827_v8  ;;  %v1810_v20 = vrot.slane %v1808_v9, 1  ;;  %v1815_v21 = vrot.slane %v1813_v10, 1  ;;  %v1837_v22 = vshrl.u32 %v14574_v50, 16  ;;  %v13186_v50 = vld [vmem:[%s17448_s3 + $0x150] sm:$0xff]   ;;  %v13201_v7 = vld [vmem:[%s17448_s3 + $0x198] sm:$0xff]  }
 0x250   : > { %v11256_v24 = vpack.c.bf16 %v1478_v14, %v1478_v14  ;;  %v1479_v25 = vmax.f32 %v1469_v15, 0.0  ;;  %2581 = vmatmul.mubr.bf16.vlgmr.msra.gmra.mrb[32].mxu0 %v1828_v19  ;;  %v1567_v59 = vrot.slane %v1565_v16, 1  ;;  %v14612_v26 = vsel %vm1620_vm0, %v1624_v43, %v1626_v17  ;;  %v13185_v43 = vld [vmem:[%s17448_s3 + $0x108] sm:$0xff]   ;;  %v13188_v10 = vld [vmem:[%s17448_s3 + $0x158] sm:$0xff]  }
 0x251   : > { %v1811_v28 = vor.u32 %v1810_v20, %v1806_v6  ;;  %v1841_v29 = vshll.u32 %v14612_v26, 16  ;;  %11547 = vmatpush3.bf16.msra.mxu0 %v13191_v11  ;;  %v1569_v34 = vshrl.u32 %v14586_v1, 16  ;;  %v1573_v38 = vshll.u32 %v14601_v18, 16 }
 0x252   : > { %v1510_v31 = vrot.slane %v11256_v24, 7  ;;  %v11257_v32 = vpack.c.bf16 %v1479_v25, %v1479_v25  ;;  %v14622_v33 = vsel %vm1540_vm1, %v1563_v61, %v1567_v59  ;;  %11548 = vmatprep.subr.bf16.mxu0 %v13194_v12  ;;  %v1831_v41 = vor.u32 %v1829_v62, %v1815_v21  ;;  %v13203_v24 = vld [vmem:[%s17448_s3 + $0x1a0] sm:$0xff]  }
 0x253   : > { %v1816_v35 = vsel %vm1540_vm1, %v1811_v28, %v1815_v21  ;;  %2587 = vmatprep.mubr.bf16.mxu0 %v14622_v33  ;;  %v1833_v36 = vshll.u32 %v14622_v33, 16  ;;  %v1843_v37 = vrot.slane %v1841_v29, 1  ;;  %v14629_v39 = vld [vmem:[#allocation2 + $0x28] sm:$0xff]  ;;  %v1571_v42 = vor.u32 %v1569_v34, %v1567_v59 }
 0x254   : > { %1527 = vst [vmem:[#allocation2 + $0x38] sm:$0x1e] %v1510_v31  ;;  %v1511_v40 = vrot.slane %v11257_v32, 7  ;;  %2491 = vmatprep.mubr.bf16.mxu1 %v1816_v35  ;;  %v1628_v44 = vrot.slane %v14601_v18, 1  ;;  %v1839_v47 = vor.u32 %v1837_v22, %v1827_v8  ;;  %v1575_v48 = vrot.slane %v1573_v38, 1  ;;  %v13207_v28 = vld [vmem:[%s17448_s3 + $0x1a8] sm:$0xff]  }
 0x255   : > { %2492 = vmatmul.mubr.bf16.vlgmr.msra.gmra.mrb[16].mxu1 %v14578_v53  ;;  %v1835_v46 = vrot.slane %v1833_v36, 1  ;;  %v1845_v49 = vshrl.u32 %v14622_v33, 16  ;;  %11549 = vmatpush3.bf16.msra.mxu0 %v13195_v23  ;;  %v1577_v53 = vshrl.u32 %v14601_v18, 16  ;;  %v1581_v54 = vshll.u32 %v14629_v39, 16  ;;  %v14652_v56 = vld [vmem:[#allocation2 + $0x30] sm:$0xff]  ;;  %v13189_v18 = vld [vmem:[%s17448_s3 + $0x118] sm:$0xff]  }
 0x256   : > { %1528 = vst [vmem:[#allocation2 + $0x40] sm:$0x1e] %v1511_v40  ;;  %11483 = vmatpush3.bf16.msra.mxu1 %v13183_v13  ;;  %v14647_v52 = vsel %vm1620_vm0, %v1626_v17, %v1628_v44  ;;  %v1630_v55 = vrot.slane %v14629_v39, 1  ;;  %11550 = vmatprep.subr.bf16.mxu0 %v13196_v27  ;;  %v14658_v60 = vsel %vm1540_vm1, %v1839_v47, %v1843_v37  ;;  %v1853_v5 = vshrl.u32 %v14612_v26, 16  ;;  %v13202_v17 = vld [vmem:[%s17448_s3 + $0x1e0] sm:$0xff]   ;;  %v13198_v40 = vld [vmem:[%s17448_s3 + $0x168] sm:$0xff]  }
 0x257   : > { %v14655_v57 = vsel %vm1540_vm1, %v1831_v41, %v1835_v46  ;;  %v14661_v61 = vsel %vm1540_vm1, %v1571_v42, %v1575_v48  ;;  %11484 = vmatprep.subr.bf16.mxu1 %v13184_v30  ;;  %v1857_v63 = vshll.u32 %v14647_v52, 16  ;;  %v1579_v0 = vor.u32 %v1577_v53, %v1575_v48  ;;  %v13192_v23 = vld [vmem:[%s17448_s3 + $0x160] sm:$0xff]   ;;  %v13208_v41 = vld [vmem:[%s17448_s3 + $0x1f0] sm:$0xff]  }
 0x258   : > { %2498 = vmatprep.mubr.bf16.mxu1 %v14655_v57  ;;  %2588 = vmatmul.mubr.bf16.gmra.mrb[36].mxu0 %v14658_v60  ;;  %v1849_v62 = vshll.u32 %v14661_v61, 16  ;;  %v1583_v1 = vrot.slane %v1581_v54, 1  ;;  %v1847_v4 = vor.u32 %v1845_v49, %v1835_v46  ;;  %v1585_v6 = vshrl.u32 %v14629_v39, 16  ;;  %v13193_v30 = vld [vmem:[%s17448_s3 + $0x120] sm:$0xff]   ;;  %v13209_v46 = vld [vmem:[%s17448_s3 + $0x1b0] sm:$0xff]   ;;  %v13199_v49 = vld [vmem:[%s17448_s3 + $0x128] sm:$0xff]  }
 0x259   : > { %2594 = vmatprep.mubr.bf16.mxu0 %v14661_v61  ;;  %11551 = vmatpush3.bf16.msra.mxu0 %v13197_v45  ;;  %v1855_v11 = vor.u32 %v1853_v5, %v1843_v37  ;;  %v1859_v12 = vrot.slane %v1857_v63, 1  ;;  %v14685_v14 = vsel %vm1620_vm0, %v1628_v44, %v1630_v55  ;;  %v1589_v15 = vshll.u32 %v14652_v56, 16  ;;  %v13204_v39 = vld [vmem:[%s17448_s3 + $0x170] sm:$0xff]   ;;  %v13212_v63 = vld [vmem:[%s17448_s3 + $0x1f8] sm:$0xff]  }
 0x25a   : > { %v1851_v8 = vrot.slane %v1849_v62, 1  ;;  %11485 = vmatpush3.bf16.msra.mxu1 %v13185_v43  ;;  %v14677_v9 = vsel %vm1540_vm1, %v1579_v0, %v1583_v1  ;;  %11552 = vmatprep.subr.bf16.mxu0 %v13200_v51  ;;  %v1587_v21 = vor.u32 %v1585_v6, %v1583_v1  ;;  %v1873_v25 = vshll.u32 %v14685_v14, 16 }
 0x25b   : > { %11486 = vmatprep.subr.bf16.mxu1 %v13186_v50  ;;  %v14688_v16 = vld [vmem:[#allocation2 + $0x38] sm:$0xff]  ;;  %v1865_v20 = vshll.u32 %v14677_v9, 16  ;;  %v1591_v22 = vrot.slane %v1589_v15, 1  ;;  %v1593_v59 = vshrl.u32 %v14652_v56, 16  ;;  %v14717_v27 = vsel %vm1540_vm1, %v1855_v11, %v1859_v12 }
 0x25c   : > { %v14698_v19 = vsel %vm1540_vm1, %v1847_v4, %v1851_v8  ;;  %v1597_v13 = vshll.u32 %v14688_v16, 16  ;;  %v1632_v29 = vrot.slane %v14652_v56, 1  ;;  %v1861_v31 = vshrl.u32 %v14661_v61, 16  ;;  %v13210_v15 = vld [vmem:[%s17448_s3 + $0x178] sm:$0xff]  }
 0x25d   : > { %2499 = vmatmul.mubr.bf16.gmra.mrb[20].mxu1 %v14581_v58  ;;  %11553 = vmatpush3.bf16.msra.mxu0 %v13201_v7  ;;  %v13206_v58 = vld [vmem:[%s17448_s3 + $0x1e8] sm:$0xff]   ;;  %v14714_v26 = vld [vmem:[#allocation2 + $0x40] sm:$0xff]  ;;  %v1867_v32 = vrot.slane %v1865_v20, 1  ;;  %v14730_v34 = vsel %vm1540_vm1, %v1587_v21, %v1591_v22  ;;  %v1595_v36 = vor.u32 %v1593_v59, %v1591_v22  ;;  %v1634_v37 = vrot.slane %v14688_v16, 1  ;;  %v13205_v7 = vld [vmem:[%s17448_s3 + $0x130] sm:$0xff]  }
 0x25e   : > { %2505 = vmatprep.mubr.bf16.mxu1 %v14698_v19  ;;  %11487 = vmatpush3.bf16.msra.mxu1 %v13187_v2  ;;  %v1599_v35 = vrot.slane %v1597_v13, 1  ;;  %v1601_v38 = vshrl.u32 %v14688_v16, 16  ;;  %v1863_v42 = vor.u32 %v1861_v31, %v1851_v8  ;;  %v1869_v43 = vshrl.u32 %v14647_v52, 16  ;;  %v13213_v2 = vld [vmem:[%s17448_s3 + $0x1b8] sm:$0xff]   ;;  %v13214_v59 = vld [vmem:[%s17448_s3 + $0x200] sm:$0xff]  }
 0x25f   : > { %11488 = vmatprep.subr.bf16.mxu1 %v13188_v10  ;;  %11554 = vmatprep.subr.bf16.mxu0 %v13202_v17  ;;  %v1875_v44 = vrot.slane %v1873_v25, 1  ;;  %v1605_v45 = vshll.u32 %v14714_v26, 16  ;;  %v1881_v47 = vshll.u32 %v14730_v34, 16  ;;  %v14749_v48 = vsel %vm1620_vm0, %v1630_v55, %v1632_v29  ;;  %v13211_v22 = vld [vmem:[%s17448_s3 + $0x138] sm:$0xff]  }
 0x260   : > { %2595 = vmatmul.mubr.bf16.gmra.mrb[40].mxu0 %v14717_v27  ;;  %v14755_v50 = vrot.slane %v14714_v26, 1  ;;  %v14759_v51 = vsel %vm1540_vm1, %v1863_v42, %v1867_v32  ;;  %v1871_v52 = vor.u32 %v1869_v43, %v1859_v12  ;;  %v1603_v53 = vor.u32 %v1601_v38, %v1599_v35 }
 0x261   : > { %2601 = vmatprep.mubr.bf16.mxu0 %v14677_v9  ;;  %11555 = vmatpush3.bf16.msra.mxu0 %v13203_v24  ;;  %v14761_v54 = vrot.slane %v1605_v45, 1  ;;  %v1877_v55 = vshrl.u32 %v14677_v9, 16  ;;  %v14769_v56 = vsel %vm1540_vm1, %v1595_v36, %v1599_v35  ;;  %v14772_v62 = vsel %vm1620_vm0, %v1632_v29, %v1634_v37 }
 0x262   : > { %11489 = vmatpush3.bf16.msra.mxu1 %v13189_v18  ;;  %11556 = vmatprep.subr.bf16.mxu0 %v13206_v58  ;;  %v14778_v0 = vsel %vm1540_vm1, %v1871_v52, %v1875_v44  ;;  %v1889_v1 = vshll.u32 %v14749_v48, 16  ;;  %v1885_v5 = vshrl.u32 %v14685_v14, 16  ;;  %v14788_v6 = vsel %vm1620_vm0, %v1634_v37, %v14755_v50 }
 0x263   : > { %11490 = vmatprep.subr.bf16.mxu1 %v13192_v23  ;;  %v1879_v4 = vor.u32 %v1877_v55, %v1867_v32  ;;  %v1883_v8 = vrot.slane %v1881_v47, 1  ;;  %v1897_v10 = vshll.u32 %v14769_v56, 16  ;;  %v1905_v11 = vshll.u32 %v14772_v62, 16  ;;  %v13215_v55 = vld [vmem:[%s17448_s3 + $0x208] sm:$0xff]  }
 0x264   : > { %v14798_v12 = vsel %vm1540_vm1, %v1603_v53, %v14761_v54  ;;  %v1893_v14 = vshrl.u32 %v14730_v34, 16  ;;  %v1887_v16 = vor.u32 %v1885_v5, %v1875_v44  ;;  %v1891_v17 = vrot.slane %v1889_v1, 1 }
 0x265   : > { %2506 = vmatmul.mubr.bf16.gmra.mrb[24].mxu1 %v14622_v33  ;;  %11557 = vmatpush3.bf16.msra.mxu0 %v13207_v28  ;;  %v1921_v18 = vshll.u32 %v14788_v6, 16  ;;  %v1913_v20 = vshll.u32 %v14798_v12, 16  ;;  %v1609_v21 = vshrl.u32 %v14714_v26, 16  ;;  %v14812_v23 = vsel %vm1540_vm1, %v1879_v4, %v1883_v8 }
 0x266   : > { %2512 = vmatprep.mubr.bf16.mxu1 %v14759_v51  ;;  %11491 = vmatpush3.bf16.msra.mxu1 %v13193_v30  ;;  %v1899_v24 = vrot.slane %v1897_v10, 1  ;;  %v1901_v58 = vshrl.u32 %v14749_v48, 16  ;;  %v1907_v25 = vrot.slane %v1905_v11, 1  ;;  %v1909_v13 = vshrl.u32 %v14769_v56, 16 }
 0x267   : > { %11492 = vmatprep.subr.bf16.mxu1 %v13198_v40  ;;  %11558 = vmatprep.subr.bf16.mxu0 %v13208_v41  ;;  %v1917_v26 = vshrl.u32 %v14772_v62, 16  ;;  %v1958_v28 = vshll.u32 %v1609_v21, 16  ;;  %v1963_v29 = vshll.u32 %v14755_v50, 16  ;;  %v14823_v30 = vsel %vm1540_vm1, %v1887_v16, %v1891_v17  ;;  %v13216_v62 = vld [vmem:[%s17448_s3 + $0x210] sm:$0xff]   ;;  %v14921_v16 = vld [vmem:[#allocation2] sm:$0xff] }
 0x268   : > { %2602 = vmatmul.mubr.bf16.gmra.mrb[44].mxu0 %v14778_v0  ;;  %v1923_v31 = vrot.slane %v1921_v18, 1  ;;  %v1925_v32 = vshrl.u32 %v14798_v12, 16  ;;  %v1915_v35 = vrot.slane %v1913_v20, 1  ;;  %v1933_v36 = vshrl.u32 %v14788_v6, 16  ;;  %v13227_v20 = vld [vmem:[%s17449_s4 + $0x24] ss:$16 sps:$4 sm:$0xff]  }
 0x269   : > { %2608 = vmatprep.mubr.bf16.mxu0 %v14730_v34  ;;  %11559 = vmatpush3.bf16.msra.mxu0 %v13209_v46  ;;  %v1895_v37 = vor.u32 %v1893_v14, %v1883_v8  ;;  %v1960_v38 = vrot.slane %v1958_v28, 1  ;;  %v1965_v40 = vrot.slane %v1963_v29, 1  ;;  %v1903_v41 = vor.u32 %v1901_v58, %v1891_v17  ;;  %v13234_v58 = vld [vmem:[%s17449_s4 + $0x80] ss:$16 sps:$4 sm:$0xff]   ;;  %v13242_v28 = vld [vmem:[%s17449_s4 + $0x2c] ss:$16 sps:$4 sm:$0xff]  }
 0x26a   : > { %11493 = vmatpush3.bf16.msra.mxu1 %v13199_v49  ;;  %11560 = vmatprep.subr.bf16.mxu0 %v13212_v63  ;;  %v1911_v44 = vor.u32 %v1909_v13, %v1899_v24  ;;  %v1919_v45 = vor.u32 %v1917_v26, %v1907_v25  ;;  %v1638_v46 = vor.u32 %v1609_v21, %v14761_v54  ;;  %v1945_v1 = vshll.u32 %v14564_v3, 16  ;;  %v13228_v21 = vld [vmem:[%s17449_s4 + $0x40] ss:$16 sps:$4 sm:$0xff]   ;;  %v13239_v13 = vld [vmem:[%s17449_s4 + $0xc] ss:$16 sps:$4 sm:$0xff]  }
 0x26b   : > { %11494 = vmatprep.subr.bf16.mxu1 %v13204_v39  ;;  %v14831_v42 = vsel %vm1540_vm1, %v1895_v37, %v1899_v24  ;;  %v14835_v43 = vsel %vm1540_vm1, %v1903_v41, %v1907_v25  ;;  %v1927_v52 = vor.u32 %v1925_v32, %v1915_v35  ;;  %v14854_v53 = vor.u32 %v1933_v36, %v1923_v31  ;;  %v13233_v24 = vld [vmem:[%s17449_s4 + $0x64] ss:$16 sps:$4 sm:$0xff]   ;;  %v13240_v26 = vld [vmem:[%s17449_s4 + $0x28] ss:$16 sps:$4 sm:$0xff]   ;;  %v13243_v29 = vld [vmem:[%s17449_s4 + $0xa0] ss:$16 sps:$4 sm:$0xff]  }
 0x26c   : > { %v14842_v47 = vsel %vm1540_vm1, %v1911_v44, %v1915_v35  ;;  %v14846_v48 = vsel %vm1540_vm1, %v1919_v45, %v1923_v31  ;;  %v14851_v49 = vsel %vm1540_vm1, %v1638_v46, %v14564_v3  ;;  %v1947_v4 = vrot.slane %v1945_v1, 1  ;;  %v13236_v25 = vld [vmem:[%s17449_s4 + $0x84] ss:$16 sps:$4 sm:$0xff]   ;;  %v13246_v31 = vld [vmem:[%s17449_s4 + $0x48] ss:$16 sps:$4 sm:$0xff]  }
 0x26d   : > { %2513 = vmatmul.mubr.bf16.gmra.mrb[28].mxu1 %v14661_v61  ;;  %11561 = vmatpush3.bf16.msra.mxu0 %v13213_v2  ;;  %v1961_v54 = vsel %vm1540_vm1, %v1927_v52, %v1960_v38  ;;  %v1966_v39 = vsel %vm1540_vm1, %v14854_v53, %v1965_v40  ;;  %v1941_v63 = vshrl.u32 %v14851_v49, 16  ;;  %v1648_v5 = vsel %vm1620_vm0, %v14755_v50, %v14564_v3  ;;  %v13248_v32 = vld [vmem:[%s17449_s4 + $0x4c] ss:$16 sps:$4 sm:$0xff]   ;;  %v13249_v35 = vld [vmem:[%s17449_s4 + $0x68] ss:$16 sps:$4 sm:$0xff]  }
 0x26e   : > { %2519 = vmatprep.mubr.bf16.mxu1 %v14812_v23  ;;  %11495 = vmatpush3.bf16.msra.mxu1 %v13205_v7  ;;  %v1977_v6 = vshrl.u32 %v14564_v3, 16  ;;  %v1937_v7 = vshll.u32 %v1648_v5, 16  ;;  %v1949_v50 = vshrl.u32 %v1648_v5, 16  ;;  %v13251_v36 = vld [vmem:[%s17449_s4 + $0x6c] ss:$16 sps:$4 sm:$0xff]  }
 0x26f   : > { %11496 = vmatprep.subr.bf16.mxu1 %v13210_v15  ;;  %v13252_v37 = vld [vmem:[%s17449_s4 + $0xc0] ss:$16 sps:$4 sm:$0xff]   ;;  %v13254_v38 = vld [vmem:[%s17449_s4 + $0xc4] ss:$16 sps:$4 sm:$0xff]   ;;  %v13255_v40 = vld [vmem:[%s17449_s4 + $0x88] ss:$16 sps:$4 sm:$0xff]  }
 0x270   : > { %2609 = vmatmul.mubr.bf16.gmra.mrb[48].mxu0 %v14823_v30  ;;  %v1979_v8 = vor.u32 %v1977_v6, %v1947_v4  ;;  %v1939_v10 = vrot.slane %v1937_v7, 1  ;;  %v13257_v41 = vld [vmem:[%s17449_s4 + $0x8c] ss:$16 sps:$4 sm:$0xff]   ;;  %v13258_v44 = vld [vmem:[%s17449_s4 + $0xa8] ss:$16 sps:$4 sm:$0xff]  }
 0x271   : > { %2615 = vmatprep.mubr.bf16.mxu0 %v14769_v56  ;;  %v13260_v45 = vld [vmem:[%s17449_s4 + $0xac] ss:$16 sps:$4 sm:$0xff]  }
 0x272   : > { %11497 = vmatpush3.bf16.msra.mxu1 %v13211_v22  ;;  %v1940_v11 = vsel %vm1540_vm1, %v14854_v53, %v1939_v10  ;;  %v1984_v14 = vsel %vm1540_vm1, %v1979_v8, %v14564_v3  ;;  %v1951_v15 = vor.u32 %v1949_v50, %v1939_v10  ;;  %v1992_v18 = vsel %vm1540_vm1, %v1979_v8, %v1947_v4  ;;  %v13230_v22 = vld [vmem:[%s17449_s4 + $0x44] ss:$16 sps:$4 sm:$0xff]  }
 0x273   : > { %12682 = vmatprep.subr.bf16.mxu1 %v13214_v59 }
 0x275   : > { %2520 = vmatmul.mubr.bf16.gmra.mrb[32].mxu1 %v14677_v9 }
 0x276   : > { %2526 = vmatprep.mubr.bf16.mxu1 %v14831_v42 }
 0x278   : > { %2616 = vmatmul.mubr.bf16.gmra.mrb[52].mxu0 %v14835_v43 }
 0x279   : > { %2622 = vmatprep.mubr.bf16.mxu0 %v14798_v12 }
 0x27d   : > { %2527 = vmatmul.mubr.bf16.gmra.mrb[36].mxu1 %v14730_v34 }
 0x27e   : > { %2533 = vmatprep.mubr.bf16.mxu1 %v14842_v47 }
 0x280   : > { %2623 = vmatmul.mubr.bf16.gmra.mrb[56].mxu0 %v14846_v48 }
 0x281   : > { %2629 = vmatprep.mubr.bf16.mxu0 %v14851_v49 }
 0x285   : > { %2534 = vmatmul.mubr.bf16.gmra.mrb[40].mxu1 %v14769_v56 }
 0x286   : > { %2540 = vmatprep.mubr.bf16.mxu1 %v1961_v54 }
 0x288   : > { %2630 = vmatmul.mubr.bf16.gmra.mrb[60].mxu0 %v1966_v39 }
 0x289   : > { %2758 = vmatprep.mubr.bf16.mxu0 %v14698_v19 }
 0x28d   : > { %2541 = vmatmul.mubr.bf16.gmra.mrb[44].mxu1 %v14798_v12 }
 0x28e   : > { %2669 = vmatprep.mubr.bf16.mxu1 %v14658_v60  ;;  %v13219_v60 = vld [vmem:[%s17448_s3 + $0x228] sm:$0xff]  }
 0x290   : > { %2759 = vmatmul.mubr.bf16.vlgmr.msra.gmra.mrb[64].mxu0 %v14622_v33  ;;  %v13217_v33 = vld [vmem:[%s17448_s3 + $0x218] sm:$0xff]  }
 0x291   : > { %2765 = vmatprep.mubr.bf16.mxu0 %v14759_v51 }
 0x295   : > { %2670 = vmatmul.mubr.bf16.vlgmr.msra.gmra.mrb[48].mxu1 %v14655_v57  ;;  %v13218_v57 = vld [vmem:[%s17448_s3 + $0x220] sm:$0xff]  }
 0x296   : > { %2676 = vmatprep.mubr.bf16.mxu1 %v14717_v27  ;;  %12683 = vmatpush3.bf16.msra.mxu1 %v13214_v59  ;;  %v13237_v59 = vld [vmem:[%s17449_s4 + $0x8] ss:$16 sps:$4 sm:$0xff]  }
 0x297   : > { %12684 = vmatprep.subr.bf16.mxu1 %v13215_v55 }
 0x298   : > { %2766 = vmatmul.mubr.bf16.gmra.mrb[68].mxu0 %v14661_v61  ;;  %v13220_v61 = vld [vmem:[%s17448_s3 + $0x230] sm:$0xff]  }
 0x299   : > { %2772 = vmatprep.mubr.bf16.mxu0 %v14812_v23 }
 0x29a   : > { %12685 = vmatpush3.bf16.msra.mxu1 %v13215_v55  ;;  %v13266_v55 = vld [vmem:[%s17449_s4 + $0xcc] ss:$16 sps:$4 sm:$0xff]  }
 0x29b   : > { %12686 = vmatprep.subr.bf16.mxu1 %v13216_v62 }
 0x29d   : > { %2677 = vmatmul.mubr.bf16.gmra.mrb[52].mxu1 %v14698_v19  ;;  %v13221_v19 = vld [vmem:[%s17448_s3 + $0x238] sm:$0xff]  }
 0x29e   : > { %2683 = vmatprep.mubr.bf16.mxu1 %v14778_v0  ;;  %12687 = vmatpush3.bf16.msra.mxu1 %v13216_v62 }
 0x29f   : > { %12688 = vmatprep.subr.bf16.mxu1 %v13217_v33 }
 0x2a0   : > { %2773 = vmatmul.mubr.bf16.gmra.mrb[72].mxu0 %v14677_v9  ;;  %v1929_v9 = vshll.u32 %v14851_v49, 16 }
 0x2a1   : > { %2779 = vmatprep.mubr.bf16.mxu0 %v14831_v42 }
 0x2a2   : > { %12689 = vmatpush3.bf16.msra.mxu1 %v13217_v33 }
 0x2a3   : > { %12690 = vmatprep.subr.bf16.mxu1 %v13218_v57 }
 0x2a5   : > { %2684 = vmatmul.mubr.bf16.gmra.mrb[56].mxu1 %v14759_v51  ;;  %v1931_v51 = vrot.slane %v1929_v9, 1 }
 0x2a6   : > { %2690 = vmatprep.mubr.bf16.mxu1 %v14823_v30  ;;  %12691 = vmatpush3.bf16.msra.mxu1 %v13218_v57  ;;  %v13261_v57 = vld [vmem:[%s17449_s4 + $0xe0] ss:$16 sps:$4 sm:$0xff]  }
 0x2a7   : > { %12692 = vmatprep.subr.bf16.mxu1 %v13219_v60  ;;  %v1943_v2 = vor.u32 %v1941_v63, %v1931_v51 }
 0x2a8   : > { %2780 = vmatmul.mubr.bf16.gmra.mrb[76].mxu0 %v14730_v34  ;;  %v1932_v34 = vsel %vm1540_vm1, %v1927_v52, %v1931_v51  ;;  %v15014_v52 = vld [vmem:[%s17459_s14 + $0x2] ss:$0 sm:$0xff] }
 0x2a9   : > { %2786 = vmatprep.mubr.bf16.mxu0 %v14842_v47  ;;  %v1971_v17 = vsel %vm1540_vm1, %v1943_v2, %v14564_v3 }
 0x2aa   : > { %12693 = vmatpush3.bf16.msra.mxu1 %v13219_v60  ;;  %v13263_v60 = vld [vmem:[%s17449_s4 + $0xe4] ss:$16 sps:$4 sm:$0xff]  }
 0x2ab   : > { %12694 = vmatprep.subr.bf16.mxu1 %v13220_v61 }
 0x2ad   : > { %2691 = vmatmul.mubr.bf16.gmra.mrb[60].mxu1 %v14812_v23  ;;  %v13231_v23 = vld [vmem:[%s17449_s4 + $0x60] ss:$16 sps:$4 sm:$0xff]  }
 0x2ae   : > { %2697 = vmatprep.mubr.bf16.mxu1 %v14835_v43  ;;  %12695 = vmatpush3.bf16.msra.mxu1 %v13220_v61 }
 0x2af   : > { %12696 = vmatprep.subr.bf16.mxu1 %v13221_v19 }
 0x2b0   : > { %2787 = vmatmul.mubr.bf16.gmra.mrb[80].mxu0 %v14769_v56  ;;  %v1948_v56 = vsel %vm1540_vm1, %v1943_v2, %v1947_v4  ;;  %v13267_v2 = vld [vmem:[%s17449_s4 + $0xe8] ss:$16 sps:$4 sm:$0xff]  }
 0x2b1   : > { %2793 = vmatprep.mubr.bf16.mxu0 %v1932_v34 }
 0x2b2   : > { %12697 = vmatpush3.bf16.msra.mxu1 %v13221_v19  ;;  %v13264_v19 = vld [vmem:[%s17449_s4 + $0xc8] ss:$16 sps:$4 sm:$0xff]  }
 0x2b3   : > { %3204 = vmatprep.subr.bf16.mxu1 %v13239_v13 }
 0x2b5   : > { %2698 = vmatmul.mubr.bf16.gmra.mrb[64].mxu1 %v14831_v42 }
 0x2b6   : > { %2704 = vmatprep.mubr.bf16.mxu1 %v14846_v48 }
 0x2b8   : > { %2794 = vmatmul.mubr.bf16.gmra.mrb[84].mxu0 %v14798_v12  ;;  %v1976_v12 = vsel %vm1540_vm1, %v1951_v15, %v1947_v4  ;;  %v13269_v4 = vld [vmem:[%s17449_s4 + $0xec] ss:$16 sps:$4 sm:$0xff]  }
 0x2b9   : > { %2800 = vmatprep.mubr.bf16.mxu0 %v1948_v56 }
 0x2bd   : > { %2705 = vmatmul.mubr.bf16.gmra.mrb[68].mxu1 %v14842_v47 }
 0x2be   : > { %2711 = vmatprep.mubr.bf16.mxu1 %v1940_v11 }
 0x2c0   : > { %2801 = vmatmul.mubr.bf16.gmra.mrb[88].mxu0 %v14851_v49 }
 0x2c1   : > { %2807 = vmatprep.mubr.bf16.mxu0 %v1984_v14 }
 0x2c5   : > { %2712 = vmatmul.mubr.bf16.gmra.mrb[72].mxu1 %v1932_v34 }
 0x2c6   : > { %2718 = vmatprep.mubr.bf16.mxu1 %v1976_v12 }
 0x2c8   : > { %2808 = vmatmul.mubr.bf16.gmra.mrb[92].mxu0 %v14564_v3  ;;  %v13222_v3 = vld [vmem:[%s17449_s4] ss:$16 sps:$4 sm:$0xff]  }
 0x2c9   : > { %3163 = vmatprep.mubr.bf16.mxu0 %v14921_v16 }
 0x2cd   : > { %2719 = vmatmul.mubr.bf16.gmra.mrb[76].mxu1 %v1971_v17 }
 0x2ce   : > { %12698 = vmatprep.mubr.bf16.mxu1 %v14717_v27  ;;  %v13224_v27 = vld [vmem:[%s17449_s4 + $0x4] ss:$16 sps:$4 sm:$0xff]  }
 0x2cf   : > { %3131 = vmatprep.subr.bf16.mxu0 %v13224_v27 }
 0x2d0   : > { %3132 = vmatpush1.bf16.msra.mxu0 %v13222_v3 }
 0x2d1   : > { %3133 = vmatprep.subr.bf16.mxu0 %v13227_v20 }
 0x2d5   : > { %12699 = vmatmul.mubr.bf16.vlgmr.msra.gmra.mrb[80].mxu1 %v14778_v0  ;;  %v13225_v0 = vld [vmem:[%s17449_s4 + $0x20] ss:$16 sps:$4 sm:$0xff]  }
 0x2d6   : > { %12702 = vmatprep.mubr.bf16.mxu1 %v14823_v30  ;;  %3134 = vmatpush1.bf16.msra.mxu0 %v13225_v0  ;;  %v13245_v30 = vld [vmem:[%s17449_s4 + $0xa4] ss:$16 sps:$4 sm:$0xff]  }
 0x2d7   : > { %3135 = vmatprep.subr.bf16.mxu0 %v13230_v22  ;;  %3205 = vmatpush1.bf16.msra.mxu1 %v13237_v59 }
 0x2d8   : > { %3206 = vmatprep.subr.bf16.mxu1 %v13242_v28 }
 0x2da   : > { %3136 = vmatpush1.bf16.msra.mxu0 %v13228_v21 }
 0x2db   : > { %3137 = vmatprep.subr.bf16.mxu0 %v13233_v24  ;;  %3207 = vmatpush1.bf16.msra.mxu1 %v13240_v26 }
 0x2dc   : > { %3208 = vmatprep.subr.bf16.mxu1 %v13248_v32 }
 0x2dd   : > { %12703 = vmatmul.mubr.bf16.gmra.mrb[84].mxu1 %v14835_v43 }
 0x2de   : > { %12706 = vmatprep.mubr.bf16.mxu1 %v14846_v48  ;;  %3138 = vmatpush1.bf16.msra.mxu0 %v13231_v23 }
 0x2df   : > { %3139 = vmatprep.subr.bf16.mxu0 %v13236_v25  ;;  %3209 = vmatpush1.bf16.msra.mxu1 %v13246_v31 }
 0x2e0   : > { %3210 = vmatprep.subr.bf16.mxu1 %v13251_v36 }
 0x2e2   : > { %3140 = vmatpush1.bf16.msra.mxu0 %v13234_v58 }
 0x2e3   : > { %3141 = vmatprep.subr.bf16.mxu0 %v13245_v30  ;;  %3211 = vmatpush1.bf16.msra.mxu1 %v13249_v35 }
 0x2e4   : > { %3212 = vmatprep.subr.bf16.mxu1 %v13257_v41 }
 0x2e5   : > { %12707 = vmatmul.mubr.bf16.gmra.mrb[88].mxu1 %v1940_v11 }
 0x2e6   : > { %12710 = vmatprep.mubr.bf16.mxu1 %v1976_v12  ;;  %3142 = vmatpush1.bf16.msra.mxu0 %v13243_v29 }
 0x2e7   : > { %3143 = vmatprep.subr.bf16.mxu0 %v13254_v38  ;;  %3213 = vmatpush1.bf16.msra.mxu1 %v13255_v40 }
 0x2e8   : > { %3214 = vmatprep.subr.bf16.mxu1 %v13260_v45 }
 0x2ea   : > { %3144 = vmatpush1.bf16.msra.mxu0 %v13252_v37 }
 0x2eb   : > { %3215 = vmatpush1.bf16.msra.mxu1 %v13258_v44  ;;  %3145 = vmatprep.subr.bf16.mxu0 %v13263_v60 }
 0x2ec   : > { %3216 = vmatprep.subr.bf16.mxu1 %v13266_v55 }
 0x2ed   : > { %12711 = vmatmul.mubr.bf16.gmra.mrb[92].mxu1 %v1992_v18 }
 0x2ee   : > { %3236 = vmatprep.mubr.bf16.mxu1 %v14921_v16  ;;  %3146 = vmatpush1.bf16.msra.mxu0 %v13261_v57 }
 0x2ef   : > { %3217 = vmatpush1.bf16.msra.mxu1 %v13264_v19 }
 0x2f0   : > { %3218 = vmatprep.subr.bf16.mxu1 %v13269_v4 }
 0x2f3   : > { %3219 = vmatpush1.bf16.msra.mxu1 %v13267_v2 }
 0x323   : > { %v11434_v42 = vpop.f32.mrb[32].mxu0 }
 0x324   : > { %v11435_v43 = vpop.f32.mrb[33].mxu0 }
 0x325   : > { %v11436_v46 = vadd.f32 %v11435_v43, %v11434_v42  ;;  %v11437_v47 = vpop.f32.mrb[34].mxu0  ;;  %v13270_v42 = vld [vmem:[#allocation7 + $0x40] sm:$0xff]  }
 0x326   : > { %v11438_v48 = vpop.f32.mrb[35].mxu0  ;;  %v13271_v43 = vld [vmem:[#allocation7 + $0xc0] sm:$0xff]   ;;  %11626 = vmatprep.subr.bf16.mxu0 %v13270_v42 }
 0x327   : > { %11666 = vmatprep.subr.bf16.mxu1 %v13271_v43 }
 0x328   : > { %v11370_v49 = vpop.f32.mrb[16].mxu1 }
 0x329   : > { %v11371_v53 = vpop.f32.mrb[17].mxu1 }
 0x32a   : > { %v11372_v54 = vadd.f32 %v11371_v53, %v11370_v49  ;;  %v11373_v39 = vpop.f32.mrb[18].mxu1 }
 0x32b   : > { %v11374_v62 = vpop.f32.mrb[19].mxu1  ;;  %v11440_v33 = vpop.f32.mrb[36].mxu0 }
 0x32c   : > { %v2494_v61 = vadd.f32 %v11372_v54, %v15014_v52  ;;  %v11441_v9 = vpop.f32.mrb[37].mxu0 }
 0x32d   : > { %v11442_v51 = vadd.f32 %v11441_v9, %v11440_v33  ;;  %v11443_v63 = vpop.f32.mrb[38].mxu0 }
 0x32e   : > { %v11444_v34 = vpop.f32.mrb[39].mxu0  ;;  %v15029_v1 = vadd.f32 %v11436_v46, %v2494_v61 }
 0x330   : > { %v11376_v5 = vpop.f32.mrb[20].mxu1 }
 0x331   : > { %v11377_v6 = vpop.f32.mrb[21].mxu1 }
 0x332   : > { %v11378_v7 = vadd.f32 %v11377_v6, %v11376_v5  ;;  %v11379_v56 = vpop.f32.mrb[22].mxu1 }
 0x333   : > { %v11380_v8 = vpop.f32.mrb[23].mxu1  ;;  %v11446_v10 = vpop.f32.mrb[40].mxu0 }
 0x334   : > { %v2501_v11 = vadd.f32 %v11378_v7, %v15014_v52  ;;  %v11447_v50 = vpop.f32.mrb[41].mxu0 }
 0x335   : > { %v11448_v14 = vadd.f32 %v11447_v50, %v11446_v10  ;;  %v11449_v15 = vpop.f32.mrb[42].mxu0 }
 0x336   : > { %v11450_v12 = vpop.f32.mrb[43].mxu0  ;;  %v15038_v17 = vadd.f32 %v11442_v51, %v2501_v11 }
 0x338   : > { %v11382_v18 = vpop.f32.mrb[24].mxu1 }
 0x339   : > { %v11383_v3 = vpop.f32.mrb[25].mxu1 }
 0x33a   : > { %v11384_v27 = vadd.f32 %v11383_v3, %v11382_v18  ;;  %v11385_v0 = vpop.f32.mrb[26].mxu1 }
 0x33b   : > { %v11386_v20 = vpop.f32.mrb[27].mxu1  ;;  %v11452_v21 = vpop.f32.mrb[44].mxu0 }
 0x33c   : > { %v2508_v22 = vadd.f32 %v11384_v27, %v15014_v52  ;;  %v11453_v23 = vpop.f32.mrb[45].mxu0 }
 0x33d   : > { %v11454_v24 = vadd.f32 %v11453_v23, %v11452_v21  ;;  %v11455_v58 = vpop.f32.mrb[46].mxu0 }
 0x33e   : > { %v11456_v25 = vpop.f32.mrb[47].mxu0  ;;  %v15041_v59 = vadd.f32 %v11448_v14, %v2508_v22 }
 0x340   : > { %v11388_v13 = vpop.f32.mrb[28].mxu1 }
 0x341   : > { %v11389_v26 = vpop.f32.mrb[29].mxu1 }
 0x342   : > { %v11390_v28 = vadd.f32 %v11389_v26, %v11388_v13  ;;  %v11391_v29 = vpop.f32.mrb[30].mxu1 }
 0x343   : > { %v11392_v30 = vpop.f32.mrb[31].mxu1  ;;  %v11458_v31 = vpop.f32.mrb[48].mxu0 }
 0x344   : > { %v2515_v32 = vadd.f32 %v11390_v28, %v15014_v52  ;;  %v11459_v35 = vpop.f32.mrb[49].mxu0 }
 0x345   : > { %v11460_v36 = vadd.f32 %v11459_v35, %v11458_v31  ;;  %v11461_v37 = vpop.f32.mrb[50].mxu0 }
 0x346   : > { %v11462_v38 = vpop.f32.mrb[51].mxu0  ;;  %v15044_v40 = vadd.f32 %v11454_v24, %v2515_v32 }
 0x348   : > { %v11394_v41 = vpop.f32.mrb[32].mxu1 }
 0x349   : > { %v11395_v44 = vpop.f32.mrb[33].mxu1 }
 0x34a   : > { %v11396_v45 = vadd.f32 %v11395_v44, %v11394_v41  ;;  %v11397_v46 = vpop.f32.mrb[34].mxu1 }
 0x34b   : > { %v11398_v47 = vpop.f32.mrb[35].mxu1  ;;  %v11464_v48 = vpop.f32.mrb[52].mxu0 }
 0x34c   : > { %v2522_v49 = vadd.f32 %v11396_v45, %v15014_v52  ;;  %v11465_v53 = vpop.f32.mrb[53].mxu0 }
 0x34d   : > { %v11466_v54 = vadd.f32 %v11465_v53, %v11464_v48  ;;  %v11467_v39 = vpop.f32.mrb[54].mxu0 }
 0x34e   : > { %v11468_v55 = vpop.f32.mrb[55].mxu0  ;;  %v15047_v62 = vadd.f32 %v11460_v36, %v2522_v49 }
 0x350   : > { %v11400_v33 = vpop.f32.mrb[36].mxu1 }
 0x351   : > { %v11401_v57 = vpop.f32.mrb[37].mxu1 }
 0x352   : > { %v11402_v60 = vadd.f32 %v11401_v57, %v11400_v33  ;;  %v11403_v61 = vpop.f32.mrb[38].mxu1 }
 0x353   : > { %v11404_v9 = vpop.f32.mrb[39].mxu1  ;;  %v11470_v19 = vpop.f32.mrb[56].mxu0 }
 0x354   : > { %v2529_v51 = vadd.f32 %v11402_v60, %v15014_v52  ;;  %v11471_v63 = vpop.f32.mrb[57].mxu0 }
 0x355   : > { %v11472_v34 = vadd.f32 %v11471_v63, %v11470_v19  ;;  %v11473_v2 = vpop.f32.mrb[58].mxu0 }
 0x356   : > { %v11474_v4 = vpop.f32.mrb[59].mxu0  ;;  %v15050_v5 = vadd.f32 %v11466_v54, %v2529_v51 }
 0x358   : > { %v11406_v6 = vpop.f32.mrb[40].mxu1 }
 0x359   : > { %v11407_v7 = vpop.f32.mrb[41].mxu1 }
 0x35a   : > { %v11408_v56 = vadd.f32 %v11407_v7, %v11406_v6  ;;  %v11409_v8 = vpop.f32.mrb[42].mxu1 }
 0x35b   : > { %v11410_v10 = vpop.f32.mrb[43].mxu1  ;;  %v11476_v11 = vpop.f32.mrb[60].mxu0 }
 0x35c   : > { %v2536_v50 = vadd.f32 %v11408_v56, %v15014_v52  ;;  %v11477_v14 = vpop.f32.mrb[61].mxu0 }
 0x35d   : > { %v11478_v15 = vadd.f32 %v11477_v14, %v11476_v11  ;;  %v11479_v12 = vpop.f32.mrb[62].mxu0 }
 0x35e   : > { %v11480_v18 = vpop.f32.mrb[63].mxu0  ;;  %v15053_v3 = vadd.f32 %v11472_v34, %v2536_v50 }
 0x360   : > { %v11412_v27 = vpop.f32.mrb[44].mxu1 }
 0x361   : > { %v11413_v0 = vpop.f32.mrb[45].mxu1 }
 0x362   : > { %v11414_v20 = vadd.f32 %v11413_v0, %v11412_v27  ;;  %v11415_v21 = vpop.f32.mrb[46].mxu1 }
 0x363   : > { %v11416_v22 = vpop.f32.mrb[47].mxu1  ;;  %v11562_v23 = vpop.f32.mrb[64].mxu0 }
 0x364   : > { %v2543_v24 = vadd.f32 %v11414_v20, %v15014_v52  ;;  %v11563_v58 = vpop.f32.mrb[65].mxu0 }
 0x365   : > { %v11564_v25 = vadd.f32 %v11563_v58, %v11562_v23  ;;  %v11565_v13 = vpop.f32.mrb[66].mxu0 }
 0x366   : > { %v11566_v26 = vpop.f32.mrb[67].mxu0  ;;  %v15056_v28 = vadd.f32 %v11478_v15, %v2543_v24 }
 0x368   : > { %v11498_v29 = vpop.f32.mrb[48].mxu1 }
 0x369   : > { %v11499_v30 = vpop.f32.mrb[49].mxu1 }
 0x36a   : > { %v11500_v31 = vadd.f32 %v11499_v30, %v11498_v29  ;;  %v11501_v32 = vpop.f32.mrb[50].mxu1 }
 0x36b   : > { %v11502_v35 = vpop.f32.mrb[51].mxu1  ;;  %v11568_v36 = vpop.f32.mrb[68].mxu0 }
 0x36c   : > { %v2672_v37 = vadd.f32 %v11500_v31, %v15029_v1  ;;  %v11569_v38 = vpop.f32.mrb[69].mxu0 }
 0x36d   : > { %v11570_v41 = vadd.f32 %v11569_v38, %v11568_v36  ;;  %v11571_v42 = vpop.f32.mrb[70].mxu0 }
 0x36e   : > { %v11572_v43 = vpop.f32.mrb[71].mxu0  ;;  %v15059_v44 = vadd.f32 %v11564_v25, %v2672_v37 }
 0x370   : > { %v11504_v52 = vpop.f32.mrb[52].mxu1 }
 0x371   : > { %v11505_v45 = vpop.f32.mrb[53].mxu1 }
 0x372   : > { %v11506_v46 = vadd.f32 %v11505_v45, %v11504_v52  ;;  %v11507_v47 = vpop.f32.mrb[54].mxu1 }
 0x373   : > { %v11508_v48 = vpop.f32.mrb[55].mxu1  ;;  %v11574_v49 = vpop.f32.mrb[72].mxu0 }
 0x374   : > { %v2679_v53 = vadd.f32 %v11506_v46, %v15038_v17  ;;  %v11575_v54 = vpop.f32.mrb[73].mxu0 }
 0x375   : > { %v11576_v39 = vadd.f32 %v11575_v54, %v11574_v49  ;;  %v11577_v55 = vpop.f32.mrb[74].mxu0 }
 0x376   : > { %v11578_v33 = vpop.f32.mrb[75].mxu0  ;;  %v15062_v57 = vadd.f32 %v11570_v41, %v2679_v53 }
 0x378   : > { %v11510_v1 = vpop.f32.mrb[56].mxu1 }
 0x379   : > { %v11511_v60 = vpop.f32.mrb[57].mxu1 }
 0x37a   : > { %v11512_v61 = vadd.f32 %v11511_v60, %v11510_v1  ;;  %v11513_v9 = vpop.f32.mrb[58].mxu1 }
 0x37b   : > { %v11514_v19 = vpop.f32.mrb[59].mxu1  ;;  %v11580_v51 = vpop.f32.mrb[76].mxu0 }
 0x37c   : > { %v2686_v63 = vadd.f32 %v11512_v61, %v15041_v59  ;;  %v11581_v34 = vpop.f32.mrb[77].mxu0 }
 0x37d   : > { %v11582_v2 = vadd.f32 %v11581_v34, %v11580_v51  ;;  %v11583_v4 = vpop.f32.mrb[78].mxu0 }
 0x37e   : > { %v11584_v6 = vpop.f32.mrb[79].mxu0  ;;  %v15065_v7 = vadd.f32 %v11576_v39, %v2686_v63 }
 0x380   : > { %v11516_v17 = vpop.f32.mrb[60].mxu1 }
 0x381   : > { %v11517_v56 = vpop.f32.mrb[61].mxu1 }
 0x382   : > { %v11518_v8 = vadd.f32 %v11517_v56, %v11516_v17  ;;  %v11519_v10 = vpop.f32.mrb[62].mxu1 }
 0x383   : > { %v11520_v11 = vpop.f32.mrb[63].mxu1  ;;  %v11586_v50 = vpop.f32.mrb[80].mxu0 }
 0x384   : > { %v2693_v14 = vadd.f32 %v11518_v8, %v15044_v40  ;;  %v11587_v15 = vpop.f32.mrb[81].mxu0 }
 0x385   : > { %v11588_v12 = vadd.f32 %v11587_v15, %v11586_v50  ;;  %v11589_v18 = vpop.f32.mrb[82].mxu0  ;;  %v13272_v50 = vld [vmem:[#allocation7] sm:$0xff]   ;;  %v13274_v15 = vld [vmem:[#allocation7 + $0x48] sm:$0xff]  }
 0x386   : > { %v11590_v27 = vpop.f32.mrb[83].mxu0  ;;  %v2782_v0 = vadd.f32 %v11582_v2, %v2693_v14  ;;  %v13273_v14 = vld [vmem:[#allocation7 + $0x80] sm:$0xff]  }
 0x388   : > { %v11522_v59 = vpop.f32.mrb[64].mxu1 }
 0x389   : > { %v11523_v20 = vpop.f32.mrb[65].mxu1 }
 0x38a   : > { %v11524_v21 = vadd.f32 %v11523_v20, %v11522_v59  ;;  %v11525_v22 = vpop.f32.mrb[66].mxu1  ;;  %v13276_v59 = vld [vmem:[#allocation7 + $0x8] sm:$0xff]  }
 0x38b   : > { %v11526_v23 = vpop.f32.mrb[67].mxu1  ;;  %v11592_v24 = vpop.f32.mrb[84].mxu0  ;;  %v13277_v20 = vld [vmem:[#allocation7 + $0x88] sm:$0xff]  }
 0x38c   : > { %v2700_v58 = vadd.f32 %v11524_v21, %v15047_v62  ;;  %v11593_v25 = vpop.f32.mrb[85].mxu0  ;;  %v13278_v23 = vld [vmem:[#allocation7 + $0x50] sm:$0xff]  }
 0x38d   : > { %v11594_v13 = vadd.f32 %v11593_v25, %v11592_v24  ;;  %v11595_v26 = vpop.f32.mrb[86].mxu0  ;;  %v13279_v24 = vld [vmem:[#allocation7 + $0xd0] sm:$0xff]  }
 0x38e   : > { %v11596_v29 = vpop.f32.mrb[87].mxu0  ;;  %v15069_v30 = vadd.f32 %v11588_v12, %v2700_v58  ;;  %v13275_v12 = vld [vmem:[#allocation7 + $0xc8] sm:$0xff]   ;;  %v13280_v25 = vld [vmem:[#allocation7 + $0x10] sm:$0xff]   ;;  %v13283_v26 = vld [vmem:[#allocation7 + $0xd8] sm:$0xff]  }
 0x390   : > { %v11528_v40 = vpop.f32.mrb[68].mxu1 }
 0x391   : > { %v11529_v31 = vpop.f32.mrb[69].mxu1 }
 0x392   : > { %v11530_v32 = vadd.f32 %v11529_v31, %v11528_v40  ;;  %v11531_v35 = vpop.f32.mrb[70].mxu1 }
 0x393   : > { %v11532_v36 = vpop.f32.mrb[71].mxu1  ;;  %v11598_v37 = vpop.f32.mrb[88].mxu0 }
 0x394   : > { %v2707_v38 = vadd.f32 %v11530_v32, %v15050_v5  ;;  %v11599_v41 = vpop.f32.mrb[89].mxu0  ;;  %v13284_v36 = vld [vmem:[#allocation7 + $0x18] sm:$0xff]  }
 0x395   : > { %v11600_v42 = vadd.f32 %v11599_v41, %v11598_v37  ;;  %v11601_v43 = vpop.f32.mrb[90].mxu0  ;;  %v13285_v37 = vld [vmem:[#allocation7 + $0x98] sm:$0xff]  }
 0x396   : > { %v11602_v52 = vpop.f32.mrb[91].mxu0  ;;  %v15072_v45 = vadd.f32 %v11594_v13, %v2707_v38  ;;  %v13281_v13 = vld [vmem:[#allocation7 + $0x90] sm:$0xff]   ;;  %v13287_v43 = vld [vmem:[#allocation7 + $0xe0] sm:$0xff]  }
 0x398   : > { %v11534_v62 = vpop.f32.mrb[72].mxu1 }
 0x399   : > { %v11535_v46 = vpop.f32.mrb[73].mxu1 }
 0x39a   : > { %v11536_v47 = vadd.f32 %v11535_v46, %v11534_v62  ;;  %v11537_v48 = vpop.f32.mrb[74].mxu1  ;;  %v13288_v62 = vld [vmem:[#allocation7 + $0x20] sm:$0xff]  }
 0x39b   : > { %v11538_v49 = vpop.f32.mrb[75].mxu1  ;;  %v11604_v53 = vpop.f32.mrb[92].mxu0  ;;  %v13289_v46 = vld [vmem:[#allocation7 + $0xa0] sm:$0xff]  }
 0x39c   : > { %v2714_v54 = vadd.f32 %v11536_v47, %v15053_v3  ;;  %v11605_v39 = vpop.f32.mrb[93].mxu0  ;;  %v13291_v47 = vld [vmem:[#allocation7 + $0xe8] sm:$0xff]  }
 0x39d   : > { %v11606_v55 = vadd.f32 %v11605_v39, %v11604_v53  ;;  %v11607_v33 = vpop.f32.mrb[94].mxu0 }
 0x39e   : > { %v15075_v1 = vadd.f32 %v11600_v42, %v2714_v54  ;;  %v11608_v5 = vpop.f32.mrb[95].mxu0  ;;  %v13286_v42 = vld [vmem:[#allocation7 + $0x60] sm:$0xff]  }
 0x3a0   : > { %v11540_v60 = vpop.f32.mrb[76].mxu1 }
 0x3a1   : > { %v11541_v61 = vpop.f32.mrb[77].mxu1 }
 0x3a2   : > { %v11542_v9 = vadd.f32 %v11541_v61, %v11540_v60  ;;  %v11543_v19 = vpop.f32.mrb[78].mxu1  ;;  %v13292_v61 = vld [vmem:[#allocation7 + $0x28] sm:$0xff]  }
 0x3a3   : > { %v11544_v51 = vpop.f32.mrb[79].mxu1  ;;  %v13294_v19 = vld [vmem:[#allocation7 + $0x70] sm:$0xff]  }
 0x3a4   : > { %v2721_v63 = vadd.f32 %v11542_v9, %v15056_v28  ;;  %v13293_v9 = vld [vmem:[#allocation7 + $0xa8] sm:$0xff]   ;;  %v13295_v51 = vld [vmem:[#allocation7 + $0xf0] sm:$0xff]  }
 0x3a6   : > { %v15078_v34 = vadd.f32 %v11606_v55, %v2721_v63  ;;  %v13297_v63 = vld [vmem:[#allocation7 + $0xb0] sm:$0xff]  }
 0x3a8   : > { %v12700_v2 = vpop.f32.mrb[80].mxu1 }
 0x3a9   : > { %v2857_v4 = vadd.f32 %v12700_v2, %v15062_v57  ;;  %v2849_v6 = vpop.f32.mrb[81].mxu1  ;;  %v13300_v2 = vld [vmem:[#allocation7 + $0x38] sm:$0xff]  }
 0x3aa   : > { %v2850_v3 = vadd.f32 %v2849_v6, %v15059_v44  ;;  %v12701_v17 = vpop.f32.mrb[82].mxu1  ;;  %v752_v6 = vlaneseq }
 0x3ab   : > { %v2905_v56 = vmax.f32 %v2857_v4, 0.0  ;;  %v2852_v8 = vpop.f32.mrb[83].mxu1  ;;  %v13301_v4 = vld [vmem:[#allocation7 + $0xb8] sm:$0xff]  }
 0x3ac   : > { %v2904_v10 = vmax.f32 %v2850_v3, 0.0  ;;  %v753_v3 = vshrl.u32 %v752_v6, 7  ;;  %v750_v17 = vld [vmem:[%s17459_s14] ss:$8 sm:$0xf] }
 0x3ae   : > { %v2912_v11 = vpack.c.bf16 %v2905_v56, %v2904_v10  ;;  %v15096_v56 = vsub.s32 1, %v753_v3  ;;  %v15098_v8 = vsub.s32 3, %v753_v3  ;;  %v15100_v10 = vsub.s32 0, %v753_v3 }
 0x3b0   : > { %v12704_v18 = vpop.f32.mrb[84].mxu1  ;;  %3164 = vmatmul.mubr.bf16.vlgmr.msra.gmra.mrb[0].mxu0 %v2912_v11  ;;  %3237 = vmatmul.mubr.bf16.vlgmr.msra.gmra.mrb[0].mxu1 %v2912_v11  ;;  %v10745_v11 = vld [vmem:[%s17459_s14 + $0x3] ss:$8 sm:$0xf] }
 0x3b1   : > { %v2871_v28 = vadd.f32 %v12704_v18, %v2782_v0  ;;  %v2863_v27 = vpop.f32.mrb[85].mxu1  ;;  %3173 = vmatprep.mubr.bf16.mxu0 %v14921_v16  ;;  %3246 = vmatprep.mubr.bf16.mxu1 %v14921_v16  ;;  %v2966_v18 = vrot.slane %v10745_v11, %v15098_v8 }
 0x3b2   : > { %v2864_v44 = vadd.f32 %v2863_v27, %v15065_v7  ;;  %v12705_v57 = vpop.f32.mrb[86].mxu1  ;;  %11627 = vmatpush3.bf16.msra.mxu0 %v13272_v50  ;;  %11667 = vmatpush3.bf16.msra.mxu1 %v13273_v14  ;;  %v13282_v7 = vld [vmem:[#allocation7 + $0x58] sm:$0xff]   ;;  %v15105_v50 = vsub.s32 2, %v753_v3  ;;  %v759_v14 = vrot.slane %v750_v17, %v15096_v56  ;;  %v2954_v27 = vrot.slane %v10745_v11, %v15100_v10 }
 0x3b3   : > { %v2907_v21 = vmax.f32 %v2871_v28, 0.0  ;;  %v2866_v22 = vpop.f32.mrb[87].mxu1  ;;  %11628 = vmatprep.subr.bf16.mxu0 %v13274_v15  ;;  %11668 = vmatprep.subr.bf16.mxu1 %v13275_v12  ;;  %v2958_v15 = vrot.slane %v10745_v11, %v15096_v56  ;;  %v767_v12 = vrot.slane %v750_v17, %v15098_v8  ;;  %v755_v28 = vrot.slane %v750_v17, %v15100_v10 }
 0x3b4   : > { %v2906_v58 = vmax.f32 %v2864_v44, 0.0  ;;  %v763_v44 = vrot.slane %v750_v17, %v15105_v50  ;;  %v2962_v57 = vrot.slane %v10745_v11, %v15105_v50 }
 0x3b6   : > { %v2913_v0 = vpack.c.bf16 %v2907_v21, %v2906_v58  ;;  %11629 = vmatpush3.bf16.msra.mxu0 %v13276_v59  ;;  %11669 = vmatpush3.bf16.msra.mxu1 %v13277_v20  ;;  %v15115_v59 = vadd.f32 %v2958_v15, %v759_v14  ;;  %v15117_v20 = vadd.f32 %v2966_v18, %v767_v12 }
 0x3b7   : > { %11630 = vmatprep.subr.bf16.mxu0 %v13278_v23  ;;  %11670 = vmatprep.subr.bf16.mxu1 %v13279_v24  ;;  %v15119_v21 = vadd.f32 %v2954_v27, %v755_v28  ;;  %v15121_v22 = vadd.f32 %v2962_v57, %v763_v44 }
 0x3b8   : > { %v12708_v29 = vpop.f32.mrb[88].mxu1  ;;  %3174 = vmatmul.mubr.bf16.gmra.mrb[4].mxu0 %v2913_v0  ;;  %3247 = vmatmul.mubr.bf16.gmra.mrb[4].mxu1 %v2913_v0 }
 0x3b9   : > { %v2885_v40 = vadd.f32 %v12708_v29, %v15072_v45  ;;  %v2877_v31 = vpop.f32.mrb[89].mxu1  ;;  %3183 = vmatprep.mubr.bf16.mxu0 %v14921_v16  ;;  %3256 = vmatprep.mubr.bf16.mxu1 %v14921_v16 }
 0x3ba   : > { %v2878_v32 = vadd.f32 %v2877_v31, %v15069_v30  ;;  %v12709_v35 = vpop.f32.mrb[90].mxu1  ;;  %11631 = vmatpush3.bf16.msra.mxu0 %v13280_v25  ;;  %11671 = vmatpush3.bf16.msra.mxu1 %v13281_v13  ;;  %v13290_v30 = vld [vmem:[#allocation7 + $0x68] sm:$0xff]  }
 0x3bb   : > { %v2909_v38 = vmax.f32 %v2885_v40, 0.0  ;;  %v2880_v41 = vpop.f32.mrb[91].mxu1  ;;  %11632 = vmatprep.subr.bf16.mxu0 %v13282_v7  ;;  %11672 = vmatprep.subr.bf16.mxu1 %v13283_v26 }
 0x3bc   : > { %v2908_v52 = vmax.f32 %v2878_v32, 0.0 }
 0x3be   : > { %v2914_v45 = vpack.c.bf16 %v2909_v38, %v2908_v52  ;;  %11633 = vmatpush3.bf16.msra.mxu0 %v13284_v36  ;;  %11673 = vmatpush3.bf16.msra.mxu1 %v13285_v37 }
 0x3bf   : > { %11634 = vmatprep.subr.bf16.mxu0 %v13286_v42  ;;  %11674 = vmatprep.subr.bf16.mxu1 %v13287_v43 }
 0x3c0   : > { %v12712_v48 = vpop.f32.mrb[92].mxu1  ;;  %3184 = vmatmul.mubr.bf16.gmra.mrb[8].mxu0 %v2914_v45  ;;  %3257 = vmatmul.mubr.bf16.gmra.mrb[8].mxu1 %v2914_v45 }
 0x3c1   : > { %v2899_v49 = vadd.f32 %v12712_v48, %v15078_v34  ;;  %v2891_v53 = vpop.f32.mrb[93].mxu1  ;;  %3193 = vmatprep.mubr.bf16.mxu0 %v14921_v16  ;;  %3266 = vmatprep.mubr.bf16.mxu1 %v14921_v16  ;;  %v13296_v16 = vld [vmem:[#allocation7 + $0x30] sm:$0xff]   ;;  %v13299_v34 = vld [vmem:[#allocation7 + $0xf8] sm:$0xff]  }
 0x3c2   : > { %v2892_v54 = vadd.f32 %v2891_v53, %v15075_v1  ;;  %v12713_v39 = vpop.f32.mrb[94].mxu1  ;;  %11635 = vmatpush3.bf16.msra.mxu0 %v13288_v62  ;;  %11675 = vmatpush3.bf16.msra.mxu1 %v13289_v46  ;;  %v13298_v1 = vld [vmem:[#allocation7 + $0x78] sm:$0xff]  }
 0x3c3   : > { %v2911_v55 = vmax.f32 %v2899_v49, 0.0  ;;  %v2894_v33 = vpop.f32.mrb[95].mxu1  ;;  %11636 = vmatprep.subr.bf16.mxu0 %v13290_v30  ;;  %11676 = vmatprep.subr.bf16.mxu1 %v13291_v47 }
 0x3c4   : > { %v2910_v5 = vmax.f32 %v2892_v54, 0.0 }
 0x3c6   : > { %v2915_v60 = vpack.c.bf16 %v2911_v55, %v2910_v5  ;;  %11637 = vmatpush3.bf16.msra.mxu0 %v13292_v61  ;;  %11677 = vmatpush3.bf16.msra.mxu1 %v13293_v9 }
 0x3c7   : > { %11638 = vmatprep.subr.bf16.mxu0 %v13294_v19  ;;  %11678 = vmatprep.subr.bf16.mxu1 %v13295_v51 }
 0x3c8   : > { %3194 = vmatmul.mubr.bf16.gmra.mrb[12].mxu0 %v2915_v60  ;;  %3267 = vmatmul.mubr.bf16.gmra.mrb[12].mxu1 %v2915_v60 }
 0x3ca   : > { %11639 = vmatpush3.bf16.msra.mxu0 %v13296_v16  ;;  %11679 = vmatpush3.bf16.msra.mxu1 %v13297_v63 }
 0x3cb   : > { %11640 = vmatprep.subr.bf16.mxu0 %v13298_v1  ;;  %11680 = vmatprep.subr.bf16.mxu1 %v13299_v34 }
 0x3ce   : > { %11641 = vmatpush3.bf16.msra.mxu0 %v13300_v2  ;;  %11681 = vmatpush3.bf16.msra.mxu1 %v13301_v4 }
 0x483   : > { %v3165_v23 = vpop.f32.mrb[0].mxu0  ;;  %v3238_v24 = vpop.f32.mrb[0].mxu1 }
 0x484   : > { %v3167_v58 = vpop.f32.mrb[1].mxu0  ;;  %v3240_v0 = vpop.f32.mrb[1].mxu1  ;;  %v15130_v29 = vadd.f32 %v15119_v21, %v3165_v23  ;;  %v15133_v40 = vadd.f32 %v15121_v22, %v3238_v24 }
 0x485   : > { %v15124_v25 = vadd.f32 %v15115_v59, %v3167_v58  ;;  %v15127_v13 = vadd.f32 %v15117_v20, %v3240_v0  ;;  %v3169_v7 = vpop.f32.mrb[2].mxu0  ;;  %v3242_v26 = vpop.f32.mrb[2].mxu1 }
 0x486   : > { %v15136_v31 = vadd.f32 %v15119_v21, %v3169_v7  ;;  %v15139_v32 = vadd.f32 %v15121_v22, %v3242_v26  ;;  %v3171_v35 = vpop.f32.mrb[3].mxu0  ;;  %v3244_v36 = vpop.f32.mrb[3].mxu1  ;;  %v17503_v46 = vmax.f32 %v15130_v29, 0.0  ;;  %v17500_v30 = vmax.f32 %v15133_v40, 0.0 }
 0x487   : > { %v15142_v37 = vadd.f32 %v15115_v59, %v3171_v35  ;;  %v15145_v38 = vadd.f32 %v15117_v20, %v3244_v36  ;;  %v17502_v43 = vmax.f32 %v15124_v25, 0.0  ;;  %v17501_v52 = vmax.f32 %v15127_v13, 0.0 }
 0x488   : > { %v17499_v41 = vmax.f32 %v15136_v31, 0.0  ;;  %v17498_v42 = vmax.f32 %v15139_v32, 0.0 }
 0x489   : > { %v17497_v45 = vmax.f32 %v15142_v37, 0.0  ;;  %v17496_v62 = vmax.f32 %v15145_v38, 0.0 }
 0x48a   : > { %v3341_v54 = vpack.c.bf16 %v17499_v41, %v17503_v46  ;;  %v3343_v39 = vpack.c.bf16 %v17498_v42, %v17500_v30 }
 0x48b   : > { %v3175_v47 = vpop.f32.mrb[4].mxu0  ;;  %v3248_v48 = vpop.f32.mrb[4].mxu1  ;;  %v3342_v49 = vpack.c.bf16 %v17497_v45, %v17502_v43  ;;  %v3344_v53 = vpack.c.bf16 %v17496_v62, %v17501_v52 }
 0x48c   : > { %v3177_v55 = vpop.f32.mrb[5].mxu0  ;;  %v3250_v33 = vpop.f32.mrb[5].mxu1  ;;  %v15172_v5 = vadd.f32 %v15119_v21, %v3175_v47  ;;  %v15181_v51 = vadd.f32 %v15121_v22, %v3248_v48 }
 0x48d   : > { %v15175_v60 = vadd.f32 %v15115_v59, %v3177_v55  ;;  %v15178_v61 = vadd.f32 %v15117_v20, %v3250_v33  ;;  %v3179_v9 = vpop.f32.mrb[6].mxu0  ;;  %v3252_v19 = vpop.f32.mrb[6].mxu1  ;;  %3646 = vmatprep.mubr.bf16.mxu0 %v3342_v49  ;;  %3711 = vmatprep.mubr.bf16.mxu1 %v3344_v53 }
 0x48e   : > { %v15184_v16 = vadd.f32 %v15119_v21, %v3179_v9  ;;  %v15187_v63 = vadd.f32 %v15121_v22, %v3252_v19  ;;  %v3181_v1 = vpop.f32.mrb[7].mxu0  ;;  %v3254_v34 = vpop.f32.mrb[7].mxu1  ;;  %3647 = vmatmul.mubr.bf16.vlgmr.msra.gmra.mrb[96].mxu0 %v3341_v54  ;;  %3712 = vmatmul.mubr.bf16.vlgmr.msra.gmra.mrb[96].mxu1 %v3343_v39  ;;  %v17495_v12 = vmax.f32 %v15172_v5, 0.0  ;;  %v17492_v18 = vmax.f32 %v15181_v51, 0.0 }
 0x48f   : > { %v15190_v2 = vadd.f32 %v15115_v59, %v3181_v1  ;;  %v15193_v4 = vadd.f32 %v15117_v20, %v3254_v34  ;;  %v17494_v17 = vmax.f32 %v15175_v60, 0.0  ;;  %v17493_v11 = vmax.f32 %v15178_v61, 0.0 }
 0x490   : > { %v17491_v6 = vmax.f32 %v15184_v16, 0.0  ;;  %v17490_v3 = vmax.f32 %v15187_v63, 0.0 }
 0x491   : > { %v17489_v14 = vmax.f32 %v15190_v2, 0.0  ;;  %v17472_v15 = vmax.f32 %v15193_v4, 0.0 }
 0x492   : > { %v3345_v58 = vpack.c.bf16 %v17491_v6, %v17495_v12  ;;  %v3347_v0 = vpack.c.bf16 %v17490_v3, %v17492_v18 }
 0x493   : > { %v3185_v28 = vpop.f32.mrb[8].mxu0  ;;  %v3258_v27 = vpop.f32.mrb[8].mxu1  ;;  %v3346_v44 = vpack.c.bf16 %v17489_v14, %v17494_v17  ;;  %v3348_v57 = vpack.c.bf16 %v17472_v15, %v17493_v11 }
 0x494   : > { %v3187_v23 = vpop.f32.mrb[9].mxu0  ;;  %v3260_v24 = vpop.f32.mrb[9].mxu1  ;;  %v15220_v7 = vadd.f32 %v15119_v21, %v3185_v28  ;;  %v15229_v48 = vadd.f32 %v15121_v22, %v3258_v27 }
 0x495   : > { %v15223_v26 = vadd.f32 %v15115_v59, %v3187_v23  ;;  %v15226_v35 = vadd.f32 %v15117_v20, %v3260_v24  ;;  %v3189_v36 = vpop.f32.mrb[10].mxu0  ;;  %v3262_v47 = vpop.f32.mrb[10].mxu1  ;;  %3654 = vmatprep.mubr.bf16.mxu0 %v3346_v44  ;;  %3719 = vmatprep.mubr.bf16.mxu1 %v3348_v57 }
 0x496   : > { %17640 = vst [vmem:[#allocation23_spill] sm:$0xff] %v15229_v48  ;;  %v15232_v49 = vadd.f32 %v15119_v21, %v3189_v36  ;;  %v15235_v53 = vadd.f32 %v15121_v22, %v3262_v47  ;;  %v3191_v54 = vpop.f32.mrb[11].mxu0  ;;  %v3264_v39 = vpop.f32.mrb[11].mxu1  ;;  %3655 = vmatmul.mubr.bf16.gmra.mrb[100].mxu0 %v3345_v58  ;;  %3720 = vmatmul.mubr.bf16.gmra.mrb[100].mxu1 %v3347_v0  ;;  %v17478_v44 = vmax.f32 %v15220_v7, 0.0  ;;  %v17480_v57 = vmax.f32 %v15229_v48, 0.0 }
 0x497   : > { %v15238_v55 = vadd.f32 %v15115_v59, %v3191_v54  ;;  %v15241_v33 = vadd.f32 %v15117_v20, %v3264_v39  ;;  %v17476_v1 = vmax.f32 %v15223_v26, 0.0  ;;  %v17475_v34 = vmax.f32 %v15226_v35, 0.0 }
 0x498   : > { %17641 = vst [vmem:[#allocation24_spill] sm:$0xff] %v15232_v49  ;;  %17642 = vst [vmem:[#allocation25_spill] sm:$0xff] %v15235_v53  ;;  %v17477_v9 = vmax.f32 %v15232_v49, 0.0  ;;  %v17479_v19 = vmax.f32 %v15235_v53, 0.0 }
 0x499   : > { %17643 = vst [vmem:[#allocation26_spill] sm:$0xff] %v15238_v55  ;;  %17644 = vst [vmem:[#allocation27_spill] sm:$0xff] %v15241_v33  ;;  %v17473_v28 = vmax.f32 %v15238_v55, 0.0  ;;  %v17474_v27 = vmax.f32 %v15241_v33, 0.0 }
 0x49a   : > { %v3349_v54 = vpack.c.bf16 %v17477_v9, %v17478_v44  ;;  %v3351_v39 = vpack.c.bf16 %v17479_v19, %v17480_v57 }
 0x49b   : > { %v3195_v23 = vpop.f32.mrb[12].mxu0  ;;  %v3268_v24 = vpop.f32.mrb[12].mxu1  ;;  %v3350_v58 = vpack.c.bf16 %v17473_v28, %v17476_v1  ;;  %v3352_v0 = vpack.c.bf16 %v17474_v27, %v17475_v34 }
 0x49c   : > { %v3197_v36 = vpop.f32.mrb[13].mxu0  ;;  %v3270_v47 = vpop.f32.mrb[13].mxu1  ;;  %v15268_v15 = vadd.f32 %v15119_v21, %v3195_v23  ;;  %v15277_v9 = vadd.f32 %v15121_v22, %v3268_v24 }
 0x49d   : > { %v15271_v28 = vadd.f32 %v15115_v59, %v3197_v36  ;;  %v15274_v27 = vadd.f32 %v15117_v20, %v3270_v47  ;;  %v3199_v34 = vpop.f32.mrb[14].mxu0  ;;  %v3272_v1 = vpop.f32.mrb[14].mxu1  ;;  %3662 = vmatprep.mubr.bf16.mxu0 %v3350_v58  ;;  %3727 = vmatprep.mubr.bf16.mxu1 %v3352_v0 }
 0x49e   : > { %17645 = vst [vmem:[#allocation28_spill] sm:$0xff] %v15268_v15  ;;  %17648 = vst [vmem:[#allocation31_spill] sm:$0xff] %v15277_v9  ;;  %v15280_v44 = vadd.f32 %v15119_v21, %v3199_v34  ;;  %v15283_v19 = vadd.f32 %v15121_v22, %v3272_v1  ;;  %v3201_v23 = vpop.f32.mrb[15].mxu0  ;;  %v3274_v57 = vpop.f32.mrb[15].mxu1  ;;  %3663 = vmatmul.mubr.bf16.gmra.mrb[104].mxu0 %v3349_v54  ;;  %3728 = vmatmul.mubr.bf16.gmra.mrb[104].mxu1 %v3351_v39  ;;  %v17486_v0 = vmax.f32 %v15268_v15, 0.0 }
 0x49f   : > { %17646 = vst [vmem:[#allocation29_spill] sm:$0xff] %v15271_v28  ;;  %17647 = vst [vmem:[#allocation30_spill] sm:$0xff] %v15274_v27  ;;  %v15286_v36 = vadd.f32 %v15115_v59, %v3201_v23  ;;  %v15289_v47 = vadd.f32 %v15117_v20, %v3274_v57  ;;  %v17488_v21 = vmax.f32 %v15271_v28, 0.0  ;;  %v17487_v34 = vmax.f32 %v15274_v27, 0.0  ;;  %v13302_v23 = vld [vmem:[%s17451_s6 + $0xc0] sm:$0xff]  }
 0x4a0   : > { %17649 = vst [vmem:[#allocation32_spill] sm:$0xff] %v15280_v44  ;;  %17650 = vst [vmem:[#allocation33_spill] sm:$0xff] %v15283_v19  ;;  %v17485_v58 = vmax.f32 %v15280_v44, 0.0  ;;  %v17484_v24 = vmax.f32 %v15283_v19, 0.0  ;;  %v17483_v59 = vmax.f32 %v15277_v9, 0.0  ;;  %11770 = vmatprep.subr.bf16.mxu1 %v13302_v23  ;;  %v13310_v23 = vld [vmem:[%s17451_s6 + $0xd0] sm:$0xff]  }
 0x4a1   : > { %17651 = vst [vmem:[#allocation34_spill] sm:$0xff] %v15286_v36  ;;  %17652 = vst [vmem:[#allocation35_spill] sm:$0xff] %v15289_v47  ;;  %v17482_v22 = vmax.f32 %v15286_v36, 0.0  ;;  %v17481_v1 = vmax.f32 %v15289_v47, 0.0 }
 0x4a2   : > { %v3353_v54 = vpack.c.bf16 %v17485_v58, %v17486_v0  ;;  %v3355_v39 = vpack.c.bf16 %v17484_v24, %v17483_v59 }
 0x4a3   : > { %v3354_v20 = vpack.c.bf16 %v17482_v22, %v17488_v21  ;;  %v3356_v57 = vpack.c.bf16 %v17481_v1, %v17487_v34  ;;  %v13303_v1 = vld [vmem:[%s17451_s6 + $0x80] sm:$0xff]  }
 0x4a4   : > { %11771 = vmatpush3.bf16.msra.mxu1 %v13303_v1  ;;  %v13304_v22 = vld [vmem:[%s17451_s6 + $0x40] sm:$0xff]   ;;  %v13308_v1 = vld [vmem:[%s17451_s6 + $0x48] sm:$0xff]  }
 0x4a5   : > { %3670 = vmatprep.mubr.bf16.mxu0 %v3354_v20  ;;  %3735 = vmatprep.mubr.bf16.mxu1 %v3356_v57  ;;  %v13305_v20 = vld [vmem:[%s17451_s6] sm:$0xff]   ;;  %v13306_v57 = vld [vmem:[%s17451_s6 + $0xc8] sm:$0xff]  }
 0x4a6   : > { %3671 = vmatmul.mubr.bf16.gmra.mrb[108].mxu0 %v3353_v54  ;;  %3736 = vmatmul.mubr.bf16.gmra.mrb[108].mxu1 %v3355_v39  ;;  %v13307_v54 = vld [vmem:[%s17451_s6 + $0x88] sm:$0xff]  }
 0x4a7   : > { %11706 = vmatprep.subr.bf16.mxu0 %v13304_v22  ;;  %11772 = vmatprep.subr.bf16.mxu1 %v13306_v57  ;;  %v13309_v39 = vld [vmem:[%s17451_s6 + $0x8] sm:$0xff]   ;;  %v13311_v22 = vld [vmem:[%s17451_s6 + $0x90] sm:$0xff]  }
 0x4a8   : > { %11707 = vmatpush3.bf16.msra.mxu0 %v13305_v20  ;;  %11773 = vmatpush3.bf16.msra.mxu1 %v13307_v54  ;;  %v13312_v20 = vld [vmem:[%s17451_s6 + $0x50] sm:$0xff]   ;;  %v13314_v54 = vld [vmem:[%s17451_s6 + $0xd8] sm:$0xff]  }
 0x4a9   : > { %11708 = vmatprep.subr.bf16.mxu0 %v13308_v1  ;;  %11774 = vmatprep.subr.bf16.mxu1 %v13310_v23  ;;  %v13313_v57 = vld [vmem:[%s17451_s6 + $0x10] sm:$0xff]   ;;  %v13315_v1 = vld [vmem:[%s17451_s6 + $0x98] sm:$0xff]  }
 0x4aa   : > { %v13317_v23 = vld [vmem:[%s17451_s6 + $0x18] sm:$0xff]  }
 0x4ac   : > { %11709 = vmatpush3.bf16.msra.mxu0 %v13309_v39  ;;  %11775 = vmatpush3.bf16.msra.mxu1 %v13311_v22  ;;  %v13316_v39 = vld [vmem:[%s17451_s6 + $0x58] sm:$0xff]   ;;  %v13318_v22 = vld [vmem:[%s17451_s6 + $0xe0] sm:$0xff]  }
 0x4ad   : > { %11710 = vmatprep.subr.bf16.mxu0 %v13312_v20  ;;  %11776 = vmatprep.subr.bf16.mxu1 %v13314_v54  ;;  %v13319_v20 = vld [vmem:[%s17451_s6 + $0xa0] sm:$0xff]  }
 0x4ae   : > { %v13321_v54 = vld [vmem:[%s17451_s6 + $0x20] sm:$0xff]  }
 0x4b0   : > { %11711 = vmatpush3.bf16.msra.mxu0 %v13313_v57  ;;  %11777 = vmatpush3.bf16.msra.mxu1 %v13315_v1  ;;  %v13320_v57 = vld [vmem:[%s17451_s6 + $0x60] sm:$0xff]   ;;  %v13322_v1 = vld [vmem:[%s17451_s6 + $0xe8] sm:$0xff]  }
 0x4b1   : > { %11712 = vmatprep.subr.bf16.mxu0 %v13316_v39  ;;  %11778 = vmatprep.subr.bf16.mxu1 %v13318_v22  ;;  %v13323_v39 = vld [vmem:[%s17451_s6 + $0xa8] sm:$0xff]  }
 0x4b2   : > { %v13325_v22 = vld [vmem:[%s17451_s6 + $0x28] sm:$0xff]  }
 0x4b4   : > { %11713 = vmatpush3.bf16.msra.mxu0 %v13317_v23  ;;  %11779 = vmatpush3.bf16.msra.mxu1 %v13319_v20  ;;  %v13324_v23 = vld [vmem:[%s17451_s6 + $0x68] sm:$0xff]   ;;  %v13326_v20 = vld [vmem:[%s17451_s6 + $0xf0] sm:$0xff]  }
 0x4b5   : > { %11714 = vmatprep.subr.bf16.mxu0 %v13320_v57  ;;  %11780 = vmatprep.subr.bf16.mxu1 %v13322_v1  ;;  %v13327_v57 = vld [vmem:[%s17451_s6 + $0xb0] sm:$0xff]  }
 0x4b6   : > { %v13329_v1 = vld [vmem:[%s17451_s6 + $0x30] sm:$0xff]  }
 0x4b8   : > { %11715 = vmatpush3.bf16.msra.mxu0 %v13321_v54  ;;  %11781 = vmatpush3.bf16.msra.mxu1 %v13323_v39  ;;  %v13328_v54 = vld [vmem:[%s17451_s6 + $0x70] sm:$0xff]   ;;  %v13330_v39 = vld [vmem:[%s17451_s6 + $0xf8] sm:$0xff]  }
 0x4b9   : > { %11716 = vmatprep.subr.bf16.mxu0 %v13324_v23  ;;  %11782 = vmatprep.subr.bf16.mxu1 %v13326_v20  ;;  %v13331_v23 = vld [vmem:[%s17451_s6 + $0xb8] sm:$0xff]  }
 0x4ba   : > { %v13333_v20 = vld [vmem:[%s17451_s6 + $0x38] sm:$0xff]  }
 0x4bc   : > { %11717 = vmatpush3.bf16.msra.mxu0 %v13325_v22  ;;  %11783 = vmatpush3.bf16.msra.mxu1 %v13327_v57  ;;  %v13332_v22 = vld [vmem:[%s17451_s6 + $0x78] sm:$0xff]   ;;  %v13334_v57 = vld [vmem:[%s17451_s6 + $0x140] sm:$0xff]  }
 0x4bd   : > { %11718 = vmatprep.subr.bf16.mxu0 %v13328_v54  ;;  %11784 = vmatprep.subr.bf16.mxu1 %v13330_v39  ;;  %v13342_v54 = vld [vmem:[%s17451_s6 + $0x1c0] sm:$0xff]  }
 0x4c0   : > { %11719 = vmatpush3.bf16.msra.mxu0 %v13329_v1  ;;  %11785 = vmatpush3.bf16.msra.mxu1 %v13331_v23  ;;  %v15420_v23 = vld [vmem:[%s17459_s14 + $0x4] ss:$0 sm:$0xff] }
 0x4c1   : > { %11720 = vmatprep.subr.bf16.mxu0 %v13332_v22  ;;  %11898 = vmatprep.subr.bf16.mxu1 %v13342_v54 }
 0x4c4   : > { %11721 = vmatpush3.bf16.msra.mxu0 %v13333_v20 }
 0x4c5   : > { %11834 = vmatprep.subr.bf16.mxu0 %v13334_v57 }
 0x561   : > { %v11642_v1 = vpop.f32.mrb[96].mxu0  ;;  %v11682_v39 = vpop.f32.mrb[96].mxu1 }
 0x562   : > { %v11643_v59 = vpop.f32.mrb[97].mxu0  ;;  %v11683_v22 = vpop.f32.mrb[97].mxu1 }
 0x563   : > { %v11644_v20 = vadd.f32 %v11643_v59, %v11642_v1  ;;  %v11684_v24 = vadd.f32 %v11683_v22, %v11682_v39  ;;  %v11645_v58 = vpop.f32.mrb[98].mxu0  ;;  %v11685_v0 = vpop.f32.mrb[98].mxu1 }
 0x564   : > { %v11646_v34 = vpop.f32.mrb[99].mxu0  ;;  %v11686_v57 = vpop.f32.mrb[99].mxu1 }
 0x565   : > { %v3649_v21 = vadd.f32 %v11644_v20, %v15420_v23  ;;  %v11647_v14 = vadd.f32 %v11646_v34, %v11645_v58  ;;  %v11687_v3 = vadd.f32 %v11686_v57, %v11685_v0 }
 0x567   : > { %v3714_v54 = vadd.f32 %v11684_v24, %v3649_v21  ;;  %v3652_v6 = vadd.f32 %v11647_v14, %v15420_v23 }
 0x569   : > { %v3744_v18 = vmax.f32 %v3714_v54, 0.0  ;;  %v3717_v11 = vadd.f32 %v11687_v3, %v3652_v6  ;;  %v11648_v17 = vpop.f32.mrb[100].mxu0  ;;  %v11688_v12 = vpop.f32.mrb[100].mxu1 }
 0x56a   : > { %v11649_v62 = vpop.f32.mrb[101].mxu0  ;;  %v11689_v45 = vpop.f32.mrb[101].mxu1 }
 0x56b   : > { %v11258_v42 = vpack.c.bf16 %v3744_v18, %v3744_v18  ;;  %v3745_v59 = vmax.f32 %v3717_v11, 0.0  ;;  %v11650_v1 = vadd.f32 %v11649_v62, %v11648_v17  ;;  %v11690_v39 = vadd.f32 %v11689_v45, %v11688_v12  ;;  %v11651_v22 = vpop.f32.mrb[102].mxu0  ;;  %v11691_v41 = vpop.f32.mrb[102].mxu1 }
 0x56c   : > { %v11652_v30 = vpop.f32.mrb[103].mxu0  ;;  %v11692_v52 = vpop.f32.mrb[103].mxu1 }
 0x56d   : > { %v3776_v20 = vrot.slane %v11258_v42, 7  ;;  %v11259_v58 = vpack.c.bf16 %v3745_v59, %v3745_v59  ;;  %v3657_v24 = vadd.f32 %v11650_v1, %v15420_v23  ;;  %v11653_v21 = vadd.f32 %v11652_v30, %v11651_v22 }
 0x56e   : > { %v11693_v14 = vadd.f32 %v11692_v52, %v11691_v41  ;;  %v15426_v52 = vld [vmem:[#allocation2] sm:$0xff] }
 0x56f   : > { %3792 = vst [vmem:[#allocation2 + $0x8] sm:$0x1e] %v3776_v20  ;;  %v3777_v6 = vrot.slane %v11259_v58, 7  ;;  %v3722_v3 = vadd.f32 %v11690_v39, %v3657_v24  ;;  %v3660_v34 = vadd.f32 %v11653_v21, %v15420_v23  ;;  %v3814_v39 = vshll.u32 %v15426_v52, 16 }
 0x571   : > { %3793 = vst [vmem:[#allocation2 + $0x10] sm:$0x1e] %v3777_v6  ;;  %v3746_v18 = vmax.f32 %v3722_v3, 0.0  ;;  %v3725_v11 = vadd.f32 %v11693_v14, %v3660_v34  ;;  %v11654_v62 = vpop.f32.mrb[104].mxu0  ;;  %v11694_v45 = vpop.f32.mrb[104].mxu1  ;;  %v15431_v6 = vrot.slane %v15426_v52, 1 }
 0x572   : > { %v11655_v17 = vpop.f32.mrb[105].mxu0  ;;  %v11695_v12 = vpop.f32.mrb[105].mxu1 }
 0x573   : > { %v11260_v0 = vpack.c.bf16 %v3746_v18, %v3746_v18  ;;  %v3747_v57 = vmax.f32 %v3725_v11, 0.0  ;;  %v11656_v42 = vadd.f32 %v11655_v17, %v11654_v62  ;;  %v11696_v54 = vadd.f32 %v11695_v12, %v11694_v45  ;;  %v11657_v59 = vpop.f32.mrb[106].mxu0  ;;  %v11697_v1 = vpop.f32.mrb[106].mxu1 }
 0x574   : > { %v11658_v30 = vpop.f32.mrb[107].mxu0  ;;  %v11698_v41 = vpop.f32.mrb[107].mxu1  ;;  %v15437_v12 = vrot.slane %v3814_v39, 1 }
 0x575   : > { %v3778_v22 = vrot.slane %v11260_v0, 7  ;;  %v11261_v20 = vpack.c.bf16 %v3747_v57, %v3747_v57  ;;  %v3665_v58 = vadd.f32 %v11656_v42, %v15420_v23  ;;  %v11659_v24 = vadd.f32 %v11658_v30, %v11657_v59 }
 0x576   : > { %v11699_v21 = vadd.f32 %v11698_v41, %v11697_v1  ;;  %v3801_v14 = vld [vmem:[#allocation2 + $0x8] sm:$0xff] }
 0x577   : > { %3794 = vst [vmem:[#allocation2 + $0x18] sm:$0x1e] %v3778_v22  ;;  %v3779_v3 = vrot.slane %v11261_v20, 7  ;;  %v3730_v34 = vadd.f32 %v11696_v54, %v3665_v58  ;;  %v3668_v18 = vadd.f32 %v11659_v24, %v15420_v23  ;;  %v3819_v11 = vshll.u32 %v3801_v14, 16 }
 0x578   : > { %v15434_v62 = vld [vmem:[#allocation2 + $0x10] sm:$0xff]  ;;  %v3891_v45 = vrot.slane %v3801_v14, 1  ;;  %v3823_v22 = vshrl.u32 %v3801_v14, 16  ;;  %v17653_v14 = vshrl.u32 %v15426_v52, 16 }
 0x579   : > { %3795 = vst [vmem:[#allocation2 + $0x20] sm:$0x1e] %v3779_v3  ;;  %v3748_v0 = vmax.f32 %v3730_v34, 0.0  ;;  %v3733_v57 = vadd.f32 %v11699_v21, %v3668_v18  ;;  %v11660_v42 = vpop.f32.mrb[108].mxu0  ;;  %v11700_v59 = vpop.f32.mrb[108].mxu1  ;;  %v3821_v1 = vrot.slane %v3819_v11, 1 }
 0x57a   : > { %v3827_v30 = vshll.u32 %v15434_v62, 16  ;;  %v11661_v41 = vpop.f32.mrb[109].mxu0  ;;  %v11701_v54 = vpop.f32.mrb[109].mxu1  ;;  %v3892_v20 = vsel %vm1620_vm0, %v15431_v6, %v3891_v45  ;;  %v3893_v58 = vrot.slane %v15434_v62, 1  ;;  %v15449_v36 = vor.u32 %v15437_v12, %v17653_v14 }
 0x57b   : > { %v11262_v24 = vpack.c.bf16 %v3748_v0, %v3748_v0  ;;  %v3749_v43 = vmax.f32 %v3733_v57, 0.0  ;;  %v11662_v39 = vadd.f32 %v11661_v41, %v11660_v42  ;;  %v11702_v46 = vadd.f32 %v11701_v54, %v11700_v59  ;;  %v11663_v3 = vpop.f32.mrb[110].mxu0  ;;  %v11703_v34 = vpop.f32.mrb[110].mxu1 }
 0x57c   : > { %v11664_v21 = vpop.f32.mrb[111].mxu0  ;;  %v11704_v18 = vpop.f32.mrb[111].mxu1  ;;  %v3825_v17 = vor.u32 %v3823_v22, %v3821_v1  ;;  %v3829_v11 = vrot.slane %v3827_v30, 1  ;;  %v15444_v47 = vsel %vm1620_vm0, %v3891_v45, %v3893_v58  ;;  %v3831_v41 = vshrl.u32 %v15434_v62, 16 }
 0x57d   : > { %v3780_v9 = vrot.slane %v11262_v24, 7  ;;  %v11263_v19 = vpack.c.bf16 %v3749_v43, %v3749_v43  ;;  %v3673_v0 = vadd.f32 %v11662_v39, %v15420_v23  ;;  %v11665_v57 = vadd.f32 %v11664_v21, %v11663_v3 }
 0x57e   : > { %v11705_v42 = vadd.f32 %v11704_v18, %v11703_v34  ;;  %v15453_v59 = vsel %vm1540_vm1, %v3825_v17, %v3829_v11  ;;  %v4089_v30 = vshll.u32 %v3892_v20, 16  ;;  %v4087_v14 = vshrl.u32 %v3892_v20, 16  ;;  %v3803_v24 = vld [vmem:[#allocation2 + $0x18] sm:$0xff]  ;;  %v13343_v20 = vld [vmem:[%s17451_s6 + $0x180] sm:$0xff]  }
 0x57f   : > { %3796 = vst [vmem:[#allocation2 + $0x28] sm:$0x1e] %v3780_v9  ;;  %v3781_v45 = vrot.slane %v11263_v19, 7  ;;  %v3738_v54 = vadd.f32 %v11702_v46, %v3673_v0  ;;  %v3676_v22 = vadd.f32 %v11665_v57, %v15420_v23  ;;  %4849 = vmatprep.mubr.bf16.mxu1 %v15453_v59  ;;  %v4094_v39 = vshll.u32 %v15444_v47, 16 }
 0x580   : > { %v4091_v43 = vrot.slane %v4089_v30, 1  ;;  %v3822_v3 = vsel %vm1540_vm1, %v15449_v36, %v3821_v1  ;;  %v4082_v17 = vshll.u32 %v15453_v59, 16  ;;  %v3835_v18 = vshll.u32 %v3803_v24, 16  ;;  %v13346_v1 = vld [vmem:[%s17451_s6 + $0x1c8] sm:$0xff]  }
 0x581   : > { %3797 = vst [vmem:[#allocation2 + $0x30] sm:$0x1e] %v3781_v45  ;;  %v3750_v62 = vmax.f32 %v3738_v54, 0.0  ;;  %v3741_v34 = vadd.f32 %v11705_v42, %v3676_v22  ;;  %v4075_v9 = vshrl.u32 %v3822_v3, 16  ;;  %v4077_v19 = vshll.u32 %v3822_v3, 16 }
 0x582   : > { %v4092_v46 = vor.u32 %v4091_v43, %v4087_v14  ;;  %v4096_v21 = vrot.slane %v4094_v39, 1  ;;  %v4084_v23 = vrot.slane %v4082_v17, 1  ;;  %v3895_v44 = vrot.slane %v3803_v24, 1  ;;  %v15470_v14 = vld [vmem:[#allocation2 + $0x20] sm:$0xff] }
 0x583   : > { %v11264_v0 = vpack.c.bf16 %v3750_v62, %v3750_v62  ;;  %v3751_v57 = vmax.f32 %v3741_v34, 0.0  ;;  %v4079_v30 = vrot.slane %v4077_v19, 1  ;;  %v3833_v45 = vor.u32 %v3831_v41, %v3829_v11  ;;  %v13335_v11 = vld [vmem:[%s17451_s6 + $0x100] sm:$0xff]  }
 0x584   : > { %v4098_v42 = vshrl.u32 %v15453_v59, 16  ;;  %v4097_v54 = vsel %vm1540_vm1, %v4092_v46, %v4096_v21  ;;  %v3837_v22 = vrot.slane %v3835_v18, 1  ;;  %v15473_v62 = vsel %vm1620_vm0, %v3893_v58, %v3895_v44 }
 0x585   : > { %v3782_v43 = vrot.slane %v11264_v0, 7  ;;  %v11265_v39 = vpack.c.bf16 %v3751_v57, %v3751_v57  ;;  %4850 = vmatmul.mubr.bf16.vlgmr.msra.gmra.mrb[112].mxu1 %v4097_v54  ;;  %v4080_v17 = vor.u32 %v4079_v30, %v4075_v9  ;;  %v4106_v41 = vshrl.u32 %v15444_v47, 16  ;;  %v13347_v9 = vld [vmem:[%s17451_s6 + $0x188] sm:$0xff]   ;;  %v13348_v54 = vld [vmem:[%s17451_s6 + $0x1d0] sm:$0xff]  }
 0x586   : > { %v15476_v34 = vsel %vm1540_vm1, %v3833_v45, %v3837_v22  ;;  %v4110_v19 = vshll.u32 %v15473_v62, 16  ;;  %v3839_v46 = vshrl.u32 %v3803_v24, 16  ;;  %11899 = vmatpush3.bf16.msra.mxu1 %v13343_v20  ;;  %v3843_v57 = vshll.u32 %v15470_v14, 16  ;;  %v13336_v47 = vld [vmem:[%s17451_s6 + $0x148] sm:$0xff]  }
 0x587   : > { %3798 = vst [vmem:[#allocation2 + $0x38] sm:$0x1e] %v3782_v43  ;;  %v3783_v58 = vrot.slane %v11265_v39, 7  ;;  %v4085_v18 = vsel %vm1540_vm1, %v4080_v17, %v4084_v23  ;;  %4856 = vmatprep.mubr.bf16.mxu1 %v15476_v34  ;;  %v4102_v0 = vshll.u32 %v15476_v34, 16  ;;  %v15493_v24 = vld [vmem:[#allocation2 + $0x28] sm:$0xff]  ;;  %11900 = vmatprep.subr.bf16.mxu1 %v13346_v1  ;;  %v3897_v45 = vrot.slane %v15470_v14, 1 }
 0x588   : > { %4760 = vmatprep.mubr.bf16.mxu0 %v4085_v18  ;;  %v4112_v20 = vrot.slane %v4110_v19, 1  ;;  %v3841_v30 = vor.u32 %v3839_v46, %v3837_v22  ;;  %v4100_v43 = vor.u32 %v4098_v42, %v4084_v23  ;;  %v4108_v17 = vor.u32 %v4106_v41, %v4096_v21  ;;  %v13337_v1 = vld [vmem:[%s17451_s6 + $0x108] sm:$0xff]   ;;  %v13349_v42 = vld [vmem:[%s17451_s6 + $0x190] sm:$0xff]  }
 0x589   : > { %3799 = vst [vmem:[#allocation2 + $0x40] sm:$0x1e] %v3783_v58  ;;  %4761 = vmatmul.mubr.bf16.vlgmr.msra.gmra.mrb[112].mxu0 %v3822_v3  ;;  %v4104_v39 = vrot.slane %v4102_v0, 1  ;;  %v3845_v15 = vrot.slane %v3843_v57, 1  ;;  %v15503_v19 = vsel %vm1620_vm0, %v3895_v44, %v3897_v45  ;;  %v3847_v22 = vshrl.u32 %v15470_v14, 16  ;;  %v13338_v44 = vld [vmem:[%s17451_s6 + $0x150] sm:$0xff]  }
 0x58a   : > { %11835 = vmatpush3.bf16.msra.mxu0 %v13335_v11  ;;  %v3851_v46 = vshll.u32 %v15493_v24, 16  ;;  %11901 = vmatpush3.bf16.msra.mxu1 %v13347_v9  ;;  %v15511_v3 = vsel %vm1540_vm1, %v4108_v17, %v4112_v20  ;;  %v4114_v23 = vshrl.u32 %v15476_v34, 16  ;;  %v4126_v11 = vshll.u32 %v15503_v19, 16  ;;  %v15526_v18 = vld [vmem:[#allocation2 + $0x30] sm:$0xff]  ;;  %v13352_v0 = vld [vmem:[%s17451_s6 + $0x1d8] sm:$0xff]  }
 0x58b   : > { %v15508_v58 = vsel %vm1540_vm1, %v4100_v43, %v4104_v39  ;;  %v15514_v21 = vsel %vm1540_vm1, %v3841_v30, %v3845_v15  ;;  %11836 = vmatprep.subr.bf16.mxu0 %v13336_v47  ;;  %v3849_v41 = vor.u32 %v3847_v22, %v3845_v15  ;;  %11902 = vmatprep.subr.bf16.mxu1 %v13348_v54  ;;  %v3899_v47 = vrot.slane %v15493_v24, 1  ;;  %v13339_v54 = vld [vmem:[%s17451_s6 + $0x110] sm:$0xff]  }
 0x58c   : > { %4767 = vmatprep.mubr.bf16.mxu0 %v15508_v58  ;;  %v4118_v14 = vshll.u32 %v15514_v21, 16  ;;  %v3853_v9 = vrot.slane %v3851_v46, 1  ;;  %v4116_v57 = vor.u32 %v4114_v23, %v4104_v39  ;;  %v4122_v43 = vshrl.u32 %v15473_v62, 16  ;;  %v13340_v39 = vld [vmem:[%s17451_s6 + $0x158] sm:$0xff]  }
 0x58d   : > { %4857 = vmatmul.mubr.bf16.gmra.mrb[116].mxu1 %v15511_v3  ;;  %v3859_v17 = vshll.u32 %v15526_v18, 16  ;;  %v4128_v46 = vrot.slane %v4126_v11, 1  ;;  %v13353_v62 = vld [vmem:[%s17451_s6 + $0x198] sm:$0xff]  }
 0x58e   : > { %4863 = vmatprep.mubr.bf16.mxu1 %v15514_v21  ;;  %v4120_v30 = vrot.slane %v4118_v14, 1  ;;  %11837 = vmatpush3.bf16.msra.mxu0 %v13337_v1  ;;  %v15536_v15 = vsel %vm1540_vm1, %v3849_v41, %v3853_v9  ;;  %v4124_v22 = vor.u32 %v4122_v43, %v4112_v20  ;;  %v3855_v1 = vshrl.u32 %v15493_v24, 16  ;;  %v13354_v20 = vld [vmem:[%s17451_s6 + $0x1e0] sm:$0xff]   ;;  %v15564_v11 = vld [vmem:[#allocation2 + $0x38] sm:$0xff] }
 0x58f   : > { %11838 = vmatprep.subr.bf16.mxu0 %v13338_v44  ;;  %11903 = vmatpush3.bf16.msra.mxu1 %v13349_v42  ;;  %v4134_v44 = vshll.u32 %v15536_v15, 16  ;;  %v15555_v14 = vsel %vm1620_vm0, %v3897_v45, %v3899_v47  ;;  %v3861_v42 = vrot.slane %v3859_v17, 1  ;;  %v13344_v45 = vld [vmem:[%s17451_s6 + $0x160] sm:$0xff]   ;;  %v13358_v17 = vld [vmem:[%s17451_s6 + $0x1e8] sm:$0xff]   ;;  %v4146_v28 = vshrl.u32 %v15536_v15, 16 }
 0x590   : > { %11904 = vmatprep.subr.bf16.mxu1 %v13352_v0  ;;  %v15551_v23 = vsel %vm1540_vm1, %v4116_v57, %v4120_v30  ;;  %v3857_v24 = vor.u32 %v3855_v1, %v3853_v9  ;;  %v15570_v41 = vsel %vm1540_vm1, %v4124_v22, %v4128_v46  ;;  %v4142_v0 = vshll.u32 %v15555_v14, 16  ;;  %v13355_v9 = vld [vmem:[%s17451_s6 + $0x1a0] sm:$0xff]  }
 0x591   : > { %4768 = vmatmul.mubr.bf16.gmra.mrb[116].mxu0 %v15453_v59  ;;  %v13341_v59 = vld [vmem:[%s17451_s6 + $0x118] sm:$0xff]   ;;  %v4130_v57 = vshrl.u32 %v15514_v21, 16  ;;  %v4136_v43 = vrot.slane %v4134_v44, 1  ;;  %v3867_v22 = vshll.u32 %v15564_v11, 16  ;;  %v13345_v1 = vld [vmem:[%s17451_s6 + $0x120] sm:$0xff]   ;;  %v13350_v44 = vld [vmem:[%s17451_s6 + $0x168] sm:$0xff]  }
 0x592   : > { %4774 = vmatprep.mubr.bf16.mxu0 %v15551_v23  ;;  %11839 = vmatpush3.bf16.msra.mxu0 %v13339_v54  ;;  %v3901_v54 = vrot.slane %v15526_v18, 1  ;;  %v4144_v27 = vrot.slane %v4142_v0, 1  ;;  %v3871_v55 = vshrl.u32 %v15564_v11, 16 }
 0x593   : > { %11840 = vmatprep.subr.bf16.mxu0 %v13340_v39  ;;  %11905 = vmatpush3.bf16.msra.mxu1 %v13353_v62  ;;  %v15584_v39 = vsel %vm1540_vm1, %v3857_v24, %v3861_v42  ;;  %v4132_v62 = vor.u32 %v4130_v57, %v4120_v30  ;;  %v13359_v24 = vld [vmem:[%s17451_s6 + $0x1a8] sm:$0xff]   ;;  %v3869_v57 = vrot.slane %v3867_v22, 1  ;;  %v13361_v22 = vld [vmem:[%s17451_s6 + $0x1b0] sm:$0xff]  }
 0x594   : > { %11906 = vmatprep.subr.bf16.mxu1 %v13354_v20  ;;  %v4138_v20 = vshrl.u32 %v15503_v19, 16  ;;  %v4150_v30 = vshll.u32 %v15584_v39, 16  ;;  %v13360_v19 = vld [vmem:[%s17451_s6 + $0x1f0] sm:$0xff]  }
 0x595   : > { %4864 = vmatmul.mubr.bf16.gmra.mrb[120].mxu1 %v15570_v41 }
 0x596   : > { %4870 = vmatprep.mubr.bf16.mxu1 %v15536_v15  ;;  %11841 = vmatpush3.bf16.msra.mxu0 %v13341_v59  ;;  %v15599_v59 = vsel %vm1540_vm1, %v4132_v62, %v4136_v43  ;;  %v4140_v0 = vor.u32 %v4138_v20, %v4128_v46  ;;  %v13351_v62 = vld [vmem:[%s17451_s6 + $0x128] sm:$0xff]   ;;  %v4152_v20 = vrot.slane %v4150_v30, 1 }
 0x597   : > { %11842 = vmatprep.subr.bf16.mxu0 %v13344_v45  ;;  %11907 = vmatpush3.bf16.msra.mxu1 %v13355_v9  ;;  %v15603_v45 = vsel %vm1620_vm0, %v3899_v47, %v3901_v54  ;;  %v3863_v9 = vshrl.u32 %v15526_v18, 16  ;;  %v15614_v47 = vld [vmem:[#allocation2 + $0x40] sm:$0xff] }
 0x598   : > { %11908 = vmatprep.subr.bf16.mxu1 %v13358_v17  ;;  %v13356_v17 = vld [vmem:[%s17451_s6 + $0x170] sm:$0xff]   ;;  %v15620_v33 = vsel %vm1540_vm1, %v4140_v0, %v4144_v27  ;;  %v4158_v18 = vshll.u32 %v15603_v45, 16  ;;  %v13364_v0 = vld [vmem:[%s17451_s6 + $0x1f8] sm:$0xff]   ;;  %v3879_v53 = vshrl.u32 %v15614_v47, 16 }
 0x599   : > { %4775 = vmatmul.mubr.bf16.gmra.mrb[120].mxu0 %v15476_v34  ;;  %v3865_v46 = vor.u32 %v3863_v9, %v3861_v42  ;;  %v4154_v42 = vshrl.u32 %v15555_v14, 16  ;;  %v3875_v9 = vshll.u32 %v15614_v47, 16  ;;  %v13365_v14 = vld [vmem:[%s17451_s6 + $0x1b8] sm:$0xff]  }
 0x59a   : > { %4781 = vmatprep.mubr.bf16.mxu0 %v15599_v59  ;;  %11843 = vmatpush3.bf16.msra.mxu0 %v13345_v1  ;;  %v4148_v1 = vor.u32 %v4146_v28, %v4136_v43  ;;  %v13357_v28 = vld [vmem:[%s17451_s6 + $0x130] sm:$0xff]   ;;  %v13362_v43 = vld [vmem:[%s17451_s6 + $0x178] sm:$0xff]   ;;  %v4227_v48 = vshll.u32 %v3879_v53, 16 }
 0x59b   : > { %11844 = vmatprep.subr.bf16.mxu0 %v13350_v44  ;;  %11909 = vmatpush3.bf16.msra.mxu1 %v13359_v24  ;;  %v3903_v44 = vrot.slane %v15564_v11, 1  ;;  %v15634_v24 = vsel %vm1540_vm1, %v3865_v46, %v3869_v57  ;;  %v4156_v30 = vor.u32 %v4154_v42, %v4144_v27  ;;  %v3873_v27 = vor.u32 %v3871_v55, %v3869_v57  ;;  %v13363_v11 = vld [vmem:[%s17451_s6 + $0x138] sm:$0xff]  }
 0x59c   : > { %11910 = vmatprep.subr.bf16.mxu1 %v13360_v19  ;;  %v4160_v19 = vrot.slane %v4158_v18, 1  ;;  %v3877_v18 = vrot.slane %v3875_v9, 1  ;;  %v4162_v55 = vshrl.u32 %v15584_v39, 16  ;;  %v15666_v57 = vrot.slane %v15614_v47, 1 }
 0x59d   : > { %4871 = vmatmul.mubr.bf16.gmra.mrb[124].mxu1 %v15620_v33  ;;  %v3904_v46 = vsel %vm1620_vm0, %v3901_v54, %v3903_v44 }
 0x59e   : > { %4877 = vmatprep.mubr.bf16.mxu1 %v15584_v39  ;;  %11845 = vmatpush3.bf16.msra.mxu0 %v13351_v62  ;;  %v15649_v62 = vsel %vm1540_vm1, %v4148_v1, %v4152_v20  ;;  %v15661_v1 = vsel %vm1540_vm1, %v4156_v30, %v4160_v19  ;;  %v4174_v42 = vshll.u32 %v3904_v46, 16  ;;  %v4164_v9 = vor.u32 %v4162_v55, %v4152_v20 }
 0x59f   : > { %11846 = vmatprep.subr.bf16.mxu0 %v13356_v17  ;;  %11911 = vmatpush3.bf16.msra.mxu1 %v13361_v22  ;;  %v4166_v17 = vshll.u32 %v15634_v24, 16  ;;  %v13366_v22 = vld [vmem:[%s17451_s6 + $0x200] sm:$0xff]  }
 0x5a0   : > { %11912 = vmatprep.subr.bf16.mxu1 %v13364_v0  ;;  %v15670_v0 = vsel %vm1540_vm1, %v3873_v27, %v3877_v18 }
 0x5a1   : > { %4782 = vmatmul.mubr.bf16.gmra.mrb[124].mxu0 %v15514_v21  ;;  %v4168_v54 = vrot.slane %v4166_v17, 1  ;;  %v3906_v17 = vsel %vm1620_vm0, %v3903_v44, %v15666_v57 }
 0x5a2   : > { %4788 = vmatprep.mubr.bf16.mxu0 %v15649_v62  ;;  %11847 = vmatpush3.bf16.msra.mxu0 %v13357_v28  ;;  %v4170_v28 = vshrl.u32 %v15603_v45, 16  ;;  %v4190_v45 = vshll.u32 %v3906_v17, 16 }
 0x5a3   : > { %11848 = vmatprep.subr.bf16.mxu0 %v13362_v43  ;;  %11913 = vmatpush3.bf16.msra.mxu1 %v13365_v14  ;;  %v4176_v43 = vrot.slane %v4174_v42, 1  ;;  %v15675_v30 = vsel %vm1540_vm1, %v4164_v9, %v4168_v54  ;;  %v4182_v14 = vshll.u32 %v15670_v0, 16  ;;  %v4186_v9 = vshrl.u32 %v3904_v46, 16 }
 0x5a4   : > { %v4172_v27 = vor.u32 %v4170_v28, %v4160_v19  ;;  %v4192_v44 = vrot.slane %v4190_v45, 1  ;;  %v3907_v28 = vor.u32 %v3879_v53, %v3877_v18  ;;  %v4232_v18 = vshll.u32 %v15666_v57, 16 }
 0x5a5   : > { %4878 = vmatmul.mubr.bf16.gmra.mrb[128].mxu1 %v15661_v1  ;;  %v4184_v55 = vrot.slane %v4182_v14, 1  ;;  %v4188_v49 = vor.u32 %v4186_v9, %v4176_v43  ;;  %v4229_v14 = vrot.slane %v4227_v48, 1  ;;  %v13367_v48 = vld [vmem:[%s17451_s6 + $0x208] sm:$0xff]  }
 0x5a6   : > { %4884 = vmatprep.mubr.bf16.mxu1 %v15634_v24  ;;  %11849 = vmatpush3.bf16.msra.mxu0 %v13363_v11  ;;  %v4178_v11 = vshrl.u32 %v15634_v24, 16  ;;  %v15683_v20 = vsel %vm1540_vm1, %v4172_v27, %v4176_v43  ;;  %v4194_v27 = vshrl.u32 %v15670_v0, 16  ;;  %v15700_v47 = vsel %vm1540_vm1, %v3907_v28, %v15437_v12 }
 0x5a7   : > { %12714 = vmatprep.subr.bf16.mxu0 %v13366_v22  ;;  %v4202_v43 = vshrl.u32 %v3906_v17, 16  ;;  %v4234_v53 = vrot.slane %v4232_v18, 1  ;;  %v13368_v17 = vld [vmem:[%s17451_s6 + $0x210] sm:$0xff]  }
 0x5a8   : > { %v4180_v42 = vor.u32 %v4178_v11, %v4168_v54  ;;  %v15695_v54 = vsel %vm1540_vm1, %v4188_v49, %v4192_v44  ;;  %v4196_v46 = vor.u32 %v4194_v27, %v4184_v55 }
 0x5a9   : > { %4789 = vmatmul.mubr.bf16.gmra.mrb[128].mxu0 %v15536_v15  ;;  %v15704_v11 = vor.u32 %v4202_v43, %v4192_v44 }
 0x5aa   : > { %4795 = vmatprep.mubr.bf16.mxu0 %v15675_v30  ;;  %v15690_v19 = vsel %vm1540_vm1, %v4180_v42, %v4184_v55  ;;  %v4230_v49 = vsel %vm1540_vm1, %v4196_v46, %v4229_v14  ;;  %v4210_v55 = vshrl.u32 %v15700_v47, 16 }
 0x5ab   : > { %v4235_v45 = vsel %vm1540_vm1, %v15704_v11, %v4234_v53 }
 0x5ad   : > { %4885 = vmatmul.mubr.bf16.gmra.mrb[132].mxu1 %v15683_v20 }
 0x5ae   : > { %4891 = vmatprep.mubr.bf16.mxu1 %v15670_v0 }
 0x5b1   : > { %4796 = vmatmul.mubr.bf16.gmra.mrb[132].mxu0 %v15584_v39 }
 0x5b2   : > { %4802 = vmatprep.mubr.bf16.mxu0 %v15690_v19 }
 0x5b5   : > { %4892 = vmatmul.mubr.bf16.gmra.mrb[136].mxu1 %v15695_v54 }
 0x5b6   : > { %4898 = vmatprep.mubr.bf16.mxu1 %v15700_v47 }
 0x5b9   : > { %4803 = vmatmul.mubr.bf16.gmra.mrb[136].mxu0 %v15634_v24 }
 0x5ba   : > { %4809 = vmatprep.mubr.bf16.mxu0 %v4230_v49 }
 0x5bd   : > { %4899 = vmatmul.mubr.bf16.gmra.mrb[140].mxu1 %v4235_v45 }
 0x5be   : > { %5027 = vmatprep.mubr.bf16.mxu1 %v15551_v23 }
 0x5c1   : > { %4810 = vmatmul.mubr.bf16.gmra.mrb[140].mxu0 %v15670_v0 }
 0x5c2   : > { %4938 = vmatprep.mubr.bf16.mxu0 %v15511_v3  ;;  %v13371_v3 = vld [vmem:[%s17451_s6 + $0x228] sm:$0xff]  }
 0x5c5   : > { %5028 = vmatmul.mubr.bf16.vlgmr.msra.gmra.mrb[144].mxu1 %v15476_v34  ;;  %v13369_v34 = vld [vmem:[%s17451_s6 + $0x218] sm:$0xff]  }
 0x5c6   : > { %5034 = vmatprep.mubr.bf16.mxu1 %v15599_v59 }
 0x5c9   : > { %4939 = vmatmul.mubr.bf16.vlgmr.msra.gmra.mrb[144].mxu0 %v15508_v58  ;;  %v13370_v58 = vld [vmem:[%s17451_s6 + $0x220] sm:$0xff]  }
 0x5ca   : > { %4945 = vmatprep.mubr.bf16.mxu0 %v15570_v41  ;;  %12715 = vmatpush3.bf16.msra.mxu0 %v13366_v22  ;;  %v3923_v22 = vsel %vm1540_vm1, %v15449_v36, %v15437_v12 }
 0x5cb   : > { %12716 = vmatprep.subr.bf16.mxu0 %v13367_v48  ;;  %v4214_v42 = vshll.u32 %v3923_v22, 16  ;;  %v4246_v12 = vshrl.u32 %v3923_v22, 16 }
 0x5cd   : > { %5035 = vmatmul.mubr.bf16.gmra.mrb[148].mxu1 %v15514_v21  ;;  %v13372_v21 = vld [vmem:[%s17451_s6 + $0x230] sm:$0xff]   ;;  %v4216_v44 = vrot.slane %v4214_v42, 1 }
 0x5ce   : > { %5041 = vmatprep.mubr.bf16.mxu1 %v15649_v62  ;;  %12717 = vmatpush3.bf16.msra.mxu0 %v13367_v48  ;;  %v13400_v42 = vld [vmem:[#allocation8 + $0x4c] ss:$16 sps:$4 sm:$0xff]  }
 0x5cf   : > { %12718 = vmatprep.subr.bf16.mxu0 %v13368_v17  ;;  %v4248_v43 = vor.u32 %v4246_v12, %v4216_v44  ;;  %v13409_v12 = vld [vmem:[#allocation8 + $0x8c] ss:$16 sps:$4 sm:$0xff]  }
 0x5d1   : > { %4946 = vmatmul.mubr.bf16.gmra.mrb[148].mxu0 %v15551_v23  ;;  %v13373_v23 = vld [vmem:[%s17451_s6 + $0x238] sm:$0xff]  }
 0x5d2   : > { %4952 = vmatprep.mubr.bf16.mxu0 %v15620_v33  ;;  %12719 = vmatpush3.bf16.msra.mxu0 %v13368_v17  ;;  %v13374_v17 = vld [vmem:[#allocation8] ss:$16 sps:$4 sm:$0xff]  }
 0x5d3   : > { %12720 = vmatprep.subr.bf16.mxu0 %v13369_v34 }
 0x5d5   : > { %5042 = vmatmul.mubr.bf16.gmra.mrb[152].mxu1 %v15536_v15  ;;  %v4198_v15 = vshll.u32 %v15700_v47, 16 }
 0x5d6   : > { %5048 = vmatprep.mubr.bf16.mxu1 %v15675_v30  ;;  %12721 = vmatpush3.bf16.msra.mxu0 %v13369_v34  ;;  %v13385_v34 = vld [vmem:[#allocation8 + $0x64] ss:$16 sps:$4 sm:$0xff]  }
 0x5d7   : > { %12722 = vmatprep.subr.bf16.mxu0 %v13370_v58 }
 0x5d9   : > { %4953 = vmatmul.mubr.bf16.gmra.mrb[152].mxu0 %v15599_v59  ;;  %v4200_v59 = vrot.slane %v4198_v15, 1  ;;  %v13392_v15 = vld [vmem:[#allocation8 + $0x28] ss:$16 sps:$4 sm:$0xff]  }
 0x5da   : > { %4959 = vmatprep.mubr.bf16.mxu0 %v15661_v1  ;;  %12723 = vmatpush3.bf16.msra.mxu0 %v13370_v58  ;;  %v13386_v58 = vld [vmem:[#allocation8 + $0x80] ss:$16 sps:$4 sm:$0xff]  }
 0x5db   : > { %12724 = vmatprep.subr.bf16.mxu0 %v13371_v3  ;;  %v4212_v9 = vor.u32 %v4210_v55, %v4200_v59  ;;  %v13401_v55 = vld [vmem:[#allocation8 + $0x68] ss:$16 sps:$4 sm:$0xff]  }
 0x5dd   : > { %5049 = vmatmul.mubr.bf16.gmra.mrb[156].mxu1 %v15584_v39  ;;  %v4201_v39 = vsel %vm1540_vm1, %v4196_v46, %v4200_v59  ;;  %v4217_v27 = vsel %vm1540_vm1, %v4212_v9, %v4216_v44  ;;  %v13395_v59 = vld [vmem:[#allocation8 + $0xa0] ss:$16 sps:$4 sm:$0xff]   ;;  %v13406_v44 = vld [vmem:[#allocation8 + $0xc4] ss:$16 sps:$4 sm:$0xff]  }
 0x5de   : > { %5055 = vmatprep.mubr.bf16.mxu1 %v15690_v19  ;;  %12725 = vmatpush3.bf16.msra.mxu0 %v13371_v3  ;;  %v13388_v3 = vld [vmem:[#allocation8 + $0x84] ss:$16 sps:$4 sm:$0xff]  }
 0x5df   : > { %12726 = vmatprep.subr.bf16.mxu0 %v13372_v21 }
 0x5e1   : > { %4960 = vmatmul.mubr.bf16.gmra.mrb[156].mxu0 %v15649_v62  ;;  %v3917_v62 = vsel %vm1620_vm0, %v15666_v57, %v15431_v6 }
 0x5e2   : > { %4966 = vmatprep.mubr.bf16.mxu0 %v15683_v20  ;;  %12727 = vmatpush3.bf16.msra.mxu0 %v13372_v21  ;;  %v4206_v36 = vshll.u32 %v3917_v62, 16  ;;  %v4218_v14 = vshrl.u32 %v3917_v62, 16  ;;  %v13389_v21 = vld [vmem:[#allocation8 + $0x8] ss:$16 sps:$4 sm:$0xff]   ;;  %v13403_v62 = vld [vmem:[#allocation8 + $0x6c] ss:$16 sps:$4 sm:$0xff]  }
 0x5e3   : > { %12728 = vmatprep.subr.bf16.mxu0 %v13373_v23 }
 0x5e4   : > { %v4208_v46 = vrot.slane %v4206_v36, 1  ;;  %v13407_v36 = vld [vmem:[#allocation8 + $0x88] ss:$16 sps:$4 sm:$0xff]  }
 0x5e5   : > { %5056 = vmatmul.mubr.bf16.gmra.mrb[160].mxu1 %v15634_v24  ;;  %v17654_v24 = vshrl.u32 %v15426_v52, 16 }
 0x5e6   : > { %5062 = vmatprep.mubr.bf16.mxu1 %v4201_v39  ;;  %12729 = vmatpush3.bf16.msra.mxu0 %v13373_v23  ;;  %v4209_v57 = vsel %vm1540_vm1, %v15704_v11, %v4208_v46  ;;  %v13394_v23 = vld [vmem:[#allocation8 + $0x2c] ss:$16 sps:$4 sm:$0xff]  }
 0x5e7   : > { %v4250_v28 = vshll.u32 %v17654_v24, 16 }
 0x5e9   : > { %4967 = vmatmul.mubr.bf16.gmra.mrb[160].mxu0 %v15675_v30  ;;  %v4252_v18 = vrot.slane %v4250_v28, 1  ;;  %v4242_v30 = vshll.u32 %v15431_v6, 16  ;;  %v13410_v28 = vld [vmem:[#allocation8 + $0xa8] ss:$16 sps:$4 sm:$0xff]  }
 0x5ea   : > { %4973 = vmatprep.mubr.bf16.mxu0 %v15695_v54 }
 0x5eb   : > { %v4253_v49 = vsel %vm1540_vm1, %v4248_v43, %v4252_v18  ;;  %v4244_v53 = vrot.slane %v4242_v30, 1 }
 0x5ed   : > { %5063 = vmatmul.mubr.bf16.gmra.mrb[164].mxu1 %v15670_v0  ;;  %v4220_v0 = vor.u32 %v4218_v14, %v4208_v46  ;;  %v15786_v14 = vld [vmem:[%s17459_s14 + $0x5] ss:$0 sm:$0xff] }
 0x5ee   : > { %5069 = vmatprep.mubr.bf16.mxu1 %v4217_v27  ;;  %v13412_v27 = vld [vmem:[#allocation8 + $0xac] ss:$16 sps:$4 sm:$0xff]  }
 0x5ef   : > { %v4245_v45 = vsel %vm1540_vm1, %v4220_v0, %v4244_v53 }
 0x5f1   : > { %4974 = vmatmul.mubr.bf16.gmra.mrb[164].mxu0 %v15690_v19  ;;  %v4240_v19 = vsel %vm1540_vm1, %v4212_v9, %v4252_v18  ;;  %v13404_v9 = vld [vmem:[#allocation8 + $0xc0] ss:$16 sps:$4 sm:$0xff]  }
 0x5f2   : > { %4980 = vmatprep.mubr.bf16.mxu0 %v4209_v57 }
 0x5f5   : > { %5070 = vmatmul.mubr.bf16.gmra.mrb[168].mxu1 %v15700_v47  ;;  %v4254_v47 = vshrl.u32 %v15431_v6, 16  ;;  %v13383_v6 = vld [vmem:[#allocation8 + $0x60] ss:$16 sps:$4 sm:$0xff]  }
 0x5f6   : > { %5076 = vmatprep.mubr.bf16.mxu1 %v4253_v49 }
 0x5f7   : > { %v4256_v11 = vor.u32 %v4254_v47, %v4244_v53  ;;  %v13415_v47 = vld [vmem:[#allocation8 + $0xe4] ss:$16 sps:$4 sm:$0xff]  }
 0x5f9   : > { %4981 = vmatmul.mubr.bf16.gmra.mrb[168].mxu0 %v4201_v39  ;;  %v4261_v48 = vsel %vm1540_vm1, %v4256_v11, %v4244_v53  ;;  %v13398_v39 = vld [vmem:[#allocation8 + $0x48] ss:$16 sps:$4 sm:$0xff]  }
 0x5fa   : > { %4987 = vmatprep.mubr.bf16.mxu0 %v4245_v45 }
 0x5fd   : > { %5077 = vmatmul.mubr.bf16.gmra.mrb[172].mxu1 %v3923_v22  ;;  %v13397_v22 = vld [vmem:[#allocation8 + $0xa4] ss:$16 sps:$4 sm:$0xff]  }
 0x5fe   : > { %5432 = vmatprep.mubr.bf16.mxu1 %v15426_v52 }
 0x601   : > { %4988 = vmatmul.mubr.bf16.gmra.mrb[172].mxu0 %v4240_v19  ;;  %v13413_v19 = vld [vmem:[#allocation8 + $0xe0] ss:$16 sps:$4 sm:$0xff]  }
 0x602   : > { %12730 = vmatprep.mubr.bf16.mxu0 %v15570_v41  ;;  %v13376_v41 = vld [vmem:[#allocation8 + $0x4] ss:$16 sps:$4 sm:$0xff]  }
 0x603   : > { %5400 = vmatprep.subr.bf16.mxu1 %v13376_v41  ;;  %v13418_v41 = vld [vmem:[#allocation8 + $0xcc] ss:$16 sps:$4 sm:$0xff]  }
 0x604   : > { %5401 = vmatpush1.bf16.msra.mxu1 %v13374_v17  ;;  %v13416_v17 = vld [vmem:[#allocation8 + $0xc8] ss:$16 sps:$4 sm:$0xff]  }
 0x609   : > { %12731 = vmatmul.mubr.bf16.vlgmr.msra.gmra.mrb[176].mxu0 %v15620_v33  ;;  %v13377_v33 = vld [vmem:[#allocation8 + $0x20] ss:$16 sps:$4 sm:$0xff]  }
 0x60a   : > { %12734 = vmatprep.mubr.bf16.mxu0 %v15661_v1  ;;  %v13379_v1 = vld [vmem:[#allocation8 + $0x24] ss:$16 sps:$4 sm:$0xff]  }
 0x60b   : > { %5402 = vmatprep.subr.bf16.mxu1 %v13379_v1 }
 0x60c   : > { %5403 = vmatpush1.bf16.msra.mxu1 %v13377_v33 }
 0x611   : > { %12735 = vmatmul.mubr.bf16.gmra.mrb[180].mxu0 %v15683_v20  ;;  %v13380_v20 = vld [vmem:[#allocation8 + $0x40] ss:$16 sps:$4 sm:$0xff]  }
 0x612   : > { %12738 = vmatprep.mubr.bf16.mxu0 %v15695_v54  ;;  %v13382_v54 = vld [vmem:[#allocation8 + $0x44] ss:$16 sps:$4 sm:$0xff]  }
 0x613   : > { %5404 = vmatprep.subr.bf16.mxu1 %v13382_v54 }
 0x614   : > { %5405 = vmatpush1.bf16.msra.mxu1 %v13380_v20 }
 0x615   : > { %5406 = vmatprep.subr.bf16.mxu1 %v13385_v34 }
 0x618   : > { %5407 = vmatpush1.bf16.msra.mxu1 %v13383_v6  ;;  %v13421_v6 = vld [vmem:[#allocation8 + $0xec] ss:$16 sps:$4 sm:$0xff]  }
 0x619   : > { %12739 = vmatmul.mubr.bf16.gmra.mrb[184].mxu0 %v4209_v57  ;;  %5408 = vmatprep.subr.bf16.mxu1 %v13388_v3 }
 0x61a   : > { %12742 = vmatprep.mubr.bf16.mxu0 %v4245_v45 }
 0x61c   : > { %5409 = vmatpush1.bf16.msra.mxu1 %v13386_v58  ;;  %v13419_v58 = vld [vmem:[#allocation8 + $0xe8] ss:$16 sps:$4 sm:$0xff]  }
 0x61d   : > { %5410 = vmatprep.subr.bf16.mxu1 %v13397_v22 }
 0x620   : > { %5411 = vmatpush1.bf16.msra.mxu1 %v13395_v59 }
 0x621   : > { %12743 = vmatmul.mubr.bf16.gmra.mrb[188].mxu0 %v4261_v48  ;;  %5412 = vmatprep.subr.bf16.mxu1 %v13406_v44 }
 0x622   : > { %5505 = vmatprep.mubr.bf16.mxu0 %v15426_v52  ;;  %v13391_v52 = vld [vmem:[#allocation8 + $0xc] ss:$16 sps:$4 sm:$0xff]  }
 0x623   : > { %5473 = vmatprep.subr.bf16.mxu0 %v13391_v52 }
 0x624   : > { %5474 = vmatpush1.bf16.msra.mxu0 %v13389_v21  ;;  %5413 = vmatpush1.bf16.msra.mxu1 %v13404_v9 }
 0x625   : > { %5475 = vmatprep.subr.bf16.mxu0 %v13394_v23  ;;  %5414 = vmatprep.subr.bf16.mxu1 %v13415_v47 }
 0x628   : > { %5476 = vmatpush1.bf16.msra.mxu0 %v13392_v15  ;;  %5415 = vmatpush1.bf16.msra.mxu1 %v13413_v19 }
 0x629   : > { %5477 = vmatprep.subr.bf16.mxu0 %v13400_v42 }
 0x62c   : > { %5478 = vmatpush1.bf16.msra.mxu0 %v13398_v39 }
 0x62d   : > { %5479 = vmatprep.subr.bf16.mxu0 %v13403_v62 }
 0x630   : > { %5480 = vmatpush1.bf16.msra.mxu0 %v13401_v55 }
 0x631   : > { %5481 = vmatprep.subr.bf16.mxu0 %v13409_v12 }
 0x634   : > { %5482 = vmatpush1.bf16.msra.mxu0 %v13407_v36 }
 0x635   : > { %5483 = vmatprep.subr.bf16.mxu0 %v13412_v27 }
 0x638   : > { %5484 = vmatpush1.bf16.msra.mxu0 %v13410_v28 }
 0x639   : > { %5485 = vmatprep.subr.bf16.mxu0 %v13418_v41 }
 0x63c   : > { %5486 = vmatpush1.bf16.msra.mxu0 %v13416_v17 }
 0x63d   : > { %5487 = vmatprep.subr.bf16.mxu0 %v13421_v6 }
 0x640   : > { %5488 = vmatpush1.bf16.msra.mxu0 %v13419_v58  ;;  %v13423_v58 = vld [vmem:[#allocation10 + $0xc0] sm:$0xff]  }
 0x641   : > { %12018 = vmatprep.subr.bf16.mxu0 %v13423_v58 }
 0x658   : > { %v11786_v24 = vpop.f32.mrb[112].mxu1 }
 0x659   : > { %v11787_v46 = vpop.f32.mrb[113].mxu1 }
 0x65a   : > { %v11788_v43 = vadd.f32 %v11787_v46, %v11786_v24  ;;  %v11789_v18 = vpop.f32.mrb[114].mxu1 }
 0x65b   : > { %v11790_v57 = vpop.f32.mrb[115].mxu1 }
 0x65c   : > { %v11722_v30 = vpop.f32.mrb[112].mxu0 }
 0x65d   : > { %v11723_v49 = vpop.f32.mrb[113].mxu0 }
 0x65e   : > { %v11724_v0 = vadd.f32 %v11723_v49, %v11722_v30  ;;  %v11725_v53 = vpop.f32.mrb[114].mxu0 }
 0x65f   : > { %v11726_v45 = vpop.f32.mrb[115].mxu0 }
 0x660   : > { %v4763_v11 = vadd.f32 %v11724_v0, %v15786_v14  ;;  %v11792_v48 = vpop.f32.mrb[116].mxu1 }
 0x661   : > { %v11793_v33 = vpop.f32.mrb[117].mxu1 }
 0x662   : > { %v11794_v1 = vadd.f32 %v11793_v33, %v11792_v48  ;;  %v11795_v20 = vpop.f32.mrb[118].mxu1  ;;  %v15789_v54 = vadd.f32 %v11788_v43, %v4763_v11 }
 0x663   : > { %v11796_v34 = vpop.f32.mrb[119].mxu1 }
 0x664   : > { %v11728_v3 = vpop.f32.mrb[116].mxu0  ;;  %v13422_v34 = vld [vmem:[#allocation10 + $0x40] sm:$0xff]  }
 0x665   : > { %v11729_v21 = vpop.f32.mrb[117].mxu0  ;;  %11978 = vmatprep.subr.bf16.mxu1 %v13422_v34 }
 0x666   : > { %v11730_v52 = vadd.f32 %v11729_v21, %v11728_v3  ;;  %v11731_v15 = vpop.f32.mrb[118].mxu0 }
 0x667   : > { %v11732_v23 = vpop.f32.mrb[119].mxu0 }
 0x668   : > { %v4770_v59 = vadd.f32 %v11730_v52, %v15786_v14  ;;  %v11798_v22 = vpop.f32.mrb[120].mxu1 }
 0x669   : > { %v11799_v39 = vpop.f32.mrb[121].mxu1 }
 0x66a   : > { %v11800_v42 = vadd.f32 %v11799_v39, %v11798_v22  ;;  %v11801_v55 = vpop.f32.mrb[122].mxu1  ;;  %v15792_v62 = vadd.f32 %v11794_v1, %v4770_v59 }
 0x66b   : > { %v11802_v9 = vpop.f32.mrb[123].mxu1 }
 0x66c   : > { %v11734_v44 = vpop.f32.mrb[120].mxu0 }
 0x66d   : > { %v11735_v36 = vpop.f32.mrb[121].mxu0 }
 0x66e   : > { %v11736_v12 = vadd.f32 %v11735_v36, %v11734_v44  ;;  %v11737_v24 = vpop.f32.mrb[122].mxu0 }
 0x66f   : > { %v11738_v28 = vpop.f32.mrb[123].mxu0 }
 0x670   : > { %v4777_v27 = vadd.f32 %v11736_v12, %v15786_v14  ;;  %v11804_v46 = vpop.f32.mrb[124].mxu1 }
 0x671   : > { %v11805_v43 = vpop.f32.mrb[125].mxu1 }
 0x672   : > { %v11806_v18 = vadd.f32 %v11805_v43, %v11804_v46  ;;  %v11807_v57 = vpop.f32.mrb[126].mxu1  ;;  %v15795_v30 = vadd.f32 %v11800_v42, %v4777_v27 }
 0x673   : > { %v11808_v49 = vpop.f32.mrb[127].mxu1 }
 0x674   : > { %v11740_v0 = vpop.f32.mrb[124].mxu0 }
 0x675   : > { %v11741_v53 = vpop.f32.mrb[125].mxu0 }
 0x676   : > { %v11742_v45 = vadd.f32 %v11741_v53, %v11740_v0  ;;  %v11743_v19 = vpop.f32.mrb[126].mxu0 }
 0x677   : > { %v11744_v47 = vpop.f32.mrb[127].mxu0 }
 0x678   : > { %v4784_v11 = vadd.f32 %v11742_v45, %v15786_v14  ;;  %v11810_v48 = vpop.f32.mrb[128].mxu1 }
 0x679   : > { %v11811_v17 = vpop.f32.mrb[129].mxu1 }
 0x67a   : > { %v11812_v41 = vadd.f32 %v11811_v17, %v11810_v48  ;;  %v11813_v33 = vpop.f32.mrb[130].mxu1  ;;  %v15798_v1 = vadd.f32 %v11806_v18, %v4784_v11 }
 0x67b   : > { %v11814_v20 = vpop.f32.mrb[131].mxu1 }
 0x67c   : > { %v11746_v6 = vpop.f32.mrb[128].mxu0 }
 0x67d   : > { %v11747_v3 = vpop.f32.mrb[129].mxu0 }
 0x67e   : > { %v11748_v21 = vadd.f32 %v11747_v3, %v11746_v6  ;;  %v11749_v52 = vpop.f32.mrb[130].mxu0 }
 0x67f   : > { %v11750_v15 = vpop.f32.mrb[131].mxu0 }
 0x680   : > { %v4791_v23 = vadd.f32 %v11748_v21, %v15786_v14  ;;  %v11816_v59 = vpop.f32.mrb[132].mxu1 }
 0x681   : > { %v11817_v22 = vpop.f32.mrb[133].mxu1 }
 0x682   : > { %v11818_v39 = vadd.f32 %v11817_v22, %v11816_v59  ;;  %v11819_v42 = vpop.f32.mrb[134].mxu1  ;;  %v15801_v55 = vadd.f32 %v11812_v41, %v4791_v23 }
 0x683   : > { %v11820_v9 = vpop.f32.mrb[135].mxu1 }
 0x684   : > { %v11752_v44 = vpop.f32.mrb[132].mxu0 }
 0x685   : > { %v11753_v36 = vpop.f32.mrb[133].mxu0 }
 0x686   : > { %v11754_v12 = vadd.f32 %v11753_v36, %v11752_v44  ;;  %v11755_v24 = vpop.f32.mrb[134].mxu0 }
 0x687   : > { %v11756_v28 = vpop.f32.mrb[135].mxu0 }
 0x688   : > { %v4798_v27 = vadd.f32 %v11754_v12, %v15786_v14  ;;  %v11822_v46 = vpop.f32.mrb[136].mxu1 }
 0x689   : > { %v11823_v43 = vpop.f32.mrb[137].mxu1 }
 0x68a   : > { %v11824_v18 = vadd.f32 %v11823_v43, %v11822_v46  ;;  %v11825_v57 = vpop.f32.mrb[138].mxu1  ;;  %v15804_v49 = vadd.f32 %v11818_v39, %v4798_v27 }
 0x68b   : > { %v11826_v0 = vpop.f32.mrb[139].mxu1 }
 0x68c   : > { %v11758_v53 = vpop.f32.mrb[136].mxu0 }
 0x68d   : > { %v11759_v45 = vpop.f32.mrb[137].mxu0 }
 0x68e   : > { %v11760_v19 = vadd.f32 %v11759_v45, %v11758_v53  ;;  %v11761_v47 = vpop.f32.mrb[138].mxu0 }
 0x68f   : > { %v11762_v11 = vpop.f32.mrb[139].mxu0 }
 0x690   : > { %v4805_v48 = vadd.f32 %v11760_v19, %v15786_v14  ;;  %v11828_v17 = vpop.f32.mrb[140].mxu1 }
 0x691   : > { %v11829_v41 = vpop.f32.mrb[141].mxu1 }
 0x692   : > { %v11830_v33 = vadd.f32 %v11829_v41, %v11828_v17  ;;  %v11831_v20 = vpop.f32.mrb[142].mxu1  ;;  %v15807_v6 = vadd.f32 %v11824_v18, %v4805_v48 }
 0x693   : > { %v11832_v34 = vpop.f32.mrb[143].mxu1 }
 0x694   : > { %v11764_v58 = vpop.f32.mrb[140].mxu0 }
 0x695   : > { %v11765_v3 = vpop.f32.mrb[141].mxu0 }
 0x696   : > { %v11766_v21 = vadd.f32 %v11765_v3, %v11764_v58  ;;  %v11767_v52 = vpop.f32.mrb[142].mxu0 }
 0x697   : > { %v11768_v15 = vpop.f32.mrb[143].mxu0 }
 0x698   : > { %v4812_v23 = vadd.f32 %v11766_v21, %v15786_v14  ;;  %v11914_v59 = vpop.f32.mrb[144].mxu1 }
 0x699   : > { %v11915_v22 = vpop.f32.mrb[145].mxu1 }
 0x69a   : > { %v11916_v39 = vadd.f32 %v11915_v22, %v11914_v59  ;;  %v11917_v42 = vpop.f32.mrb[146].mxu1  ;;  %v15810_v9 = vadd.f32 %v11830_v33, %v4812_v23 }
 0x69b   : > { %v11918_v44 = vpop.f32.mrb[147].mxu1 }
 0x69c   : > { %v11850_v36 = vpop.f32.mrb[144].mxu0 }
 0x69d   : > { %v11851_v12 = vpop.f32.mrb[145].mxu0 }
 0x69e   : > { %v11852_v24 = vadd.f32 %v11851_v12, %v11850_v36  ;;  %v11853_v28 = vpop.f32.mrb[146].mxu0 }
 0x69f   : > { %v11854_v27 = vpop.f32.mrb[147].mxu0 }
 0x6a0   : > { %v11920_v46 = vpop.f32.mrb[148].mxu1  ;;  %v4941_v43 = vadd.f32 %v11852_v24, %v15789_v54 }
 0x6a1   : > { %v11921_v18 = vpop.f32.mrb[149].mxu1 }
 0x6a2   : > { %v11922_v57 = vadd.f32 %v11921_v18, %v11920_v46  ;;  %v11923_v0 = vpop.f32.mrb[150].mxu1  ;;  %v15813_v53 = vadd.f32 %v11916_v39, %v4941_v43 }
 0x6a3   : > { %v11924_v14 = vpop.f32.mrb[151].mxu1 }
 0x6a4   : > { %v11856_v45 = vpop.f32.mrb[148].mxu0 }
 0x6a5   : > { %v11857_v19 = vpop.f32.mrb[149].mxu0 }
 0x6a6   : > { %v11858_v47 = vadd.f32 %v11857_v19, %v11856_v45  ;;  %v11859_v11 = vpop.f32.mrb[150].mxu0 }
 0x6a7   : > { %v11860_v48 = vpop.f32.mrb[151].mxu0 }
 0x6a8   : > { %v11926_v17 = vpop.f32.mrb[152].mxu1  ;;  %v4948_v41 = vadd.f32 %v11858_v47, %v15792_v62 }
 0x6a9   : > { %v11927_v33 = vpop.f32.mrb[153].mxu1 }
 0x6aa   : > { %v11928_v20 = vadd.f32 %v11927_v33, %v11926_v17  ;;  %v11929_v34 = vpop.f32.mrb[154].mxu1  ;;  %v15816_v58 = vadd.f32 %v11922_v57, %v4948_v41 }
 0x6ab   : > { %v11930_v54 = vpop.f32.mrb[155].mxu1 }
 0x6ac   : > { %v11862_v3 = vpop.f32.mrb[152].mxu0 }
 0x6ad   : > { %v11863_v21 = vpop.f32.mrb[153].mxu0 }
 0x6ae   : > { %v11864_v52 = vadd.f32 %v11863_v21, %v11862_v3  ;;  %v11865_v15 = vpop.f32.mrb[154].mxu0 }
 0x6af   : > { %v11866_v23 = vpop.f32.mrb[155].mxu0 }
 0x6b0   : > { %v4955_v59 = vadd.f32 %v11864_v52, %v15795_v30  ;;  %v11932_v22 = vpop.f32.mrb[156].mxu1 }
 0x6b1   : > { %v11933_v39 = vpop.f32.mrb[157].mxu1 }
 0x6b2   : > { %v11934_v42 = vadd.f32 %v11933_v39, %v11932_v22  ;;  %v11935_v44 = vpop.f32.mrb[158].mxu1  ;;  %v15819_v36 = vadd.f32 %v11928_v20, %v4955_v59 }
 0x6b3   : > { %v11936_v62 = vpop.f32.mrb[159].mxu1 }
 0x6b4   : > { %v11868_v12 = vpop.f32.mrb[156].mxu0 }
 0x6b5   : > { %v11869_v24 = vpop.f32.mrb[157].mxu0 }
 0x6b6   : > { %v11870_v28 = vadd.f32 %v11869_v24, %v11868_v12  ;;  %v11871_v27 = vpop.f32.mrb[158].mxu0 }
 0x6b7   : > { %v11872_v46 = vpop.f32.mrb[159].mxu0 }
 0x6b8   : > { %v4962_v43 = vadd.f32 %v11870_v28, %v15798_v1  ;;  %v11938_v18 = vpop.f32.mrb[160].mxu1 }
 0x6b9   : > { %v11939_v57 = vpop.f32.mrb[161].mxu1 }
 0x6ba   : > { %v11940_v0 = vadd.f32 %v11939_v57, %v11938_v18  ;;  %v11941_v14 = vpop.f32.mrb[162].mxu1  ;;  %v5051_v45 = vadd.f32 %v11934_v42, %v4962_v43 }
 0x6bb   : > { %v11942_v30 = vpop.f32.mrb[163].mxu1 }
 0x6bc   : > { %v11874_v19 = vpop.f32.mrb[160].mxu0 }
 0x6bd   : > { %v11875_v47 = vpop.f32.mrb[161].mxu0 }
 0x6be   : > { %v11876_v11 = vadd.f32 %v11875_v47, %v11874_v19  ;;  %v11877_v48 = vpop.f32.mrb[162].mxu0 }
 0x6bf   : > { %v11878_v17 = vpop.f32.mrb[163].mxu0 }
 0x6c0   : > { %v4969_v41 = vadd.f32 %v11876_v11, %v15801_v55  ;;  %v11944_v33 = vpop.f32.mrb[164].mxu1 }
 0x6c1   : > { %v11945_v20 = vpop.f32.mrb[165].mxu1 }
 0x6c2   : > { %v11946_v34 = vadd.f32 %v11945_v20, %v11944_v33  ;;  %v11947_v54 = vpop.f32.mrb[166].mxu1  ;;  %v15823_v3 = vadd.f32 %v11940_v0, %v4969_v41 }
 0x6c3   : > { %v11948_v1 = vpop.f32.mrb[167].mxu1 }
 0x6c4   : > { %v11880_v21 = vpop.f32.mrb[164].mxu0 }
 0x6c5   : > { %v11881_v52 = vpop.f32.mrb[165].mxu0 }
 0x6c6   : > { %v11882_v15 = vadd.f32 %v11881_v52, %v11880_v21  ;;  %v11883_v23 = vpop.f32.mrb[166].mxu0 }
 0x6c7   : > { %v11884_v59 = vpop.f32.mrb[167].mxu0 }
 0x6c8   : > { %v4976_v22 = vadd.f32 %v11882_v15, %v15804_v49  ;;  %v11950_v39 = vpop.f32.mrb[168].mxu1 }
 0x6c9   : > { %v11951_v42 = vpop.f32.mrb[169].mxu1 }
 0x6ca   : > { %v11952_v44 = vadd.f32 %v11951_v42, %v11950_v39  ;;  %v11953_v62 = vpop.f32.mrb[170].mxu1  ;;  %v15826_v12 = vadd.f32 %v11946_v34, %v4976_v22  ;;  %v13424_v22 = vld [vmem:[#allocation10] sm:$0xff]   ;;  %v13426_v42 = vld [vmem:[#allocation10 + $0x48] sm:$0xff]  }
 0x6cb   : > { %v11954_v55 = vpop.f32.mrb[171].mxu1  ;;  %v13425_v39 = vld [vmem:[#allocation10 + $0x80] sm:$0xff]  }
 0x6cc   : > { %v11886_v24 = vpop.f32.mrb[168].mxu0 }
 0x6cd   : > { %v11887_v28 = vpop.f32.mrb[169].mxu0 }
 0x6ce   : > { %v11888_v27 = vadd.f32 %v11887_v28, %v11886_v24  ;;  %v11889_v46 = vpop.f32.mrb[170].mxu0  ;;  %v15836_v24 = vld [vmem:[#allocation2] sm:$0xff] }
 0x6cf   : > { %v11890_v43 = vpop.f32.mrb[171].mxu0  ;;  %v13428_v28 = vld [vmem:[#allocation10 + $0x8] sm:$0xff]  }
 0x6d0   : > { %v4983_v18 = vadd.f32 %v11888_v27, %v15807_v6  ;;  %v11956_v57 = vpop.f32.mrb[172].mxu1  ;;  %v13429_v27 = vld [vmem:[#allocation10 + $0x88] sm:$0xff]  }
 0x6d1   : > { %v11957_v0 = vpop.f32.mrb[173].mxu1 }
 0x6d2   : > { %v11958_v14 = vadd.f32 %v11957_v0, %v11956_v57  ;;  %v15829_v30 = vadd.f32 %v11952_v44, %v4983_v18  ;;  %v11959_v49 = vpop.f32.mrb[174].mxu1  ;;  %v13427_v44 = vld [vmem:[#allocation10 + $0xc8] sm:$0xff]   ;;  %v13430_v18 = vld [vmem:[#allocation10 + $0x50] sm:$0xff]  }
 0x6d3   : > { %v11960_v19 = vpop.f32.mrb[175].mxu1  ;;  %v13433_v49 = vld [vmem:[#allocation10 + $0x90] sm:$0xff]  }
 0x6d4   : > { %v11892_v47 = vpop.f32.mrb[172].mxu0  ;;  %v13435_v19 = vld [vmem:[#allocation10 + $0xd8] sm:$0xff]  }
 0x6d5   : > { %v11893_v11 = vpop.f32.mrb[173].mxu0 }
 0x6d6   : > { %v11894_v48 = vadd.f32 %v11893_v11, %v11892_v47  ;;  %v11895_v17 = vpop.f32.mrb[174].mxu0 }
 0x6d7   : > { %v11896_v41 = vpop.f32.mrb[175].mxu0 }
 0x6d8   : > { %v4990_v33 = vadd.f32 %v11894_v48, %v15810_v9 }
 0x6da   : > { %v15832_v20 = vadd.f32 %v11958_v14, %v4990_v33  ;;  %v13432_v14 = vld [vmem:[#allocation10 + $0x10] sm:$0xff]   ;;  %v13436_v33 = vld [vmem:[#allocation10 + $0x18] sm:$0xff]  }
 0x6dc   : > { %v12732_v34 = vpop.f32.mrb[176].mxu0 }
 0x6dd   : > { %v5126_v54 = vadd.f32 %v12732_v34, %v15816_v58  ;;  %v5118_v6 = vpop.f32.mrb[177].mxu0  ;;  %v13437_v34 = vld [vmem:[#allocation10 + $0x98] sm:$0xff]  }
 0x6de   : > { %v5119_v1 = vadd.f32 %v5118_v6, %v15813_v53  ;;  %v12733_v21 = vpop.f32.mrb[178].mxu0 }
 0x6df   : > { %v5174_v52 = vmax.f32 %v5126_v54, 0.0  ;;  %v5121_v15 = vpop.f32.mrb[179].mxu0  ;;  %v13439_v21 = vld [vmem:[#allocation10 + $0xe0] sm:$0xff]  }
 0x6e0   : > { %v5173_v23 = vmax.f32 %v5119_v1, 0.0  ;;  %v13438_v1 = vld [vmem:[#allocation10 + $0x60] sm:$0xff]  }
 0x6e1   : > { %v13440_v15 = vld [vmem:[#allocation10 + $0x20] sm:$0xff]  }
 0x6e2   : > { %v5181_v59 = vpack.c.bf16 %v5174_v52, %v5173_v23  ;;  %v13441_v23 = vld [vmem:[#allocation10 + $0xa0] sm:$0xff]  }
 0x6e4   : > { %v12736_v62 = vpop.f32.mrb[180].mxu0  ;;  %5433 = vmatmul.mubr.bf16.vlgmr.msra.gmra.mrb[176].mxu1 %v5181_v59  ;;  %5506 = vmatmul.mubr.bf16.vlgmr.msra.gmra.mrb[192].mxu0 %v5181_v59 }
 0x6e5   : > { %v5140_v9 = vadd.f32 %v12736_v62, %v5051_v45  ;;  %v5132_v55 = vpop.f32.mrb[181].mxu0  ;;  %5442 = vmatprep.mubr.bf16.mxu1 %v15836_v24  ;;  %5515 = vmatprep.mubr.bf16.mxu0 %v15836_v24  ;;  %v13431_v45 = vld [vmem:[#allocation10 + $0xd0] sm:$0xff]  }
 0x6e6   : > { %v5133_v53 = vadd.f32 %v5132_v55, %v15819_v36  ;;  %v12737_v58 = vpop.f32.mrb[182].mxu0  ;;  %11979 = vmatpush3.bf16.msra.mxu1 %v13424_v22  ;;  %12019 = vmatpush3.bf16.msra.mxu0 %v13425_v39  ;;  %v13434_v36 = vld [vmem:[#allocation10 + $0x58] sm:$0xff]  }
 0x6e7   : > { %v5176_v46 = vmax.f32 %v5140_v9, 0.0  ;;  %v5135_v43 = vpop.f32.mrb[183].mxu0  ;;  %11980 = vmatprep.subr.bf16.mxu1 %v13426_v42  ;;  %12020 = vmatprep.subr.bf16.mxu0 %v13427_v44  ;;  %v13443_v58 = vld [vmem:[#allocation10 + $0xe8] sm:$0xff]  }
 0x6e8   : > { %v5175_v57 = vmax.f32 %v5133_v53, 0.0  ;;  %v13442_v53 = vld [vmem:[#allocation10 + $0x68] sm:$0xff]   ;;  %v13449_v43 = vld [vmem:[#allocation10 + $0xb0] sm:$0xff]  }
 0x6ea   : > { %v5182_v0 = vpack.c.bf16 %v5176_v46, %v5175_v57  ;;  %11981 = vmatpush3.bf16.msra.mxu1 %v13428_v28  ;;  %12021 = vmatpush3.bf16.msra.mxu0 %v13429_v27  ;;  %v13445_v28 = vld [vmem:[#allocation10 + $0xa8] sm:$0xff]   ;;  %v13446_v27 = vld [vmem:[#allocation10 + $0x70] sm:$0xff]   ;;  %v13452_v57 = vld [vmem:[#allocation10 + $0x38] sm:$0xff]  }
 0x6eb   : > { %11982 = vmatprep.subr.bf16.mxu1 %v13430_v18  ;;  %12022 = vmatprep.subr.bf16.mxu0 %v13431_v45  ;;  %v13447_v46 = vld [vmem:[#allocation10 + $0xf0] sm:$0xff]   ;;  %v13450_v18 = vld [vmem:[#allocation10 + $0x78] sm:$0xff]  }
 0x6ec   : > { %v12740_v47 = vpop.f32.mrb[184].mxu0  ;;  %5443 = vmatmul.mubr.bf16.gmra.mrb[180].mxu1 %v5182_v0  ;;  %5516 = vmatmul.mubr.bf16.gmra.mrb[196].mxu0 %v5182_v0  ;;  %v13451_v45 = vld [vmem:[#allocation10 + $0xf8] sm:$0xff]  }
 0x6ed   : > { %v5154_v11 = vadd.f32 %v12740_v47, %v15826_v12  ;;  %v5146_v48 = vpop.f32.mrb[185].mxu0  ;;  %5452 = vmatprep.mubr.bf16.mxu1 %v15836_v24  ;;  %5525 = vmatprep.mubr.bf16.mxu0 %v15836_v24  ;;  %v13453_v0 = vld [vmem:[#allocation10 + $0xb8] sm:$0xff]  }
 0x6ee   : > { %v5147_v17 = vadd.f32 %v5146_v48, %v15823_v3  ;;  %v12741_v41 = vpop.f32.mrb[186].mxu0  ;;  %11983 = vmatpush3.bf16.msra.mxu1 %v13432_v14  ;;  %12023 = vmatpush3.bf16.msra.mxu0 %v13433_v49  ;;  %v10890_v14 = vld [vmem:[%s17459_s14 + $0x6] ss:$8 sm:$0xf] }
 0x6ef   : > { %v5178_v54 = vmax.f32 %v5154_v11, 0.0  ;;  %v5149_v6 = vpop.f32.mrb[187].mxu0  ;;  %11984 = vmatprep.subr.bf16.mxu1 %v13434_v36  ;;  %12024 = vmatprep.subr.bf16.mxu0 %v13435_v19  ;;  %v15853_v49 = vrot.slane %v10890_v14, %v15100_v10  ;;  %v15856_v36 = vrot.slane %v10890_v14, %v15105_v50  ;;  %v15859_v19 = vrot.slane %v10890_v14, %v15096_v56 }
 0x6f0   : > { %v5177_v52 = vmax.f32 %v5147_v17, 0.0  ;;  %v15862_v47 = vrot.slane %v10890_v14, %v15098_v8 }
 0x6f2   : > { %v5183_v12 = vpack.c.bf16 %v5178_v54, %v5177_v52  ;;  %11985 = vmatpush3.bf16.msra.mxu1 %v13436_v33  ;;  %12025 = vmatpush3.bf16.msra.mxu0 %v13437_v34  ;;  %v17655_v52 = vmax.f32 %v15130_v29, 0.0 }
 0x6f3   : > { %11986 = vmatprep.subr.bf16.mxu1 %v13438_v1  ;;  %12026 = vmatprep.subr.bf16.mxu0 %v13439_v21 }
 0x6f4   : > { %v12744_v3 = vpop.f32.mrb[188].mxu0  ;;  %5453 = vmatmul.mubr.bf16.gmra.mrb[184].mxu1 %v5183_v12  ;;  %5526 = vmatmul.mubr.bf16.gmra.mrb[200].mxu0 %v5183_v12 }
 0x6f5   : > { %v5168_v59 = vadd.f32 %v12744_v3, %v15832_v20  ;;  %v5160_v22 = vpop.f32.mrb[189].mxu0  ;;  %5462 = vmatprep.mubr.bf16.mxu1 %v15836_v24  ;;  %5535 = vmatprep.mubr.bf16.mxu0 %v15836_v24  ;;  %v13444_v20 = vld [vmem:[#allocation10 + $0x28] sm:$0xff]  }
 0x6f6   : > { %v5161_v39 = vadd.f32 %v5160_v22, %v15829_v30  ;;  %v12745_v42 = vpop.f32.mrb[190].mxu0  ;;  %11987 = vmatpush3.bf16.msra.mxu1 %v13440_v15  ;;  %12027 = vmatpush3.bf16.msra.mxu0 %v13441_v23  ;;  %v13448_v30 = vld [vmem:[#allocation10 + $0x30] sm:$0xff]   ;;  %v17656_v22 = vmax.f32 %v15124_v25, 0.0  ;;  %v17660_v25 = vmax.f32 %v15139_v32, 0.0 }
 0x6f7   : > { %v5180_v44 = vmax.f32 %v5168_v59, 0.0  ;;  %v5163_v62 = vpop.f32.mrb[191].mxu0  ;;  %11988 = vmatprep.subr.bf16.mxu1 %v13442_v53  ;;  %12028 = vmatprep.subr.bf16.mxu0 %v13443_v58  ;;  %v17657_v42 = vmax.f32 %v15127_v13, 0.0  ;;  %v17659_v53 = vmax.f32 %v15136_v31, 0.0  ;;  %v17661_v13 = vmax.f32 %v15142_v37, 0.0 }
 0x6f8   : > { %v5179_v9 = vmax.f32 %v5161_v39, 0.0 }
 0x6fa   : > { %v5184_v55 = vpack.c.bf16 %v5180_v44, %v5179_v9  ;;  %11989 = vmatpush3.bf16.msra.mxu1 %v13444_v20  ;;  %12029 = vmatpush3.bf16.msra.mxu0 %v13445_v28  ;;  %v17658_v9 = vmax.f32 %v15133_v40, 0.0 }
 0x6fb   : > { %11990 = vmatprep.subr.bf16.mxu1 %v13446_v27  ;;  %12030 = vmatprep.subr.bf16.mxu0 %v13447_v46  ;;  %v17662_v27 = vmax.f32 %v15145_v38, 0.0 }
 0x6fc   : > { %5463 = vmatmul.mubr.bf16.gmra.mrb[188].mxu1 %v5184_v55  ;;  %5536 = vmatmul.mubr.bf16.gmra.mrb[204].mxu0 %v5184_v55 }
 0x6fe   : > { %11991 = vmatpush3.bf16.msra.mxu1 %v13448_v30  ;;  %12031 = vmatpush3.bf16.msra.mxu0 %v13449_v43 }
 0x6ff   : > { %11992 = vmatprep.subr.bf16.mxu1 %v13450_v18  ;;  %12032 = vmatprep.subr.bf16.mxu0 %v13451_v45 }
 0x702   : > { %11993 = vmatpush3.bf16.msra.mxu1 %v13452_v57  ;;  %12033 = vmatpush3.bf16.msra.mxu0 %v13453_v0 }
 0x7b7   : > { %v5434_v11 = vpop.f32.mrb[176].mxu1  ;;  %v5507_v48 = vpop.f32.mrb[192].mxu0 }
 0x7b8   : > { %v5435_v17 = vadd.f32 %v5434_v11, %v15853_v49  ;;  %v5508_v41 = vadd.f32 %v5507_v48, %v15856_v36  ;;  %v5436_v33 = vpop.f32.mrb[177].mxu1  ;;  %v5509_v34 = vpop.f32.mrb[193].mxu0 }
 0x7b9   : > { %v5437_v54 = vadd.f32 %v5436_v33, %v15859_v19  ;;  %v5510_v6 = vadd.f32 %v5509_v34, %v15862_v47  ;;  %v5438_v1 = vpop.f32.mrb[178].mxu1  ;;  %v5511_v21 = vpop.f32.mrb[194].mxu0 }
 0x7ba   : > { %v15870_v12 = vadd.f32 %v5435_v17, %v17655_v52  ;;  %v5439_v15 = vadd.f32 %v5438_v1, %v15853_v49  ;;  %v5512_v23 = vadd.f32 %v5511_v21, %v15856_v36  ;;  %v5440_v3 = vpop.f32.mrb[179].mxu1  ;;  %v5513_v59 = vpop.f32.mrb[195].mxu0  ;;  %v15886_v55 = vadd.f32 %v5508_v41, %v17658_v9 }
 0x7bb   : > { %v15876_v39 = vadd.f32 %v5437_v54, %v17656_v22  ;;  %v15880_v44 = vadd.f32 %v5510_v6, %v17657_v42  ;;  %v5441_v62 = vadd.f32 %v5440_v3, %v15859_v19  ;;  %v5514_v29 = vadd.f32 %v5513_v59, %v15862_v47 }
 0x7bc   : > { %v15890_v58 = vadd.f32 %v5439_v15, %v17659_v53  ;;  %v15894_v20 = vadd.f32 %v5512_v23, %v17660_v25  ;;  %v17548_v40 = vmax.f32 %v15870_v12, 0.0  ;;  %v17545_v38 = vmax.f32 %v15886_v55, 0.0 }
 0x7bd   : > { %v15898_v28 = vadd.f32 %v5441_v62, %v17661_v13  ;;  %v15902_v46 = vadd.f32 %v5514_v29, %v17662_v27  ;;  %v17547_v43 = vmax.f32 %v15876_v39, 0.0  ;;  %v17546_v32 = vmax.f32 %v15880_v44, 0.0 }
 0x7be   : > { %v17544_v30 = vmax.f32 %v15890_v58, 0.0  ;;  %v17543_v31 = vmax.f32 %v15894_v20, 0.0  ;;  %v17663_v52 = vmax.f32 %v15172_v5, 0.0  ;;  %v17664_v42 = vmax.f32 %v15175_v60, 0.0 }
 0x7bf   : > { %v17532_v18 = vmax.f32 %v15898_v28, 0.0  ;;  %v17531_v37 = vmax.f32 %v15902_v46, 0.0  ;;  %v5444_v45 = vpop.f32.mrb[180].mxu1  ;;  %v5517_v57 = vpop.f32.mrb[196].mxu0  ;;  %v17665_v29 = vmax.f32 %v15178_v61, 0.0  ;;  %v17666_v25 = vmax.f32 %v15181_v51, 0.0 }
 0x7c0   : > { %v5610_v0 = vpack.c.bf16 %v17544_v30, %v17548_v40  ;;  %v5445_v14 = vadd.f32 %v5444_v45, %v15853_v49  ;;  %v5518_v11 = vadd.f32 %v5517_v57, %v15856_v36  ;;  %v5446_v48 = vpop.f32.mrb[181].mxu1  ;;  %v5519_v17 = vpop.f32.mrb[197].mxu0  ;;  %v5612_v21 = vpack.c.bf16 %v17543_v31, %v17545_v38 }
 0x7c1   : > { %v5447_v41 = vadd.f32 %v5446_v48, %v15859_v19  ;;  %v5520_v33 = vadd.f32 %v5519_v17, %v15862_v47  ;;  %v5448_v34 = vpop.f32.mrb[182].mxu1  ;;  %v5521_v54 = vpop.f32.mrb[198].mxu0  ;;  %v5611_v6 = vpack.c.bf16 %v17532_v18, %v17547_v43  ;;  %v5613_v1 = vpack.c.bf16 %v17531_v37, %v17546_v32  ;;  %v17698_v37 = vld [vmem:[#allocation32_spill] sm:$0xff] }
 0x7c2   : > { %v15934_v15 = vadd.f32 %v5445_v14, %v17663_v52  ;;  %v5449_v23 = vadd.f32 %v5448_v34, %v15853_v49  ;;  %v5522_v3 = vadd.f32 %v5521_v54, %v15856_v36  ;;  %v5450_v59 = vpop.f32.mrb[183].mxu1  ;;  %v5523_v22 = vpop.f32.mrb[199].mxu0  ;;  %v15950_v13 = vadd.f32 %v5518_v11, %v17666_v25 }
 0x7c3   : > { %v15940_v62 = vadd.f32 %v5447_v41, %v17664_v42  ;;  %v15944_v9 = vadd.f32 %v5520_v33, %v17665_v29  ;;  %v5451_v53 = vadd.f32 %v5450_v59, %v15859_v19  ;;  %v5524_v5 = vadd.f32 %v5523_v22, %v15862_v47  ;;  %5915 = vmatprep.mubr.bf16.mxu1 %v5611_v6 }
 0x7c4   : > { %v17667_v27 = vmax.f32 %v15184_v16, 0.0  ;;  %v17668_v60 = vmax.f32 %v15187_v63, 0.0  ;;  %5980 = vmatprep.mubr.bf16.mxu0 %v5613_v1  ;;  %5916 = vmatmul.mubr.bf16.vlgmr.msra.gmra.mrb[192].mxu1 %v5610_v0  ;;  %v17669_v61 = vmax.f32 %v15190_v2, 0.0  ;;  %v17670_v48 = vmax.f32 %v15193_v4, 0.0 }
 0x7c5   : > { %5981 = vmatmul.mubr.bf16.vlgmr.msra.gmra.mrb[208].mxu0 %v5612_v21  ;;  %v17526_v51 = vmax.f32 %v15934_v15, 0.0  ;;  %v17525_v63 = vmax.f32 %v15940_v62, 0.0  ;;  %v17522_v41 = vmax.f32 %v15944_v9, 0.0  ;;  %v17521_v4 = vmax.f32 %v15950_v13, 0.0 }
 0x7c6   : > { %v15954_v45 = vadd.f32 %v5449_v23, %v17667_v27  ;;  %v15958_v57 = vadd.f32 %v5522_v3, %v17668_v60  ;;  %v15962_v14 = vadd.f32 %v5451_v53, %v17669_v61  ;;  %v15966_v17 = vadd.f32 %v5524_v5, %v17670_v48 }
 0x7c7   : > { %v5454_v33 = vpop.f32.mrb[184].mxu1  ;;  %v5527_v34 = vpop.f32.mrb[200].mxu0  ;;  %v17671_v53 = vmax.f32 %v15220_v7, 0.0  ;;  %v17699_v18 = vmax.f32 %v17698_v37, 0.0 }
 0x7c8   : > { %v17520_v16 = vmax.f32 %v15954_v45, 0.0  ;;  %v17519_v11 = vmax.f32 %v15958_v57, 0.0  ;;  %v17518_v0 = vmax.f32 %v15962_v14, 0.0  ;;  %v17517_v2 = vmax.f32 %v15966_v17, 0.0  ;;  %v5456_v1 = vpop.f32.mrb[185].mxu1  ;;  %v5529_v21 = vpop.f32.mrb[201].mxu0 }
 0x7c9   : > { %v5455_v54 = vadd.f32 %v5454_v33, %v15853_v49  ;;  %v5528_v6 = vadd.f32 %v5527_v34, %v15856_v36  ;;  %v5457_v23 = vadd.f32 %v5456_v1, %v15859_v19  ;;  %v5530_v3 = vadd.f32 %v5529_v21, %v15862_v47  ;;  %v5458_v59 = vpop.f32.mrb[186].mxu1  ;;  %v5531_v22 = vpop.f32.mrb[202].mxu0 }
 0x7ca   : > { %v5614_v52 = vpack.c.bf16 %v17520_v16, %v17526_v51  ;;  %v5615_v42 = vpack.c.bf16 %v17518_v0, %v17525_v63  ;;  %v5617_v29 = vpack.c.bf16 %v17517_v2, %v17522_v41  ;;  %v5459_v25 = vadd.f32 %v5458_v59, %v15853_v49  ;;  %v5460_v60 = vpop.f32.mrb[187].mxu1  ;;  %v5533_v61 = vpop.f32.mrb[203].mxu0  ;;  %v17674_v59 = vld [vmem:[#allocation23_spill] sm:$0xff]  ;;  %v17677_v2 = vld [vmem:[#allocation24_spill] sm:$0xff] }
 0x7cb   : > { %v15994_v5 = vadd.f32 %v5455_v54, %v17671_v53  ;;  %v5532_v27 = vadd.f32 %v5531_v22, %v15856_v36  ;;  %v5616_v48 = vpack.c.bf16 %v17519_v11, %v17521_v4  ;;  %v17672_v33 = vmax.f32 %v15223_v26, 0.0  ;;  %v17680_v26 = vld [vmem:[#allocation25_spill] sm:$0xff] }
 0x7cc   : > { %v17673_v1 = vmax.f32 %v15226_v35, 0.0  ;;  %v5461_v54 = vadd.f32 %v5460_v60, %v15859_v19  ;;  %v5534_v21 = vadd.f32 %v5533_v61, %v15862_v47  ;;  %5923 = vmatprep.mubr.bf16.mxu1 %v5615_v42  ;;  %v17675_v22 = vmax.f32 %v17674_v59, 0.0  ;;  %5988 = vmatprep.mubr.bf16.mxu0 %v5617_v29  ;;  %v17683_v35 = vld [vmem:[#allocation26_spill] sm:$0xff]  ;;  %v17686_v61 = vld [vmem:[#allocation27_spill] sm:$0xff] }
 0x7cd   : > { %v16004_v34 = vadd.f32 %v5457_v23, %v17672_v33  ;;  %v17678_v0 = vmax.f32 %v17677_v2, 0.0  ;;  %v17681_v23 = vmax.f32 %v17680_v26, 0.0  ;;  %5924 = vmatmul.mubr.bf16.gmra.mrb[196].mxu1 %v5614_v52  ;;  %v17687_v42 = vmax.f32 %v17686_v61, 0.0  ;;  %5989 = vmatmul.mubr.bf16.gmra.mrb[212].mxu0 %v5616_v48 }
 0x7ce   : > { %v16008_v7 = vadd.f32 %v5530_v3, %v17673_v1  ;;  %v16014_v53 = vadd.f32 %v5528_v6, %v17675_v22  ;;  %v17684_v3 = vmax.f32 %v17683_v35, 0.0  ;;  %v17530_v59 = vmax.f32 %v15994_v5, 0.0 }
 0x7cf   : > { %v16018_v11 = vadd.f32 %v5459_v25, %v17678_v0  ;;  %v16022_v33 = vadd.f32 %v5532_v27, %v17681_v23  ;;  %v16030_v1 = vadd.f32 %v5534_v21, %v17687_v42  ;;  %v17524_v2 = vmax.f32 %v16004_v34, 0.0  ;;  %v5464_v27 = vpop.f32.mrb[188].mxu1 }
 0x7d0   : > { %17676 = vst [vmem:[#allocation23_spill] sm:$0xff] %v16014_v53  ;;  %v16026_v60 = vadd.f32 %v5461_v54, %v17684_v3  ;;  %v17528_v25 = vmax.f32 %v16008_v7, 0.0  ;;  %v5537_v54 = vpop.f32.mrb[204].mxu0  ;;  %v17542_v21 = vmax.f32 %v16014_v53, 0.0  ;;  %v5465_v48 = vadd.f32 %v5464_v27, %v15853_v49  ;;  %v5466_v26 = vpop.f32.mrb[189].mxu1 }
 0x7d1   : > { %17679 = vst [vmem:[#allocation24_spill] sm:$0xff] %v16018_v11  ;;  %17682 = vst [vmem:[#allocation25_spill] sm:$0xff] %v16022_v33  ;;  %v17529_v6 = vmax.f32 %v16018_v11, 0.0  ;;  %v17533_v0 = vmax.f32 %v16022_v33, 0.0  ;;  %v17527_v52 = vmax.f32 %v16030_v1, 0.0  ;;  %v5538_v22 = vadd.f32 %v5537_v54, %v15856_v36  ;;  %v5539_v23 = vpop.f32.mrb[205].mxu0 }
 0x7d2   : > { %17685 = vst [vmem:[#allocation26_spill] sm:$0xff] %v16026_v60  ;;  %17688 = vst [vmem:[#allocation27_spill] sm:$0xff] %v16030_v1  ;;  %v17523_v29 = vmax.f32 %v16026_v60, 0.0  ;;  %v5467_v35 = vadd.f32 %v5466_v26, %v15859_v19  ;;  %v5540_v3 = vadd.f32 %v5539_v23, %v15862_v47  ;;  %v5468_v61 = vpop.f32.mrb[190].mxu1  ;;  %v5541_v42 = vpop.f32.mrb[206].mxu0 }
 0x7d3   : > { %v5621_v27 = vpack.c.bf16 %v17527_v52, %v17528_v25  ;;  %v5469_v54 = vadd.f32 %v5468_v61, %v15853_v49  ;;  %v5542_v4 = vadd.f32 %v5541_v42, %v15856_v36  ;;  %v5470_v41 = vpop.f32.mrb[191].mxu1  ;;  %v5543_v26 = vpop.f32.mrb[207].mxu0  ;;  %v5618_v23 = vpack.c.bf16 %v17529_v6, %v17530_v59  ;;  %v17692_v52 = vld [vmem:[#allocation30_spill] sm:$0xff]  ;;  %v17695_v25 = vld [vmem:[#allocation28_spill] sm:$0xff] }
 0x7d4   : > { %v5619_v16 = vpack.c.bf16 %v17523_v29, %v17524_v2  ;;  %v5620_v29 = vpack.c.bf16 %v17533_v0, %v17542_v21  ;;  %v17689_v2 = vld [vmem:[#allocation29_spill] sm:$0xff]  ;;  %v17693_v49 = vmax.f32 %v17692_v52, 0.0  ;;  %v5471_v36 = vadd.f32 %v5470_v41, %v15859_v19  ;;  %v17704_v52 = vld [vmem:[#allocation31_spill] sm:$0xff] }
 0x7d5   : > { %v17690_v63 = vmax.f32 %v17689_v2, 0.0  ;;  %v5544_v42 = vadd.f32 %v5543_v26, %v15862_v47  ;;  %v17696_v6 = vmax.f32 %v17695_v25, 0.0  ;;  %v16078_v0 = vadd.f32 %v5469_v54, %v17699_v18  ;;  %v17701_v2 = vld [vmem:[#allocation33_spill] sm:$0xff]  ;;  %5996 = vmatprep.mubr.bf16.mxu0 %v5621_v27  ;;  %v17707_v47 = vld [vmem:[#allocation34_spill] sm:$0xff] }
 0x7d6   : > { %v16068_v61 = vadd.f32 %v5540_v3, %v17693_v49  ;;  %5931 = vmatprep.mubr.bf16.mxu1 %v5619_v16  ;;  %v17705_v3 = vmax.f32 %v17704_v52, 0.0  ;;  %v17708_v16 = vmax.f32 %v17707_v47, 0.0  ;;  %5997 = vmatmul.mubr.bf16.gmra.mrb[216].mxu0 %v5620_v29  ;;  %v13456_v52 = vld [vmem:[%s17713_s27 + $0x40] sm:$0xff]   ;;  %v13458_v47 = vld [vmem:[%s17713_s27 + $0xc8] sm:$0xff]  }
 0x7d7   : > { %v16064_v51 = vadd.f32 %v5467_v35, %v17690_v63  ;;  %v16074_v59 = vadd.f32 %v5465_v48, %v17696_v6  ;;  %17700 = vst [vmem:[#allocation32_spill] sm:$0xff] %v16078_v0  ;;  %v17702_v63 = vmax.f32 %v17701_v2, 0.0  ;;  %5932 = vmatmul.mubr.bf16.gmra.mrb[200].mxu1 %v5618_v23  ;;  %v17710_v6 = vld [vmem:[#allocation35_spill] sm:$0xff]  ;;  %v17538_v37 = vmax.f32 %v16078_v0, 0.0  ;;  %v13454_v2 = vld [vmem:[%s17713_s27 + $0xc0] sm:$0xff]   ;;  %12058 = vmatprep.subr.bf16.mxu1 %v13456_v52 }
 0x7d8   : > { %17694 = vst [vmem:[#allocation30_spill] sm:$0xff] %v16068_v61  ;;  %v16086_v19 = vadd.f32 %v5538_v22, %v17705_v3  ;;  %v16090_v41 = vadd.f32 %v5471_v36, %v17708_v16  ;;  %v17711_v25 = vmax.f32 %v17710_v6, 0.0  ;;  %12122 = vmatprep.subr.bf16.mxu0 %v13454_v2  ;;  %v13457_v3 = vld [vmem:[%s17713_s27] sm:$0xff]   ;;  %v13459_v16 = vld [vmem:[%s17713_s27 + $0x88] sm:$0xff]   ;;  %v13466_v2 = vld [vmem:[%s17713_s27 + $0xd8] sm:$0xff]  }
 0x7d9   : > { %17691 = vst [vmem:[#allocation29_spill] sm:$0xff] %v16064_v51  ;;  %17697 = vst [vmem:[#allocation28_spill] sm:$0xff] %v16074_v59  ;;  %v16082_v35 = vadd.f32 %v5542_v4, %v17702_v63  ;;  %v17541_v18 = vmax.f32 %v16064_v51, 0.0  ;;  %v17540_v4 = vmax.f32 %v16068_v61, 0.0  ;;  %v17539_v26 = vmax.f32 %v16074_v59, 0.0  ;;  %v13455_v63 = vld [vmem:[%s17713_s27 + $0x80] sm:$0xff]   ;;  %12059 = vmatpush3.bf16.msra.mxu1 %v13457_v3 }
 0x7da   : > { %17706 = vst [vmem:[#allocation31_spill] sm:$0xff] %v16086_v19  ;;  %17709 = vst [vmem:[#allocation34_spill] sm:$0xff] %v16090_v41  ;;  %v16094_v48 = vadd.f32 %v5544_v42, %v17711_v25  ;;  %v17535_v22 = vmax.f32 %v16090_v41, 0.0  ;;  %v17536_v23 = vmax.f32 %v16086_v19, 0.0  ;;  %12123 = vmatpush3.bf16.msra.mxu0 %v13455_v63  ;;  %v13460_v6 = vld [vmem:[%s17713_s27 + $0x48] sm:$0xff]   ;;  %v13467_v63 = vld [vmem:[%s17713_s27 + $0x98] sm:$0xff]  }
 0x7db   : > { %17703 = vst [vmem:[#allocation33_spill] sm:$0xff] %v16082_v35  ;;  %v17537_v27 = vmax.f32 %v16082_v35, 0.0  ;;  %v5622_v36 = vpack.c.bf16 %v17538_v37, %v17539_v26  ;;  %12124 = vmatprep.subr.bf16.mxu0 %v13458_v47  ;;  %v13461_v25 = vld [vmem:[%s17713_s27 + $0x8] sm:$0xff]   ;;  %12060 = vmatprep.subr.bf16.mxu1 %v13460_v6  ;;  %v13468_v52 = vld [vmem:[%s17713_s27 + $0x58] sm:$0xff]   ;;  %v13470_v47 = vld [vmem:[%s17713_s27 + $0xe0] sm:$0xff]  }
 0x7dc   : > { %17712 = vst [vmem:[#allocation35_spill] sm:$0xff] %v16094_v48  ;;  %v17534_v54 = vmax.f32 %v16094_v48, 0.0  ;;  %v5623_v29 = vpack.c.bf16 %v17535_v22, %v17541_v18  ;;  %v13469_v3 = vld [vmem:[%s17713_s27 + $0x18] sm:$0xff]   ;;  %v13472_v6 = vld [vmem:[%s17713_s27 + $0x60] sm:$0xff]  }
 0x7dd   : > { %v5624_v42 = vpack.c.bf16 %v17537_v27, %v17536_v23  ;;  %12061 = vmatpush3.bf16.msra.mxu1 %v13461_v25  ;;  %v13473_v25 = vld [vmem:[%s17713_s27 + $0x20] sm:$0xff]  }
 0x7de   : > { %v5625_v49 = vpack.c.bf16 %v17534_v54, %v17540_v4  ;;  %5939 = vmatprep.mubr.bf16.mxu1 %v5623_v29  ;;  %12125 = vmatpush3.bf16.msra.mxu0 %v13459_v16  ;;  %v13462_v29 = vld [vmem:[%s17713_s27 + $0xd0] sm:$0xff]   ;;  %v13471_v16 = vld [vmem:[%s17713_s27 + $0xa0] sm:$0xff]  }
 0x7df   : > { %5940 = vmatmul.mubr.bf16.gmra.mrb[204].mxu1 %v5622_v36  ;;  %12126 = vmatprep.subr.bf16.mxu0 %v13462_v29  ;;  %v13464_v36 = vld [vmem:[%s17713_s27 + $0x50] sm:$0xff]   ;;  %v13474_v29 = vld [vmem:[%s17713_s27 + $0xe8] sm:$0xff]  }
 0x7e0   : > { %6004 = vmatprep.mubr.bf16.mxu0 %v5625_v49  ;;  %v13463_v49 = vld [vmem:[%s17713_s27 + $0x90] sm:$0xff]   ;;  %12062 = vmatprep.subr.bf16.mxu1 %v13464_v36  ;;  %v13476_v36 = vld [vmem:[%s17713_s27 + $0x68] sm:$0xff]  }
 0x7e1   : > { %6005 = vmatmul.mubr.bf16.gmra.mrb[220].mxu0 %v5624_v42  ;;  %v13465_v42 = vld [vmem:[%s17713_s27 + $0x10] sm:$0xff]  }
 0x7e2   : > { %12127 = vmatpush3.bf16.msra.mxu0 %v13463_v49  ;;  %12063 = vmatpush3.bf16.msra.mxu1 %v13465_v42  ;;  %v13475_v49 = vld [vmem:[%s17713_s27 + $0xa8] sm:$0xff]  }
 0x7e3   : > { %12128 = vmatprep.subr.bf16.mxu0 %v13466_v2  ;;  %12064 = vmatprep.subr.bf16.mxu1 %v13468_v52  ;;  %v13477_v42 = vld [vmem:[%s17713_s27 + $0x28] sm:$0xff]   ;;  %v13478_v2 = vld [vmem:[%s17713_s27 + $0xf0] sm:$0xff]  }
 0x7e4   : > { %v13480_v52 = vld [vmem:[%s17713_s27 + $0x70] sm:$0xff]  }
 0x7e6   : > { %12129 = vmatpush3.bf16.msra.mxu0 %v13467_v63  ;;  %12065 = vmatpush3.bf16.msra.mxu1 %v13469_v3  ;;  %v13479_v63 = vld [vmem:[%s17713_s27 + $0xb0] sm:$0xff]  }
 0x7e7   : > { %12130 = vmatprep.subr.bf16.mxu0 %v13470_v47  ;;  %12066 = vmatprep.subr.bf16.mxu1 %v13472_v6  ;;  %v13481_v3 = vld [vmem:[%s17713_s27 + $0x30] sm:$0xff]   ;;  %v13482_v47 = vld [vmem:[%s17713_s27 + $0xf8] sm:$0xff]  }
 0x7e8   : > { %v13484_v6 = vld [vmem:[%s17713_s27 + $0x78] sm:$0xff]  }
 0x7ea   : > { %12131 = vmatpush3.bf16.msra.mxu0 %v13471_v16  ;;  %12067 = vmatpush3.bf16.msra.mxu1 %v13473_v25  ;;  %v13483_v16 = vld [vmem:[%s17713_s27 + $0xb8] sm:$0xff]  }
 0x7eb   : > { %12132 = vmatprep.subr.bf16.mxu0 %v13474_v29  ;;  %12068 = vmatprep.subr.bf16.mxu1 %v13476_v36  ;;  %v13485_v25 = vld [vmem:[%s17713_s27 + $0x38] sm:$0xff]   ;;  %v13486_v29 = vld [vmem:[%s17713_s27 + $0x140] sm:$0xff]  }
 0x7ee   : > { %12133 = vmatpush3.bf16.msra.mxu0 %v13475_v49  ;;  %12069 = vmatpush3.bf16.msra.mxu1 %v13477_v42  ;;  %v13494_v49 = vld [vmem:[%s17713_s27 + $0x1c0] sm:$0xff]  }
 0x7ef   : > { %12134 = vmatprep.subr.bf16.mxu0 %v13478_v2  ;;  %12070 = vmatprep.subr.bf16.mxu1 %v13480_v52  ;;  %v16225_v2 = vld [vmem:[%s17459_s14 + $0x7] ss:$0 sm:$0xff] }
 0x7f2   : > { %12135 = vmatpush3.bf16.msra.mxu0 %v13479_v63  ;;  %12071 = vmatpush3.bf16.msra.mxu1 %v13481_v3 }
 0x7f3   : > { %12136 = vmatprep.subr.bf16.mxu0 %v13482_v47  ;;  %12072 = vmatprep.subr.bf16.mxu1 %v13484_v6 }
 0x7f6   : > { %12137 = vmatpush3.bf16.msra.mxu0 %v13483_v16  ;;  %12073 = vmatpush3.bf16.msra.mxu1 %v13485_v25 }
 0x7f7   : > { %12186 = vmatprep.subr.bf16.mxu1 %v13486_v29  ;;  %12250 = vmatprep.subr.bf16.mxu0 %v13494_v49 }
 0x897   : > { %v11994_v36 = vpop.f32.mrb[192].mxu1 }
 0x898   : > { %v12034_v42 = vpop.f32.mrb[208].mxu0  ;;  %v11995_v63 = vpop.f32.mrb[193].mxu1 }
 0x899   : > { %v11996_v52 = vadd.f32 %v11995_v63, %v11994_v36  ;;  %v12035_v3 = vpop.f32.mrb[209].mxu0  ;;  %v11997_v47 = vpop.f32.mrb[194].mxu1 }
 0x89a   : > { %v12036_v16 = vadd.f32 %v12035_v3, %v12034_v42  ;;  %v12037_v6 = vpop.f32.mrb[210].mxu0  ;;  %v11998_v25 = vpop.f32.mrb[195].mxu1 }
 0x89b   : > { %v5918_v29 = vadd.f32 %v11996_v52, %v16225_v2  ;;  %v11999_v54 = vadd.f32 %v11998_v25, %v11997_v47  ;;  %v12038_v22 = vpop.f32.mrb[211].mxu0 }
 0x89c   : > { %v12039_v23 = vadd.f32 %v12038_v22, %v12037_v6 }
 0x89d   : > { %v5983_v49 = vadd.f32 %v12036_v16, %v5918_v29  ;;  %v5921_v27 = vadd.f32 %v11999_v54, %v16225_v2 }
 0x89f   : > { %v6013_v37 = vmax.f32 %v5983_v49, 0.0  ;;  %v5986_v26 = vadd.f32 %v12039_v23, %v5921_v27 }
 0x8a0   : > { %v12000_v4 = vpop.f32.mrb[196].mxu1  ;;  %v12040_v18 = vpop.f32.mrb[212].mxu0 }
 0x8a1   : > { %v12001_v21 = vpop.f32.mrb[197].mxu1  ;;  %v11266_v31 = vpack.c.bf16 %v6013_v37, %v6013_v37  ;;  %v6014_v36 = vmax.f32 %v5986_v26, 0.0  ;;  %v12041_v30 = vpop.f32.mrb[213].mxu0 }
 0x8a2   : > { %v12002_v63 = vadd.f32 %v12001_v21, %v12000_v4  ;;  %v12003_v42 = vpop.f32.mrb[198].mxu1  ;;  %v12042_v3 = vadd.f32 %v12041_v30, %v12040_v18  ;;  %v12043_v38 = vpop.f32.mrb[214].mxu0 }
 0x8a3   : > { %v12004_v32 = vpop.f32.mrb[199].mxu1  ;;  %v6045_v52 = vrot.slane %v11266_v31, 7  ;;  %v11267_v47 = vpack.c.bf16 %v6014_v36, %v6014_v36  ;;  %v12044_v6 = vpop.f32.mrb[215].mxu0 }
 0x8a4   : > { %v5926_v22 = vadd.f32 %v12002_v63, %v16225_v2  ;;  %v12005_v16 = vadd.f32 %v12004_v32, %v12003_v42  ;;  %v12045_v54 = vadd.f32 %v12044_v6, %v12043_v38  ;;  %v6083_v38 = vshll.u32 %v15836_v24, 16 }
 0x8a5   : > { %6061 = vst [vmem:[#allocation2 + $0x8] sm:$0x1e] %v6045_v52  ;;  %v6046_v27 = vrot.slane %v11267_v47, 7 }
 0x8a6   : > { %v5991_v23 = vadd.f32 %v12042_v3, %v5926_v22  ;;  %v5929_v25 = vadd.f32 %v12005_v16, %v16225_v2 }
 0x8a7   : > { %6062 = vst [vmem:[#allocation2 + $0x10] sm:$0x1e] %v6046_v27  ;;  %v16234_v27 = vrot.slane %v15836_v24, 1 }
 0x8a8   : > { %v6015_v37 = vmax.f32 %v5991_v23, 0.0  ;;  %v5994_v21 = vadd.f32 %v12045_v54, %v5929_v25 }
 0x8a9   : > { %v12046_v26 = vpop.f32.mrb[216].mxu0 }
 0x8aa   : > { %v12006_v4 = vpop.f32.mrb[200].mxu1  ;;  %v11268_v18 = vpack.c.bf16 %v6015_v37, %v6015_v37  ;;  %v6016_v29 = vmax.f32 %v5994_v21, 0.0  ;;  %v12047_v49 = vpop.f32.mrb[217].mxu0 }
 0x8ab   : > { %v12007_v30 = vpop.f32.mrb[201].mxu1  ;;  %v12048_v63 = vadd.f32 %v12047_v49, %v12046_v26  ;;  %v12049_v32 = vpop.f32.mrb[218].mxu0 }
 0x8ac   : > { %v12008_v31 = vadd.f32 %v12007_v30, %v12006_v4  ;;  %v12009_v36 = vpop.f32.mrb[202].mxu1  ;;  %v6047_v52 = vrot.slane %v11268_v18, 7  ;;  %v11269_v3 = vpack.c.bf16 %v6016_v29, %v6016_v29  ;;  %v12050_v16 = vpop.f32.mrb[219].mxu0  ;;  %v6070_v54 = vld [vmem:[#allocation2 + $0x8] sm:$0xff]  ;;  %v17553_v18 = vshrl.u32 %v15836_v24, 16 }
 0x8ad   : > { %v12010_v42 = vpop.f32.mrb[203].mxu1  ;;  %v12051_v6 = vadd.f32 %v12050_v16, %v12049_v32  ;;  %v6088_v21 = vshll.u32 %v6070_v54, 16  ;;  %v6092_v26 = vshrl.u32 %v6070_v54, 16  ;;  %v6160_v30 = vrot.slane %v6070_v54, 1 }
 0x8ae   : > { %v5934_v47 = vadd.f32 %v12008_v31, %v16225_v2  ;;  %v12011_v22 = vadd.f32 %v12010_v42, %v12009_v36  ;;  %6063 = vst [vmem:[#allocation2 + $0x18] sm:$0x1e] %v6047_v52  ;;  %v6048_v23 = vrot.slane %v11269_v3, 7  ;;  %v16237_v4 = vld [vmem:[#allocation2 + $0x10] sm:$0xff]  ;;  %v16240_v29 = vrot.slane %v6083_v38, 1 }
 0x8af   : > { %v6090_v32 = vrot.slane %v6088_v21, 1  ;;  %v6096_v42 = vshll.u32 %v16237_v4, 16  ;;  %v6161_v3 = vsel %vm1620_vm0, %v16234_v27, %v6160_v30 }
 0x8b0   : > { %v5999_v25 = vadd.f32 %v12048_v63, %v5934_v47  ;;  %v5937_v37 = vadd.f32 %v12011_v22, %v16225_v2  ;;  %6064 = vst [vmem:[#allocation2 + $0x20] sm:$0x1e] %v6048_v23  ;;  %v6162_v47 = vrot.slane %v16237_v4, 1  ;;  %v16252_v48 = vor.u32 %v16240_v29, %v17553_v18 }
 0x8b1   : > { %v6094_v40 = vor.u32 %v6092_v26, %v6090_v32  ;;  %v6100_v26 = vshrl.u32 %v16237_v4, 16 }
 0x8b2   : > { %v6017_v31 = vmax.f32 %v5999_v25, 0.0  ;;  %v6002_v49 = vadd.f32 %v12051_v6, %v5937_v37  ;;  %v12012_v36 = vpop.f32.mrb[204].mxu1  ;;  %v6098_v37 = vrot.slane %v6096_v42, 1  ;;  %v16247_v21 = vsel %vm1620_vm0, %v6160_v30, %v6162_v47 }
 0x8b3   : > { %v12013_v63 = vpop.f32.mrb[205].mxu1  ;;  %v6358_v42 = vshll.u32 %v6161_v3, 16 }
 0x8b4   : > { %v12052_v52 = vpop.f32.mrb[220].mxu0  ;;  %v11270_v22 = vpack.c.bf16 %v6017_v31, %v6017_v31  ;;  %v6018_v16 = vmax.f32 %v6002_v49, 0.0  ;;  %v12014_v54 = vadd.f32 %v12013_v63, %v12012_v36  ;;  %v12015_v38 = vpop.f32.mrb[206].mxu1 }
 0x8b5   : > { %v12053_v43 = vpop.f32.mrb[221].mxu0  ;;  %v12016_v6 = vpop.f32.mrb[207].mxu1  ;;  %v6360_v18 = vrot.slane %v6358_v42, 1 }
 0x8b6   : > { %v12054_v23 = vadd.f32 %v12053_v43, %v12052_v52  ;;  %v12055_v25 = vpop.f32.mrb[222].mxu0  ;;  %v6049_v41 = vrot.slane %v11270_v22, 7  ;;  %v11271_v19 = vpack.c.bf16 %v6018_v16, %v6018_v16  ;;  %v5942_v31 = vadd.f32 %v12014_v54, %v16225_v2  ;;  %v6072_v16 = vld [vmem:[#allocation2 + $0x18] sm:$0xff] }
 0x8b7   : > { %v12017_v49 = vadd.f32 %v12016_v6, %v12015_v38  ;;  %v12056_v36 = vpop.f32.mrb[223].mxu0  ;;  %v16256_v43 = vsel %vm1540_vm1, %v6094_v40, %v6098_v37  ;;  %v6356_v22 = vshrl.u32 %v6161_v3, 16  ;;  %v6363_v54 = vshll.u32 %v16247_v21, 16  ;;  %v13495_v3 = vld [vmem:[%s17713_s27 + $0x180] sm:$0xff]  }
 0x8b8   : > { %v12057_v63 = vadd.f32 %v12056_v36, %v12055_v25  ;;  %6065 = vst [vmem:[#allocation2 + $0x28] sm:$0x1e] %v6049_v41  ;;  %v6050_v30 = vrot.slane %v11271_v19, 7  ;;  %v6007_v52 = vadd.f32 %v12054_v23, %v5942_v31  ;;  %7118 = vmatprep.mubr.bf16.mxu0 %v16256_v43  ;;  %v6091_v38 = vsel %vm1540_vm1, %v16252_v48, %v6090_v32  ;;  %v13498_v32 = vld [vmem:[%s17713_s27 + $0x1c8] sm:$0xff]  }
 0x8b9   : > { %v5945_v35 = vadd.f32 %v12017_v49, %v16225_v2  ;;  %v6351_v40 = vshll.u32 %v16256_v43, 16  ;;  %v6344_v41 = vshrl.u32 %v6091_v38, 16  ;;  %v6346_v19 = vshll.u32 %v6091_v38, 16 }
 0x8ba   : > { %6066 = vst [vmem:[#allocation2 + $0x30] sm:$0x1e] %v6050_v30  ;;  %v6019_v4 = vmax.f32 %v6007_v52, 0.0  ;;  %v6361_v23 = vor.u32 %v6360_v18, %v6356_v22  ;;  %v6365_v6 = vrot.slane %v6363_v54, 1  ;;  %v6104_v31 = vshll.u32 %v6072_v16, 16  ;;  %v16273_v52 = vld [vmem:[#allocation2 + $0x20] sm:$0xff] }
 0x8bb   : > { %v6010_v25 = vadd.f32 %v12057_v63, %v5945_v35  ;;  %v6353_v2 = vrot.slane %v6351_v40, 1  ;;  %v6348_v42 = vrot.slane %v6346_v19, 1  ;;  %v6164_v0 = vrot.slane %v6072_v16, 1 }
 0x8bc   : > { %v11272_v49 = vpack.c.bf16 %v6019_v4, %v6019_v4  ;;  %v6102_v30 = vor.u32 %v6100_v26, %v6098_v37  ;;  %v6367_v35 = vshrl.u32 %v16256_v43, 16  ;;  %v6366_v18 = vsel %vm1540_vm1, %v6361_v23, %v6365_v6  ;;  %v13487_v37 = vld [vmem:[%s17713_s27 + $0x100] sm:$0xff]  }
 0x8bd   : > { %v6020_v36 = vmax.f32 %v6010_v25, 0.0  ;;  %v6106_v63 = vrot.slane %v6104_v31, 1  ;;  %7119 = vmatmul.mubr.bf16.vlgmr.msra.gmra.mrb[224].mxu0 %v6366_v18  ;;  %v6349_v40 = vor.u32 %v6348_v42, %v6344_v41  ;;  %v16276_v4 = vsel %vm1620_vm0, %v6162_v47, %v6164_v0  ;;  %v13499_v41 = vld [vmem:[%s17713_s27 + $0x188] sm:$0xff]   ;;  %v13500_v18 = vld [vmem:[%s17713_s27 + $0x1d0] sm:$0xff]  }
 0x8be   : > { %v6051_v22 = vrot.slane %v11272_v49, 7  ;;  %v6375_v26 = vshrl.u32 %v16247_v21, 16  ;;  %v6379_v19 = vshll.u32 %v16276_v4, 16  ;;  %v6108_v23 = vshrl.u32 %v6072_v16, 16  ;;  %12251 = vmatpush3.bf16.msra.mxu0 %v13495_v3  ;;  %v13488_v21 = vld [vmem:[%s17713_s27 + $0x148] sm:$0xff]  }
 0x8bf   : > { %v11273_v54 = vpack.c.bf16 %v6020_v36, %v6020_v36  ;;  %v16279_v25 = vsel %vm1540_vm1, %v6102_v30, %v6106_v63  ;;  %v6354_v31 = vsel %vm1540_vm1, %v6349_v40, %v6353_v2  ;;  %v6112_v36 = vshll.u32 %v16273_v52, 16  ;;  %v16296_v16 = vld [vmem:[#allocation2 + $0x28] sm:$0xff]  ;;  %12252 = vmatprep.subr.bf16.mxu0 %v13498_v32 }
 0x8c0   : > { %6067 = vst [vmem:[#allocation2 + $0x38] sm:$0x1e] %v6051_v22  ;;  %7125 = vmatprep.mubr.bf16.mxu0 %v16279_v25  ;;  %v6371_v49 = vshll.u32 %v16279_v25, 16  ;;  %7029 = vmatprep.mubr.bf16.mxu1 %v6354_v31  ;;  %v6381_v3 = vrot.slane %v6379_v19, 1  ;;  %v6110_v42 = vor.u32 %v6108_v23, %v6106_v63  ;;  %v6166_v30 = vrot.slane %v16273_v52, 1  ;;  %v13489_v32 = vld [vmem:[%s17713_s27 + $0x108] sm:$0xff]  }
 0x8c1   : > { %v6052_v47 = vrot.slane %v11273_v54, 7  ;;  %7030 = vmatmul.mubr.bf16.vlgmr.msra.gmra.mrb[208].mxu1 %v6091_v38  ;;  %v6369_v22 = vor.u32 %v6367_v35, %v6353_v2  ;;  %v6377_v40 = vor.u32 %v6375_v26, %v6365_v6  ;;  %v6114_v59 = vrot.slane %v6112_v36, 1  ;;  %v13501_v35 = vld [vmem:[%s17713_s27 + $0x190] sm:$0xff]  }
 0x8c2   : > { %v6373_v54 = vrot.slane %v6371_v49, 1  ;;  %12187 = vmatpush3.bf16.msra.mxu1 %v13487_v37  ;;  %v16306_v19 = vsel %vm1620_vm0, %v6164_v0, %v6166_v30  ;;  %v6116_v63 = vshrl.u32 %v16273_v52, 16  ;;  %v6120_v23 = vshll.u32 %v16296_v16, 16  ;;  %12253 = vmatpush3.bf16.msra.mxu0 %v13499_v41  ;;  %v13490_v0 = vld [vmem:[%s17713_s27 + $0x150] sm:$0xff]   ;;  %v13504_v49 = vld [vmem:[%s17713_s27 + $0x1d8] sm:$0xff]  }
 0x8c3   : > { %6068 = vst [vmem:[#allocation2 + $0x40] sm:$0x1e] %v6052_v47  ;;  %v16314_v38 = vsel %vm1540_vm1, %v6377_v40, %v6381_v3  ;;  %v16317_v6 = vsel %vm1540_vm1, %v6110_v42, %v6114_v59  ;;  %12188 = vmatprep.subr.bf16.mxu1 %v13488_v21  ;;  %v6383_v2 = vshrl.u32 %v16279_v25, 16  ;;  %v6395_v37 = vshll.u32 %v16306_v19, 16  ;;  %v16329_v31 = vld [vmem:[#allocation2 + $0x30] sm:$0xff]  ;;  %12254 = vmatprep.subr.bf16.mxu0 %v13500_v18 }
 0x8c4   : > { %v16311_v47 = vsel %vm1540_vm1, %v6369_v22, %v6373_v54  ;;  %v6387_v52 = vshll.u32 %v16317_v6, 16  ;;  %v6118_v26 = vor.u32 %v6116_v63, %v6114_v59  ;;  %v6122_v41 = vrot.slane %v6120_v23, 1  ;;  %v13491_v18 = vld [vmem:[%s17713_s27 + $0x110] sm:$0xff]  }
 0x8c5   : > { %7036 = vmatprep.mubr.bf16.mxu1 %v16311_v47  ;;  %7126 = vmatmul.mubr.bf16.gmra.mrb[228].mxu0 %v16314_v38  ;;  %v6385_v36 = vor.u32 %v6383_v2, %v6373_v54  ;;  %v6168_v21 = vrot.slane %v16296_v16, 1  ;;  %v6391_v22 = vshrl.u32 %v16276_v4, 16  ;;  %v6128_v40 = vshll.u32 %v16329_v31, 16  ;;  %v13492_v54 = vld [vmem:[%s17713_s27 + $0x158] sm:$0xff]  }
 0x8c6   : > { %7132 = vmatprep.mubr.bf16.mxu0 %v16317_v6  ;;  %v6389_v42 = vrot.slane %v6387_v52, 1  ;;  %12189 = vmatpush3.bf16.msra.mxu1 %v13489_v32  ;;  %v16339_v59 = vsel %vm1540_vm1, %v6118_v26, %v6122_v41  ;;  %v6397_v23 = vrot.slane %v6395_v37, 1  ;;  %v6124_v32 = vshrl.u32 %v16296_v16, 16  ;;  %v13505_v4 = vld [vmem:[%s17713_s27 + $0x198] sm:$0xff]  }
 0x8c7   : > { %12190 = vmatprep.subr.bf16.mxu1 %v13490_v0  ;;  %12255 = vmatpush3.bf16.msra.mxu0 %v13501_v35  ;;  %v6393_v63 = vor.u32 %v6391_v22, %v6381_v3  ;;  %v6403_v0 = vshll.u32 %v16339_v59, 16  ;;  %v16358_v52 = vsel %vm1620_vm0, %v6166_v30, %v6168_v21  ;;  %v13506_v3 = vld [vmem:[%s17713_s27 + $0x1e0] sm:$0xff]   ;;  %v6130_v35 = vrot.slane %v6128_v40, 1  ;;  %v16367_v37 = vld [vmem:[#allocation2 + $0x38] sm:$0xff]  ;;  %v13510_v40 = vld [vmem:[%s17713_s27 + $0x1e8] sm:$0xff]  }
 0x8c8   : > { %12256 = vmatprep.subr.bf16.mxu0 %v13504_v49  ;;  %v16354_v2 = vsel %vm1540_vm1, %v6385_v36, %v6389_v42  ;;  %v6126_v16 = vor.u32 %v6124_v32, %v6122_v41  ;;  %v13496_v30 = vld [vmem:[%s17713_s27 + $0x160] sm:$0xff]   ;;  %v6411_v49 = vshll.u32 %v16358_v52, 16  ;;  %v6399_v36 = vshrl.u32 %v16317_v6, 16 }
 0x8c9   : > { %7037 = vmatmul.mubr.bf16.gmra.mrb[212].mxu1 %v16256_v43  ;;  %v13493_v43 = vld [vmem:[%s17713_s27 + $0x118] sm:$0xff]   ;;  %v16373_v26 = vsel %vm1540_vm1, %v6393_v63, %v6397_v23  ;;  %v13507_v41 = vld [vmem:[%s17713_s27 + $0x1a0] sm:$0xff]   ;;  %v6405_v22 = vrot.slane %v6403_v0, 1  ;;  %v6136_v63 = vshll.u32 %v16367_v37, 16  ;;  %v13502_v0 = vld [vmem:[%s17713_s27 + $0x168] sm:$0xff]   ;;  %v6415_v51 = vshrl.u32 %v16339_v59, 16 }
 0x8ca   : > { %7043 = vmatprep.mubr.bf16.mxu1 %v16354_v2  ;;  %12191 = vmatpush3.bf16.msra.mxu1 %v13491_v18  ;;  %v6170_v18 = vrot.slane %v16329_v31, 1  ;;  %v13497_v32 = vld [vmem:[%s17713_s27 + $0x120] sm:$0xff]   ;;  %v6413_v61 = vrot.slane %v6411_v49, 1  ;;  %v6140_v60 = vshrl.u32 %v16367_v37, 16 }
 0x8cb   : > { %12192 = vmatprep.subr.bf16.mxu1 %v13492_v54  ;;  %12257 = vmatpush3.bf16.msra.mxu0 %v13505_v4  ;;  %v16387_v54 = vsel %vm1540_vm1, %v6126_v16, %v6130_v35  ;;  %v6401_v4 = vor.u32 %v6399_v36, %v6389_v42  ;;  %v13511_v16 = vld [vmem:[%s17713_s27 + $0x1a8] sm:$0xff]   ;;  %v6138_v36 = vrot.slane %v6136_v63, 1  ;;  %v13513_v63 = vld [vmem:[%s17713_s27 + $0x1b0] sm:$0xff]  }
 0x8cc   : > { %12258 = vmatprep.subr.bf16.mxu0 %v13506_v3  ;;  %v6407_v3 = vshrl.u32 %v16306_v19, 16  ;;  %v6419_v42 = vshll.u32 %v16387_v54, 16  ;;  %v13512_v19 = vld [vmem:[%s17713_s27 + $0x1f0] sm:$0xff]  }
 0x8cd   : > { %7133 = vmatmul.mubr.bf16.gmra.mrb[232].mxu0 %v16373_v26 }
 0x8ce   : > { %7139 = vmatprep.mubr.bf16.mxu0 %v16339_v59  ;;  %12193 = vmatpush3.bf16.msra.mxu1 %v13493_v43  ;;  %v16402_v43 = vsel %vm1540_vm1, %v6401_v4, %v6405_v22  ;;  %v6409_v49 = vor.u32 %v6407_v3, %v6397_v23  ;;  %v13503_v4 = vld [vmem:[%s17713_s27 + $0x128] sm:$0xff]   ;;  %v6421_v3 = vrot.slane %v6419_v42, 1 }
 0x8cf   : > { %12194 = vmatprep.subr.bf16.mxu1 %v13496_v30  ;;  %12259 = vmatpush3.bf16.msra.mxu0 %v13507_v41  ;;  %v16406_v30 = vsel %vm1620_vm0, %v6168_v21, %v6170_v18  ;;  %v6132_v41 = vshrl.u32 %v16329_v31, 16  ;;  %v16417_v21 = vld [vmem:[#allocation2 + $0x40] sm:$0xff] }
 0x8d0   : > { %12260 = vmatprep.subr.bf16.mxu0 %v13510_v40  ;;  %v13508_v40 = vld [vmem:[%s17713_s27 + $0x170] sm:$0xff]   ;;  %v16423_v1 = vsel %vm1540_vm1, %v6409_v49, %v6413_v61  ;;  %v6427_v31 = vshll.u32 %v16406_v30, 16  ;;  %v13516_v49 = vld [vmem:[%s17713_s27 + $0x1f8] sm:$0xff]   ;;  %v6148_v33 = vshrl.u32 %v16417_v21, 16 }
 0x8d1   : > { %7044 = vmatmul.mubr.bf16.gmra.mrb[216].mxu1 %v16279_v25  ;;  %v6134_v23 = vor.u32 %v6132_v41, %v6130_v35  ;;  %v6423_v35 = vshrl.u32 %v16358_v52, 16  ;;  %v6144_v41 = vshll.u32 %v16417_v21, 16  ;;  %v13517_v52 = vld [vmem:[%s17713_s27 + $0x1b8] sm:$0xff]  }
 0x8d2   : > { %7050 = vmatprep.mubr.bf16.mxu1 %v16402_v43  ;;  %12195 = vmatpush3.bf16.msra.mxu1 %v13497_v32  ;;  %v6417_v32 = vor.u32 %v6415_v51, %v6405_v22  ;;  %v13509_v51 = vld [vmem:[%s17713_s27 + $0x130] sm:$0xff]   ;;  %v13514_v22 = vld [vmem:[%s17713_s27 + $0x178] sm:$0xff]   ;;  %v6496_v53 = vshll.u32 %v6148_v33, 16 }
 0x8d3   : > { %12196 = vmatprep.subr.bf16.mxu1 %v13502_v0  ;;  %12261 = vmatpush3.bf16.msra.mxu0 %v13511_v16  ;;  %v6172_v0 = vrot.slane %v16367_v37, 1  ;;  %v16437_v16 = vsel %vm1540_vm1, %v6134_v23, %v6138_v36  ;;  %v6425_v42 = vor.u32 %v6423_v35, %v6413_v61  ;;  %v6142_v61 = vor.u32 %v6140_v60, %v6138_v36  ;;  %v13515_v37 = vld [vmem:[%s17713_s27 + $0x138] sm:$0xff]  }
 0x8d4   : > { %12262 = vmatprep.subr.bf16.mxu0 %v13512_v19  ;;  %v6429_v19 = vrot.slane %v6427_v31, 1  ;;  %v6146_v31 = vrot.slane %v6144_v41, 1  ;;  %v6431_v60 = vshrl.u32 %v16387_v54, 16  ;;  %v16469_v36 = vrot.slane %v16417_v21, 1 }
 0x8d5   : > { %7140 = vmatmul.mubr.bf16.gmra.mrb[236].mxu0 %v16423_v1  ;;  %v6173_v23 = vsel %vm1620_vm0, %v6170_v18, %v6172_v0 }
 0x8d6   : > { %7146 = vmatprep.mubr.bf16.mxu0 %v16387_v54  ;;  %12197 = vmatpush3.bf16.msra.mxu1 %v13503_v4  ;;  %v16452_v4 = vsel %vm1540_vm1, %v6417_v32, %v6421_v3  ;;  %v16464_v32 = vsel %vm1540_vm1, %v6425_v42, %v6429_v19  ;;  %v6443_v35 = vshll.u32 %v6173_v23, 16  ;;  %v6433_v41 = vor.u32 %v6431_v60, %v6421_v3 }
 0x8d7   : > { %12198 = vmatprep.subr.bf16.mxu1 %v13508_v40  ;;  %12263 = vmatpush3.bf16.msra.mxu0 %v13513_v63  ;;  %v6435_v40 = vshll.u32 %v16437_v16, 16  ;;  %v13518_v63 = vld [vmem:[%s17713_s27 + $0x200] sm:$0xff]  }
 0x8d8   : > { %12264 = vmatprep.subr.bf16.mxu0 %v13516_v49  ;;  %v16473_v49 = vsel %vm1540_vm1, %v6142_v61, %v6146_v31 }
 0x8d9   : > { %7051 = vmatmul.mubr.bf16.gmra.mrb[220].mxu1 %v16317_v6  ;;  %v6437_v18 = vrot.slane %v6435_v40, 1  ;;  %v6175_v40 = vsel %vm1620_vm0, %v6172_v0, %v16469_v36 }
 0x8da   : > { %7057 = vmatprep.mubr.bf16.mxu1 %v16452_v4  ;;  %12199 = vmatpush3.bf16.msra.mxu1 %v13509_v51  ;;  %v6439_v51 = vshrl.u32 %v16406_v30, 16  ;;  %v6459_v30 = vshll.u32 %v6175_v40, 16 }
 0x8db   : > { %12200 = vmatprep.subr.bf16.mxu1 %v13514_v22  ;;  %12265 = vmatpush3.bf16.msra.mxu0 %v13517_v52  ;;  %v6445_v22 = vrot.slane %v6443_v35, 1  ;;  %v16478_v42 = vsel %vm1540_vm1, %v6433_v41, %v6437_v18  ;;  %v6451_v52 = vshll.u32 %v16473_v49, 16  ;;  %v6455_v41 = vshrl.u32 %v6173_v23, 16 }
 0x8dc   : > { %v6441_v61 = vor.u32 %v6439_v51, %v6429_v19  ;;  %v6461_v0 = vrot.slane %v6459_v30, 1  ;;  %v6176_v51 = vor.u32 %v6148_v33, %v6146_v31  ;;  %v6501_v31 = vshll.u32 %v16469_v36, 16 }
 0x8dd   : > { %7147 = vmatmul.mubr.bf16.gmra.mrb[240].mxu0 %v16464_v32  ;;  %v6453_v60 = vrot.slane %v6451_v52, 1  ;;  %v6457_v11 = vor.u32 %v6455_v41, %v6445_v22  ;;  %v6498_v52 = vrot.slane %v6496_v53, 1  ;;  %v13519_v53 = vld [vmem:[%s17713_s27 + $0x208] sm:$0xff]  }
 0x8de   : > { %7153 = vmatprep.mubr.bf16.mxu0 %v16437_v16  ;;  %12201 = vmatpush3.bf16.msra.mxu1 %v13515_v37  ;;  %v6447_v37 = vshrl.u32 %v16437_v16, 16  ;;  %v16486_v3 = vsel %vm1540_vm1, %v6441_v61, %v6445_v22  ;;  %v6463_v61 = vshrl.u32 %v16473_v49, 16  ;;  %v16503_v21 = vsel %vm1540_vm1, %v6176_v51, %v16240_v29 }
 0x8df   : > { %12746 = vmatprep.subr.bf16.mxu1 %v13518_v63  ;;  %v6471_v22 = vshrl.u32 %v6175_v40, 16  ;;  %v6503_v33 = vrot.slane %v6501_v31, 1  ;;  %v13520_v40 = vld [vmem:[%s17713_s27 + $0x210] sm:$0xff]  }
 0x8e0   : > { %v6449_v35 = vor.u32 %v6447_v37, %v6437_v18  ;;  %v16498_v18 = vsel %vm1540_vm1, %v6457_v11, %v6461_v0  ;;  %v6465_v23 = vor.u32 %v6463_v61, %v6453_v60 }
 0x8e1   : > { %7058 = vmatmul.mubr.bf16.gmra.mrb[224].mxu1 %v16339_v59  ;;  %v16507_v37 = vor.u32 %v6471_v22, %v6461_v0 }
 0x8e2   : > { %7064 = vmatprep.mubr.bf16.mxu1 %v16478_v42  ;;  %v16493_v19 = vsel %vm1540_vm1, %v6449_v35, %v6453_v60  ;;  %v6499_v11 = vsel %vm1540_vm1, %v6465_v23, %v6498_v52  ;;  %v6479_v60 = vshrl.u32 %v16503_v21, 16 }
 0x8e3   : > { %v6504_v30 = vsel %vm1540_vm1, %v16507_v37, %v6503_v33 }
 0x8e5   : > { %7154 = vmatmul.mubr.bf16.gmra.mrb[244].mxu0 %v16486_v3 }
 0x8e6   : > { %7160 = vmatprep.mubr.bf16.mxu0 %v16473_v49 }
 0x8e9   : > { %7065 = vmatmul.mubr.bf16.gmra.mrb[228].mxu1 %v16387_v54 }
 0x8ea   : > { %7071 = vmatprep.mubr.bf16.mxu1 %v16493_v19 }
 0x8ed   : > { %7161 = vmatmul.mubr.bf16.gmra.mrb[248].mxu0 %v16498_v18 }
 0x8ee   : > { %7167 = vmatprep.mubr.bf16.mxu0 %v16503_v21 }
 0x8f1   : > { %7072 = vmatmul.mubr.bf16.gmra.mrb[232].mxu1 %v16437_v16 }
 0x8f2   : > { %7078 = vmatprep.mubr.bf16.mxu1 %v6499_v11 }
 0x8f5   : > { %7168 = vmatmul.mubr.bf16.gmra.mrb[252].mxu0 %v6504_v30 }
 0x8f6   : > { %7296 = vmatprep.mubr.bf16.mxu0 %v16354_v2 }
 0x8f9   : > { %7079 = vmatmul.mubr.bf16.gmra.mrb[236].mxu1 %v16473_v49 }
 0x8fa   : > { %7207 = vmatprep.mubr.bf16.mxu1 %v16314_v38  ;;  %v13523_v38 = vld [vmem:[%s17713_s27 + $0x228] sm:$0xff]  }
 0x8fd   : > { %7297 = vmatmul.mubr.bf16.vlgmr.msra.gmra.mrb[16].mxu0 %v16279_v25  ;;  %v13521_v25 = vld [vmem:[%s17713_s27 + $0x218] sm:$0xff]  }
 0x8fe   : > { %7303 = vmatprep.mubr.bf16.mxu0 %v16402_v43 }
 0x901   : > { %7208 = vmatmul.mubr.bf16.vlgmr.msra.gmra.mrb[240].mxu1 %v16311_v47  ;;  %v13522_v47 = vld [vmem:[%s17713_s27 + $0x220] sm:$0xff]  }
 0x902   : > { %7214 = vmatprep.mubr.bf16.mxu1 %v16373_v26  ;;  %12747 = vmatpush3.bf16.msra.mxu1 %v13518_v63  ;;  %v6192_v63 = vsel %vm1540_vm1, %v16252_v48, %v16240_v29 }
 0x903   : > { %12748 = vmatprep.subr.bf16.mxu1 %v13519_v53  ;;  %v6483_v35 = vshll.u32 %v6192_v63, 16  ;;  %v6515_v29 = vshrl.u32 %v6192_v63, 16 }
 0x905   : > { %7304 = vmatmul.mubr.bf16.gmra.mrb[20].mxu0 %v16317_v6  ;;  %v13524_v6 = vld [vmem:[%s17713_s27 + $0x230] sm:$0xff]   ;;  %v6485_v0 = vrot.slane %v6483_v35, 1 }
 0x906   : > { %7310 = vmatprep.mubr.bf16.mxu0 %v16452_v4  ;;  %12749 = vmatpush3.bf16.msra.mxu1 %v13519_v53  ;;  %v13550_v35 = vld [vmem:[#allocation11 + $0x48] ss:$16 sps:$4 sm:$0xff]  }
 0x907   : > { %12750 = vmatprep.subr.bf16.mxu1 %v13520_v40  ;;  %v6517_v22 = vor.u32 %v6515_v29, %v6485_v0  ;;  %v13559_v29 = vld [vmem:[#allocation11 + $0x88] ss:$16 sps:$4 sm:$0xff]  }
 0x909   : > { %7215 = vmatmul.mubr.bf16.gmra.mrb[244].mxu1 %v16354_v2  ;;  %v13525_v2 = vld [vmem:[%s17713_s27 + $0x238] sm:$0xff]  }
 0x90a   : > { %7221 = vmatprep.mubr.bf16.mxu1 %v16423_v1  ;;  %12751 = vmatpush3.bf16.msra.mxu1 %v13520_v40  ;;  %v13526_v40 = vld [vmem:[#allocation11] ss:$16 sps:$4 sm:$0xff]  }
 0x90b   : > { %12752 = vmatprep.subr.bf16.mxu1 %v13521_v25 }
 0x90d   : > { %7311 = vmatmul.mubr.bf16.gmra.mrb[24].mxu0 %v16339_v59  ;;  %v6467_v59 = vshll.u32 %v16503_v21, 16 }
 0x90e   : > { %7317 = vmatprep.mubr.bf16.mxu0 %v16478_v42  ;;  %12753 = vmatpush3.bf16.msra.mxu1 %v13521_v25  ;;  %v13537_v25 = vld [vmem:[#allocation11 + $0x64] ss:$16 sps:$4 sm:$0xff]  }
 0x90f   : > { %12754 = vmatprep.subr.bf16.mxu1 %v13522_v47 }
 0x911   : > { %7222 = vmatmul.mubr.bf16.gmra.mrb[248].mxu1 %v16402_v43  ;;  %v6469_v43 = vrot.slane %v6467_v59, 1  ;;  %v13543_v59 = vld [vmem:[#allocation11 + $0xc] ss:$16 sps:$4 sm:$0xff]  }
 0x912   : > { %7228 = vmatprep.mubr.bf16.mxu1 %v16464_v32  ;;  %12755 = vmatpush3.bf16.msra.mxu1 %v13522_v47  ;;  %v13538_v47 = vld [vmem:[#allocation11 + $0x80] ss:$16 sps:$4 sm:$0xff]  }
 0x913   : > { %12756 = vmatprep.subr.bf16.mxu1 %v13523_v38  ;;  %v6481_v41 = vor.u32 %v6479_v60, %v6469_v43  ;;  %v13552_v60 = vld [vmem:[#allocation11 + $0x4c] ss:$16 sps:$4 sm:$0xff]  }
 0x915   : > { %7318 = vmatmul.mubr.bf16.gmra.mrb[28].mxu0 %v16387_v54  ;;  %v6470_v54 = vsel %vm1540_vm1, %v6465_v23, %v6469_v43  ;;  %v6486_v61 = vsel %vm1540_vm1, %v6481_v41, %v6485_v0  ;;  %v13546_v43 = vld [vmem:[#allocation11 + $0x2c] ss:$16 sps:$4 sm:$0xff]   ;;  %v13556_v0 = vld [vmem:[#allocation11 + $0xc0] ss:$16 sps:$4 sm:$0xff]  }
 0x916   : > { %7324 = vmatprep.mubr.bf16.mxu0 %v16493_v19  ;;  %12757 = vmatpush3.bf16.msra.mxu1 %v13523_v38  ;;  %v13540_v38 = vld [vmem:[#allocation11 + $0x84] ss:$16 sps:$4 sm:$0xff]  }
 0x917   : > { %12758 = vmatprep.subr.bf16.mxu1 %v13524_v6 }
 0x919   : > { %7229 = vmatmul.mubr.bf16.gmra.mrb[252].mxu1 %v16452_v4  ;;  %v6186_v4 = vsel %vm1620_vm0, %v16469_v36, %v16234_v27 }
 0x91a   : > { %7235 = vmatprep.mubr.bf16.mxu1 %v16486_v3  ;;  %12759 = vmatpush3.bf16.msra.mxu1 %v13524_v6  ;;  %v6475_v48 = vshll.u32 %v6186_v4, 16  ;;  %v6487_v52 = vshrl.u32 %v6186_v4, 16  ;;  %v13541_v6 = vld [vmem:[#allocation11 + $0x8] ss:$16 sps:$4 sm:$0xff]  }
 0x91b   : > { %12760 = vmatprep.subr.bf16.mxu1 %v13525_v2  ;;  %v13553_v4 = vld [vmem:[#allocation11 + $0x68] ss:$16 sps:$4 sm:$0xff]  }
 0x91c   : > { %v6477_v23 = vrot.slane %v6475_v48, 1  ;;  %v13558_v48 = vld [vmem:[#allocation11 + $0xc4] ss:$16 sps:$4 sm:$0xff]  }
 0x91d   : > { %7325 = vmatmul.mubr.bf16.gmra.mrb[32].mxu0 %v16437_v16  ;;  %v17714_v16 = vshrl.u32 %v15836_v24, 16 }
 0x91e   : > { %7331 = vmatprep.mubr.bf16.mxu0 %v6470_v54  ;;  %12761 = vmatpush3.bf16.msra.mxu1 %v13525_v2  ;;  %v6478_v36 = vsel %vm1540_vm1, %v16507_v37, %v6477_v23  ;;  %v13544_v2 = vld [vmem:[#allocation11 + $0x28] ss:$16 sps:$4 sm:$0xff]  }
 0x91f   : > { %v6519_v51 = vshll.u32 %v17714_v16, 16  ;;  %7742 = vmatprep.subr.bf16.mxu1 %v13543_v59  ;;  %v13561_v16 = vld [vmem:[#allocation11 + $0x8c] ss:$16 sps:$4 sm:$0xff]  }
 0x921   : > { %7236 = vmatmul.mubr.bf16.gmra.mrb[16].mxu1 %v16478_v42  ;;  %v6521_v31 = vrot.slane %v6519_v51, 1  ;;  %v6511_v42 = vshll.u32 %v16234_v27, 16 }
 0x922   : > { %7242 = vmatprep.mubr.bf16.mxu1 %v16498_v18 }
 0x923   : > { %v6522_v24 = vsel %vm1540_vm1, %v6517_v22, %v6521_v31  ;;  %v6513_v11 = vrot.slane %v6511_v42, 1  ;;  %v6509_v37 = vsel %vm1540_vm1, %v6481_v41, %v6521_v31  ;;  %v13555_v41 = vld [vmem:[#allocation11 + $0x6c] ss:$16 sps:$4 sm:$0xff]  }
 0x925   : > { %7332 = vmatmul.mubr.bf16.gmra.mrb[36].mxu0 %v16473_v49  ;;  %v6489_v49 = vor.u32 %v6487_v52, %v6477_v23  ;;  %v13564_v23 = vld [vmem:[#allocation11 + $0xac] ss:$16 sps:$4 sm:$0xff]  }
 0x926   : > { %7338 = vmatprep.mubr.bf16.mxu0 %v6486_v61  ;;  %v13562_v61 = vld [vmem:[#allocation11 + $0xa8] ss:$16 sps:$4 sm:$0xff]  }
 0x927   : > { %v6514_v33 = vsel %vm1540_vm1, %v6489_v49, %v6513_v11 }
 0x929   : > { %7243 = vmatmul.mubr.bf16.gmra.mrb[20].mxu1 %v16493_v19  ;;  %v16576_v19 = vld [vmem:[#allocation2] sm:$0xff] }
 0x92a   : > { %7249 = vmatprep.mubr.bf16.mxu1 %v6478_v36 }
 0x92d   : > { %7339 = vmatmul.mubr.bf16.gmra.mrb[40].mxu0 %v16503_v21  ;;  %v6523_v21 = vshrl.u32 %v16234_v27, 16  ;;  %v13535_v27 = vld [vmem:[#allocation11 + $0x60] ss:$16 sps:$4 sm:$0xff]  }
 0x92e   : > { %7345 = vmatprep.mubr.bf16.mxu0 %v6522_v24  ;;  %v16591_v24 = vld [vmem:[%s17459_s14 + $0x20] ss:$0 sm:$0xff] }
 0x92f   : > { %v6525_v30 = vor.u32 %v6523_v21, %v6513_v11  ;;  %v13565_v21 = vld [vmem:[#allocation11 + $0xe0] ss:$16 sps:$4 sm:$0xff]  }
 0x931   : > { %7250 = vmatmul.mubr.bf16.gmra.mrb[24].mxu1 %v6470_v54  ;;  %v6530_v53 = vsel %vm1540_vm1, %v6525_v30, %v6513_v11  ;;  %v13549_v54 = vld [vmem:[#allocation11 + $0xa4] ss:$16 sps:$4 sm:$0xff]  }
 0x932   : > { %7256 = vmatprep.mubr.bf16.mxu1 %v6514_v33  ;;  %v13567_v30 = vld [vmem:[#allocation11 + $0xe4] ss:$16 sps:$4 sm:$0xff]  }
 0x935   : > { %7346 = vmatmul.mubr.bf16.gmra.mrb[44].mxu0 %v6192_v63  ;;  %v13547_v63 = vld [vmem:[#allocation11 + $0xa0] ss:$16 sps:$4 sm:$0xff]  }
 0x936   : > { %7701 = vmatprep.mubr.bf16.mxu0 %v16576_v19 }
 0x939   : > { %7257 = vmatmul.mubr.bf16.gmra.mrb[28].mxu1 %v6509_v37 }
 0x93a   : > { %12762 = vmatprep.mubr.bf16.mxu1 %v16373_v26  ;;  %v13528_v26 = vld [vmem:[#allocation11 + $0x4] ss:$16 sps:$4 sm:$0xff]  }
 0x93b   : > { %7669 = vmatprep.subr.bf16.mxu0 %v13528_v26  ;;  %v13568_v26 = vld [vmem:[#allocation11 + $0xc8] ss:$16 sps:$4 sm:$0xff]  }
 0x93c   : > { %7670 = vmatpush1.bf16.msra.mxu0 %v13526_v40 }
 0x941   : > { %12763 = vmatmul.mubr.bf16.vlgmr.msra.gmra.mrb[32].mxu1 %v16423_v1  ;;  %v13529_v1 = vld [vmem:[#allocation11 + $0x20] ss:$16 sps:$4 sm:$0xff]  }
 0x942   : > { %12766 = vmatprep.mubr.bf16.mxu1 %v16464_v32  ;;  %v13531_v32 = vld [vmem:[#allocation11 + $0x24] ss:$16 sps:$4 sm:$0xff]   ;;  %7743 = vmatpush1.bf16.msra.mxu1 %v13541_v6 }
 0x943   : > { %7671 = vmatprep.subr.bf16.mxu0 %v13531_v32  ;;  %7744 = vmatprep.subr.bf16.mxu1 %v13546_v43 }
 0x944   : > { %7672 = vmatpush1.bf16.msra.mxu0 %v13529_v1  ;;  %v13570_v1 = vld [vmem:[#allocation11 + $0xcc] ss:$16 sps:$4 sm:$0xff]  }
 0x946   : > { %7745 = vmatpush1.bf16.msra.mxu1 %v13544_v2 }
 0x947   : > { %7746 = vmatprep.subr.bf16.mxu1 %v13552_v60 }
 0x949   : > { %12767 = vmatmul.mubr.bf16.gmra.mrb[36].mxu1 %v16486_v3  ;;  %v13532_v3 = vld [vmem:[#allocation11 + $0x40] ss:$16 sps:$4 sm:$0xff]  }
 0x94a   : > { %12770 = vmatprep.mubr.bf16.mxu1 %v16498_v18  ;;  %v13534_v18 = vld [vmem:[#allocation11 + $0x44] ss:$16 sps:$4 sm:$0xff]   ;;  %7747 = vmatpush1.bf16.msra.mxu1 %v13550_v35 }
 0x94b   : > { %7673 = vmatprep.subr.bf16.mxu0 %v13534_v18  ;;  %7748 = vmatprep.subr.bf16.mxu1 %v13555_v41 }
 0x94c   : > { %7674 = vmatpush1.bf16.msra.mxu0 %v13532_v3 }
 0x94d   : > { %7675 = vmatprep.subr.bf16.mxu0 %v13537_v25  ;;  %v13573_v25 = vld [vmem:[#allocation11 + $0xec] ss:$16 sps:$4 sm:$0xff]  }
 0x94e   : > { %7749 = vmatpush1.bf16.msra.mxu1 %v13553_v4 }
 0x94f   : > { %7750 = vmatprep.subr.bf16.mxu1 %v13561_v16 }
 0x950   : > { %7676 = vmatpush1.bf16.msra.mxu0 %v13535_v27 }
 0x951   : > { %12771 = vmatmul.mubr.bf16.gmra.mrb[40].mxu1 %v6478_v36  ;;  %7677 = vmatprep.subr.bf16.mxu0 %v13540_v38  ;;  %v13571_v38 = vld [vmem:[#allocation11 + $0xe8] ss:$16 sps:$4 sm:$0xff]  }
 0x952   : > { %12774 = vmatprep.mubr.bf16.mxu1 %v6514_v33  ;;  %7751 = vmatpush1.bf16.msra.mxu1 %v13559_v29 }
 0x953   : > { %7752 = vmatprep.subr.bf16.mxu1 %v13564_v23 }
 0x954   : > { %7678 = vmatpush1.bf16.msra.mxu0 %v13538_v47 }
 0x955   : > { %7679 = vmatprep.subr.bf16.mxu0 %v13549_v54 }
 0x956   : > { %7753 = vmatpush1.bf16.msra.mxu1 %v13562_v61 }
 0x957   : > { %7754 = vmatprep.subr.bf16.mxu1 %v13570_v1 }
 0x958   : > { %7680 = vmatpush1.bf16.msra.mxu0 %v13547_v63 }
 0x959   : > { %12775 = vmatmul.mubr.bf16.gmra.mrb[44].mxu1 %v6530_v53  ;;  %7681 = vmatprep.subr.bf16.mxu0 %v13558_v48 }
 0x95a   : > { %7774 = vmatprep.mubr.bf16.mxu1 %v16576_v19  ;;  %7755 = vmatpush1.bf16.msra.mxu1 %v13568_v26 }
 0x95b   : > { %7756 = vmatprep.subr.bf16.mxu1 %v13573_v25 }
 0x95c   : > { %7682 = vmatpush1.bf16.msra.mxu0 %v13556_v0 }
 0x95d   : > { %7683 = vmatprep.subr.bf16.mxu0 %v13567_v30 }
 0x95e   : > { %7757 = vmatpush1.bf16.msra.mxu1 %v13571_v38  ;;  %v13574_v38 = vld [vmem:[#allocation13 + $0x40] sm:$0xff]  }
 0x960   : > { %7684 = vmatpush1.bf16.msra.mxu0 %v13565_v21 }
 0x961   : > { %12330 = vmatprep.subr.bf16.mxu0 %v13574_v38 }
 0x990   : > { %v12138_v51 = vpop.f32.mrb[224].mxu0 }
 0x991   : > { %v12139_v22 = vpop.f32.mrb[225].mxu0 }
 0x992   : > { %v12140_v31 = vadd.f32 %v12139_v22, %v12138_v51  ;;  %v12141_v36 = vpop.f32.mrb[226].mxu0 }
 0x993   : > { %v12142_v42 = vpop.f32.mrb[227].mxu0 }
 0x994   : > { %v12074_v52 = vpop.f32.mrb[208].mxu1 }
 0x995   : > { %v12075_v49 = vpop.f32.mrb[209].mxu1 }
 0x996   : > { %v12076_v11 = vadd.f32 %v12075_v49, %v12074_v52  ;;  %v12077_v33 = vpop.f32.mrb[210].mxu1 }
 0x997   : > { %v12078_v37 = vpop.f32.mrb[211].mxu1 }
 0x998   : > { %v7032_v53 = vadd.f32 %v12076_v11, %v16591_v24  ;;  %v12144_v40 = vpop.f32.mrb[228].mxu0 }
 0x999   : > { %v12145_v32 = vpop.f32.mrb[229].mxu0 }
 0x99a   : > { %v12146_v3 = vadd.f32 %v12145_v32, %v12144_v40  ;;  %v12147_v18 = vpop.f32.mrb[230].mxu0  ;;  %v16594_v27 = vadd.f32 %v12140_v31, %v7032_v53 }
 0x99b   : > { %v12148_v47 = vpop.f32.mrb[231].mxu0 }
 0x99c   : > { %v12080_v6 = vpop.f32.mrb[212].mxu1 }
 0x99d   : > { %v12081_v59 = vpop.f32.mrb[213].mxu1 }
 0x99e   : > { %v12082_v2 = vadd.f32 %v12081_v59, %v12080_v6  ;;  %v12083_v43 = vpop.f32.mrb[214].mxu1  ;;  %v13575_v6 = vld [vmem:[#allocation13 + $0xc0] sm:$0xff]  }
 0x99f   : > { %v12084_v63 = vpop.f32.mrb[215].mxu1  ;;  %12370 = vmatprep.subr.bf16.mxu1 %v13575_v6 }
 0x9a0   : > { %v7039_v54 = vadd.f32 %v12082_v2, %v16591_v24  ;;  %v12150_v35 = vpop.f32.mrb[232].mxu0 }
 0x9a1   : > { %v12151_v60 = vpop.f32.mrb[233].mxu0 }
 0x9a2   : > { %v12152_v4 = vadd.f32 %v12151_v60, %v12150_v35  ;;  %v12153_v41 = vpop.f32.mrb[234].mxu0  ;;  %v16597_v0 = vadd.f32 %v12146_v3, %v7039_v54 }
 0x9a3   : > { %v12154_v48 = vpop.f32.mrb[235].mxu0 }
 0x9a4   : > { %v12086_v29 = vpop.f32.mrb[216].mxu1 }
 0x9a5   : > { %v12087_v16 = vpop.f32.mrb[217].mxu1 }
 0x9a6   : > { %v12088_v51 = vadd.f32 %v12087_v16, %v12086_v29  ;;  %v12089_v61 = vpop.f32.mrb[218].mxu1 }
 0x9a7   : > { %v12090_v23 = vpop.f32.mrb[219].mxu1 }
 0x9a8   : > { %v7046_v22 = vadd.f32 %v12088_v51, %v16591_v24  ;;  %v12156_v31 = vpop.f32.mrb[236].mxu0 }
 0x9a9   : > { %v12157_v36 = vpop.f32.mrb[237].mxu0 }
 0x9aa   : > { %v12158_v42 = vadd.f32 %v12157_v36, %v12156_v31  ;;  %v12159_v52 = vpop.f32.mrb[238].mxu0  ;;  %v16600_v49 = vadd.f32 %v12152_v4, %v7046_v22 }
 0x9ab   : > { %v12160_v11 = vpop.f32.mrb[239].mxu0 }
 0x9ac   : > { %v12092_v33 = vpop.f32.mrb[220].mxu1 }
 0x9ad   : > { %v12093_v37 = vpop.f32.mrb[221].mxu1 }
 0x9ae   : > { %v12094_v21 = vadd.f32 %v12093_v37, %v12092_v33  ;;  %v12095_v30 = vpop.f32.mrb[222].mxu1 }
 0x9af   : > { %v12096_v53 = vpop.f32.mrb[223].mxu1 }
 0x9b0   : > { %v7053_v40 = vadd.f32 %v12094_v21, %v16591_v24  ;;  %v12162_v26 = vpop.f32.mrb[240].mxu0 }
 0x9b1   : > { %v12163_v1 = vpop.f32.mrb[241].mxu0 }
 0x9b2   : > { %v12164_v32 = vadd.f32 %v12163_v1, %v12162_v26  ;;  %v12165_v3 = vpop.f32.mrb[242].mxu0  ;;  %v16603_v18 = vadd.f32 %v12158_v42, %v7053_v40 }
 0x9b3   : > { %v12166_v25 = vpop.f32.mrb[243].mxu0 }
 0x9b4   : > { %v12098_v47 = vpop.f32.mrb[224].mxu1 }
 0x9b5   : > { %v12099_v59 = vpop.f32.mrb[225].mxu1 }
 0x9b6   : > { %v12100_v2 = vadd.f32 %v12099_v59, %v12098_v47  ;;  %v12101_v43 = vpop.f32.mrb[226].mxu1 }
 0x9b7   : > { %v12102_v63 = vpop.f32.mrb[227].mxu1 }
 0x9b8   : > { %v7060_v54 = vadd.f32 %v12100_v2, %v16591_v24  ;;  %v12168_v35 = vpop.f32.mrb[244].mxu0 }
 0x9b9   : > { %v12169_v60 = vpop.f32.mrb[245].mxu0 }
 0x9ba   : > { %v12170_v4 = vadd.f32 %v12169_v60, %v12168_v35  ;;  %v12171_v41 = vpop.f32.mrb[246].mxu0  ;;  %v16606_v48 = vadd.f32 %v12164_v32, %v7060_v54 }
 0x9bb   : > { %v12172_v29 = vpop.f32.mrb[247].mxu0 }
 0x9bc   : > { %v12104_v16 = vpop.f32.mrb[228].mxu1 }
 0x9bd   : > { %v12105_v51 = vpop.f32.mrb[229].mxu1 }
 0x9be   : > { %v12106_v61 = vadd.f32 %v12105_v51, %v12104_v16  ;;  %v12107_v23 = vpop.f32.mrb[230].mxu1 }
 0x9bf   : > { %v12108_v22 = vpop.f32.mrb[231].mxu1 }
 0x9c0   : > { %v7067_v31 = vadd.f32 %v12106_v61, %v16591_v24  ;;  %v12174_v36 = vpop.f32.mrb[248].mxu0 }
 0x9c1   : > { %v12175_v42 = vpop.f32.mrb[249].mxu0 }
 0x9c2   : > { %v12176_v52 = vadd.f32 %v12175_v42, %v12174_v36  ;;  %v12177_v11 = vpop.f32.mrb[250].mxu0  ;;  %v16609_v33 = vadd.f32 %v12170_v4, %v7067_v31 }
 0x9c3   : > { %v12178_v37 = vpop.f32.mrb[251].mxu0 }
 0x9c4   : > { %v12110_v21 = vpop.f32.mrb[232].mxu1 }
 0x9c5   : > { %v12111_v30 = vpop.f32.mrb[233].mxu1 }
 0x9c6   : > { %v12112_v53 = vadd.f32 %v12111_v30, %v12110_v21  ;;  %v12113_v40 = vpop.f32.mrb[234].mxu1 }
 0x9c7   : > { %v12114_v26 = vpop.f32.mrb[235].mxu1 }
 0x9c8   : > { %v7074_v1 = vadd.f32 %v12112_v53, %v16591_v24  ;;  %v12180_v32 = vpop.f32.mrb[252].mxu0 }
 0x9c9   : > { %v12181_v3 = vpop.f32.mrb[253].mxu0 }
 0x9ca   : > { %v12182_v25 = vadd.f32 %v12181_v3, %v12180_v32  ;;  %v12183_v47 = vpop.f32.mrb[254].mxu0  ;;  %v16612_v38 = vadd.f32 %v12176_v52, %v7074_v1 }
 0x9cb   : > { %v12184_v6 = vpop.f32.mrb[255].mxu0 }
 0x9cc   : > { %v12116_v59 = vpop.f32.mrb[236].mxu1 }
 0x9cd   : > { %v12117_v2 = vpop.f32.mrb[237].mxu1 }
 0x9ce   : > { %v12118_v43 = vadd.f32 %v12117_v2, %v12116_v59  ;;  %v12119_v63 = vpop.f32.mrb[238].mxu1 }
 0x9cf   : > { %v12120_v54 = vpop.f32.mrb[239].mxu1 }
 0x9d0   : > { %v7081_v35 = vadd.f32 %v12118_v43, %v16591_v24  ;;  %v12266_v60 = vpop.f32.mrb[16].mxu0 }
 0x9d1   : > { %v12267_v4 = vpop.f32.mrb[17].mxu0 }
 0x9d2   : > { %v12268_v41 = vadd.f32 %v12267_v4, %v12266_v60  ;;  %v12269_v29 = vpop.f32.mrb[18].mxu0  ;;  %v16615_v16 = vadd.f32 %v12182_v25, %v7081_v35 }
 0x9d3   : > { %v12270_v51 = vpop.f32.mrb[19].mxu0 }
 0x9d4   : > { %v12202_v61 = vpop.f32.mrb[240].mxu1 }
 0x9d5   : > { %v12203_v23 = vpop.f32.mrb[241].mxu1 }
 0x9d6   : > { %v12204_v22 = vadd.f32 %v12203_v23, %v12202_v61  ;;  %v12205_v31 = vpop.f32.mrb[242].mxu1 }
 0x9d7   : > { %v12206_v36 = vpop.f32.mrb[243].mxu1 }
 0x9d8   : > { %v7210_v42 = vadd.f32 %v12204_v22, %v16594_v27  ;;  %v12272_v52 = vpop.f32.mrb[20].mxu0 }
 0x9d9   : > { %v12273_v11 = vpop.f32.mrb[21].mxu0 }
 0x9da   : > { %v12274_v37 = vadd.f32 %v12273_v11, %v12272_v52  ;;  %v12275_v21 = vpop.f32.mrb[22].mxu0  ;;  %v16618_v30 = vadd.f32 %v12268_v41, %v7210_v42 }
 0x9db   : > { %v12276_v24 = vpop.f32.mrb[23].mxu0 }
 0x9dc   : > { %v12208_v53 = vpop.f32.mrb[244].mxu1 }
 0x9dd   : > { %v12209_v40 = vpop.f32.mrb[245].mxu1 }
 0x9de   : > { %v12210_v26 = vadd.f32 %v12209_v40, %v12208_v53  ;;  %v12211_v1 = vpop.f32.mrb[246].mxu1 }
 0x9df   : > { %v12212_v32 = vpop.f32.mrb[247].mxu1 }
 0x9e0   : > { %v7217_v3 = vadd.f32 %v12210_v26, %v16597_v0  ;;  %v12278_v25 = vpop.f32.mrb[24].mxu0 }
 0x9e1   : > { %v12279_v47 = vpop.f32.mrb[25].mxu0 }
 0x9e2   : > { %v12280_v6 = vadd.f32 %v12279_v47, %v12278_v25  ;;  %v12281_v59 = vpop.f32.mrb[26].mxu0  ;;  %v16621_v2 = vadd.f32 %v12274_v37, %v7217_v3 }
 0x9e3   : > { %v12282_v27 = vpop.f32.mrb[27].mxu0 }
 0x9e4   : > { %v12214_v43 = vpop.f32.mrb[248].mxu1 }
 0x9e5   : > { %v12215_v63 = vpop.f32.mrb[249].mxu1 }
 0x9e6   : > { %v12216_v54 = vadd.f32 %v12215_v63, %v12214_v43  ;;  %v12217_v35 = vpop.f32.mrb[250].mxu1 }
 0x9e7   : > { %v12218_v60 = vpop.f32.mrb[251].mxu1 }
 0x9e8   : > { %v7224_v4 = vadd.f32 %v12216_v54, %v16600_v49  ;;  %v12284_v41 = vpop.f32.mrb[28].mxu0 }
 0x9e9   : > { %v12285_v29 = vpop.f32.mrb[29].mxu0 }
 0x9ea   : > { %v12286_v51 = vadd.f32 %v12285_v29, %v12284_v41  ;;  %v12287_v61 = vpop.f32.mrb[30].mxu0  ;;  %v16624_v23 = vadd.f32 %v12280_v6, %v7224_v4 }
 0x9eb   : > { %v12288_v0 = vpop.f32.mrb[31].mxu0 }
 0x9ec   : > { %v12220_v22 = vpop.f32.mrb[252].mxu1 }
 0x9ed   : > { %v12221_v31 = vpop.f32.mrb[253].mxu1 }
 0x9ee   : > { %v12222_v36 = vadd.f32 %v12221_v31, %v12220_v22  ;;  %v12223_v42 = vpop.f32.mrb[254].mxu1 }
 0x9ef   : > { %v12224_v52 = vpop.f32.mrb[255].mxu1 }
 0x9f0   : > { %v7231_v11 = vadd.f32 %v12222_v36, %v16603_v18  ;;  %v12290_v37 = vpop.f32.mrb[32].mxu0 }
 0x9f1   : > { %v12291_v21 = vpop.f32.mrb[33].mxu0 }
 0x9f2   : > { %v12292_v24 = vadd.f32 %v12291_v21, %v12290_v37  ;;  %v12293_v53 = vpop.f32.mrb[34].mxu0  ;;  %v7320_v40 = vadd.f32 %v12286_v51, %v7231_v11 }
 0x9f3   : > { %v12294_v49 = vpop.f32.mrb[35].mxu0 }
 0x9f4   : > { %v12226_v26 = vpop.f32.mrb[16].mxu1 }
 0x9f5   : > { %v12227_v1 = vpop.f32.mrb[17].mxu1 }
 0x9f6   : > { %v12228_v32 = vadd.f32 %v12227_v1, %v12226_v26  ;;  %v12229_v3 = vpop.f32.mrb[18].mxu1 }
 0x9f7   : > { %v12230_v25 = vpop.f32.mrb[19].mxu1 }
 0x9f8   : > { %v7238_v47 = vadd.f32 %v12228_v32, %v16606_v48  ;;  %v12296_v6 = vpop.f32.mrb[36].mxu0 }
 0x9f9   : > { %v12297_v59 = vpop.f32.mrb[37].mxu0 }
 0x9fa   : > { %v12298_v27 = vadd.f32 %v12297_v59, %v12296_v6  ;;  %v12299_v43 = vpop.f32.mrb[38].mxu0  ;;  %v16628_v63 = vadd.f32 %v12292_v24, %v7238_v47 }
 0x9fb   : > { %v12300_v18 = vpop.f32.mrb[39].mxu0 }
 0x9fc   : > { %v12232_v54 = vpop.f32.mrb[20].mxu1 }
 0x9fd   : > { %v12233_v35 = vpop.f32.mrb[21].mxu1 }
 0x9fe   : > { %v12234_v60 = vadd.f32 %v12233_v35, %v12232_v54  ;;  %v12235_v4 = vpop.f32.mrb[22].mxu1 }
 0x9ff   : > { %v12236_v41 = vpop.f32.mrb[23].mxu1 }
 0xa00   : > { %v7245_v29 = vadd.f32 %v12234_v60, %v16609_v33  ;;  %v12302_v51 = vpop.f32.mrb[40].mxu0 }
 0xa01   : > { %v12303_v61 = vpop.f32.mrb[41].mxu0 }
 0xa02   : > { %v12304_v0 = vadd.f32 %v12303_v61, %v12302_v51  ;;  %v12305_v22 = vpop.f32.mrb[42].mxu0  ;;  %v16631_v31 = vadd.f32 %v12298_v27, %v7245_v29  ;;  %v13576_v51 = vld [vmem:[#allocation13] sm:$0xff]  }
 0xa03   : > { %v12306_v48 = vpop.f32.mrb[43].mxu0  ;;  %v13577_v61 = vld [vmem:[#allocation13 + $0x80] sm:$0xff]   ;;  %v13579_v22 = vld [vmem:[#allocation13 + $0xc8] sm:$0xff]  }
 0xa04   : > { %v12238_v36 = vpop.f32.mrb[24].mxu1 }
 0xa05   : > { %v12239_v42 = vpop.f32.mrb[25].mxu1 }
 0xa06   : > { %v12240_v52 = vadd.f32 %v12239_v42, %v12238_v36  ;;  %v12241_v11 = vpop.f32.mrb[26].mxu1  ;;  %v13580_v42 = vld [vmem:[#allocation13 + $0x8] sm:$0xff]  }
 0xa07   : > { %v12242_v37 = vpop.f32.mrb[27].mxu1 }
 0xa08   : > { %v7252_v21 = vadd.f32 %v12240_v52, %v16612_v38  ;;  %v12308_v24 = vpop.f32.mrb[44].mxu0  ;;  %v13581_v52 = vld [vmem:[#allocation13 + $0x88] sm:$0xff]  }
 0xa09   : > { %v12309_v53 = vpop.f32.mrb[45].mxu0 }
 0xa0a   : > { %v12310_v49 = vadd.f32 %v12309_v53, %v12308_v24  ;;  %v16634_v26 = vadd.f32 %v12304_v0, %v7252_v21  ;;  %v12311_v33 = vpop.f32.mrb[46].mxu0  ;;  %v13578_v0 = vld [vmem:[#allocation13 + $0x48] sm:$0xff]   ;;  %v13582_v21 = vld [vmem:[#allocation13 + $0x50] sm:$0xff]  }
 0xa0b   : > { %v12312_v1 = vpop.f32.mrb[47].mxu0  ;;  %v13583_v24 = vld [vmem:[#allocation13 + $0xd0] sm:$0xff]  }
 0xa0c   : > { %v12244_v32 = vpop.f32.mrb[28].mxu1  ;;  %v13585_v33 = vld [vmem:[#allocation13 + $0x90] sm:$0xff]   ;;  %v13587_v1 = vld [vmem:[#allocation13 + $0xd8] sm:$0xff]  }
 0xa0d   : > { %v12245_v3 = vpop.f32.mrb[29].mxu1 }
 0xa0e   : > { %v12246_v25 = vadd.f32 %v12245_v3, %v12244_v32  ;;  %v12247_v47 = vpop.f32.mrb[30].mxu1 }
 0xa0f   : > { %v12248_v6 = vpop.f32.mrb[31].mxu1 }
 0xa10   : > { %v7259_v59 = vadd.f32 %v12246_v25, %v16615_v16 }
 0xa12   : > { %v16637_v27 = vadd.f32 %v12310_v49, %v7259_v59  ;;  %v13584_v49 = vld [vmem:[#allocation13 + $0x10] sm:$0xff]   ;;  %v13588_v59 = vld [vmem:[#allocation13 + $0x18] sm:$0xff]  }
 0xa14   : > { %v12764_v43 = vpop.f32.mrb[32].mxu1 }
 0xa15   : > { %v7395_v18 = vadd.f32 %v12764_v43, %v16621_v2  ;;  %v7387_v38 = vpop.f32.mrb[33].mxu1  ;;  %v13589_v43 = vld [vmem:[#allocation13 + $0x98] sm:$0xff]  }
 0xa16   : > { %v7388_v54 = vadd.f32 %v7387_v38, %v16618_v30  ;;  %v12765_v35 = vpop.f32.mrb[34].mxu1 }
 0xa17   : > { %v7443_v60 = vmax.f32 %v7395_v18, 0.0  ;;  %v7390_v4 = vpop.f32.mrb[35].mxu1  ;;  %v13591_v35 = vld [vmem:[#allocation13 + $0xe0] sm:$0xff]  }
 0xa18   : > { %v7442_v41 = vmax.f32 %v7388_v54, 0.0  ;;  %v13590_v54 = vld [vmem:[#allocation13 + $0x60] sm:$0xff]  }
 0xa19   : > { %v13592_v4 = vld [vmem:[#allocation13 + $0x20] sm:$0xff]  }
 0xa1a   : > { %v7450_v29 = vpack.c.bf16 %v7443_v60, %v7442_v41  ;;  %v13593_v41 = vld [vmem:[#allocation13 + $0xa0] sm:$0xff]  }
 0xa1c   : > { %v12768_v48 = vpop.f32.mrb[36].mxu1  ;;  %7702 = vmatmul.mubr.bf16.vlgmr.msra.gmra.mrb[48].mxu0 %v7450_v29  ;;  %7775 = vmatmul.mubr.bf16.vlgmr.msra.gmra.mrb[48].mxu1 %v7450_v29 }
 0xa1d   : > { %v7409_v16 = vadd.f32 %v12768_v48, %v7320_v40  ;;  %v7401_v36 = vpop.f32.mrb[37].mxu1  ;;  %7711 = vmatprep.mubr.bf16.mxu0 %v16576_v19  ;;  %7784 = vmatprep.mubr.bf16.mxu1 %v16576_v19 }
 0xa1e   : > { %v7402_v30 = vadd.f32 %v7401_v36, %v16624_v23  ;;  %v12769_v2 = vpop.f32.mrb[38].mxu1  ;;  %12331 = vmatpush3.bf16.msra.mxu0 %v13576_v51  ;;  %12371 = vmatpush3.bf16.msra.mxu1 %v13577_v61  ;;  %v13586_v23 = vld [vmem:[#allocation13 + $0x58] sm:$0xff]  }
 0xa1f   : > { %v7445_v11 = vmax.f32 %v7409_v16, 0.0  ;;  %v7404_v37 = vpop.f32.mrb[39].mxu1  ;;  %12332 = vmatprep.subr.bf16.mxu0 %v13578_v0  ;;  %12372 = vmatprep.subr.bf16.mxu1 %v13579_v22  ;;  %v13595_v2 = vld [vmem:[#allocation13 + $0xe8] sm:$0xff]  }
 0xa20   : > { %v7444_v53 = vmax.f32 %v7402_v30, 0.0  ;;  %v13594_v30 = vld [vmem:[#allocation13 + $0x68] sm:$0xff]   ;;  %v13602_v37 = vld [vmem:[#allocation13 + $0x78] sm:$0xff]  }
 0xa22   : > { %v7451_v40 = vpack.c.bf16 %v7445_v11, %v7444_v53  ;;  %12333 = vmatpush3.bf16.msra.mxu0 %v13580_v42  ;;  %12373 = vmatpush3.bf16.msra.mxu1 %v13581_v52  ;;  %v13597_v42 = vld [vmem:[#allocation13 + $0xa8] sm:$0xff]   ;;  %v13598_v52 = vld [vmem:[#allocation13 + $0x70] sm:$0xff]   ;;  %v13605_v53 = vld [vmem:[#allocation13 + $0xb8] sm:$0xff]  }
 0xa23   : > { %12334 = vmatprep.subr.bf16.mxu0 %v13582_v21  ;;  %12374 = vmatprep.subr.bf16.mxu1 %v13583_v24  ;;  %v13599_v11 = vld [vmem:[#allocation13 + $0xf0] sm:$0xff]   ;;  %v13603_v21 = vld [vmem:[#allocation13 + $0xf8] sm:$0xff]  }
 0xa24   : > { %v12772_v32 = vpop.f32.mrb[40].mxu1  ;;  %7712 = vmatmul.mubr.bf16.gmra.mrb[52].mxu0 %v7451_v40  ;;  %7785 = vmatmul.mubr.bf16.gmra.mrb[52].mxu1 %v7451_v40  ;;  %v13604_v24 = vld [vmem:[#allocation13 + $0x38] sm:$0xff]  }
 0xa25   : > { %v7423_v3 = vadd.f32 %v12772_v32, %v16631_v31  ;;  %v7415_v25 = vpop.f32.mrb[41].mxu1  ;;  %7721 = vmatprep.mubr.bf16.mxu0 %v16576_v19  ;;  %7794 = vmatprep.mubr.bf16.mxu1 %v16576_v19  ;;  %v11035_v40 = vld [vmem:[%s17459_s14 + $0x21] ss:$8 sm:$0xf] }
 0xa26   : > { %v7416_v47 = vadd.f32 %v7415_v25, %v16628_v63  ;;  %v12773_v6 = vpop.f32.mrb[42].mxu1  ;;  %12335 = vmatpush3.bf16.msra.mxu0 %v13584_v49  ;;  %12375 = vmatpush3.bf16.msra.mxu1 %v13585_v33  ;;  %v16656_v49 = vrot.slane %v11035_v40, %v15100_v10  ;;  %v16659_v33 = vrot.slane %v11035_v40, %v15105_v50 }
 0xa27   : > { %v7447_v18 = vmax.f32 %v7423_v3, 0.0  ;;  %v7418_v38 = vpop.f32.mrb[43].mxu1  ;;  %12336 = vmatprep.subr.bf16.mxu0 %v13586_v23  ;;  %12376 = vmatprep.subr.bf16.mxu1 %v13587_v1  ;;  %v16662_v23 = vrot.slane %v11035_v40, %v15096_v56  ;;  %v16665_v1 = vrot.slane %v11035_v40, %v15098_v8 }
 0xa28   : > { %v7446_v60 = vmax.f32 %v7416_v47, 0.0 }
 0xa2a   : > { %v7452_v31 = vpack.c.bf16 %v7447_v18, %v7446_v60  ;;  %12337 = vmatpush3.bf16.msra.mxu0 %v13588_v59  ;;  %12377 = vmatpush3.bf16.msra.mxu1 %v13589_v43 }
 0xa2b   : > { %12338 = vmatprep.subr.bf16.mxu0 %v13590_v54  ;;  %12378 = vmatprep.subr.bf16.mxu1 %v13591_v35  ;;  %v17715_v35 = vmax.f32 %v15870_v12, 0.0 }
 0xa2c   : > { %v12776_v63 = vpop.f32.mrb[44].mxu1  ;;  %7722 = vmatmul.mubr.bf16.gmra.mrb[56].mxu0 %v7452_v31  ;;  %7795 = vmatmul.mubr.bf16.gmra.mrb[56].mxu1 %v7452_v31 }
 0xa2d   : > { %v7437_v29 = vadd.f32 %v12776_v63, %v16637_v27  ;;  %v7429_v51 = vpop.f32.mrb[45].mxu1  ;;  %7731 = vmatprep.mubr.bf16.mxu0 %v16576_v19  ;;  %7804 = vmatprep.mubr.bf16.mxu1 %v16576_v19  ;;  %v13596_v27 = vld [vmem:[#allocation13 + $0x28] sm:$0xff]   ;;  %v13600_v19 = vld [vmem:[#allocation13 + $0x30] sm:$0xff]  }
 0xa2e   : > { %v7430_v61 = vadd.f32 %v7429_v51, %v16634_v26  ;;  %v12777_v0 = vpop.f32.mrb[46].mxu1  ;;  %12339 = vmatpush3.bf16.msra.mxu0 %v13592_v4  ;;  %12379 = vmatpush3.bf16.msra.mxu1 %v13593_v41  ;;  %v13601_v26 = vld [vmem:[#allocation13 + $0xb0] sm:$0xff]  }
 0xa2f   : > { %v7449_v22 = vmax.f32 %v7437_v29, 0.0  ;;  %v7432_v48 = vpop.f32.mrb[47].mxu1  ;;  %12340 = vmatprep.subr.bf16.mxu0 %v13594_v30  ;;  %12380 = vmatprep.subr.bf16.mxu1 %v13595_v2  ;;  %v17716_v29 = vmax.f32 %v15876_v39, 0.0  ;;  %v17720_v39 = vmax.f32 %v15894_v20, 0.0 }
 0xa30   : > { %v7448_v16 = vmax.f32 %v7430_v61, 0.0  ;;  %v17717_v61 = vmax.f32 %v15880_v44, 0.0  ;;  %v17718_v48 = vmax.f32 %v15886_v55, 0.0  ;;  %v17721_v44 = vmax.f32 %v15898_v28, 0.0 }
 0xa32   : > { %v7453_v36 = vpack.c.bf16 %v7449_v22, %v7448_v16  ;;  %12341 = vmatpush3.bf16.msra.mxu0 %v13596_v27  ;;  %12381 = vmatpush3.bf16.msra.mxu1 %v13597_v42  ;;  %v17722_v42 = vmax.f32 %v15902_v46, 0.0 }
 0xa33   : > { %12342 = vmatprep.subr.bf16.mxu0 %v13598_v52  ;;  %12382 = vmatprep.subr.bf16.mxu1 %v13599_v11 }
 0xa34   : > { %7732 = vmatmul.mubr.bf16.gmra.mrb[60].mxu0 %v7453_v36  ;;  %7805 = vmatmul.mubr.bf16.gmra.mrb[60].mxu1 %v7453_v36  ;;  %v17719_v36 = vmax.f32 %v15890_v58, 0.0 }
 0xa36   : > { %12343 = vmatpush3.bf16.msra.mxu0 %v13600_v19  ;;  %12383 = vmatpush3.bf16.msra.mxu1 %v13601_v26 }
 0xa37   : > { %12344 = vmatprep.subr.bf16.mxu0 %v13602_v37  ;;  %12384 = vmatprep.subr.bf16.mxu1 %v13603_v21 }
 0xa3a   : > { %12345 = vmatpush3.bf16.msra.mxu0 %v13604_v24  ;;  %12385 = vmatpush3.bf16.msra.mxu1 %v13605_v53 }
 0xaef   : > { %v7703_v32 = vpop.f32.mrb[48].mxu0  ;;  %v7776_v3 = vpop.f32.mrb[48].mxu1 }
 0xaf0   : > { %v7704_v25 = vadd.f32 %v7703_v32, %v16656_v49  ;;  %v7777_v47 = vadd.f32 %v7776_v3, %v16659_v33  ;;  %v7705_v6 = vpop.f32.mrb[49].mxu0  ;;  %v7778_v59 = vpop.f32.mrb[49].mxu1 }
 0xaf1   : > { %v7706_v43 = vadd.f32 %v7705_v6, %v16662_v23  ;;  %v7779_v18 = vadd.f32 %v7778_v59, %v16665_v1  ;;  %v7707_v38 = vpop.f32.mrb[50].mxu0  ;;  %v7780_v54 = vpop.f32.mrb[50].mxu1 }
 0xaf2   : > { %v16673_v60 = vadd.f32 %v7704_v25, %v17715_v35  ;;  %v7708_v31 = vadd.f32 %v7707_v38, %v16656_v49  ;;  %v7781_v4 = vadd.f32 %v7780_v54, %v16659_v33  ;;  %v7709_v41 = vpop.f32.mrb[51].mxu0  ;;  %v7782_v63 = vpop.f32.mrb[51].mxu1  ;;  %v16689_v16 = vadd.f32 %v7777_v47, %v17718_v48 }
 0xaf3   : > { %v16679_v51 = vadd.f32 %v7706_v43, %v17716_v29  ;;  %v16683_v0 = vadd.f32 %v7779_v18, %v17717_v61  ;;  %v7710_v22 = vadd.f32 %v7709_v41, %v16662_v23  ;;  %v7783_v12 = vadd.f32 %v7782_v63, %v16665_v1 }
 0xaf4   : > { %v16693_v30 = vadd.f32 %v7708_v31, %v17719_v36  ;;  %v16697_v2 = vadd.f32 %v7781_v4, %v17720_v39  ;;  %v17594_v55 = vmax.f32 %v16673_v60, 0.0  ;;  %v17593_v46 = vmax.f32 %v16689_v16, 0.0 }
 0xaf5   : > { %v16701_v27 = vadd.f32 %v7710_v22, %v17721_v44  ;;  %v16705_v52 = vadd.f32 %v7783_v12, %v17722_v42  ;;  %v17592_v19 = vmax.f32 %v16679_v51, 0.0  ;;  %v17591_v20 = vmax.f32 %v16683_v0, 0.0 }
 0xaf6   : > { %v17590_v11 = vmax.f32 %v16693_v30, 0.0  ;;  %v17589_v58 = vmax.f32 %v16697_v2, 0.0  ;;  %v17723_v54 = vmax.f32 %v15934_v15, 0.0  ;;  %v17724_v29 = vmax.f32 %v15940_v62, 0.0 }
 0xaf7   : > { %v17588_v26 = vmax.f32 %v16701_v27, 0.0  ;;  %v17587_v28 = vmax.f32 %v16705_v52, 0.0  ;;  %v7713_v37 = vpop.f32.mrb[52].mxu0  ;;  %v7786_v21 = vpop.f32.mrb[52].mxu1  ;;  %v17725_v22 = vmax.f32 %v15944_v9, 0.0  ;;  %v17726_v36 = vmax.f32 %v15950_v13, 0.0 }
 0xaf8   : > { %v7879_v24 = vpack.c.bf16 %v17590_v11, %v17594_v55  ;;  %v7714_v53 = vadd.f32 %v7713_v37, %v16656_v49  ;;  %v7787_v40 = vadd.f32 %v7786_v21, %v16659_v33  ;;  %v7715_v32 = vpop.f32.mrb[53].mxu0  ;;  %v7788_v3 = vpop.f32.mrb[53].mxu1  ;;  %v7881_v38 = vpack.c.bf16 %v17589_v58, %v17593_v46 }
 0xaf9   : > { %v7716_v25 = vadd.f32 %v7715_v32, %v16662_v23  ;;  %v7789_v47 = vadd.f32 %v7788_v3, %v16665_v1  ;;  %v7717_v6 = vpop.f32.mrb[54].mxu0  ;;  %v7790_v59 = vpop.f32.mrb[54].mxu1  ;;  %v7880_v43 = vpack.c.bf16 %v17588_v26, %v17592_v19  ;;  %v7882_v18 = vpack.c.bf16 %v17587_v28, %v17591_v20 }
 0xafa   : > { %v16737_v35 = vadd.f32 %v7714_v53, %v17723_v54  ;;  %v7718_v31 = vadd.f32 %v7717_v6, %v16656_v49  ;;  %v7791_v4 = vadd.f32 %v7790_v59, %v16659_v33  ;;  %v7719_v41 = vpop.f32.mrb[55].mxu0  ;;  %v7792_v63 = vpop.f32.mrb[55].mxu1  ;;  %v16753_v39 = vadd.f32 %v7787_v40, %v17726_v36 }
 0xafb   : > { %v16743_v61 = vadd.f32 %v7716_v25, %v17724_v29  ;;  %v16747_v12 = vadd.f32 %v7789_v47, %v17725_v22  ;;  %v7720_v48 = vadd.f32 %v7719_v41, %v16662_v23  ;;  %v7793_v15 = vadd.f32 %v7792_v63, %v16665_v1  ;;  %8184 = vmatprep.mubr.bf16.mxu0 %v7880_v43 }
 0xafc   : > { %v17727_v44 = vmax.f32 %v15954_v45, 0.0  ;;  %v17728_v62 = vmax.f32 %v15958_v57, 0.0  ;;  %8249 = vmatprep.mubr.bf16.mxu1 %v7882_v18  ;;  %8185 = vmatmul.mubr.bf16.vlgmr.msra.gmra.mrb[64].mxu0 %v7879_v24  ;;  %v17729_v9 = vmax.f32 %v15962_v14, 0.0  ;;  %v17730_v53 = vmax.f32 %v15966_v17, 0.0 }
 0xafd   : > { %8250 = vmatmul.mubr.bf16.vlgmr.msra.gmra.mrb[64].mxu1 %v7881_v38  ;;  %v17574_v13 = vmax.f32 %v16737_v35, 0.0  ;;  %v17570_v57 = vmax.f32 %v16743_v61, 0.0  ;;  %v17569_v3 = vmax.f32 %v16747_v12, 0.0  ;;  %v17571_v17 = vmax.f32 %v16753_v39, 0.0 }
 0xafe   : > { %v16757_v42 = vadd.f32 %v7718_v31, %v17727_v44  ;;  %v16761_v37 = vadd.f32 %v7791_v4, %v17728_v62  ;;  %v16765_v21 = vadd.f32 %v7720_v48, %v17729_v9  ;;  %v16769_v32 = vadd.f32 %v7793_v15, %v17730_v53 }
 0xaff   : > { %v7723_v25 = vpop.f32.mrb[56].mxu0  ;;  %v7796_v47 = vpop.f32.mrb[56].mxu1  ;;  %v17732_v48 = vmax.f32 %v15994_v5, 0.0  ;;  %v17734_v53 = vmax.f32 %v16004_v34, 0.0  ;;  %v17744_v34 = vld [vmem:[#allocation25_spill] sm:$0xff] }
 0xb00   : > { %17731 = vst [vmem:[#allocation36_spill] sm:$0xff] %v16769_v32  ;;  %v17566_v45 = vmax.f32 %v16757_v42, 0.0  ;;  %v17565_v40 = vmax.f32 %v16761_v37, 0.0  ;;  %v17564_v24 = vmax.f32 %v16765_v21, 0.0  ;;  %v17563_v14 = vmax.f32 %v16769_v32, 0.0  ;;  %v7725_v18 = vpop.f32.mrb[57].mxu0 }
 0xb01   : > { %v7724_v59 = vadd.f32 %v7723_v25, %v16656_v49  ;;  %v7797_v43 = vadd.f32 %v7796_v47, %v16659_v33  ;;  %v7798_v38 = vpop.f32.mrb[57].mxu1  ;;  %v7726_v54 = vadd.f32 %v7725_v18, %v16662_v23  ;;  %v7727_v4 = vpop.f32.mrb[58].mxu0  ;;  %v17736_v47 = vmax.f32 %v16008_v7, 0.0  ;;  %v17747_v7 = vld [vmem:[#allocation26_spill] sm:$0xff] }
 0xb02   : > { %v7883_v6 = vpack.c.bf16 %v17566_v45, %v17574_v13  ;;  %v7799_v31 = vadd.f32 %v7798_v38, %v16665_v1  ;;  %v7800_v41 = vpop.f32.mrb[58].mxu1  ;;  %v7884_v63 = vpack.c.bf16 %v17564_v24, %v17570_v57  ;;  %v7886_v29 = vpack.c.bf16 %v17563_v14, %v17569_v3  ;;  %v7729_v62 = vpop.f32.mrb[59].mxu0  ;;  %v17753_v3 = vld [vmem:[#allocation29_spill] sm:$0xff] }
 0xb03   : > { %v7885_v22 = vpack.c.bf16 %v17565_v40, %v17571_v17  ;;  %v16801_v15 = vadd.f32 %v7724_v59, %v17732_v48  ;;  %v7728_v36 = vadd.f32 %v7727_v4, %v16656_v49  ;;  %v7801_v44 = vadd.f32 %v7800_v41, %v16659_v33  ;;  %v7802_v9 = vpop.f32.mrb[59].mxu1  ;;  %v17738_v59 = vld [vmem:[#allocation23_spill] sm:$0xff]  ;;  %v17741_v41 = vld [vmem:[#allocation24_spill] sm:$0xff] }
 0xb04   : > { %v16807_v25 = vadd.f32 %v7726_v54, %v17734_v53  ;;  %v16811_v18 = vadd.f32 %v7799_v31, %v17736_v47  ;;  %v7730_v38 = vadd.f32 %v7729_v62, %v16662_v23  ;;  %v7803_v5 = vadd.f32 %v7802_v9, %v16665_v1  ;;  %8192 = vmatprep.mubr.bf16.mxu0 %v7884_v63  ;;  %v17750_v9 = vld [vmem:[#allocation27_spill] sm:$0xff] }
 0xb05   : > { %17733 = vst [vmem:[#allocation37_spill] sm:$0xff] %v16801_v15  ;;  %v17739_v48 = vmax.f32 %v17738_v59, 0.0  ;;  %v17742_v14 = vmax.f32 %v17741_v41, 0.0  ;;  %v17745_v54 = vmax.f32 %v17744_v34, 0.0  ;;  %8257 = vmatprep.mubr.bf16.mxu1 %v7886_v29  ;;  %8193 = vmatmul.mubr.bf16.gmra.mrb[68].mxu0 %v7883_v6  ;;  %v17748_v31 = vmax.f32 %v17747_v7, 0.0 }
 0xb06   : > { %17735 = vst [vmem:[#allocation38_spill] sm:$0xff] %v16807_v25  ;;  %17737 = vst [vmem:[#allocation39_spill] sm:$0xff] %v16811_v18  ;;  %v17751_v63 = vmax.f32 %v17750_v9, 0.0  ;;  %8258 = vmatmul.mubr.bf16.gmra.mrb[68].mxu1 %v7885_v22  ;;  %v17754_v57 = vmax.f32 %v17753_v3, 0.0  ;;  %v17765_v3 = vld [vmem:[#allocation33_spill] sm:$0xff] }
 0xb07   : > { %v16817_v4 = vadd.f32 %v7797_v43, %v17739_v48  ;;  %v16821_v24 = vadd.f32 %v7728_v36, %v17742_v14  ;;  %v16825_v53 = vadd.f32 %v7801_v44, %v17745_v54  ;;  %v16829_v62 = vadd.f32 %v7730_v38, %v17748_v31  ;;  %v7733_v59 = vpop.f32.mrb[60].mxu0  ;;  %v7806_v38 = vpop.f32.mrb[60].mxu1 }
 0xb08   : > { %v16833_v47 = vadd.f32 %v7803_v5, %v17751_v63  ;;  %v17568_v36 = vmax.f32 %v16807_v25, 0.0  ;;  %v17573_v44 = vmax.f32 %v16811_v18, 0.0  ;;  %v17576_v48 = vmax.f32 %v16801_v15, 0.0  ;;  %v7735_v34 = vpop.f32.mrb[61].mxu0  ;;  %v7808_v54 = vpop.f32.mrb[61].mxu1 }
 0xb09   : > { %17740 = vst [vmem:[#allocation23_spill] sm:$0xff] %v16817_v4  ;;  %17743 = vst [vmem:[#allocation24_spill] sm:$0xff] %v16821_v24  ;;  %v17575_v43 = vmax.f32 %v16821_v24, 0.0  ;;  %v17577_v14 = vmax.f32 %v16825_v53, 0.0  ;;  %v17567_v29 = vmax.f32 %v16829_v62, 0.0  ;;  %v17578_v5 = vmax.f32 %v16817_v4, 0.0 }
 0xb0a   : > { %17746 = vst [vmem:[#allocation25_spill] sm:$0xff] %v16825_v53  ;;  %17749 = vst [vmem:[#allocation26_spill] sm:$0xff] %v16829_v62  ;;  %v17572_v6 = vmax.f32 %v16833_v47, 0.0  ;;  %v7734_v22 = vadd.f32 %v7733_v59, %v16656_v49  ;;  %v7807_v41 = vadd.f32 %v7806_v38, %v16659_v33  ;;  %v7736_v7 = vadd.f32 %v7735_v34, %v16662_v23  ;;  %v7737_v9 = vpop.f32.mrb[62].mxu0  ;;  %v7810_v63 = vpop.f32.mrb[62].mxu1 }
 0xb0b   : > { %17752 = vst [vmem:[#allocation27_spill] sm:$0xff] %v16833_v47  ;;  %v7809_v31 = vadd.f32 %v7808_v54, %v16665_v1  ;;  %v7888_v40 = vpack.c.bf16 %v17567_v29, %v17568_v36  ;;  %v7887_v38 = vpack.c.bf16 %v17575_v43, %v17576_v48  ;;  %v7889_v34 = vpack.c.bf16 %v17577_v14, %v17578_v5  ;;  %v7739_v29 = vpop.f32.mrb[63].mxu0  ;;  %v7812_v36 = vpop.f32.mrb[63].mxu1  ;;  %v17759_v14 = vld [vmem:[#allocation28_spill] sm:$0xff] }
 0xb0c   : > { %v7890_v59 = vpack.c.bf16 %v17572_v6, %v17573_v44  ;;  %v7738_v54 = vadd.f32 %v7737_v9, %v16656_v49  ;;  %v7811_v45 = vadd.f32 %v7810_v63, %v16659_v33  ;;  %v16867_v17 = vadd.f32 %v7736_v7, %v17754_v57  ;;  %v17756_v6 = vld [vmem:[#allocation30_spill] sm:$0xff]  ;;  %v17762_v33 = vld [vmem:[#allocation32_spill] sm:$0xff] }
 0xb0d   : > { %v17757_v44 = vmax.f32 %v17756_v6, 0.0  ;;  %v7740_v43 = vadd.f32 %v7739_v29, %v16662_v23  ;;  %v7813_v48 = vadd.f32 %v7812_v36, %v16665_v1  ;;  %8200 = vmatprep.mubr.bf16.mxu0 %v7888_v40  ;;  %v17760_v5 = vmax.f32 %v17759_v14, 0.0  ;;  %v17771_v1 = vld [vmem:[#allocation34_spill] sm:$0xff]  ;;  %v17774_v14 = vld [vmem:[#allocation35_spill] sm:$0xff] }
 0xb0e   : > { %17755 = vst [vmem:[#allocation29_spill] sm:$0xff] %v16867_v17  ;;  %v17763_v9 = vmax.f32 %v17762_v33, 0.0  ;;  %v17766_v57 = vmax.f32 %v17765_v3, 0.0  ;;  %8265 = vmatprep.mubr.bf16.mxu1 %v7890_v59  ;;  %8201 = vmatmul.mubr.bf16.gmra.mrb[72].mxu0 %v7887_v38  ;;  %v17772_v40 = vmax.f32 %v17771_v1, 0.0  ;;  %v17775_v29 = vmax.f32 %v17774_v14, 0.0  ;;  %v13606_v3 = vld [vmem:[#allocation14 + $0xc0] sm:$0xff]  }
 0xb0f   : > { %v16871_v13 = vadd.f32 %v7809_v31, %v17757_v44  ;;  %v16877_v49 = vadd.f32 %v7734_v22, %v17760_v5  ;;  %v17768_v44 = vld [vmem:[#allocation31_spill] sm:$0xff]  ;;  %8266 = vmatmul.mubr.bf16.gmra.mrb[72].mxu1 %v7889_v34  ;;  %v17585_v22 = vmax.f32 %v16867_v17, 0.0  ;;  %12474 = vmatprep.subr.bf16.mxu1 %v13606_v3  ;;  %v13610_v1 = vld [vmem:[#allocation14 + $0xc8] sm:$0xff]   ;;  %v13619_v3 = vld [vmem:[#allocation14 + $0x98] sm:$0xff]  }
 0xb10   : > { %v16881_v63 = vadd.f32 %v7738_v54, %v17763_v9  ;;  %v16885_v7 = vadd.f32 %v7811_v45, %v17766_v57  ;;  %v17769_v6 = vmax.f32 %v17768_v44, 0.0  ;;  %v16893_v36 = vadd.f32 %v7740_v43, %v17772_v40  ;;  %v13607_v57 = vld [vmem:[#allocation14 + $0x80] sm:$0xff]   ;;  %v13611_v40 = vld [vmem:[#allocation14 + $0x88] sm:$0xff]  }
 0xb11   : > { %17758 = vst [vmem:[#allocation30_spill] sm:$0xff] %v16871_v13  ;;  %17761 = vst [vmem:[#allocation28_spill] sm:$0xff] %v16877_v49  ;;  %v16897_v5 = vadd.f32 %v7813_v48, %v17775_v29  ;;  %v17581_v31 = vmax.f32 %v16871_v13, 0.0  ;;  %v17586_v43 = vmax.f32 %v16877_v49, 0.0  ;;  %12475 = vmatpush3.bf16.msra.mxu1 %v13607_v57  ;;  %v13608_v44 = vld [vmem:[#allocation14 + $0x40] sm:$0xff]   ;;  %v13612_v14 = vld [vmem:[#allocation14 + $0x48] sm:$0xff]  }
 0xb12   : > { %17764 = vst [vmem:[#allocation32_spill] sm:$0xff] %v16881_v63  ;;  %17767 = vst [vmem:[#allocation33_spill] sm:$0xff] %v16885_v7  ;;  %v16889_v23 = vadd.f32 %v7807_v41, %v17769_v6  ;;  %v17584_v45 = vmax.f32 %v16881_v63, 0.0  ;;  %v17580_v59 = vmax.f32 %v16885_v7, 0.0  ;;  %v17583_v41 = vmax.f32 %v16893_v36, 0.0  ;;  %v13609_v6 = vld [vmem:[#allocation14] sm:$0xff]   ;;  %12410 = vmatprep.subr.bf16.mxu0 %v13608_v44  ;;  %12476 = vmatprep.subr.bf16.mxu1 %v13610_v1 }
 0xb13   : > { %17773 = vst [vmem:[#allocation34_spill] sm:$0xff] %v16893_v36  ;;  %17776 = vst [vmem:[#allocation35_spill] sm:$0xff] %v16897_v5  ;;  %v17579_v38 = vmax.f32 %v16897_v5, 0.0  ;;  %12411 = vmatpush3.bf16.msra.mxu0 %v13609_v6  ;;  %v13613_v29 = vld [vmem:[#allocation14 + $0x8] sm:$0xff]   ;;  %v13620_v57 = vld [vmem:[#allocation14 + $0x58] sm:$0xff]  }
 0xb14   : > { %17770 = vst [vmem:[#allocation31_spill] sm:$0xff] %v16889_v23  ;;  %v17582_v54 = vmax.f32 %v16889_v23, 0.0  ;;  %v7892_v48 = vpack.c.bf16 %v17583_v41, %v17585_v22  ;;  %v7891_v33 = vpack.c.bf16 %v17584_v45, %v17586_v43  ;;  %12412 = vmatprep.subr.bf16.mxu0 %v13612_v14  ;;  %v13621_v44 = vld [vmem:[#allocation14 + $0x18] sm:$0xff]   ;;  %v13622_v6 = vld [vmem:[#allocation14 + $0xe0] sm:$0xff]   ;;  %v13664_v63 = vld [vmem:[#allocation14 + $0x1f0] sm:$0xff]  }
 0xb15   : > { %v7894_v34 = vpack.c.bf16 %v17579_v38, %v17581_v31  ;;  %12477 = vmatpush3.bf16.msra.mxu1 %v13611_v40  ;;  %v13614_v38 = vld [vmem:[#allocation14 + $0xd0] sm:$0xff]   ;;  %v13623_v1 = vld [vmem:[#allocation14 + $0xa0] sm:$0xff]  }
 0xb16   : > { %v7893_v9 = vpack.c.bf16 %v17580_v59, %v17582_v54  ;;  %8208 = vmatprep.mubr.bf16.mxu0 %v7892_v48  ;;  %v13615_v48 = vld [vmem:[#allocation14 + $0x90] sm:$0xff]   ;;  %12478 = vmatprep.subr.bf16.mxu1 %v13614_v38  ;;  %v13624_v40 = vld [vmem:[#allocation14 + $0x60] sm:$0xff]   ;;  %v13626_v38 = vld [vmem:[#allocation14 + $0xe8] sm:$0xff]  }
 0xb17   : > { %8273 = vmatprep.mubr.bf16.mxu1 %v7894_v34  ;;  %8209 = vmatmul.mubr.bf16.gmra.mrb[76].mxu0 %v7891_v33  ;;  %v13616_v34 = vld [vmem:[#allocation14 + $0x50] sm:$0xff]   ;;  %v13625_v14 = vld [vmem:[#allocation14 + $0x20] sm:$0xff]  }
 0xb18   : > { %8274 = vmatmul.mubr.bf16.gmra.mrb[76].mxu1 %v7893_v9  ;;  %12413 = vmatpush3.bf16.msra.mxu0 %v13613_v29  ;;  %v13617_v33 = vld [vmem:[#allocation14 + $0x10] sm:$0xff]   ;;  %v13618_v9 = vld [vmem:[#allocation14 + $0xd8] sm:$0xff]   ;;  %v13627_v29 = vld [vmem:[#allocation14 + $0xa8] sm:$0xff]  }
 0xb19   : > { %12479 = vmatpush3.bf16.msra.mxu1 %v13615_v48  ;;  %12414 = vmatprep.subr.bf16.mxu0 %v13616_v34  ;;  %v13628_v48 = vld [vmem:[#allocation14 + $0x68] sm:$0xff]  }
 0xb1a   : > { %12480 = vmatprep.subr.bf16.mxu1 %v13618_v9  ;;  %v13629_v34 = vld [vmem:[#allocation14 + $0x28] sm:$0xff]   ;;  %v13631_v9 = vld [vmem:[#allocation14 + $0xb0] sm:$0xff]  }
 0xb1c   : > { %12415 = vmatpush3.bf16.msra.mxu0 %v13617_v33  ;;  %v13630_v33 = vld [vmem:[#allocation14 + $0xf0] sm:$0xff]  }
 0xb1d   : > { %12481 = vmatpush3.bf16.msra.mxu1 %v13619_v3  ;;  %12416 = vmatprep.subr.bf16.mxu0 %v13620_v57  ;;  %v13632_v3 = vld [vmem:[#allocation14 + $0x70] sm:$0xff]  }
 0xb1e   : > { %12482 = vmatprep.subr.bf16.mxu1 %v13622_v6  ;;  %v13633_v57 = vld [vmem:[#allocation14 + $0x30] sm:$0xff]   ;;  %v13635_v6 = vld [vmem:[#allocation14 + $0xb8] sm:$0xff]  }
 0xb20   : > { %12417 = vmatpush3.bf16.msra.mxu0 %v13621_v44  ;;  %v13634_v44 = vld [vmem:[#allocation14 + $0xf8] sm:$0xff]  }
 0xb21   : > { %12483 = vmatpush3.bf16.msra.mxu1 %v13623_v1  ;;  %12418 = vmatprep.subr.bf16.mxu0 %v13624_v40  ;;  %v13636_v1 = vld [vmem:[#allocation14 + $0x78] sm:$0xff]  }
 0xb22   : > { %12484 = vmatprep.subr.bf16.mxu1 %v13626_v38  ;;  %v13637_v40 = vld [vmem:[#allocation14 + $0x38] sm:$0xff]   ;;  %v13646_v38 = vld [vmem:[#allocation14 + $0x1c0] sm:$0xff]  }
 0xb24   : > { %12419 = vmatpush3.bf16.msra.mxu0 %v13625_v14  ;;  %v13638_v14 = vld [vmem:[#allocation14 + $0x140] sm:$0xff]  }
 0xb25   : > { %12485 = vmatpush3.bf16.msra.mxu1 %v13627_v29  ;;  %12420 = vmatprep.subr.bf16.mxu0 %v13628_v48 }
 0xb26   : > { %12486 = vmatprep.subr.bf16.mxu1 %v13630_v33 }
 0xb28   : > { %12421 = vmatpush3.bf16.msra.mxu0 %v13629_v34  ;;  %v16926_v34 = vld [vmem:[%s17459_s14 + $0x22] ss:$0 sm:$0xff] }
 0xb29   : > { %12487 = vmatpush3.bf16.msra.mxu1 %v13631_v9  ;;  %12422 = vmatprep.subr.bf16.mxu0 %v13632_v3 }
 0xb2a   : > { %12488 = vmatprep.subr.bf16.mxu1 %v13634_v44 }
 0xb2c   : > { %12423 = vmatpush3.bf16.msra.mxu0 %v13633_v57 }
 0xb2d   : > { %12489 = vmatpush3.bf16.msra.mxu1 %v13635_v6  ;;  %12424 = vmatprep.subr.bf16.mxu0 %v13636_v1 }
 0xb2e   : > { %12602 = vmatprep.subr.bf16.mxu1 %v13646_v38 }
 0xb30   : > { %12425 = vmatpush3.bf16.msra.mxu0 %v13637_v40 }
 0xb31   : > { %12538 = vmatprep.subr.bf16.mxu0 %v13638_v14 }
 0xbcf   : > { %v12346_v29 = vpop.f32.mrb[64].mxu0 }
 0xbd0   : > { %v12386_v48 = vpop.f32.mrb[64].mxu1  ;;  %v12347_v33 = vpop.f32.mrb[65].mxu0 }
 0xbd1   : > { %v12348_v9 = vadd.f32 %v12347_v33, %v12346_v29  ;;  %v12387_v3 = vpop.f32.mrb[65].mxu1  ;;  %v12349_v57 = vpop.f32.mrb[66].mxu0 }
 0xbd2   : > { %v12388_v44 = vadd.f32 %v12387_v3, %v12386_v48  ;;  %v12389_v6 = vpop.f32.mrb[66].mxu1  ;;  %v12350_v59 = vpop.f32.mrb[67].mxu0 }
 0xbd3   : > { %v8187_v1 = vadd.f32 %v12348_v9, %v16926_v34  ;;  %v12351_v40 = vadd.f32 %v12350_v59, %v12349_v57  ;;  %v12390_v14 = vpop.f32.mrb[67].mxu1 }
 0xbd4   : > { %v12391_v31 = vadd.f32 %v12390_v14, %v12389_v6 }
 0xbd5   : > { %v8252_v38 = vadd.f32 %v12388_v44, %v8187_v1  ;;  %v8190_v54 = vadd.f32 %v12351_v40, %v16926_v34 }
 0xbd7   : > { %v8282_v41 = vmax.f32 %v8252_v38, 0.0  ;;  %v8255_v45 = vadd.f32 %v12391_v31, %v8190_v54 }
 0xbd8   : > { %v12352_v22 = vpop.f32.mrb[68].mxu0 }
 0xbd9   : > { %v12392_v43 = vpop.f32.mrb[68].mxu1  ;;  %v12353_v28 = vpop.f32.mrb[69].mxu0  ;;  %v11274_v26 = vpack.c.bf16 %v8282_v41, %v8282_v41  ;;  %v8283_v29 = vmax.f32 %v8255_v45, 0.0 }
 0xbda   : > { %v12354_v33 = vadd.f32 %v12353_v28, %v12352_v22  ;;  %v12393_v58 = vpop.f32.mrb[69].mxu1  ;;  %v12355_v48 = vpop.f32.mrb[70].mxu0 }
 0xbdb   : > { %v12394_v3 = vadd.f32 %v12393_v58, %v12392_v43  ;;  %v12395_v11 = vpop.f32.mrb[70].mxu1  ;;  %v12356_v20 = vpop.f32.mrb[71].mxu0  ;;  %v8314_v9 = vrot.slane %v11274_v26, 7  ;;  %v11275_v59 = vpack.c.bf16 %v8283_v29, %v8283_v29 }
 0xbdc   : > { %v8195_v57 = vadd.f32 %v12354_v33, %v16926_v34  ;;  %v12357_v44 = vadd.f32 %v12356_v20, %v12355_v48  ;;  %v12396_v6 = vpop.f32.mrb[71].mxu1 }
 0xbdd   : > { %v12397_v1 = vadd.f32 %v12396_v6, %v12395_v11  ;;  %8330 = vst [vmem:[#allocation2 + $0x8] sm:$0x1e] %v8314_v9  ;;  %v8315_v31 = vrot.slane %v11275_v59, 7  ;;  %v16932_v11 = vld [vmem:[#allocation2] sm:$0xff] }
 0xbde   : > { %v8260_v54 = vadd.f32 %v12394_v3, %v8195_v57  ;;  %v8198_v40 = vadd.f32 %v12357_v44, %v16926_v34  ;;  %v8352_v3 = vshll.u32 %v16932_v11, 16 }
 0xbdf   : > { %8331 = vst [vmem:[#allocation2 + $0x10] sm:$0x1e] %v8315_v31 }
 0xbe0   : > { %v8284_v45 = vmax.f32 %v8260_v54, 0.0  ;;  %v8263_v28 = vadd.f32 %v12397_v1, %v8198_v40  ;;  %v16937_v54 = vrot.slane %v16932_v11, 1 }
 0xbe1   : > { %v12358_v22 = vpop.f32.mrb[72].mxu0 }
 0xbe2   : > { %v12398_v41 = vpop.f32.mrb[72].mxu1  ;;  %v12359_v58 = vpop.f32.mrb[73].mxu0  ;;  %v11276_v43 = vpack.c.bf16 %v8284_v45, %v8284_v45  ;;  %v8285_v14 = vmax.f32 %v8263_v28, 0.0 }
 0xbe3   : > { %v12360_v26 = vadd.f32 %v12359_v58, %v12358_v22  ;;  %v12399_v38 = vpop.f32.mrb[73].mxu1  ;;  %v12361_v29 = vpop.f32.mrb[74].mxu0 }
 0xbe4   : > { %v12400_v33 = vadd.f32 %v12399_v38, %v12398_v41  ;;  %v12401_v20 = vpop.f32.mrb[74].mxu1  ;;  %v12362_v48 = vpop.f32.mrb[75].mxu0  ;;  %v8316_v9 = vrot.slane %v11276_v43, 7  ;;  %v11277_v59 = vpack.c.bf16 %v8285_v14, %v8285_v14  ;;  %v8339_v31 = vld [vmem:[#allocation2 + $0x8] sm:$0xff]  ;;  %v17599_v14 = vshrl.u32 %v16932_v11, 16 }
 0xbe5   : > { %v8203_v57 = vadd.f32 %v12360_v26, %v16926_v34  ;;  %v12363_v44 = vadd.f32 %v12362_v48, %v12361_v29  ;;  %v12402_v6 = vpop.f32.mrb[75].mxu1  ;;  %v8357_v22 = vshll.u32 %v8339_v31, 16  ;;  %v8361_v58 = vshrl.u32 %v8339_v31, 16 }
 0xbe6   : > { %v12403_v1 = vadd.f32 %v12402_v6, %v12401_v20  ;;  %8332 = vst [vmem:[#allocation2 + $0x18] sm:$0x1e] %v8316_v9  ;;  %v8317_v40 = vrot.slane %v11277_v59, 7  ;;  %v16940_v41 = vld [vmem:[#allocation2 + $0x10] sm:$0xff]  ;;  %v8429_v43 = vrot.slane %v8339_v31, 1  ;;  %v16943_v26 = vrot.slane %v8352_v3, 1 }
 0xbe7   : > { %v8268_v45 = vadd.f32 %v12400_v33, %v8203_v57  ;;  %v8206_v28 = vadd.f32 %v12363_v44, %v16926_v34  ;;  %v8359_v48 = vrot.slane %v8357_v22, 1  ;;  %v8365_v9 = vshll.u32 %v16940_v41, 16 }
 0xbe8   : > { %8333 = vst [vmem:[#allocation2 + $0x20] sm:$0x1e] %v8317_v40  ;;  %v8430_v57 = vsel %vm1620_vm0, %v16937_v54, %v8429_v43  ;;  %v8431_v44 = vrot.slane %v16940_v41, 1  ;;  %v16955_v5 = vor.u32 %v16943_v26, %v17599_v14 }
 0xbe9   : > { %v8286_v38 = vmax.f32 %v8268_v45, 0.0  ;;  %v8271_v29 = vadd.f32 %v12403_v1, %v8206_v28  ;;  %v8363_v55 = vor.u32 %v8361_v58, %v8359_v48  ;;  %v8367_v28 = vrot.slane %v8365_v9, 1 }
 0xbea   : > { %v12364_v20 = vpop.f32.mrb[76].mxu0  ;;  %v16950_v22 = vsel %vm1620_vm0, %v8429_v43, %v8431_v44  ;;  %v8369_v58 = vshrl.u32 %v16940_v41, 16  ;;  %v8627_v9 = vshll.u32 %v8430_v57, 16 }
 0xbeb   : > { %v12404_v59 = vpop.f32.mrb[76].mxu1  ;;  %v12365_v33 = vpop.f32.mrb[77].mxu0  ;;  %v11278_v6 = vpack.c.bf16 %v8286_v38, %v8286_v38  ;;  %v8287_v31 = vmax.f32 %v8271_v29, 0.0  ;;  %v8632_v14 = vshll.u32 %v16950_v22, 16 }
 0xbec   : > { %v12366_v19 = vadd.f32 %v12365_v33, %v12364_v20  ;;  %v12405_v46 = vpop.f32.mrb[77].mxu1  ;;  %v12367_v3 = vpop.f32.mrb[78].mxu0 }
 0xbed   : > { %v12406_v40 = vadd.f32 %v12405_v46, %v12404_v59  ;;  %v12407_v45 = vpop.f32.mrb[78].mxu1  ;;  %v12368_v1 = vpop.f32.mrb[79].mxu0  ;;  %v8318_v7 = vrot.slane %v11278_v6, 7  ;;  %v11279_v13 = vpack.c.bf16 %v8287_v31, %v8287_v31  ;;  %v16959_v46 = vsel %vm1540_vm1, %v8363_v55, %v8367_v28  ;;  %v8341_v6 = vld [vmem:[#allocation2 + $0x18] sm:$0xff] }
 0xbee   : > { %v8211_v38 = vadd.f32 %v12366_v19, %v16926_v34  ;;  %v12369_v29 = vadd.f32 %v12368_v1, %v12367_v3  ;;  %v12408_v20 = vpop.f32.mrb[79].mxu1  ;;  %9387 = vmatprep.mubr.bf16.mxu1 %v16959_v46  ;;  %v8625_v19 = vshrl.u32 %v8430_v57, 16  ;;  %v8629_v31 = vrot.slane %v8627_v9, 1  ;;  %v13650_v57 = vld [vmem:[#allocation14 + $0x1c8] sm:$0xff]  }
 0xbef   : > { %v12409_v33 = vadd.f32 %v12408_v20, %v12407_v45  ;;  %8334 = vst [vmem:[#allocation2 + $0x28] sm:$0x1e] %v8318_v7  ;;  %v8319_v43 = vrot.slane %v11279_v13, 7  ;;  %v8360_v3 = vsel %vm1540_vm1, %v16955_v5, %v8359_v48  ;;  %v8620_v55 = vshll.u32 %v16959_v46, 16  ;;  %v16969_v36 = vld [vmem:[#allocation2 + $0x20] sm:$0xff] }
 0xbf0   : > { %v8276_v59 = vadd.f32 %v12406_v40, %v8211_v38  ;;  %v8214_v23 = vadd.f32 %v12369_v29, %v16926_v34  ;;  %v8634_v7 = vrot.slane %v8632_v14, 1  ;;  %v8371_v13 = vor.u32 %v8369_v58, %v8367_v28  ;;  %v13647_v38 = vld [vmem:[#allocation14 + $0x180] sm:$0xff]  }
 0xbf1   : > { %8335 = vst [vmem:[#allocation2 + $0x30] sm:$0x1e] %v8319_v43  ;;  %v8630_v40 = vor.u32 %v8629_v31, %v8625_v19  ;;  %v8615_v1 = vshll.u32 %v8360_v3, 16  ;;  %v8373_v34 = vshll.u32 %v8341_v6, 16  ;;  %v8613_v47 = vshrl.u32 %v8360_v3, 16  ;;  %v13651_v31 = vld [vmem:[#allocation14 + $0x188] sm:$0xff]  }
 0xbf2   : > { %v8288_v41 = vmax.f32 %v8276_v59, 0.0  ;;  %v8279_v45 = vadd.f32 %v12409_v33, %v8214_v23  ;;  %v8433_v53 = vrot.slane %v8341_v6, 1  ;;  %v8622_v48 = vrot.slane %v8620_v55, 1 }
 0xbf3   : > { %v8635_v9 = vsel %vm1540_vm1, %v8630_v40, %v8634_v7  ;;  %v8617_v18 = vrot.slane %v8615_v1, 1  ;;  %v8375_v4 = vrot.slane %v8373_v34, 1  ;;  %v8636_v14 = vshrl.u32 %v16959_v46, 16  ;;  %v13640_v34 = vld [vmem:[#allocation14 + $0x148] sm:$0xff]  }
 0xbf4   : > { %v11280_v29 = vpack.c.bf16 %v8288_v41, %v8288_v41  ;;  %v8289_v20 = vmax.f32 %v8279_v45, 0.0  ;;  %9388 = vmatmul.mubr.bf16.vlgmr.msra.gmra.mrb[80].mxu1 %v8635_v9  ;;  %v16973_v28 = vsel %vm1620_vm0, %v8431_v44, %v8433_v53  ;;  %v8377_v19 = vshrl.u32 %v8341_v6, 16  ;;  %v13639_v41 = vld [vmem:[#allocation14 + $0x100] sm:$0xff]  }
 0xbf5   : > { %v8618_v33 = vor.u32 %v8617_v18, %v8613_v47  ;;  %v16976_v58 = vsel %vm1540_vm1, %v8371_v13, %v8375_v4  ;;  %v8648_v59 = vshll.u32 %v16973_v28, 16  ;;  %12603 = vmatpush3.bf16.msra.mxu1 %v13647_v38  ;;  %v8381_v40 = vshll.u32 %v16969_v36, 16 }
 0xbf6   : > { %v8320_v43 = vrot.slane %v11280_v29, 7  ;;  %v11281_v23 = vpack.c.bf16 %v8289_v20, %v8289_v20  ;;  %9394 = vmatprep.mubr.bf16.mxu1 %v16976_v58  ;;  %v8640_v45 = vshll.u32 %v16976_v58, 16  ;;  %v8435_v44 = vrot.slane %v16969_v36, 1  ;;  %v16983_v18 = vld [vmem:[#allocation2 + $0x28] sm:$0xff]  ;;  %12604 = vmatprep.subr.bf16.mxu1 %v13650_v57 }
 0xbf7   : > { %v8623_v47 = vsel %vm1540_vm1, %v8618_v33, %v8622_v48  ;;  %v8644_v6 = vshrl.u32 %v16950_v22, 16  ;;  %v8650_v13 = vrot.slane %v8648_v59, 1  ;;  %v8379_v1 = vor.u32 %v8377_v19, %v8375_v4  ;;  %v13653_v33 = vld [vmem:[#allocation14 + $0x190] sm:$0xff]   ;;  %v13656_v59 = vld [vmem:[#allocation14 + $0x1d8] sm:$0xff]  }
 0xbf8   : > { %8336 = vst [vmem:[#allocation2 + $0x38] sm:$0x1e] %v8320_v43  ;;  %v8321_v55 = vrot.slane %v11281_v23, 7  ;;  %9298 = vmatprep.mubr.bf16.mxu0 %v8623_v47  ;;  %v8638_v38 = vor.u32 %v8636_v14, %v8622_v48  ;;  %v8642_v29 = vrot.slane %v8640_v45, 1  ;;  %v8383_v20 = vrot.slane %v8381_v40, 1  ;;  %v13652_v43 = vld [vmem:[#allocation14 + $0x1d0] sm:$0xff]  }
 0xbf9   : > { %v16988_v9 = vsel %vm1620_vm0, %v8433_v53, %v8435_v44  ;;  %9299 = vmatmul.mubr.bf16.vlgmr.msra.gmra.mrb[80].mxu0 %v8360_v3  ;;  %v8646_v23 = vor.u32 %v8644_v6, %v8634_v7  ;;  %v8389_v57 = vshll.u32 %v16983_v18, 16  ;;  %12605 = vmatpush3.bf16.msra.mxu1 %v13651_v31  ;;  %v8652_v48 = vshrl.u32 %v16976_v58, 16  ;;  %v13641_v14 = vld [vmem:[#allocation14 + $0x108] sm:$0xff]  }
 0xbfa   : > { %8337 = vst [vmem:[#allocation2 + $0x40] sm:$0x1e] %v8321_v55  ;;  %12539 = vmatpush3.bf16.msra.mxu0 %v13639_v41  ;;  %v16992_v22 = vsel %vm1540_vm1, %v8638_v38, %v8642_v29  ;;  %v16995_v4 = vsel %vm1540_vm1, %v8379_v1, %v8383_v20  ;;  %v8385_v53 = vshrl.u32 %v16969_v36, 16  ;;  %v8664_v19 = vshll.u32 %v16988_v9, 16  ;;  %v13642_v55 = vld [vmem:[#allocation14 + $0x150] sm:$0xff]   ;;  %v17005_v41 = vld [vmem:[#allocation2 + $0x30] sm:$0xff]  ;;  %12606 = vmatprep.subr.bf16.mxu1 %v13652_v43 }
 0xbfb   : > { %9305 = vmatprep.mubr.bf16.mxu0 %v16992_v22  ;;  %v17001_v3 = vsel %vm1540_vm1, %v8646_v23, %v8650_v13  ;;  %12540 = vmatprep.subr.bf16.mxu0 %v13640_v34  ;;  %v8656_v7 = vshll.u32 %v16995_v4, 16  ;;  %v8391_v31 = vrot.slane %v8389_v57, 1  ;;  %v8437_v36 = vrot.slane %v16983_v18, 1  ;;  %v13657_v1 = vld [vmem:[#allocation14 + $0x198] sm:$0xff]   ;;  %v13643_v38 = vld [vmem:[#allocation14 + $0x110] sm:$0xff]  }
 0xbfc   : > { %9395 = vmatmul.mubr.bf16.gmra.mrb[84].mxu1 %v17001_v3  ;;  %v8387_v45 = vor.u32 %v8385_v53, %v8383_v20  ;;  %v8654_v40 = vor.u32 %v8652_v48, %v8642_v29  ;;  %v8660_v6 = vshrl.u32 %v16973_v28, 16  ;;  %v8397_v23 = vshll.u32 %v17005_v41, 16  ;;  %v13644_v43 = vld [vmem:[#allocation14 + $0x158] sm:$0xff]   ;;  %v13658_v53 = vld [vmem:[#allocation14 + $0x1e0] sm:$0xff]  }
 0xbfd   : > { %9401 = vmatprep.mubr.bf16.mxu1 %v16995_v4  ;;  %v8658_v47 = vrot.slane %v8656_v7, 1  ;;  %12607 = vmatpush3.bf16.msra.mxu1 %v13653_v33  ;;  %v8666_v57 = vrot.slane %v8664_v19, 1  ;;  %v17016_v29 = vsel %vm1620_vm0, %v8435_v44, %v8437_v36  ;;  %v8393_v28 = vshrl.u32 %v16983_v18, 16  ;;  %v13645_v7 = vld [vmem:[#allocation14 + $0x118] sm:$0xff]   ;;  %v13648_v19 = vld [vmem:[#allocation14 + $0x160] sm:$0xff]  }
 0xbfe   : > { %12541 = vmatpush3.bf16.msra.mxu0 %v13641_v14  ;;  %v17012_v34 = vsel %vm1540_vm1, %v8387_v45, %v8391_v31  ;;  %12608 = vmatprep.subr.bf16.mxu1 %v13656_v59  ;;  %v8662_v20 = vor.u32 %v8660_v6, %v8650_v13  ;;  %v13659_v14 = vld [vmem:[#allocation14 + $0x1a0] sm:$0xff]   ;;  %v8399_v59 = vrot.slane %v8397_v23, 1  ;;  %v8680_v18 = vshll.u32 %v17016_v29, 16  ;;  %v13663_v6 = vld [vmem:[#allocation14 + $0x1a8] sm:$0xff]  }
 0xbff   : > { %12542 = vmatprep.subr.bf16.mxu0 %v13642_v55  ;;  %v17021_v33 = vsel %vm1540_vm1, %v8654_v40, %v8658_v47  ;;  %v8672_v48 = vshll.u32 %v17012_v34, 16  ;;  %v8395_v13 = vor.u32 %v8393_v28, %v8391_v31  ;;  %v13662_v55 = vld [vmem:[#allocation14 + $0x1e8] sm:$0xff]   ;;  %v8439_v45 = vrot.slane %v17005_v41, 1  ;;  %v13649_v23 = vld [vmem:[#allocation14 + $0x120] sm:$0xff]  }
 0xc00   : > { %v17026_v44 = vsel %vm1540_vm1, %v8662_v20, %v8666_v57  ;;  %v8668_v31 = vshrl.u32 %v16995_v4, 16  ;;  %v13654_v28 = vld [vmem:[#allocation14 + $0x168] sm:$0xff]  }
 0xc01   : > { %9306 = vmatmul.mubr.bf16.gmra.mrb[84].mxu0 %v16959_v46  ;;  %12609 = vmatpush3.bf16.msra.mxu1 %v13657_v1  ;;  %v17029_v46 = vld [vmem:[#allocation2 + $0x38] sm:$0xff]  ;;  %v8674_v40 = vrot.slane %v8672_v48, 1  ;;  %v17036_v1 = vsel %vm1540_vm1, %v8395_v13, %v8399_v59  ;;  %v17041_v17 = vsel %vm1620_vm0, %v8437_v36, %v8439_v45 }
 0xc02   : > { %9312 = vmatprep.mubr.bf16.mxu0 %v17021_v33  ;;  %12543 = vmatpush3.bf16.msra.mxu0 %v13643_v38  ;;  %v8405_v38 = vshll.u32 %v17029_v46, 16  ;;  %v8670_v20 = vor.u32 %v8668_v31, %v8658_v47  ;;  %v8688_v13 = vshll.u32 %v17036_v1, 16  ;;  %v13665_v47 = vld [vmem:[#allocation14 + $0x1b0] sm:$0xff]   ;;  %v8696_v31 = vshll.u32 %v17041_v17, 16 }
 0xc03   : > { %12544 = vmatprep.subr.bf16.mxu0 %v13644_v43  ;;  %12610 = vmatprep.subr.bf16.mxu1 %v13658_v53  ;;  %v8676_v43 = vshrl.u32 %v16988_v9, 16  ;;  %v8682_v53 = vrot.slane %v8680_v18, 1  ;;  %v8401_v9 = vshrl.u32 %v17005_v41, 16  ;;  %v13655_v18 = vld [vmem:[#allocation14 + $0x128] sm:$0xff]   ;;  %v8441_v41 = vrot.slane %v17029_v46, 1 }
 0xc04   : > { %9402 = vmatmul.mubr.bf16.gmra.mrb[88].mxu1 %v17026_v44  ;;  %v17045_v48 = vsel %vm1540_vm1, %v8670_v20, %v8674_v40 }
 0xc05   : > { %9408 = vmatprep.mubr.bf16.mxu1 %v17012_v34  ;;  %12611 = vmatpush3.bf16.msra.mxu1 %v13659_v14  ;;  %v8678_v14 = vor.u32 %v8676_v43, %v8666_v57  ;;  %v17055_v57 = vld [vmem:[#allocation2 + $0x40] sm:$0xff]  ;;  %v8403_v20 = vor.u32 %v8401_v9, %v8399_v59  ;;  %v8692_v43 = vshrl.u32 %v17016_v29, 16  ;;  %v8698_v59 = vrot.slane %v8696_v31, 1  ;;  %v13666_v9 = vld [vmem:[#allocation14 + $0x178] sm:$0xff]  }
 0xc06   : > { %12545 = vmatpush3.bf16.msra.mxu0 %v13645_v7  ;;  %12612 = vmatprep.subr.bf16.mxu1 %v13662_v55  ;;  %v8407_v7 = vrot.slane %v8405_v38, 1  ;;  %v8684_v55 = vshrl.u32 %v17012_v34, 16  ;;  %v8442_v24 = vsel %vm1620_vm0, %v8439_v45, %v8441_v41  ;;  %v8700_v31 = vshrl.u32 %v17036_v1, 16 }
 0xc07   : > { %12546 = vmatprep.subr.bf16.mxu0 %v13648_v19  ;;  %v13668_v19 = vld [vmem:[#allocation14 + $0x1f8] sm:$0xff]   ;;  %v17051_v36 = vsel %vm1540_vm1, %v8678_v14, %v8682_v53  ;;  %v8694_v62 = vor.u32 %v8692_v43, %v8682_v53  ;;  %v8712_v45 = vshll.u32 %v8442_v24, 16 }
 0xc08   : > { %v8686_v38 = vor.u32 %v8684_v55, %v8674_v40  ;;  %v13669_v14 = vld [vmem:[#allocation14 + $0x1b8] sm:$0xff]   ;;  %v17062_v49 = vsel %vm1540_vm1, %v8403_v20, %v8407_v7  ;;  %v8409_v40 = vshrl.u32 %v17029_v46, 16  ;;  %v13670_v46 = vld [vmem:[#allocation14 + $0x200] sm:$0xff]   ;;  %v17078_v55 = vrot.slane %v17055_v57, 1 }
 0xc09   : > { %9313 = vmatmul.mubr.bf16.gmra.mrb[88].mxu0 %v16976_v58  ;;  %12613 = vmatpush3.bf16.msra.mxu1 %v13663_v6  ;;  %v13660_v6 = vld [vmem:[#allocation14 + $0x170] sm:$0xff]   ;;  %v13667_v53 = vld [vmem:[#allocation14 + $0x138] sm:$0xff]  }
 0xc0a   : > { %9319 = vmatprep.mubr.bf16.mxu0 %v17045_v48  ;;  %12547 = vmatpush3.bf16.msra.mxu0 %v13649_v23  ;;  %v8690_v23 = vrot.slane %v8688_v13, 1  ;;  %v8704_v13 = vshll.u32 %v17062_v49, 16  ;;  %v8444_v43 = vsel %vm1620_vm0, %v8441_v41, %v17078_v55 }
 0xc0b   : > { %12548 = vmatprep.subr.bf16.mxu0 %v13654_v28  ;;  %12614 = vmatprep.subr.bf16.mxu1 %v13664_v63  ;;  %v8413_v28 = vshll.u32 %v17055_v57, 16  ;;  %v13661_v63 = vld [vmem:[#allocation14 + $0x130] sm:$0xff]  }
 0xc0c   : > { %9409 = vmatmul.mubr.bf16.gmra.mrb[92].mxu1 %v17051_v36  ;;  %v17069_v29 = vsel %vm1540_vm1, %v8686_v38, %v8690_v23  ;;  %v8702_v20 = vor.u32 %v8700_v31, %v8690_v23  ;;  %v8714_v38 = vrot.slane %v8712_v45, 1  ;;  %v8728_v23 = vshll.u32 %v8444_v43, 16 }
 0xc0d   : > { %9415 = vmatprep.mubr.bf16.mxu1 %v17036_v1  ;;  %12615 = vmatpush3.bf16.msra.mxu1 %v13665_v47  ;;  %v8411_v47 = vor.u32 %v8409_v40, %v8407_v7 }
 0xc0e   : > { %12549 = vmatpush3.bf16.msra.mxu0 %v13655_v18  ;;  %12616 = vmatprep.subr.bf16.mxu1 %v13668_v19  ;;  %v8415_v18 = vrot.slane %v8413_v28, 1  ;;  %v17074_v19 = vsel %vm1540_vm1, %v8694_v62, %v8698_v59  ;;  %v8708_v62 = vshrl.u32 %v17041_v17, 16  ;;  %v8716_v17 = vshrl.u32 %v17062_v49, 16 }
 0xc0f   : > { %12550 = vmatprep.subr.bf16.mxu0 %v13660_v6  ;;  %v8706_v6 = vrot.slane %v8704_v13, 1  ;;  %v8724_v13 = vshrl.u32 %v8442_v24, 16 }
 0xc10   : > { %v17083_v7 = vsel %vm1540_vm1, %v8411_v47, %v8415_v18  ;;  %v8710_v28 = vor.u32 %v8708_v62, %v8698_v59  ;;  %v8417_v47 = vshrl.u32 %v17055_v57, 16 }
 0xc11   : > { %9320 = vmatmul.mubr.bf16.gmra.mrb[92].mxu0 %v16995_v4  ;;  %12617 = vmatpush3.bf16.msra.mxu1 %v13669_v14  ;;  %v17090_v14 = vsel %vm1540_vm1, %v8702_v20, %v8706_v6  ;;  %v8718_v41 = vor.u32 %v8716_v17, %v8706_v6  ;;  %v8726_v59 = vor.u32 %v8724_v13, %v8714_v38  ;;  %v8732_v62 = vshrl.u32 %v17083_v7, 16  ;;  %v13673_v13 = vld [vmem:[#allocation14 + $0x218] sm:$0xff]  }
 0xc12   : > { %9326 = vmatprep.mubr.bf16.mxu0 %v17069_v29  ;;  %12551 = vmatpush3.bf16.msra.mxu0 %v13661_v63  ;;  %v8720_v63 = vshll.u32 %v17083_v7, 16  ;;  %v8445_v45 = vor.u32 %v8417_v47, %v8415_v18  ;;  %v8765_v6 = vshll.u32 %v8417_v47, 16  ;;  %v8740_v18 = vshrl.u32 %v8444_v43, 16  ;;  %v13671_v43 = vld [vmem:[#allocation14 + $0x208] sm:$0xff]  }
 0xc13   : > { %12552 = vmatprep.subr.bf16.mxu0 %v13666_v9  ;;  %v17095_v9 = vsel %vm1540_vm1, %v8710_v28, %v8714_v38  ;;  %v8770_v38 = vshll.u32 %v17078_v55, 16 }
 0xc14   : > { %9416 = vmatmul.mubr.bf16.gmra.mrb[0].mxu1 %v17074_v19  ;;  %v8722_v40 = vrot.slane %v8720_v63, 1  ;;  %v17113_v24 = vsel %vm1540_vm1, %v8445_v45, %v16943_v26  ;;  %v8767_v28 = vrot.slane %v8765_v6, 1 }
 0xc15   : > { %9422 = vmatprep.mubr.bf16.mxu1 %v17062_v49  ;;  %v8748_v47 = vshrl.u32 %v17113_v24, 16 }
 0xc16   : > { %12553 = vmatpush3.bf16.msra.mxu0 %v13667_v53  ;;  %v8730_v53 = vrot.slane %v8728_v23, 1  ;;  %v17103_v31 = vsel %vm1540_vm1, %v8718_v41, %v8722_v40  ;;  %v8734_v57 = vor.u32 %v8732_v62, %v8722_v40  ;;  %v8772_v23 = vrot.slane %v8770_v38, 1  ;;  %v13672_v40 = vld [vmem:[#allocation14 + $0x210] sm:$0xff]  }
 0xc17   : > { %12778 = vmatprep.subr.bf16.mxu0 %v13670_v46 }
 0xc18   : > { %v17107_v20 = vsel %vm1540_vm1, %v8726_v59, %v8730_v53  ;;  %v17117_v63 = vor.u32 %v8740_v18, %v8730_v53  ;;  %v8768_v17 = vsel %vm1540_vm1, %v8734_v57, %v8767_v28 }
 0xc19   : > { %9327 = vmatmul.mubr.bf16.gmra.mrb[0].mxu0 %v17012_v34 }
 0xc1a   : > { %9333 = vmatprep.mubr.bf16.mxu0 %v17090_v14  ;;  %v8773_v41 = vsel %vm1540_vm1, %v17117_v63, %v8772_v23 }
 0xc1c   : > { %9423 = vmatmul.mubr.bf16.gmra.mrb[4].mxu1 %v17095_v9 }
 0xc1d   : > { %9429 = vmatprep.mubr.bf16.mxu1 %v17083_v7 }
 0xc21   : > { %9334 = vmatmul.mubr.bf16.gmra.mrb[4].mxu0 %v17036_v1 }
 0xc22   : > { %9340 = vmatprep.mubr.bf16.mxu0 %v17103_v31 }
 0xc24   : > { %9430 = vmatmul.mubr.bf16.gmra.mrb[8].mxu1 %v17107_v20 }
 0xc25   : > { %9436 = vmatprep.mubr.bf16.mxu1 %v17113_v24 }
 0xc29   : > { %9341 = vmatmul.mubr.bf16.gmra.mrb[8].mxu0 %v17062_v49 }
 0xc2a   : > { %9347 = vmatprep.mubr.bf16.mxu0 %v8768_v17 }
 0xc2c   : > { %9437 = vmatmul.mubr.bf16.gmra.mrb[12].mxu1 %v8773_v41 }
 0xc2d   : > { %9565 = vmatprep.mubr.bf16.mxu1 %v17021_v33 }
 0xc31   : > { %9348 = vmatmul.mubr.bf16.gmra.mrb[12].mxu0 %v17083_v7 }
 0xc32   : > { %9476 = vmatprep.mubr.bf16.mxu0 %v17001_v3  ;;  %v8736_v3 = vshll.u32 %v17113_v24, 16 }
 0xc34   : > { %9566 = vmatmul.mubr.bf16.vlgmr.msra.gmra.mrb[96].mxu1 %v16976_v58  ;;  %v13674_v58 = vld [vmem:[#allocation14 + $0x220] sm:$0xff]  }
 0xc35   : > { %9572 = vmatprep.mubr.bf16.mxu1 %v17045_v48 }
 0xc39   : > { %9477 = vmatmul.mubr.bf16.vlgmr.msra.gmra.mrb[96].mxu0 %v16992_v22  ;;  %v13675_v22 = vld [vmem:[#allocation14 + $0x228] sm:$0xff]  }
 0xc3a   : > { %9483 = vmatprep.mubr.bf16.mxu0 %v17026_v44  ;;  %12779 = vmatpush3.bf16.msra.mxu0 %v13670_v46 }
 0xc3b   : > { %12780 = vmatprep.subr.bf16.mxu0 %v13671_v43 }
 0xc3c   : > { %9573 = vmatmul.mubr.bf16.gmra.mrb[100].mxu1 %v16995_v4  ;;  %v13676_v4 = vld [vmem:[#allocation14 + $0x230] sm:$0xff]  }
 0xc3d   : > { %9579 = vmatprep.mubr.bf16.mxu1 %v17069_v29 }
 0xc3e   : > { %12781 = vmatpush3.bf16.msra.mxu0 %v13671_v43  ;;  %v13678_v43 = vld [vmem:[#allocation16] ss:$16 sps:$4 sm:$0xff]  }
 0xc3f   : > { %12782 = vmatprep.subr.bf16.mxu0 %v13672_v40 }
 0xc41   : > { %9484 = vmatmul.mubr.bf16.gmra.mrb[100].mxu0 %v17021_v33  ;;  %v8738_v33 = vrot.slane %v8736_v3, 1  ;;  %v17180_v3 = vld [vmem:[#allocation16 + $0x2c] ss:$16 sps:$4 sm:$0xff]  }
 0xc42   : > { %9490 = vmatprep.mubr.bf16.mxu0 %v17051_v36  ;;  %12783 = vmatpush3.bf16.msra.mxu0 %v13672_v40  ;;  %v13689_v40 = vld [vmem:[#allocation16 + $0x64] ss:$16 sps:$4 sm:$0xff]  }
 0xc43   : > { %12784 = vmatprep.subr.bf16.mxu0 %v13673_v13  ;;  %v8750_v59 = vor.u32 %v8748_v47, %v8738_v33  ;;  %v17192_v47 = vld [vmem:[#allocation16 + $0x6c] ss:$16 sps:$4 sm:$0xff]  }
 0xc44   : > { %9580 = vmatmul.mubr.bf16.gmra.mrb[104].mxu1 %v17012_v34  ;;  %v13677_v34 = vld [vmem:[#allocation14 + $0x238] sm:$0xff]  }
 0xc45   : > { %9586 = vmatprep.mubr.bf16.mxu1 %v17090_v14 }
 0xc46   : > { %12785 = vmatpush3.bf16.msra.mxu0 %v13673_v13  ;;  %v13690_v13 = vld [vmem:[#allocation16 + $0x80] ss:$16 sps:$4 sm:$0xff]  }
 0xc47   : > { %12786 = vmatprep.subr.bf16.mxu0 %v13674_v58 }
 0xc49   : > { %9491 = vmatmul.mubr.bf16.gmra.mrb[104].mxu0 %v17045_v48  ;;  %v8461_v48 = vsel %vm1540_vm1, %v16955_v5, %v16943_v26 }
 0xc4a   : > { %9497 = vmatprep.mubr.bf16.mxu0 %v17074_v19  ;;  %12787 = vmatpush3.bf16.msra.mxu0 %v13674_v58  ;;  %v8752_v46 = vshll.u32 %v8461_v48, 16  ;;  %v8784_v5 = vshrl.u32 %v8461_v48, 16  ;;  %v13692_v58 = vld [vmem:[#allocation16 + $0x84] ss:$16 sps:$4 sm:$0xff]  }
 0xc4b   : > { %12788 = vmatprep.subr.bf16.mxu0 %v13675_v22 }
 0xc4c   : > { %9587 = vmatmul.mubr.bf16.gmra.mrb[108].mxu1 %v17036_v1  ;;  %v8739_v1 = vsel %vm1540_vm1, %v8734_v57, %v8738_v33  ;;  %v8754_v53 = vrot.slane %v8752_v46, 1  ;;  %v13701_v33 = vld [vmem:[#allocation16 + $0xa4] ss:$16 sps:$4 sm:$0xff]   ;;  %v17190_v46 = vld [vmem:[#allocation16 + $0x68] ss:$16 sps:$4 sm:$0xff]  }
 0xc4d   : > { %9593 = vmatprep.mubr.bf16.mxu1 %v17103_v31 }
 0xc4e   : > { %12789 = vmatpush3.bf16.msra.mxu0 %v13675_v22  ;;  %v8755_v62 = vsel %vm1540_vm1, %v8750_v59, %v8754_v53  ;;  %v8786_v6 = vor.u32 %v8784_v5, %v8754_v53  ;;  %v17175_v22 = vld [vmem:[#allocation16 + $0x8] ss:$16 sps:$4 sm:$0xff]   ;;  %v13710_v53 = vld [vmem:[#allocation16 + $0xc4] ss:$16 sps:$4 sm:$0xff]   ;;  %v17198_v5 = vld [vmem:[#allocation16 + $0x8c] ss:$16 sps:$4 sm:$0xff]  }
 0xc4f   : > { %12790 = vmatprep.subr.bf16.mxu0 %v13676_v4 }
 0xc51   : > { %9498 = vmatmul.mubr.bf16.gmra.mrb[108].mxu0 %v17069_v29  ;;  %v8455_v29 = vsel %vm1620_vm0, %v17078_v55, %v16937_v54 }
 0xc52   : > { %9504 = vmatprep.mubr.bf16.mxu0 %v17095_v9  ;;  %12791 = vmatpush3.bf16.msra.mxu0 %v13676_v4  ;;  %v8744_v45 = vshll.u32 %v8455_v29, 16  ;;  %v8756_v28 = vshrl.u32 %v8455_v29, 16  ;;  %v17178_v4 = vld [vmem:[#allocation16 + $0x28] ss:$16 sps:$4 sm:$0xff]  }
 0xc53   : > { %12792 = vmatprep.subr.bf16.mxu0 %v13677_v34  ;;  %v17196_v29 = vld [vmem:[#allocation16 + $0x88] ss:$16 sps:$4 sm:$0xff]  }
 0xc54   : > { %9594 = vmatmul.mubr.bf16.gmra.mrb[112].mxu1 %v17062_v49  ;;  %v17777_v49 = vshrl.u32 %v16932_v11, 16  ;;  %v8746_v18 = vrot.slane %v8744_v45, 1  ;;  %v17202_v45 = vld [vmem:[#allocation16 + $0xa8] ss:$16 sps:$4 sm:$0xff]  }
 0xc55   : > { %9600 = vmatprep.mubr.bf16.mxu1 %v8739_v1 }
 0xc56   : > { %12793 = vmatpush3.bf16.msra.mxu0 %v13677_v34  ;;  %v8788_v26 = vshll.u32 %v17777_v49, 16  ;;  %v8747_v55 = vsel %vm1540_vm1, %v17117_v63, %v8746_v18  ;;  %v13699_v34 = vld [vmem:[#allocation16 + $0xa0] ss:$16 sps:$4 sm:$0xff]  }
 0xc58   : > { %v8790_v57 = vrot.slane %v8788_v26, 1 }
 0xc59   : > { %9505 = vmatmul.mubr.bf16.gmra.mrb[112].mxu0 %v17090_v14  ;;  %v8780_v14 = vshll.u32 %v16937_v54, 16 }
 0xc5a   : > { %9511 = vmatprep.mubr.bf16.mxu0 %v17107_v20  ;;  %v8791_v38 = vsel %vm1540_vm1, %v8786_v6, %v8790_v57 }
 0xc5b   : > { %v8782_v17 = vrot.slane %v8780_v14, 1  ;;  %v17211_v14 = vld [vmem:[%s17459_s14 + $0x23] ss:$0 sm:$0xff] }
 0xc5c   : > { %9601 = vmatmul.mubr.bf16.gmra.mrb[116].mxu1 %v17083_v7  ;;  %v8758_v7 = vor.u32 %v8756_v28, %v8746_v18 }
 0xc5d   : > { %9607 = vmatprep.mubr.bf16.mxu1 %v8755_v62  ;;  %v17204_v62 = vld [vmem:[#allocation16 + $0xac] ss:$16 sps:$4 sm:$0xff]  }
 0xc5e   : > { %v8783_v23 = vsel %vm1540_vm1, %v8758_v7, %v8782_v17 }
 0xc61   : > { %9512 = vmatmul.mubr.bf16.gmra.mrb[116].mxu0 %v17103_v31  ;;  %v8778_v31 = vsel %vm1540_vm1, %v8750_v59, %v8790_v57  ;;  %v13708_v59 = vld [vmem:[#allocation16 + $0xc0] ss:$16 sps:$4 sm:$0xff]  }
 0xc62   : > { %9518 = vmatprep.mubr.bf16.mxu0 %v8747_v55 }
 0xc64   : > { %9608 = vmatmul.mubr.bf16.gmra.mrb[120].mxu1 %v17113_v24  ;;  %v8792_v24 = vshrl.u32 %v16937_v54, 16  ;;  %v13687_v54 = vld [vmem:[#allocation16 + $0x60] ss:$16 sps:$4 sm:$0xff]  }
 0xc65   : > { %9614 = vmatprep.mubr.bf16.mxu1 %v8791_v38 }
 0xc66   : > { %v8794_v63 = vor.u32 %v8792_v24, %v8782_v17  ;;  %v13719_v24 = vld [vmem:[#allocation16 + $0xe4] ss:$16 sps:$4 sm:$0xff]  }
 0xc68   : > { %v8799_v41 = vsel %vm1540_vm1, %v8794_v63, %v8782_v17 }
 0xc69   : > { %9519 = vmatmul.mubr.bf16.gmra.mrb[120].mxu0 %v8739_v1  ;;  %v17186_v1 = vld [vmem:[#allocation16 + $0x4c] ss:$16 sps:$4 sm:$0xff]  }
 0xc6a   : > { %9525 = vmatprep.mubr.bf16.mxu0 %v8783_v23 }
 0xc6c   : > { %9615 = vmatmul.mubr.bf16.gmra.mrb[124].mxu1 %v8461_v48  ;;  %v17184_v48 = vld [vmem:[#allocation16 + $0x48] ss:$16 sps:$4 sm:$0xff]  }
 0xc6d   : > { %9970 = vmatprep.mubr.bf16.mxu1 %v16932_v11 }
 0xc71   : > { %9526 = vmatmul.mubr.bf16.gmra.mrb[124].mxu0 %v8778_v31  ;;  %v13717_v31 = vld [vmem:[#allocation16 + $0xe0] ss:$16 sps:$4 sm:$0xff]  }
 0xc72   : > { %12794 = vmatprep.mubr.bf16.mxu0 %v17026_v44  ;;  %v13680_v44 = vld [vmem:[#allocation16 + $0x4] ss:$16 sps:$4 sm:$0xff]  }
 0xc73   : > { %9938 = vmatprep.subr.bf16.mxu1 %v13680_v44  ;;  %v17216_v44 = vld [vmem:[#allocation16 + $0xcc] ss:$16 sps:$4 sm:$0xff]  }
 0xc74   : > { %9939 = vmatpush1.bf16.msra.mxu1 %v13678_v43  ;;  %v17214_v43 = vld [vmem:[#allocation16 + $0xc8] ss:$16 sps:$4 sm:$0xff]  }
 0xc79   : > { %12795 = vmatmul.mubr.bf16.vlgmr.msra.gmra.mrb[128].mxu0 %v17051_v36  ;;  %v13681_v36 = vld [vmem:[#allocation16 + $0x20] ss:$16 sps:$4 sm:$0xff]  }
 0xc7a   : > { %12798 = vmatprep.mubr.bf16.mxu0 %v17074_v19  ;;  %v13683_v19 = vld [vmem:[#allocation16 + $0x24] ss:$16 sps:$4 sm:$0xff]  }
 0xc7b   : > { %9940 = vmatprep.subr.bf16.mxu1 %v13683_v19 }
 0xc7c   : > { %9941 = vmatpush1.bf16.msra.mxu1 %v13681_v36 }
 0xc81   : > { %12799 = vmatmul.mubr.bf16.gmra.mrb[132].mxu0 %v17095_v9  ;;  %v13684_v9 = vld [vmem:[#allocation16 + $0x40] ss:$16 sps:$4 sm:$0xff]  }
 0xc82   : > { %12802 = vmatprep.mubr.bf16.mxu0 %v17107_v20  ;;  %v13686_v20 = vld [vmem:[#allocation16 + $0x44] ss:$16 sps:$4 sm:$0xff]  }
 0xc83   : > { %9942 = vmatprep.subr.bf16.mxu1 %v13686_v20 }
 0xc84   : > { %9943 = vmatpush1.bf16.msra.mxu1 %v13684_v9 }
 0xc85   : > { %9944 = vmatprep.subr.bf16.mxu1 %v13689_v40  ;;  %v17224_v40 = vld [vmem:[#allocation16 + $0xe8] ss:$16 sps:$4 sm:$0xff]  }
 0xc88   : > { %9945 = vmatpush1.bf16.msra.mxu1 %v13687_v54  ;;  %v17221_v54 = vld [vmem:[#allocation16 + $0xec] ss:$16 sps:$4 sm:$0xff]  }
 0xc89   : > { %12803 = vmatmul.mubr.bf16.gmra.mrb[136].mxu0 %v8747_v55  ;;  %9946 = vmatprep.subr.bf16.mxu1 %v13692_v58 }
 0xc8a   : > { %12806 = vmatprep.mubr.bf16.mxu0 %v8783_v23 }
 0xc8c   : > { %9947 = vmatpush1.bf16.msra.mxu1 %v13690_v13 }
 0xc8d   : > { %9948 = vmatprep.subr.bf16.mxu1 %v13701_v33 }
 0xc90   : > { %9949 = vmatpush1.bf16.msra.mxu1 %v13699_v34 }
 0xc91   : > { %12807 = vmatmul.mubr.bf16.gmra.mrb[140].mxu0 %v8799_v41  ;;  %9950 = vmatprep.subr.bf16.mxu1 %v13710_v53 }
 0xc92   : > { %10043 = vmatprep.mubr.bf16.mxu0 %v16932_v11  ;;  %v13695_v11 = vld [vmem:[#allocation16 + $0xc] ss:$16 sps:$4 sm:$0xff]  }
 0xc93   : > { %10011 = vmatprep.subr.bf16.mxu0 %v13695_v11 }
 0xc94   : > { %10012 = vmatpush1.bf16.msra.mxu0 %v17175_v22  ;;  %9951 = vmatpush1.bf16.msra.mxu1 %v13708_v59 }
 0xc95   : > { %10013 = vmatprep.subr.bf16.mxu0 %v17180_v3  ;;  %9952 = vmatprep.subr.bf16.mxu1 %v13719_v24 }
 0xc98   : > { %10014 = vmatpush1.bf16.msra.mxu0 %v17178_v4  ;;  %9953 = vmatpush1.bf16.msra.mxu1 %v13717_v31 }
 0xc99   : > { %10015 = vmatprep.subr.bf16.mxu0 %v17186_v1  ;;  %12810 = vmatprep.subr.bf16.mxu1 %v13695_v11 }
 0xc9c   : > { %10016 = vmatpush1.bf16.msra.mxu0 %v17184_v48 }
 0xc9d   : > { %10017 = vmatprep.subr.bf16.mxu0 %v17192_v47 }
 0xca0   : > { %10018 = vmatpush1.bf16.msra.mxu0 %v17190_v46 }
 0xca1   : > { %10019 = vmatprep.subr.bf16.mxu0 %v17198_v5 }
 0xca4   : > { %10020 = vmatpush1.bf16.msra.mxu0 %v17196_v29 }
 0xca5   : > { %10021 = vmatprep.subr.bf16.mxu0 %v17204_v62 }
 0xca8   : > { %10022 = vmatpush1.bf16.msra.mxu0 %v17202_v45 }
 0xca9   : > { %10023 = vmatprep.subr.bf16.mxu0 %v17216_v44 }
 0xcac   : > { %10024 = vmatpush1.bf16.msra.mxu0 %v17214_v43 }
 0xcad   : > { %10025 = vmatprep.subr.bf16.mxu0 %v17221_v54 }
 0xcb0   : > { %10026 = vmatpush1.bf16.msra.mxu0 %v17224_v40 }
 0xcc7   : > { %v12490_v49 = vpop.f32.mrb[80].mxu1 }
 0xcc8   : > { %v12491_v26 = vpop.f32.mrb[81].mxu1 }
 0xcc9   : > { %v12492_v6 = vadd.f32 %v12491_v26, %v12490_v49  ;;  %v12493_v57 = vpop.f32.mrb[82].mxu1 }
 0xcca   : > { %v12494_v18 = vpop.f32.mrb[83].mxu1 }
 0xccc   : > { %v12426_v55 = vpop.f32.mrb[80].mxu0 }
 0xccd   : > { %v12427_v38 = vpop.f32.mrb[81].mxu0 }
 0xcce   : > { %v12428_v28 = vadd.f32 %v12427_v38, %v12426_v55  ;;  %v12429_v7 = vpop.f32.mrb[82].mxu0 }
 0xccf   : > { %v12430_v17 = vpop.f32.mrb[83].mxu0  ;;  %v12496_v23 = vpop.f32.mrb[84].mxu1 }
 0xcd0   : > { %v9301_v63 = vadd.f32 %v12428_v28, %v17211_v14  ;;  %v12497_v41 = vpop.f32.mrb[85].mxu1 }
 0xcd1   : > { %v12498_v36 = vadd.f32 %v12497_v41, %v12496_v23  ;;  %v12499_v19 = vpop.f32.mrb[86].mxu1 }
 0xcd2   : > { %v12500_v9 = vpop.f32.mrb[87].mxu1  ;;  %v17218_v20 = vadd.f32 %v12492_v6, %v9301_v63 }
 0xcd4   : > { %v12432_v13 = vpop.f32.mrb[84].mxu0 }
 0xcd5   : > { %v12433_v58 = vpop.f32.mrb[85].mxu0 }
 0xcd6   : > { %v12434_v34 = vadd.f32 %v12433_v58, %v12432_v13  ;;  %v12435_v33 = vpop.f32.mrb[86].mxu0 }
 0xcd7   : > { %v12436_v59 = vpop.f32.mrb[87].mxu0  ;;  %v12502_v53 = vpop.f32.mrb[88].mxu1 }
 0xcd8   : > { %v9308_v49 = vadd.f32 %v12434_v34, %v17211_v14  ;;  %v12503_v26 = vpop.f32.mrb[89].mxu1 }
 0xcd9   : > { %v12504_v6 = vadd.f32 %v12503_v26, %v12502_v53  ;;  %v12505_v57 = vpop.f32.mrb[90].mxu1 }
 0xcda   : > { %v12506_v18 = vpop.f32.mrb[91].mxu1  ;;  %v17229_v55 = vadd.f32 %v12498_v36, %v9308_v49 }
 0xcdc   : > { %v12438_v38 = vpop.f32.mrb[88].mxu0 }
 0xcdd   : > { %v12439_v11 = vpop.f32.mrb[89].mxu0 }
 0xcde   : > { %v12440_v28 = vadd.f32 %v12439_v11, %v12438_v38  ;;  %v12441_v7 = vpop.f32.mrb[90].mxu0 }
 0xcdf   : > { %v12442_v17 = vpop.f32.mrb[91].mxu0  ;;  %v12508_v23 = vpop.f32.mrb[92].mxu1 }
 0xce0   : > { %v9315_v31 = vadd.f32 %v12440_v28, %v17211_v14  ;;  %v12509_v24 = vpop.f32.mrb[93].mxu1 }
 0xce1   : > { %v12510_v63 = vadd.f32 %v12509_v24, %v12508_v23  ;;  %v12511_v41 = vpop.f32.mrb[94].mxu1 }
 0xce2   : > { %v12512_v19 = vpop.f32.mrb[95].mxu1  ;;  %v17232_v9 = vadd.f32 %v12504_v6, %v9315_v31 }
 0xce4   : > { %v12444_v13 = vpop.f32.mrb[92].mxu0 }
 0xce5   : > { %v12445_v58 = vpop.f32.mrb[93].mxu0 }
 0xce6   : > { %v12446_v34 = vadd.f32 %v12445_v58, %v12444_v13  ;;  %v12447_v33 = vpop.f32.mrb[94].mxu0 }
 0xce7   : > { %v12448_v36 = vpop.f32.mrb[95].mxu0  ;;  %v12514_v59 = vpop.f32.mrb[0].mxu1 }
 0xce8   : > { %v9322_v53 = vadd.f32 %v12446_v34, %v17211_v14  ;;  %v12515_v49 = vpop.f32.mrb[1].mxu1 }
 0xce9   : > { %v12516_v26 = vadd.f32 %v12515_v49, %v12514_v59  ;;  %v12517_v57 = vpop.f32.mrb[2].mxu1 }
 0xcea   : > { %v12518_v18 = vpop.f32.mrb[3].mxu1  ;;  %v17235_v38 = vadd.f32 %v12510_v63, %v9322_v53 }
 0xcec   : > { %v12450_v11 = vpop.f32.mrb[0].mxu0 }
 0xced   : > { %v12451_v28 = vpop.f32.mrb[1].mxu0 }
 0xcee   : > { %v12452_v7 = vadd.f32 %v12451_v28, %v12450_v11  ;;  %v12453_v17 = vpop.f32.mrb[2].mxu0 }
 0xcef   : > { %v12454_v6 = vpop.f32.mrb[3].mxu0  ;;  %v12520_v23 = vpop.f32.mrb[4].mxu1 }
 0xcf0   : > { %v9329_v31 = vadd.f32 %v12452_v7, %v17211_v14  ;;  %v12521_v24 = vpop.f32.mrb[5].mxu1 }
 0xcf1   : > { %v12522_v41 = vadd.f32 %v12521_v24, %v12520_v23  ;;  %v12523_v19 = vpop.f32.mrb[6].mxu1 }
 0xcf2   : > { %v12524_v13 = vpop.f32.mrb[7].mxu1  ;;  %v17238_v58 = vadd.f32 %v12516_v26, %v9329_v31 }
 0xcf4   : > { %v12456_v34 = vpop.f32.mrb[4].mxu0 }
 0xcf5   : > { %v12457_v33 = vpop.f32.mrb[5].mxu0 }
 0xcf6   : > { %v12458_v36 = vadd.f32 %v12457_v33, %v12456_v34  ;;  %v12459_v59 = vpop.f32.mrb[6].mxu0 }
 0xcf7   : > { %v12460_v63 = vpop.f32.mrb[7].mxu0  ;;  %v12526_v53 = vpop.f32.mrb[8].mxu1 }
 0xcf8   : > { %v9336_v49 = vadd.f32 %v12458_v36, %v17211_v14  ;;  %v12527_v57 = vpop.f32.mrb[9].mxu1 }
 0xcf9   : > { %v12528_v18 = vadd.f32 %v12527_v57, %v12526_v53  ;;  %v12529_v11 = vpop.f32.mrb[10].mxu1 }
 0xcfa   : > { %v12530_v28 = vpop.f32.mrb[11].mxu1  ;;  %v17241_v17 = vadd.f32 %v12522_v41, %v9336_v49 }
 0xcfc   : > { %v12462_v7 = vpop.f32.mrb[8].mxu0 }
 0xcfd   : > { %v12463_v6 = vpop.f32.mrb[9].mxu0 }
 0xcfe   : > { %v12464_v23 = vadd.f32 %v12463_v6, %v12462_v7  ;;  %v12465_v24 = vpop.f32.mrb[10].mxu0 }
 0xcff   : > { %v12466_v26 = vpop.f32.mrb[11].mxu0  ;;  %v12532_v31 = vpop.f32.mrb[12].mxu1 }
 0xd00   : > { %v9343_v19 = vadd.f32 %v12464_v23, %v17211_v14  ;;  %v12533_v13 = vpop.f32.mrb[13].mxu1 }
 0xd01   : > { %v12534_v34 = vadd.f32 %v12533_v13, %v12532_v31  ;;  %v12535_v33 = vpop.f32.mrb[14].mxu1 }
 0xd02   : > { %v12536_v59 = vpop.f32.mrb[15].mxu1  ;;  %v17244_v63 = vadd.f32 %v12528_v18, %v9343_v19 }
 0xd04   : > { %v12468_v36 = vpop.f32.mrb[12].mxu0 }
 0xd05   : > { %v12469_v53 = vpop.f32.mrb[13].mxu0 }
 0xd06   : > { %v12470_v57 = vadd.f32 %v12469_v53, %v12468_v36  ;;  %v12471_v11 = vpop.f32.mrb[14].mxu0 }
 0xd07   : > { %v12472_v41 = vpop.f32.mrb[15].mxu0  ;;  %v12618_v49 = vpop.f32.mrb[96].mxu1 }
 0xd08   : > { %v9350_v28 = vadd.f32 %v12470_v57, %v17211_v14  ;;  %v12619_v7 = vpop.f32.mrb[97].mxu1 }
 0xd09   : > { %v12620_v6 = vadd.f32 %v12619_v7, %v12618_v49  ;;  %v12621_v24 = vpop.f32.mrb[98].mxu1 }
 0xd0a   : > { %v12622_v26 = vpop.f32.mrb[99].mxu1  ;;  %v17247_v25 = vadd.f32 %v12534_v34, %v9350_v28 }
 0xd0c   : > { %v12554_v23 = vpop.f32.mrb[96].mxu0 }
 0xd0d   : > { %v12555_v31 = vpop.f32.mrb[97].mxu0 }
 0xd0e   : > { %v12556_v13 = vadd.f32 %v12555_v31, %v12554_v23  ;;  %v12557_v33 = vpop.f32.mrb[98].mxu0 }
 0xd0f   : > { %v12558_v18 = vpop.f32.mrb[99].mxu0  ;;  %v12624_v19 = vpop.f32.mrb[100].mxu1 }
 0xd10   : > { %v9479_v59 = vadd.f32 %v12556_v13, %v17218_v20  ;;  %v12625_v36 = vpop.f32.mrb[101].mxu1 }
 0xd11   : > { %v12626_v53 = vadd.f32 %v12625_v36, %v12624_v19  ;;  %v12627_v11 = vpop.f32.mrb[102].mxu1 }
 0xd12   : > { %v12628_v41 = vpop.f32.mrb[103].mxu1  ;;  %v17250_v15 = vadd.f32 %v12620_v6, %v9479_v59 }
 0xd14   : > { %v12560_v14 = vpop.f32.mrb[100].mxu0 }
 0xd15   : > { %v12561_v57 = vpop.f32.mrb[101].mxu0 }
 0xd16   : > { %v12562_v49 = vadd.f32 %v12561_v57, %v12560_v14  ;;  %v12563_v7 = vpop.f32.mrb[102].mxu0 }
 0xd17   : > { %v12564_v34 = vpop.f32.mrb[103].mxu0  ;;  %v12630_v28 = vpop.f32.mrb[104].mxu1 }
 0xd18   : > { %v9486_v24 = vadd.f32 %v12562_v49, %v17229_v55  ;;  %v12631_v26 = vpop.f32.mrb[105].mxu1 }
 0xd19   : > { %v12632_v23 = vadd.f32 %v12631_v26, %v12630_v28  ;;  %v12633_v31 = vpop.f32.mrb[106].mxu1 }
 0xd1a   : > { %v12634_v33 = vpop.f32.mrb[107].mxu1  ;;  %v17253_v18 = vadd.f32 %v12626_v53, %v9486_v24 }
 0xd1c   : > { %v12566_v20 = vpop.f32.mrb[104].mxu0 }
 0xd1d   : > { %v12567_v13 = vpop.f32.mrb[105].mxu0 }
 0xd1e   : > { %v12568_v19 = vadd.f32 %v12567_v13, %v12566_v20  ;;  %v12569_v36 = vpop.f32.mrb[106].mxu0 }
 0xd1f   : > { %v12570_v6 = vpop.f32.mrb[107].mxu0  ;;  %v12636_v59 = vpop.f32.mrb[108].mxu1 }
 0xd20   : > { %v9493_v11 = vadd.f32 %v12568_v19, %v17232_v9  ;;  %v12637_v41 = vpop.f32.mrb[109].mxu1 }
 0xd21   : > { %v12638_v14 = vadd.f32 %v12637_v41, %v12636_v59  ;;  %v12639_v57 = vpop.f32.mrb[110].mxu1 }
 0xd22   : > { %v12640_v7 = vpop.f32.mrb[111].mxu1  ;;  %v17256_v34 = vadd.f32 %v12632_v23, %v9493_v11 }
 0xd24   : > { %v12572_v55 = vpop.f32.mrb[108].mxu0 }
 0xd25   : > { %v12573_v49 = vpop.f32.mrb[109].mxu0 }
 0xd26   : > { %v12574_v28 = vadd.f32 %v12573_v49, %v12572_v55  ;;  %v12575_v26 = vpop.f32.mrb[110].mxu0 }
 0xd27   : > { %v12576_v53 = vpop.f32.mrb[111].mxu0  ;;  %v12642_v24 = vpop.f32.mrb[112].mxu1 }
 0xd28   : > { %v9500_v31 = vadd.f32 %v12574_v28, %v17235_v38  ;;  %v12643_v33 = vpop.f32.mrb[113].mxu1 }
 0xd29   : > { %v12644_v20 = vadd.f32 %v12643_v33, %v12642_v24  ;;  %v12645_v13 = vpop.f32.mrb[114].mxu1 }
 0xd2a   : > { %v12646_v36 = vpop.f32.mrb[115].mxu1  ;;  %v9589_v6 = vadd.f32 %v12638_v14, %v9500_v31 }
 0xd2c   : > { %v12578_v9 = vpop.f32.mrb[112].mxu0 }
 0xd2d   : > { %v12579_v19 = vpop.f32.mrb[113].mxu0 }
 0xd2e   : > { %v12580_v59 = vadd.f32 %v12579_v19, %v12578_v9  ;;  %v12581_v41 = vpop.f32.mrb[114].mxu0 }
 0xd2f   : > { %v12582_v57 = vpop.f32.mrb[115].mxu0  ;;  %v12648_v23 = vpop.f32.mrb[116].mxu1 }
 0xd30   : > { %v9507_v11 = vadd.f32 %v12580_v59, %v17238_v58  ;;  %v12649_v7 = vpop.f32.mrb[117].mxu1 }
 0xd31   : > { %v12650_v55 = vadd.f32 %v12649_v7, %v12648_v23  ;;  %v12651_v49 = vpop.f32.mrb[118].mxu1 }
 0xd32   : > { %v12652_v26 = vpop.f32.mrb[119].mxu1  ;;  %v17260_v53 = vadd.f32 %v12644_v20, %v9507_v11 }
 0xd34   : > { %v12584_v38 = vpop.f32.mrb[116].mxu0 }
 0xd35   : > { %v12585_v28 = vpop.f32.mrb[117].mxu0 }
 0xd36   : > { %v12586_v24 = vadd.f32 %v12585_v28, %v12584_v38  ;;  %v12587_v33 = vpop.f32.mrb[118].mxu0 }
 0xd37   : > { %v12588_v13 = vpop.f32.mrb[119].mxu0  ;;  %v12654_v14 = vpop.f32.mrb[120].mxu1 }
 0xd38   : > { %v9514_v31 = vadd.f32 %v12586_v24, %v17241_v17  ;;  %v12655_v36 = vpop.f32.mrb[121].mxu1 }
 0xd39   : > { %v12656_v9 = vadd.f32 %v12655_v36, %v12654_v14  ;;  %v12657_v19 = vpop.f32.mrb[122].mxu1 }
 0xd3a   : > { %v12658_v41 = vpop.f32.mrb[123].mxu1  ;;  %v9603_v57 = vadd.f32 %v12650_v55, %v9514_v31 }
 0xd3c   : > { %v12590_v58 = vpop.f32.mrb[120].mxu0 }
 0xd3d   : > { %v12591_v59 = vpop.f32.mrb[121].mxu0 }
 0xd3e   : > { %v12592_v23 = vadd.f32 %v12591_v59, %v12590_v58  ;;  %v12593_v7 = vpop.f32.mrb[122].mxu0 }
 0xd3f   : > { %v12594_v49 = vpop.f32.mrb[123].mxu0  ;;  %v12660_v20 = vpop.f32.mrb[124].mxu1 }
 0xd40   : > { %v9521_v11 = vadd.f32 %v12592_v23, %v17244_v63  ;;  %v12661_v26 = vpop.f32.mrb[125].mxu1 }
 0xd41   : > { %v12662_v38 = vadd.f32 %v12661_v26, %v12660_v20  ;;  %v12663_v28 = vpop.f32.mrb[126].mxu1 }
 0xd42   : > { %v12664_v33 = vpop.f32.mrb[127].mxu1  ;;  %v9610_v13 = vadd.f32 %v12656_v9, %v9521_v11 }
 0xd44   : > { %v12596_v32 = vpop.f32.mrb[124].mxu0 }
 0xd45   : > { %v12597_v17 = vpop.f32.mrb[125].mxu0 }
 0xd46   : > { %v12598_v24 = vadd.f32 %v12597_v17, %v12596_v32  ;;  %v12599_v14 = vpop.f32.mrb[126].mxu0 }
 0xd47   : > { %v12600_v36 = vpop.f32.mrb[127].mxu0 }
 0xd48   : > { %v9528_v55 = vadd.f32 %v12598_v24, %v17247_v25  ;;  %v13731_v25 = vld [vmem:[#allocation2] sm:$0xff] }
 0xd4a   : > { %v9617_v31 = vadd.f32 %v12662_v38, %v9528_v55 }
 0xd4c   : > { %v12796_v19 = vpop.f32.mrb[128].mxu0 }
 0xd4d   : > { %v9664_v41 = vadd.f32 %v12796_v19, %v17253_v18  ;;  %v9656_v58 = vpop.f32.mrb[129].mxu0 }
 0xd4e   : > { %v9657_v59 = vadd.f32 %v9656_v58, %v17250_v15  ;;  %v12797_v63 = vpop.f32.mrb[130].mxu0 }
 0xd4f   : > { %v9712_v23 = vmax.f32 %v9664_v41, 0.0  ;;  %v9659_v7 = vpop.f32.mrb[131].mxu0 }
 0xd50   : > { %v9711_v49 = vmax.f32 %v9657_v59, 0.0 }
 0xd52   : > { %v9719_v20 = vpack.c.bf16 %v9712_v23, %v9711_v49  ;;  %v17780_v23 = vmax.f32 %v16689_v16, 0.0  ;;  %v17783_v16 = vmax.f32 %v16693_v30, 0.0 }
 0xd54   : > { %v12800_v9 = vpop.f32.mrb[132].mxu0  ;;  %9971 = vmatmul.mubr.bf16.vlgmr.msra.gmra.mrb[128].mxu1 %v9719_v20  ;;  %10044 = vmatmul.mubr.bf16.vlgmr.msra.gmra.mrb[144].mxu0 %v9719_v20 }
 0xd55   : > { %v9678_v32 = vadd.f32 %v12800_v9, %v9589_v6  ;;  %v9670_v11 = vpop.f32.mrb[133].mxu0  ;;  %12818 = vmatpush1.bf16.msra.mxu1 %v17175_v22  ;;  %9980 = vmatprep.mubr.bf16.mxu1 %v13731_v25 }
 0xd56   : > { %v9671_v26 = vadd.f32 %v9670_v11, %v17256_v34  ;;  %v12801_v18 = vpop.f32.mrb[134].mxu0  ;;  %12811 = vmatprep.subr.bf16.mxu1 %v17180_v3  ;;  %10053 = vmatprep.mubr.bf16.mxu0 %v13731_v25  ;;  %v17781_v11 = vmax.f32 %v16679_v51, 0.0 }
 0xd57   : > { %v9714_v15 = vmax.f32 %v9678_v32, 0.0  ;;  %v9673_v38 = vpop.f32.mrb[135].mxu0  ;;  %v17782_v18 = vmax.f32 %v16683_v0, 0.0 }
 0xd58   : > { %v9713_v28 = vmax.f32 %v9671_v26, 0.0 }
 0xd59   : > { %12819 = vmatpush1.bf16.msra.mxu1 %v17178_v4 }
 0xd5a   : > { %v9720_v33 = vpack.c.bf16 %v9714_v15, %v9713_v28  ;;  %12812 = vmatprep.subr.bf16.mxu1 %v17186_v1 }
 0xd5c   : > { %v12804_v6 = vpop.f32.mrb[136].mxu0  ;;  %9981 = vmatmul.mubr.bf16.gmra.mrb[132].mxu1 %v9720_v33  ;;  %10054 = vmatmul.mubr.bf16.gmra.mrb[148].mxu0 %v9720_v33 }
 0xd5d   : > { %v9692_v22 = vadd.f32 %v12804_v6, %v9603_v57  ;;  %v9684_v17 = vpop.f32.mrb[137].mxu0  ;;  %12820 = vmatpush1.bf16.msra.mxu1 %v17184_v48  ;;  %9990 = vmatprep.mubr.bf16.mxu1 %v13731_v25  ;;  %v17784_v6 = vmax.f32 %v16697_v2, 0.0 }
 0xd5e   : > { %v9685_v34 = vadd.f32 %v9684_v17, %v17260_v53  ;;  %v12805_v3 = vpop.f32.mrb[138].mxu0  ;;  %12813 = vmatprep.subr.bf16.mxu1 %v17192_v47 }
 0xd5f   : > { %v9716_v24 = vmax.f32 %v9692_v22, 0.0  ;;  %v9687_v14 = vpop.f32.mrb[139].mxu0 }
 0xd60   : > { %v9715_v36 = vmax.f32 %v9685_v34, 0.0  ;;  %v17786_v14 = vmax.f32 %v16701_v27, 0.0 }
 0xd61   : > { %12821 = vmatpush1.bf16.msra.mxu1 %v17190_v46 }
 0xd62   : > { %v9721_v4 = vpack.c.bf16 %v9716_v24, %v9715_v36  ;;  %12814 = vmatprep.subr.bf16.mxu1 %v17198_v5 }
 0xd64   : > { %v12808_v1 = vpop.f32.mrb[140].mxu0  ;;  %9991 = vmatmul.mubr.bf16.gmra.mrb[136].mxu1 %v9721_v4 }
 0xd65   : > { %v9706_v57 = vadd.f32 %v12808_v1, %v9617_v31  ;;  %v9698_v55 = vpop.f32.mrb[141].mxu0  ;;  %12822 = vmatpush1.bf16.msra.mxu1 %v17196_v29  ;;  %10000 = vmatprep.mubr.bf16.mxu1 %v13731_v25  ;;  %v11180_v29 = vld [vmem:[%s17459_s14 + $0x24] ss:$8 sm:$0xf] }
 0xd66   : > { %v9699_v48 = vadd.f32 %v9698_v55, %v9610_v13  ;;  %v12809_v53 = vpop.f32.mrb[142].mxu0  ;;  %12815 = vmatprep.subr.bf16.mxu1 %v17204_v62  ;;  %v17288_v5 = vrot.slane %v11180_v29, %v15100_v10  ;;  %v17294_v62 = vrot.slane %v11180_v29, %v15096_v56  ;;  %v17779_v56 = vmax.f32 %v16673_v60, 0.0 }
 0xd67   : > { %v9718_v47 = vmax.f32 %v9706_v57, 0.0  ;;  %v9701_v19 = vpop.f32.mrb[143].mxu0  ;;  %v17787_v55 = vmax.f32 %v16705_v52, 0.0 }
 0xd68   : > { %v9717_v41 = vmax.f32 %v9699_v48, 0.0 }
 0xd69   : > { %12823 = vmatpush1.bf16.msra.mxu1 %v17202_v45  ;;  %v17291_v45 = vrot.slane %v11180_v29, %v15105_v50 }
 0xd6a   : > { %v9722_v46 = vpack.c.bf16 %v9718_v47, %v9717_v41  ;;  %12816 = vmatprep.subr.bf16.mxu1 %v17216_v44 }
 0xd6c   : > { %10001 = vmatmul.mubr.bf16.gmra.mrb[140].mxu1 %v9722_v46 }
 0xd6d   : > { %12824 = vmatpush1.bf16.msra.mxu1 %v17214_v43  ;;  %10063 = vmatprep.mubr.bf16.mxu1 %v13731_v25  ;;  %v17297_v43 = vrot.slane %v11180_v29, %v15098_v8 }
 0xd6e   : > { %12817 = vmatprep.subr.bf16.mxu1 %v17221_v54 }
 0xd71   : > { %12825 = vmatpush1.bf16.msra.mxu1 %v17224_v40 }
 0xd74   : > { %10064 = vmatmul.mubr.bf16.vlgmr.msra.gmra.mrb[144].mxu1 %v9721_v4 }
 0xd75   : > { %10073 = vmatprep.mubr.bf16.mxu1 %v13731_v25 }
 0xd7c   : > { %10074 = vmatmul.mubr.bf16.gmra.mrb[148].mxu1 %v9722_v46 }
 0xe27   : > { %v9972_v44 = vpop.f32.mrb[128].mxu1  ;;  %v10045_v54 = vpop.f32.mrb[144].mxu0 }
 0xe28   : > { %v9973_v40 = vadd.f32 %v9972_v44, %v17288_v5  ;;  %v10046_v13 = vadd.f32 %v10045_v54, %v17291_v45  ;;  %v9974_v31 = vpop.f32.mrb[129].mxu1  ;;  %v10047_v58 = vpop.f32.mrb[145].mxu0 }
 0xe29   : > { %v9975_v10 = vadd.f32 %v9974_v31, %v17294_v62  ;;  %v10048_v50 = vadd.f32 %v10047_v58, %v17297_v43  ;;  %v9976_v59 = vpop.f32.mrb[130].mxu1  ;;  %v10049_v63 = vpop.f32.mrb[146].mxu0  ;;  %v17789_v58 = vmax.f32 %v16753_v39, 0.0 }
 0xe2a   : > { %v10084_v8 = vadd.f32 %v9973_v40, %v17779_v56  ;;  %v10086_v7 = vadd.f32 %v10046_v13, %v17780_v23  ;;  %v9977_v49 = vadd.f32 %v9976_v59, %v17288_v5  ;;  %v10050_v20 = vadd.f32 %v10049_v63, %v17291_v45  ;;  %v9978_v9 = vpop.f32.mrb[131].mxu1  ;;  %v10051_v32 = vpop.f32.mrb[147].mxu0 }
 0xe2b   : > { %v10085_v25 = vadd.f32 %v9975_v10, %v17781_v11  ;;  %v11298_v26 = vpack.c.bf16 %v9975_v10, %v9973_v40  ;;  %v10087_v60 = vadd.f32 %v10048_v50, %v17782_v18  ;;  %v11299_v15 = vpack.c.bf16 %v10048_v50, %v10046_v13 }
 0xe2c   : > { %v10116_v38 = vmax.f32 %v10084_v8, 0.0  ;;  %v10118_v28 = vmax.f32 %v10086_v7, 0.0  ;;  %v10088_v33 = vadd.f32 %v9977_v49, %v17783_v16  ;;  %v10090_v22 = vadd.f32 %v10050_v20, %v17784_v6 }
 0xe2d   : > { %v10117_v17 = vmax.f32 %v10085_v25, 0.0  ;;  %10356 = vst [vmem:[%s17309_s28] sm:$0xff] %v11298_v26  ;;  %v10119_v34 = vmax.f32 %v10087_v60, 0.0  ;;  %10357 = vst [vmem:[%s17309_s28 + $0x8] sm:$0xff] %v11299_v15  ;;  %v9979_v51 = vadd.f32 %v9978_v9, %v17294_v62  ;;  %v10052_v3 = vadd.f32 %v10051_v32, %v17297_v43 }
 0xe2e   : > { %v10120_v0 = vmax.f32 %v10088_v33, 0.0  ;;  %v10122_v30 = vmax.f32 %v10090_v22, 0.0  ;;  %v17788_v13 = vmax.f32 %v16737_v35, 0.0  ;;  %v17790_v8 = vmax.f32 %v16743_v61, 0.0 }
 0xe2f   : > { %v11282_v2 = vpack.c.bf16 %v10117_v17, %v10116_v38  ;;  %v11283_v24 = vpack.c.bf16 %v10119_v34, %v10118_v28  ;;  %v10089_v36 = vadd.f32 %v9979_v51, %v17786_v14  ;;  %v11300_v4 = vpack.c.bf16 %v9979_v51, %v9977_v49  ;;  %v9982_v1 = vpop.f32.mrb[132].mxu1  ;;  %v10055_v57 = vpop.f32.mrb[148].mxu0  ;;  %v17795_v34 = vld [vmem:[#allocation36_spill] sm:$0xff] }
 0xe30   : > { %v10091_v48 = vadd.f32 %v10052_v3, %v17787_v55  ;;  %v11301_v53 = vpack.c.bf16 %v10052_v3, %v10050_v20  ;;  %v9983_v47 = vadd.f32 %v9982_v1, %v17288_v5  ;;  %v10056_v19 = vadd.f32 %v10055_v57, %v17291_v45  ;;  %v9984_v41 = vpop.f32.mrb[133].mxu1  ;;  %v10057_v46 = vpop.f32.mrb[149].mxu0  ;;  %v17797_v57 = vld [vmem:[#allocation37_spill] sm:$0xff] }
 0xe31   : > { %10244 = vst [vmem:[%s17334_s23] sm:$0xff] %v11282_v2  ;;  %10245 = vst [vmem:[%s17334_s23 + $0x8] sm:$0xff] %v11283_v24  ;;  %v10121_v29 = vmax.f32 %v10089_v36, 0.0  ;;  %v9985_v27 = vadd.f32 %v9984_v41, %v17294_v62  ;;  %v10058_v44 = vadd.f32 %v10057_v46, %v17297_v43  ;;  %v9986_v54 = vpop.f32.mrb[134].mxu1  ;;  %v10059_v40 = vpop.f32.mrb[150].mxu0  ;;  %v17791_v49 = vmax.f32 %v16747_v12, 0.0 }
 0xe32   : > { %10358 = vst [vmem:[%s17309_s28 + $0x10] sm:$0xff] %v11300_v4  ;;  %v10123_v52 = vmax.f32 %v10091_v48, 0.0  ;;  %10359 = vst [vmem:[%s17309_s28 + $0x18] sm:$0xff] %v11301_v53  ;;  %v10092_v31 = vadd.f32 %v9983_v47, %v17788_v13  ;;  %v10094_v10 = vadd.f32 %v10056_v19, %v17789_v58  ;;  %v9987_v50 = vadd.f32 %v9986_v54, %v17288_v5  ;;  %v9988_v59 = vpop.f32.mrb[135].mxu1  ;;  %v10061_v63 = vpop.f32.mrb[151].mxu0  ;;  %v17799_v53 = vld [vmem:[#allocation38_spill] sm:$0xff] }
 0xe33   : > { %v11284_v56 = vpack.c.bf16 %v10121_v29, %v10120_v0  ;;  %v10093_v23 = vadd.f32 %v9985_v27, %v17790_v8  ;;  %v11302_v7 = vpack.c.bf16 %v9985_v27, %v9983_v47  ;;  %v10095_v20 = vadd.f32 %v10058_v44, %v17791_v49 }
 0xe34   : > { %v11285_v35 = vpack.c.bf16 %v10123_v52, %v10122_v30  ;;  %v10124_v9 = vmax.f32 %v10092_v31, 0.0  ;;  %v10126_v32 = vmax.f32 %v10094_v10, 0.0  ;;  %v11303_v11 = vpack.c.bf16 %v10058_v44, %v10056_v19  ;;  %v17801_v44 = vld [vmem:[#allocation24_spill] sm:$0xff]  ;;  %v17803_v31 = vld [vmem:[#allocation26_spill] sm:$0xff] }
 0xe35   : > { %10246 = vst [vmem:[%s17334_s23 + $0x10] sm:$0xff] %v11284_v56  ;;  %v10125_v39 = vmax.f32 %v10093_v23, 0.0  ;;  %10360 = vst [vmem:[%s17309_s28 + $0x20] sm:$0xff] %v11302_v7  ;;  %v10127_v25 = vmax.f32 %v10095_v20, 0.0  ;;  %v17792_v26 = vmax.f32 %v16757_v42, 0.0  ;;  %v10060_v60 = vadd.f32 %v10059_v40, %v17291_v45 }
 0xe36   : > { %10247 = vst [vmem:[%s17334_s23 + $0x18] sm:$0xff] %v11285_v35  ;;  %10361 = vst [vmem:[%s17309_s28 + $0x28] sm:$0xff] %v11303_v11  ;;  %v9989_v61 = vadd.f32 %v9988_v59, %v17294_v62  ;;  %v10062_v12 = vadd.f32 %v10061_v63, %v17297_v43  ;;  %v17793_v16 = vmax.f32 %v16761_v37, 0.0  ;;  %v17794_v6 = vmax.f32 %v16765_v21, 0.0 }
 0xe37   : > { %v10096_v18 = vadd.f32 %v9987_v50, %v17792_v26  ;;  %v11286_v15 = vpack.c.bf16 %v10125_v39, %v10124_v9  ;;  %v11287_v38 = vpack.c.bf16 %v10127_v25, %v10126_v32  ;;  %v9992_v42 = vpop.f32.mrb[136].mxu1  ;;  %v17796_v51 = vmax.f32 %v17795_v34, 0.0  ;;  %v17805_v9 = vld [vmem:[#allocation28_spill] sm:$0xff]  ;;  %v17807_v26 = vld [vmem:[#allocation29_spill] sm:$0xff] }
 0xe38   : > { %v10098_v33 = vadd.f32 %v10060_v60, %v17793_v16  ;;  %v10097_v22 = vadd.f32 %v9989_v61, %v17794_v6  ;;  %v11304_v17 = vpack.c.bf16 %v9989_v61, %v9987_v50  ;;  %v11305_v0 = vpack.c.bf16 %v10062_v12, %v10060_v60  ;;  %v9994_v30 = vpop.f32.mrb[137].mxu1 }
 0xe39   : > { %v10128_v28 = vmax.f32 %v10096_v18, 0.0  ;;  %v10099_v3 = vadd.f32 %v10062_v12, %v17796_v51  ;;  %10248 = vst [vmem:[%s17334_s23 + $0x20] sm:$0xff] %v11286_v15  ;;  %10249 = vst [vmem:[%s17334_s23 + $0x28] sm:$0xff] %v11287_v38  ;;  %v9993_v24 = vadd.f32 %v9992_v42, %v17288_v5  ;;  %v9995_v14 = vadd.f32 %v9994_v30, %v17294_v62  ;;  %v9996_v37 = vpop.f32.mrb[138].mxu1  ;;  %v17809_v38 = vld [vmem:[#allocation32_spill] sm:$0xff]  ;;  %v17811_v42 = vld [vmem:[#allocation34_spill] sm:$0xff] }
 0xe3a   : > { %v10130_v2 = vmax.f32 %v10098_v33, 0.0  ;;  %v10129_v36 = vmax.f32 %v10097_v22, 0.0  ;;  %10362 = vst [vmem:[%s17309_s28 + $0x30] sm:$0xff] %v11304_v17  ;;  %10363 = vst [vmem:[%s17309_s28 + $0x38] sm:$0xff] %v11305_v0  ;;  %v9997_v21 = vadd.f32 %v9996_v37, %v17288_v5  ;;  %v9998_v1 = vpop.f32.mrb[139].mxu1  ;;  %v17798_v55 = vmax.f32 %v17797_v57, 0.0 }
 0xe3b   : > { %v10131_v4 = vmax.f32 %v10099_v3, 0.0  ;;  %v17800_v47 = vmax.f32 %v17799_v53, 0.0  ;;  %v11306_v41 = vpack.c.bf16 %v9995_v14, %v9993_v24  ;;  %v9999_v46 = vadd.f32 %v9998_v1, %v17294_v62  ;;  %v17815_v1 = vld [vmem:[#allocation39_spill] sm:$0xff] }
 0xe3c   : > { %v10100_v48 = vadd.f32 %v9993_v24, %v17798_v55  ;;  %v11288_v29 = vpack.c.bf16 %v10129_v36, %v10128_v28  ;;  %v17802_v54 = vmax.f32 %v17801_v44, 0.0  ;;  %v17804_v58 = vmax.f32 %v17803_v31, 0.0 }
 0xe3d   : > { %v10101_v19 = vadd.f32 %v9995_v14, %v17800_v47  ;;  %v11289_v27 = vpack.c.bf16 %v10131_v4, %v10130_v2  ;;  %10364 = vst [vmem:[%s17309_s28 + $0x40] sm:$0xff] %v11306_v41  ;;  %v11308_v50 = vpack.c.bf16 %v9999_v46, %v9997_v21  ;;  %v17806_v32 = vmax.f32 %v17805_v9, 0.0  ;;  %v17813_v14 = vld [vmem:[#allocation23_spill] sm:$0xff] }
 0xe3e   : > { %v10104_v40 = vadd.f32 %v9997_v21, %v17802_v54  ;;  %v10132_v52 = vmax.f32 %v10100_v48, 0.0  ;;  %v10105_v10 = vadd.f32 %v9999_v46, %v17804_v58  ;;  %10250 = vst [vmem:[%s17334_s23 + $0x30] sm:$0xff] %v11288_v29  ;;  %v17808_v18 = vmax.f32 %v17807_v26, 0.0  ;;  %v17825_v26 = vld [vmem:[#allocation33_spill] sm:$0xff] }
 0xe3f   : > { %v10133_v13 = vmax.f32 %v10101_v19, 0.0  ;;  %10251 = vst [vmem:[%s17334_s23 + $0x38] sm:$0xff] %v11289_v27  ;;  %10366 = vst [vmem:[%s17309_s28 + $0x50] sm:$0xff] %v11308_v50  ;;  %v10002_v8 = vpop.f32.mrb[140].mxu1  ;;  %v17810_v28 = vmax.f32 %v17809_v38, 0.0  ;;  %v17812_v6 = vmax.f32 %v17811_v42, 0.0 }
 0xe40   : > { %v10136_v59 = vmax.f32 %v10104_v40, 0.0  ;;  %v10137_v56 = vmax.f32 %v10105_v10, 0.0  ;;  %v10003_v23 = vadd.f32 %v10002_v8, %v17288_v5  ;;  %v10004_v7 = vpop.f32.mrb[141].mxu1  ;;  %v17814_v37 = vmax.f32 %v17813_v14, 0.0  ;;  %v17817_v19 = vld [vmem:[#allocation25_spill] sm:$0xff]  ;;  %v17819_v27 = vld [vmem:[#allocation27_spill] sm:$0xff] }
 0xe41   : > { %v11290_v63 = vpack.c.bf16 %v10133_v13, %v10132_v52  ;;  %v10005_v20 = vadd.f32 %v10004_v7, %v17294_v62  ;;  %v10006_v35 = vpop.f32.mrb[142].mxu1  ;;  %v17816_v57 = vmax.f32 %v17815_v1, 0.0  ;;  %v17818_v41 = vmax.f32 %v17817_v19, 0.0  ;;  %v17821_v8 = vld [vmem:[#allocation31_spill] sm:$0xff] }
 0xe42   : > { %v11292_v49 = vpack.c.bf16 %v10137_v56, %v10136_v59  ;;  %v10108_v11 = vadd.f32 %v10003_v23, %v17806_v32  ;;  %v10007_v39 = vadd.f32 %v10006_v35, %v17288_v5  ;;  %v10008_v25 = vpop.f32.mrb[143].mxu1  ;;  %v17820_v44 = vmax.f32 %v17819_v27, 0.0  ;;  %v17823_v35 = vld [vmem:[#allocation30_spill] sm:$0xff] }
 0xe43   : > { %10252 = vst [vmem:[%s17334_s23 + $0x40] sm:$0xff] %v11290_v63  ;;  %v10109_v60 = vadd.f32 %v10005_v20, %v17808_v18  ;;  %v11310_v61 = vpack.c.bf16 %v10005_v20, %v10003_v23  ;;  %v10009_v12 = vadd.f32 %v10008_v25, %v17294_v62  ;;  %v17822_v23 = vmax.f32 %v17821_v8, 0.0 }
 0xe44   : > { %10254 = vst [vmem:[%s17334_s23 + $0x50] sm:$0xff] %v11292_v49  ;;  %v10140_v15 = vmax.f32 %v10108_v11, 0.0  ;;  %v10112_v16 = vadd.f32 %v10007_v39, %v17810_v28  ;;  %v17824_v9 = vmax.f32 %v17823_v35, 0.0  ;;  %v17826_v18 = vmax.f32 %v17825_v26, 0.0 }
 0xe45   : > { %v10141_v33 = vmax.f32 %v10109_v60, 0.0  ;;  %10368 = vst [vmem:[%s17309_s28 + $0x60] sm:$0xff] %v11310_v61  ;;  %v10113_v22 = vadd.f32 %v10009_v12, %v17812_v6  ;;  %v11312_v5 = vpack.c.bf16 %v10009_v12, %v10007_v39  ;;  %v17827_v12 = vld [vmem:[#allocation35_spill] sm:$0xff] }
 0xe46   : > { %v10144_v17 = vmax.f32 %v10112_v16, 0.0 }
 0xe47   : > { %v11294_v34 = vpack.c.bf16 %v10141_v33, %v10140_v15  ;;  %v10145_v51 = vmax.f32 %v10113_v22, 0.0  ;;  %10370 = vst [vmem:[%s17309_s28 + $0x70] sm:$0xff] %v11312_v5  ;;  %v10065_v3 = vpop.f32.mrb[144].mxu1  ;;  %v17828_v15 = vmax.f32 %v17827_v12, 0.0 }
 0xe48   : > { %v10066_v0 = vadd.f32 %v10065_v3, %v17291_v45  ;;  %v10067_v62 = vpop.f32.mrb[145].mxu1 }
 0xe49   : > { %10256 = vst [vmem:[%s17334_s23 + $0x60] sm:$0xff] %v11294_v34  ;;  %v11296_v30 = vpack.c.bf16 %v10145_v51, %v10144_v17  ;;  %v10068_v2 = vadd.f32 %v10067_v62, %v17297_v43  ;;  %v10069_v24 = vpop.f32.mrb[146].mxu1 }
 0xe4a   : > { %v10102_v36 = vadd.f32 %v10066_v0, %v17814_v37  ;;  %v10070_v4 = vadd.f32 %v10069_v24, %v17291_v45  ;;  %v10071_v21 = vpop.f32.mrb[147].mxu1 }
 0xe4b   : > { %10258 = vst [vmem:[%s17334_s23 + $0x70] sm:$0xff] %v11296_v30  ;;  %v10103_v55 = vadd.f32 %v10068_v2, %v17816_v57  ;;  %v11307_v48 = vpack.c.bf16 %v10068_v2, %v10066_v0  ;;  %v10072_v53 = vadd.f32 %v10071_v21, %v17297_v43 }
 0xe4c   : > { %v10134_v47 = vmax.f32 %v10102_v36, 0.0  ;;  %v10106_v46 = vadd.f32 %v10070_v4, %v17818_v41 }
 0xe4d   : > { %v10135_v29 = vmax.f32 %v10103_v55, 0.0  ;;  %10365 = vst [vmem:[%s17309_s28 + $0x48] sm:$0xff] %v11307_v48  ;;  %v10107_v54 = vadd.f32 %v10072_v53, %v17820_v44  ;;  %v11309_v40 = vpack.c.bf16 %v10072_v53, %v10070_v4 }
 0xe4e   : > { %v10138_v52 = vmax.f32 %v10106_v46, 0.0 }
 0xe4f   : > { %v11291_v13 = vpack.c.bf16 %v10135_v29, %v10134_v47  ;;  %v10139_v31 = vmax.f32 %v10107_v54, 0.0  ;;  %10367 = vst [vmem:[%s17309_s28 + $0x58] sm:$0xff] %v11309_v40  ;;  %v10075_v58 = vpop.f32.mrb[148].mxu1 }
 0xe50   : > { %v10076_v10 = vadd.f32 %v10075_v58, %v17291_v45  ;;  %v10077_v50 = vpop.f32.mrb[149].mxu1 }
 0xe51   : > { %10253 = vst [vmem:[%s17334_s23 + $0x48] sm:$0xff] %v11291_v13  ;;  %v11293_v59 = vpack.c.bf16 %v10139_v31, %v10138_v52  ;;  %v10078_v63 = vadd.f32 %v10077_v50, %v17297_v43  ;;  %v10079_v56 = vpop.f32.mrb[150].mxu1 }
 0xe52   : > { %v10110_v7 = vadd.f32 %v10076_v10, %v17822_v23  ;;  %v10080_v49 = vadd.f32 %v10079_v56, %v17291_v45  ;;  %v10081_v20 = vpop.f32.mrb[151].mxu1 }
 0xe53   : > { %10255 = vst [vmem:[%s17334_s23 + $0x58] sm:$0xff] %v11293_v59  ;;  %v10111_v32 = vadd.f32 %v10078_v63, %v17824_v9  ;;  %v11311_v11 = vpack.c.bf16 %v10078_v63, %v10076_v10  ;;  %v10082_v39 = vadd.f32 %v10081_v20, %v17297_v43 }
 0xe54   : > { %v10142_v25 = vmax.f32 %v10110_v7, 0.0  ;;  %v10114_v60 = vadd.f32 %v10080_v49, %v17826_v18 }
 0xe55   : > { %v10143_v61 = vmax.f32 %v10111_v32, 0.0  ;;  %10369 = vst [vmem:[%s17309_s28 + $0x68] sm:$0xff] %v11311_v11  ;;  %v10115_v38 = vadd.f32 %v10082_v39, %v17828_v15  ;;  %v11313_v45 = vpack.c.bf16 %v10082_v39, %v10080_v49 }
 0xe56   : > { %v10146_v28 = vmax.f32 %v10114_v60, 0.0 }
 0xe57   : > { %v11295_v16 = vpack.c.bf16 %v10143_v61, %v10142_v25  ;;  %v10147_v33 = vmax.f32 %v10115_v38, 0.0  ;;  %10371 = vst [vmem:[%s17309_s28 + $0x78] sm:$0xff] %v11313_v45 }
 0xe59   : > { %10257 = vst [vmem:[%s17334_s23 + $0x68] sm:$0xff] %v11295_v16  ;;  %v11297_v42 = vpack.c.bf16 %v10147_v33, %v10146_v28 }
 0xe5b   : > { %10259 = vst [vmem:[%s17334_s23 + $0x78] sm:$0xff] %v11297_v42 }
 0xe5c PF: > { %s17829_s24 = sld [smem:[#allocation22_spill]] }
 0xe62   : > { %s32_s21 = sadd.s32 1, %s17829_s24  }
 0xe63   : > { %p29_p11 = scmp.ge.s32.totalorder %s32_s21, 4  }
 0xe65   :  { %31 = sbr.rel (!%p29_p11) target bundleno = 12 (0xc), region = 164 }
 0xe6c   :  { %10409 = vsyncpa [#allocation4], 1 }
 0xe6d   :  { %10411 = vsyncpa [#allocation4 + $0x1], 1 }
 0xe6e   :  { %10412 = vsyncpa [#allocation6], 1 }
 0xe6f   :  { %10413 = vsyncpa [#allocation9], 1 }
 0xe70   :  { %10414 = vsyncpa [#allocation12], 1 }
 0xe71   :  { %10415 = vsyncpa [#allocation15], 1 }

</bundles_post_ra>
